<compile_context>
chip_gen: v7x
topology: tpu7x:2x2x1
jax: 0.10.0
libtpu: 0.0.40
codegen_flags: <defaults>
</compile_context>

<pallas_src>
import functools

import jax
import jax.numpy as jnp
from jax.experimental import pallas as pl
from jax.experimental.pallas import tpu as pltpu


def _round_up(x, m):
    return (x + m - 1) // m * m


# Packed gate order: PyTorch stores (i, f, g, o); we repack to (i, f, o, g) so a
# single sigmoid covers gates[:, :3*Hp] and a single tanh covers gates[:, 3*Hp:].
GATE_PERM = (0, 1, 3, 2)


# --------------------------- fused LM kernel -----------------------------------
def _lm_fused_kernel(T, x_ref, wih0_ref, wih_rest_ref, whh_ref, b_ref,
                     fcw_ref, fcb_ref, out_ref, xg_ref, act_ref):
    """Fused Embedding-projection -> L-layer LSTM (wavefront) -> FC.

    Per grid point (one batch group of 8 sequences):
      x_ref        : (T*8, Ep)      bf16  time-major padded embeddings
      wih0_ref     : (Ep, 4*Hp)     bf16  layer-0 input weights (gate-padded)
      wih_rest_ref : (L-1, Hp, 4*Hp) bf16 input weights of layers 1..L-1
      whh_ref      : (L, Hp, 4*Hp)  bf16  recurrent weights
      b_ref        : (L, 1, 4*Hp)   f32   combined b_ih + b_hh per layer
      fcw_ref      : (Hp, Vp)       bf16
      fcb_ref      : (1, Vp)        f32
      out_ref      : (T*8, Vp)      f32   logits (time-major within the group)
      xg_ref       : (T*8, 4*Hp)    f32   scratch: hoisted layer-0 projections
      act_ref      : (T*8, Hp)      bf16  scratch: per-timestep activations
    """
    Bb = 8
    L, Hp, _ = whh_ref.shape

    # Layer-0 input projection hoisted over all timesteps (one big matmul;
    # only h @ W_hh + gating stays on the serial critical path).
    xg_ref[...] = (
        jnp.dot(x_ref[...], wih0_ref[...], preferred_element_type=jnp.float32)
        + b_ref[0]
    )

    # Per-layer recurrent state (f32), live across the whole wavefront.
    h = [jnp.zeros((Bb, Hp), jnp.float32) for _ in range(L)]
    c = [jnp.zeros((Bb, Hp), jnp.float32) for _ in range(L)]

    def cell(gates, h_prev, c_prev):
        # Packed gate order (i, f, o, g): 1 sigmoid + 1 tanh EUP dispatch.
        sig = jax.nn.sigmoid(gates[:, :3 * Hp])
        g = jnp.tanh(gates[:, 3 * Hp:])
        i = sig[:, 0 * Hp:1 * Hp]
        f = sig[:, 1 * Hp:2 * Hp]
        o = sig[:, 2 * Hp:3 * Hp]
        c_new = f * c_prev + i * g
        h_new = o * jnp.tanh(c_new)
        return h_new, c_new

    # Wavefront: at global step s, layer l runs timestep t = s - l.  Layers are
    # mutually independent within a step, so one layer's MXU work hides another
    # layer's EUP/VALU gate latency.  A single shared act buffer suffices: row t
    # is written by layer 0 at step t, then read+overwritten by layer l at step
    # t + l; its final contents are the last layer's outputs (fed to the FC).
    for s in range(T + L - 1):
        for l in range(L):
            t = s - l
            if t < 0 or t >= T:
                continue
            row = pl.ds(t * Bb, Bb)
            if l == 0:
                gates = xg_ref[row, :]
            else:
                gates = (
                    jnp.dot(act_ref[row, :], wih_rest_ref[l - 1],
                            preferred_element_type=jnp.float32)
                    + b_ref[l]
                )
            gates = gates + jnp.dot(h[l].astype(jnp.bfloat16), whh_ref[l],
                                    preferred_element_type=jnp.float32)
            h[l], c[l] = cell(gates, h[l], c[l])
            act_ref[row, :] = h[l].astype(jnp.bfloat16)

    # Final projection on the resident bf16 activations (Vp lane-dense).
    out_ref[...] = (
        jnp.dot(act_ref[...], fcw_ref[...], preferred_element_type=jnp.float32)
        + fcb_ref[...]
    )


# --------------------------- forward pass --------------------------------------
def language_model_forward(src, kp, vocab_size):
    """src: (B, T) int32 token ids -> logits (B, T, vocab_size)."""
    B, T = src.shape
    Ep = kp["wih0"].shape[0]
    L, Hp, _ = kp["whh"].shape
    Vp = kp["fcw"].shape[1]
    Bp = _round_up(B, 8)
    G = Bp // 8                     # batch groups of 8 sublanes (parallel grid axis)

    # bf16, feature-padded table gathered directly in time-major order.
    x = kp["emb"][src.T]                                     # (T, B, Ep) bf16
    x = jnp.pad(x, ((0, 0), (0, Bp - B), (0, 0)))            # (T, Bp, Ep)
    x = x.reshape(T, G, 8, Ep).transpose(1, 0, 2, 3).reshape(G, T * 8, Ep)
    # Dropout on embeddings = identity (eval mode).

    kernel = functools.partial(_lm_fused_kernel, T)
    out = pl.pallas_call(
        kernel,
        out_shape=jax.ShapeDtypeStruct((G, T * 8, Vp), jnp.float32),
        grid=(G,),
        in_specs=[
            pl.BlockSpec((None, T * 8, Ep), lambda g: (g, 0, 0)),
            pl.BlockSpec((Ep, 4 * Hp), lambda g: (0, 0)),
            pl.BlockSpec(kp["wih_rest"].shape, lambda g: (0, 0, 0)),
            pl.BlockSpec(kp["whh"].shape, lambda g: (0, 0, 0)),
            pl.BlockSpec(kp["b"].shape, lambda g: (0, 0, 0)),
            pl.BlockSpec((Hp, Vp), lambda g: (0, 0)),
            pl.BlockSpec((1, Vp), lambda g: (0, 0)),
        ],
        out_specs=pl.BlockSpec((None, T * 8, Vp), lambda g: (g, 0, 0)),
        scratch_shapes=[
            pltpu.VMEM((T * 8, 4 * Hp), jnp.float32),    # hoisted layer-0 gates
            pltpu.VMEM((T * 8, Hp), jnp.bfloat16),       # activations (bf16)
        ],
        compiler_params=pltpu.CompilerParams(
            dimension_semantics=("parallel",),           # batch groups -> 2 TCs on v7x
            vmem_limit_bytes=32 * 1024 * 1024,
        ),
    )(x, kp["wih0"], kp["wih_rest"], kp["whh"], kp["b"], kp["fcw"], kp["fcb"])

    # (G, T*8, Vp) -> (B, T, V) batch-first (matches PyTorch batch_first=True).
    logits = out.reshape(G, T, 8, Vp).transpose(0, 2, 1, 3).reshape(Bp, T, Vp)
    return logits[:B, :, :vocab_size]


# --------------------------- parameter init / packing ---------------------------
def init_params(key, vocab_size, embedding_dim, hidden_dim, num_layers):
    """PyTorch-shaped f32 parameters (same init distributions as the module)."""
    p = {}
    keys = jax.random.split(key, 3 + num_layers)
    p["emb"] = jax.random.uniform(
        keys[0], (vocab_size, embedding_dim), jnp.float32, -0.1, 0.1)

    stdv = 1.0 / (hidden_dim ** 0.5)
    for l in range(num_layers):
        in_dim = embedding_dim if l == 0 else hidden_dim
        ka, kb, kc, kd = jax.random.split(keys[3 + l], 4)
        p[f"w_ih_{l}"] = jax.random.uniform(
            ka, (4 * hidden_dim, in_dim), jnp.float32, -stdv, stdv)
        p[f"w_hh_{l}"] = jax.random.uniform(
            kb, (4 * hidden_dim, hidden_dim), jnp.float32, -stdv, stdv)
        p[f"b_ih_{l}"] = jax.random.uniform(
            kc, (4 * hidden_dim,), jnp.float32, -stdv, stdv)
        p[f"b_hh_{l}"] = jax.random.uniform(
            kd, (4 * hidden_dim,), jnp.float32, -stdv, stdv)

    bound = 1.0 / (hidden_dim ** 0.5)
    p["fc_w"] = jax.random.uniform(
        keys[1], (vocab_size, hidden_dim), jnp.float32, -bound, bound)
    p["fc_b"] = jax.random.uniform(
        keys[2], (vocab_size,), jnp.float32, -bound, bound)
    return p


def pack_params(p, vocab_size, embedding_dim, hidden_dim, num_layers):
    """Pad/transpose/reorder params into the lane-aligned bf16 kernel layout."""
    H = hidden_dim
    Hp = _round_up(H, 128)
    Ep = _round_up(embedding_dim, 128)
    Vp = _round_up(vocab_size, 128)
    perm = jnp.array(GATE_PERM)

    def pack_w(w, in_p):
        # (4H, in) PyTorch layout -> gate-reordered (in_p, 4*Hp) bf16.
        in_dim = w.shape[1]
        w = jnp.take(w.reshape(4, H, in_dim), perm, axis=0)
        w = jnp.pad(w, ((0, 0), (0, Hp - H), (0, in_p - in_dim)))
        return jnp.transpose(w, (2, 0, 1)).reshape(in_p, 4 * Hp).astype(jnp.bfloat16)

    def pack_b(b):
        b = jnp.take(b.reshape(4, H), perm, axis=0)
        b = jnp.pad(b, ((0, 0), (0, Hp - H)))
        return b.reshape(1, 4 * Hp).astype(jnp.float32)

    kp = {}
    kp["emb"] = jnp.pad(
        p["emb"], ((0, 0), (0, Ep - embedding_dim))).astype(jnp.bfloat16)
    kp["wih0"] = pack_w(p["w_ih_0"], Ep)
    rest = [pack_w(p[f"w_ih_{l}"], Hp) for l in range(1, num_layers)]
    if not rest:  # keep a non-empty (never read) array for num_layers == 1
        rest = [jnp.zeros((Hp, 4 * Hp), jnp.bfloat16)]
    kp["wih_rest"] = jnp.stack(rest)
    kp["whh"] = jnp.stack([pack_w(p[f"w_hh_{l}"], Hp) for l in range(num_layers)])
    kp["b"] = jnp.stack([pack_b(p[f"b_ih_{l}"] + p[f"b_hh_{l}"])
                         for l in range(num_layers)])
    kp["fcw"] = jnp.pad(p["fc_w"].T,
                        ((0, Hp - H), (0, Vp - vocab_size))).astype(jnp.bfloat16)
    kp["fcb"] = jnp.pad(p["fc_b"], (0, Vp - vocab_size))[None, :].astype(jnp.float32)
    return kp


# --------------------------- pure-JAX reference (kernel-faithful numerics) ------
def _reference_forward(src, p, num_layers, hidden_dim):
    bf = lambda a: a.astype(jnp.bfloat16).astype(jnp.float32)
    H = hidden_dim
    x = p["emb"][src]                                        # (B, T, E) f32
    B, T, _ = x.shape
    for l in range(num_layers):
        w_ih = bf(p[f"w_ih_{l}"])
        w_hh = bf(p[f"w_hh_{l}"])
        b = p[f"b_ih_{l}"] + p[f"b_hh_{l}"]
        xin = bf(x)
        h = jnp.zeros((B, H), jnp.float32)
        c = jnp.zeros((B, H), jnp.float32)
        outs = []
        for t in range(T):
            gates = xin[:, t] @ w_ih.T + bf(h) @ w_hh.T + b
            i = jax.nn.sigmoid(gates[:, 0 * H:1 * H])
            f = jax.nn.sigmoid(gates[:, 1 * H:2 * H])
            g = jnp.tanh(gates[:, 2 * H:3 * H])
            o = jax.nn.sigmoid(gates[:, 3 * H:4 * H])
            c = f * c + i * g
            h = o * jnp.tanh(c)
            outs.append(h)
        x = jnp.stack(outs, axis=1)                          # (B, T, H)
    return bf(x) @ bf(p["fc_w"]).T + p["fc_b"]               # (B, T, V)


if __name__ == "__main__":
    # Small shapes consistent with the module's forward.
    vocab_size = 128
    embedding_dim = 32
    hidden_dim = 32
    num_layers = 3
    batch, seq = 2, 8

    key = jax.random.PRNGKey(0)
    k_params, k_tokens = jax.random.split(key)

    params = init_params(k_params, vocab_size, embedding_dim, hidden_dim, num_layers)
    kparams = pack_params(params, vocab_size, embedding_dim, hidden_dim, num_layers)
    src = jax.random.randint(k_tokens, (batch, seq), 0, vocab_size, dtype=jnp.int32)

    logits = language_model_forward(src, kparams, vocab_size)
    logits = jax.block_until_ready(logits)

    assert logits.shape == (batch, seq, vocab_size), logits.shape
    assert bool(jnp.all(jnp.isfinite(logits)))

    ref = _reference_forward(src, params, num_layers, hidden_dim)
    max_err = float(jnp.max(jnp.abs(logits - ref)))
    assert jnp.allclose(logits, ref, atol=1e-2, rtol=1e-2), max_err

    print("KERNEL_OK")
</pallas_src>

<mosaic_0001>
module attributes {stable_mosaic.version = 11 : i64} {
  func.func @_lm_fused_kernel(%arg0: i32, %arg1: memref<1x64x128xbf16, #tpu.memory_space<vmem>>, %arg2: memref<128x512xbf16, #tpu.memory_space<vmem>>, %arg3: memref<2x128x512xbf16, #tpu.memory_space<vmem>>, %arg4: memref<3x128x512xbf16, #tpu.memory_space<vmem>>, %arg5: memref<3x1x512xf32, #tpu.memory_space<vmem>>, %arg6: memref<128x128xbf16, #tpu.memory_space<vmem>>, %arg7: memref<1x128xf32, #tpu.memory_space<vmem>>, %arg8: memref<1x64x128xf32, #tpu.memory_space<vmem>>, %arg9: memref<64x512xf32, #tpu.memory_space<vmem>>, %arg10: memref<64x128xbf16, #tpu.memory_space<vmem>>) attributes {dimension_semantics = [#tpu.dimension_semantics<parallel>], iteration_bounds = array<i64: 1>, scalar_prefetch = 0 : i64, scratch_operands = 2 : i64, tpu.core_type = #tpu.core_type<tc>, window_params = [{transform_indices = @transform_0, window_bounds = array<i64: 1, 64, 128>}, {pipeline_mode = #tpu.pipeline_mode<synchronous>, transform_indices = @transform_1, window_bounds = array<i64: 128, 512>}, {pipeline_mode = #tpu.pipeline_mode<synchronous>, transform_indices = @transform_2, window_bounds = array<i64: 2, 128, 512>}, {pipeline_mode = #tpu.pipeline_mode<synchronous>, transform_indices = @transform_3, window_bounds = array<i64: 3, 128, 512>}, {pipeline_mode = #tpu.pipeline_mode<synchronous>, transform_indices = @transform_4, window_bounds = array<i64: 3, 1, 512>}, {pipeline_mode = #tpu.pipeline_mode<synchronous>, transform_indices = @transform_5, window_bounds = array<i64: 128, 128>}, {pipeline_mode = #tpu.pipeline_mode<synchronous>, transform_indices = @transform_6, window_bounds = array<i64: 1, 128>}, {transform_indices = @transform_7, window_bounds = array<i64: 1, 64, 128>}]} {
    %c0 = arith.constant 0 : index
    %c0_0 = arith.constant 0 : index
    %c0_1 = arith.constant 0 : index
    %0 = vector.load %arg1[%c0, %c0_0, %c0_1] : memref<1x64x128xbf16, #tpu.memory_space<vmem>>, vector<1x64x128xbf16>
    %1 = vector.shape_cast %0 : vector<1x64x128xbf16> to vector<64x128xbf16>
    %c0_2 = arith.constant 0 : index
    %c0_3 = arith.constant 0 : index
    %2 = vector.load %arg2[%c0_2, %c0_3] : memref<128x512xbf16, #tpu.memory_space<vmem>>, vector<128x512xbf16>
    %cst = arith.constant dense<0.000000e+00> : vector<64x512xf32>
    %3 = tpu.matmul %1, %2, %cst {dimension_numbers = #tpu.dot_dimension_numbers<[1], [0], [0], [1], [0, 0, 1, 1], [], []>} : vector<64x128xbf16>, vector<128x512xbf16>, vector<64x512xf32> -> vector<64x512xf32>
    %c0_4 = arith.constant 0 : index
    %c0_5 = arith.constant 0 : index
    %c0_6 = arith.constant 0 : index
    %4 = vector.load %arg5[%c0_4, %c0_5, %c0_6] : memref<3x1x512xf32, #tpu.memory_space<vmem>>, vector<1x1x512xf32>
    %5 = vector.shape_cast %4 : vector<1x1x512xf32> to vector<1x512xf32>
    %6 = vector.broadcast %5 : vector<1x512xf32> to vector<64x512xf32>
    %7 = arith.addf %3, %6 : vector<64x512xf32>
    %c0_7 = arith.constant 0 : index
    %c0_8 = arith.constant 0 : index
    %8 = vector.load %arg9[%c0_7, %c0_8] : memref<64x512xf32, #tpu.memory_space<vmem>>, vector<64x512xf32>
    tpu.vector_store %arg9[%c0_7, %c0_8], %7 {strides = array<i32>} : memref<64x512xf32, #tpu.memory_space<vmem>>, vector<64x512xf32>,
    %cst_9 = arith.constant 0.000000e+00 : f32
    %9 = vector.broadcast %cst_9 : f32 to vector<8x128xf32>
    %cst_10 = arith.constant 0.000000e+00 : f32
    %10 = vector.broadcast %cst_10 : f32 to vector<8x128xf32>
    %cst_11 = arith.constant 0.000000e+00 : f32
    %11 = vector.broadcast %cst_11 : f32 to vector<8x128xf32>
    %cst_12 = arith.constant 0.000000e+00 : f32
    %12 = vector.broadcast %cst_12 : f32 to vector<8x128xf32>
    %cst_13 = arith.constant 0.000000e+00 : f32
    %13 = vector.broadcast %cst_13 : f32 to vector<8x128xf32>
    %cst_14 = arith.constant 0.000000e+00 : f32
    %14 = vector.broadcast %cst_14 : f32 to vector<8x128xf32>
    %c0_15 = arith.constant 0 : index
    %c0_16 = arith.constant 0 : index
    %15 = vector.load %arg9[%c0_15, %c0_16] : memref<64x512xf32, #tpu.memory_space<vmem>>, vector<8x512xf32>
    %16 = arith.truncf %9 : vector<8x128xf32> to vector<8x128xbf16>
    %c0_17 = arith.constant 0 : index
    %c0_18 = arith.constant 0 : index
    %c0_19 = arith.constant 0 : index
    %17 = vector.load %arg4[%c0_17, %c0_18, %c0_19] : memref<3x128x512xbf16, #tpu.memory_space<vmem>>, vector<1x128x512xbf16>
    %18 = vector.shape_cast %17 : vector<1x128x512xbf16> to vector<128x512xbf16>
    %cst_20 = arith.constant dense<0.000000e+00> : vector<8x512xf32>
    %19 = tpu.matmul %16, %18, %cst_20 {dimension_numbers = #tpu.dot_dimension_numbers<[1], [0], [0], [1], [0, 0, 1, 1], [], []>} : vector<8x128xbf16>, vector<128x512xbf16>, vector<8x512xf32> -> vector<8x512xf32>
    %20 = arith.addf %15, %19 : vector<8x512xf32>
    %21 = vector.extract_strided_slice %20 {offsets = [0, 0], sizes = [8, 384], strides = [1, 1]} : vector<8x512xf32> to vector<8x384xf32>
    %22 = arith.negf %21 : vector<8x384xf32>
    %23 = math.exp %22 : vector<8x384xf32>
    %cst_21 = arith.constant 1.000000e+00 : f32
    %24 = vector.broadcast %cst_21 : f32 to vector<8x384xf32>
    %25 = arith.addf %24, %23 : vector<8x384xf32>
    %26 = arith.divf %24, %25 : vector<8x384xf32>
    %27 = vector.extract_strided_slice %20 {offsets = [0, 384], sizes = [8, 128], strides = [1, 1]} : vector<8x512xf32> to vector<8x128xf32>
    %28 = math.tanh %27 : vector<8x128xf32>
    %29 = vector.extract_strided_slice %26 {offsets = [0, 0], sizes = [8, 128], strides = [1, 1]} : vector<8x384xf32> to vector<8x128xf32>
    %30 = vector.extract_strided_slice %26 {offsets = [0, 128], sizes = [8, 128], strides = [1, 1]} : vector<8x384xf32> to vector<8x128xf32>
    %31 = vector.extract_strided_slice %26 {offsets = [0, 256], sizes = [8, 128], strides = [1, 1]} : vector<8x384xf32> to vector<8x128xf32>
    %32 = arith.mulf %30, %12 : vector<8x128xf32>
    %33 = arith.mulf %29, %28 : vector<8x128xf32>
    %34 = arith.addf %32, %33 : vector<8x128xf32>
    %35 = math.tanh %34 : vector<8x128xf32>
    %36 = arith.mulf %31, %35 : vector<8x128xf32>
    %37 = arith.truncf %36 : vector<8x128xf32> to vector<8x128xbf16>
    %c0_22 = arith.constant 0 : index
    %c0_23 = arith.constant 0 : index
    %38 = vector.load %arg10[%c0_22, %c0_23] : memref<64x128xbf16, #tpu.memory_space<vmem>>, vector<8x128xbf16>
    tpu.vector_store %arg10[%c0_22, %c0_23], %37 {strides = array<i32>} : memref<64x128xbf16, #tpu.memory_space<vmem>>, vector<8x128xbf16>,
    %c8 = arith.constant 8 : index
    %c0_24 = arith.constant 0 : index
    %39 = vector.load %arg9[%c8, %c0_24] : memref<64x512xf32, #tpu.memory_space<vmem>>, vector<8x512xf32>
    %40 = arith.truncf %36 : vector<8x128xf32> to vector<8x128xbf16>
    %c0_25 = arith.constant 0 : index
    %c0_26 = arith.constant 0 : index
    %c0_27 = arith.constant 0 : index
    %41 = vector.load %arg4[%c0_25, %c0_26, %c0_27] : memref<3x128x512xbf16, #tpu.memory_space<vmem>>, vector<1x128x512xbf16>
    %42 = vector.shape_cast %41 : vector<1x128x512xbf16> to vector<128x512xbf16>
    %cst_28 = arith.constant dense<0.000000e+00> : vector<8x512xf32>
    %43 = tpu.matmul %40, %42, %cst_28 {dimension_numbers = #tpu.dot_dimension_numbers<[1], [0], [0], [1], [0, 0, 1, 1], [], []>} : vector<8x128xbf16>, vector<128x512xbf16>, vector<8x512xf32> -> vector<8x512xf32>
    %44 = arith.addf %39, %43 : vector<8x512xf32>
    %45 = vector.extract_strided_slice %44 {offsets = [0, 0], sizes = [8, 384], strides = [1, 1]} : vector<8x512xf32> to vector<8x384xf32>
    %46 = arith.negf %45 : vector<8x384xf32>
    %47 = math.exp %46 : vector<8x384xf32>
    %cst_29 = arith.constant 1.000000e+00 : f32
    %48 = vector.broadcast %cst_29 : f32 to vector<8x384xf32>
    %49 = arith.addf %48, %47 : vector<8x384xf32>
    %50 = arith.divf %48, %49 : vector<8x384xf32>
    %51 = vector.extract_strided_slice %44 {offsets = [0, 384], sizes = [8, 128], strides = [1, 1]} : vector<8x512xf32> to vector<8x128xf32>
    %52 = math.tanh %51 : vector<8x128xf32>
    %53 = vector.extract_strided_slice %50 {offsets = [0, 0], sizes = [8, 128], strides = [1, 1]} : vector<8x384xf32> to vector<8x128xf32>
    %54 = vector.extract_strided_slice %50 {offsets = [0, 128], sizes = [8, 128], strides = [1, 1]} : vector<8x384xf32> to vector<8x128xf32>
    %55 = vector.extract_strided_slice %50 {offsets = [0, 256], sizes = [8, 128], strides = [1, 1]} : vector<8x384xf32> to vector<8x128xf32>
    %56 = arith.mulf %54, %34 : vector<8x128xf32>
    %57 = arith.mulf %53, %52 : vector<8x128xf32>
    %58 = arith.addf %56, %57 : vector<8x128xf32>
    %59 = math.tanh %58 : vector<8x128xf32>
    %60 = arith.mulf %55, %59 : vector<8x128xf32>
    %61 = arith.truncf %60 : vector<8x128xf32> to vector<8x128xbf16>
    %c8_30 = arith.constant 8 : index
    %c0_31 = arith.constant 0 : index
    %62 = vector.load %arg10[%c8_30, %c0_31] : memref<64x128xbf16, #tpu.memory_space<vmem>>, vector<8x128xbf16>
    tpu.vector_store %arg10[%c8_30, %c0_31], %61 {strides = array<i32>} : memref<64x128xbf16, #tpu.memory_space<vmem>>, vector<8x128xbf16>,
    %c0_32 = arith.constant 0 : index
    %c0_33 = arith.constant 0 : index
    %63 = vector.load %arg10[%c0_32, %c0_33] : memref<64x128xbf16, #tpu.memory_space<vmem>>, vector<8x128xbf16>
    %c0_34 = arith.constant 0 : index
    %c0_35 = arith.constant 0 : index
    %c0_36 = arith.constant 0 : index
    %64 = vector.load %arg3[%c0_34, %c0_35, %c0_36] : memref<2x128x512xbf16, #tpu.memory_space<vmem>>, vector<1x128x512xbf16>
    %65 = vector.shape_cast %64 : vector<1x128x512xbf16> to vector<128x512xbf16>
    %cst_37 = arith.constant dense<0.000000e+00> : vector<8x512xf32>
    %66 = tpu.matmul %63, %65, %cst_37 {dimension_numbers = #tpu.dot_dimension_numbers<[1], [0], [0], [1], [0, 0, 1, 1], [], []>} : vector<8x128xbf16>, vector<128x512xbf16>, vector<8x512xf32> -> vector<8x512xf32>
    %c1 = arith.constant 1 : index
    %c0_38 = arith.constant 0 : index
    %c0_39 = arith.constant 0 : index
    %67 = vector.load %arg5[%c1, %c0_38, %c0_39] : memref<3x1x512xf32, #tpu.memory_space<vmem>>, vector<1x1x512xf32>
    %68 = vector.shape_cast %67 : vector<1x1x512xf32> to vector<1x512xf32>
    %69 = vector.broadcast %68 : vector<1x512xf32> to vector<8x512xf32>
    %70 = arith.addf %66, %69 : vector<8x512xf32>
    %71 = arith.truncf %10 : vector<8x128xf32> to vector<8x128xbf16>
    %c1_40 = arith.constant 1 : index
    %c0_41 = arith.constant 0 : index
    %c0_42 = arith.constant 0 : index
    %72 = vector.load %arg4[%c1_40, %c0_41, %c0_42] : memref<3x128x512xbf16, #tpu.memory_space<vmem>>, vector<1x128x512xbf16>
    %73 = vector.shape_cast %72 : vector<1x128x512xbf16> to vector<128x512xbf16>
    %cst_43 = arith.constant dense<0.000000e+00> : vector<8x512xf32>
    %74 = tpu.matmul %71, %73, %cst_43 {dimension_numbers = #tpu.dot_dimension_numbers<[1], [0], [0], [1], [0, 0, 1, 1], [], []>} : vector<8x128xbf16>, vector<128x512xbf16>, vector<8x512xf32> -> vector<8x512xf32>
    %75 = arith.addf %70, %74 : vector<8x512xf32>
    %76 = vector.extract_strided_slice %75 {offsets = [0, 0], sizes = [8, 384], strides = [1, 1]} : vector<8x512xf32> to vector<8x384xf32>
    %77 = arith.negf %76 : vector<8x384xf32>
    %78 = math.exp %77 : vector<8x384xf32>
    %cst_44 = arith.constant 1.000000e+00 : f32
    %79 = vector.broadcast %cst_44 : f32 to vector<8x384xf32>
    %80 = arith.addf %79, %78 : vector<8x384xf32>
    %81 = arith.divf %79, %80 : vector<8x384xf32>
    %82 = vector.extract_strided_slice %75 {offsets = [0, 384], sizes = [8, 128], strides = [1, 1]} : vector<8x512xf32> to vector<8x128xf32>
    %83 = math.tanh %82 : vector<8x128xf32>
    %84 = vector.extract_strided_slice %81 {offsets = [0, 0], sizes = [8, 128], strides = [1, 1]} : vector<8x384xf32> to vector<8x128xf32>
    %85 = vector.extract_strided_slice %81 {offsets = [0, 128], sizes = [8, 128], strides = [1, 1]} : vector<8x384xf32> to vector<8x128xf32>
    %86 = vector.extract_strided_slice %81 {offsets = [0, 256], sizes = [8, 128], strides = [1, 1]} : vector<8x384xf32> to vector<8x128xf32>
    %87 = arith.mulf %85, %13 : vector<8x128xf32>
    %88 = arith.mulf %84, %83 : vector<8x128xf32>
    %89 = arith.addf %87, %88 : vector<8x128xf32>
    %90 = math.tanh %89 : vector<8x128xf32>
    %91 = arith.mulf %86, %90 : vector<8x128xf32>
    %92 = arith.truncf %91 : vector<8x128xf32> to vector<8x128xbf16>
    %c0_45 = arith.constant 0 : index
    %c0_46 = arith.constant 0 : index
    %93 = vector.load %arg10[%c0_45, %c0_46] : memref<64x128xbf16, #tpu.memory_space<vmem>>, vector<8x128xbf16>
    tpu.vector_store %arg10[%c0_45, %c0_46], %92 {strides = array<i32>} : memref<64x128xbf16, #tpu.memory_space<vmem>>, vector<8x128xbf16>,
    %c16 = arith.constant 16 : index
    %c0_47 = arith.constant 0 : index
    %94 = vector.load %arg9[%c16, %c0_47] : memref<64x512xf32, #tpu.memory_space<vmem>>, vector<8x512xf32>
    %95 = arith.truncf %60 : vector<8x128xf32> to vector<8x128xbf16>
    %c0_48 = arith.constant 0 : index
    %c0_49 = arith.constant 0 : index
    %c0_50 = arith.constant 0 : index
    %96 = vector.load %arg4[%c0_48, %c0_49, %c0_50] : memref<3x128x512xbf16, #tpu.memory_space<vmem>>, vector<1x128x512xbf16>
    %97 = vector.shape_cast %96 : vector<1x128x512xbf16> to vector<128x512xbf16>
    %cst_51 = arith.constant dense<0.000000e+00> : vector<8x512xf32>
    %98 = tpu.matmul %95, %97, %cst_51 {dimension_numbers = #tpu.dot_dimension_numbers<[1], [0], [0], [1], [0, 0, 1, 1], [], []>} : vector<8x128xbf16>, vector<128x512xbf16>, vector<8x512xf32> -> vector<8x512xf32>
    %99 = arith.addf %94, %98 : vector<8x512xf32>
    %100 = vector.extract_strided_slice %99 {offsets = [0, 0], sizes = [8, 384], strides = [1, 1]} : vector<8x512xf32> to vector<8x384xf32>
    %101 = arith.negf %100 : vector<8x384xf32>
    %102 = math.exp %101 : vector<8x384xf32>
    %cst_52 = arith.constant 1.000000e+00 : f32
    %103 = vector.broadcast %cst_52 : f32 to vector<8x384xf32>
    %104 = arith.addf %103, %102 : vector<8x384xf32>
    %105 = arith.divf %103, %104 : vector<8x384xf32>
    %106 = vector.extract_strided_slice %99 {offsets = [0, 384], sizes = [8, 128], strides = [1, 1]} : vector<8x512xf32> to vector<8x128xf32>
    %107 = math.tanh %106 : vector<8x128xf32>
    %108 = vector.extract_strided_slice %105 {offsets = [0, 0], sizes = [8, 128], strides = [1, 1]} : vector<8x384xf32> to vector<8x128xf32>
    %109 = vector.extract_strided_slice %105 {offsets = [0, 128], sizes = [8, 128], strides = [1, 1]} : vector<8x384xf32> to vector<8x128xf32>
    %110 = vector.extract_strided_slice %105 {offsets = [0, 256], sizes = [8, 128], strides = [1, 1]} : vector<8x384xf32> to vector<8x128xf32>
    %111 = arith.mulf %109, %58 : vector<8x128xf32>
    %112 = arith.mulf %108, %107 : vector<8x128xf32>
    %113 = arith.addf %111, %112 : vector<8x128xf32>
    %114 = math.tanh %113 : vector<8x128xf32>
    %115 = arith.mulf %110, %114 : vector<8x128xf32>
    %116 = arith.truncf %115 : vector<8x128xf32> to vector<8x128xbf16>
    %c16_53 = arith.constant 16 : index
    %c0_54 = arith.constant 0 : index
    %117 = vector.load %arg10[%c16_53, %c0_54] : memref<64x128xbf16, #tpu.memory_space<vmem>>, vector<8x128xbf16>
    tpu.vector_store %arg10[%c16_53, %c0_54], %116 {strides = array<i32>} : memref<64x128xbf16, #tpu.memory_space<vmem>>, vector<8x128xbf16>,
    %c8_55 = arith.constant 8 : index
    %c0_56 = arith.constant 0 : index
    %118 = vector.load %arg10[%c8_55, %c0_56] : memref<64x128xbf16, #tpu.memory_space<vmem>>, vector<8x128xbf16>
    %c0_57 = arith.constant 0 : index
    %c0_58 = arith.constant 0 : index
    %c0_59 = arith.constant 0 : index
    %119 = vector.load %arg3[%c0_57, %c0_58, %c0_59] : memref<2x128x512xbf16, #tpu.memory_space<vmem>>, vector<1x128x512xbf16>
    %120 = vector.shape_cast %119 : vector<1x128x512xbf16> to vector<128x512xbf16>
    %cst_60 = arith.constant dense<0.000000e+00> : vector<8x512xf32>
    %121 = tpu.matmul %118, %120, %cst_60 {dimension_numbers = #tpu.dot_dimension_numbers<[1], [0], [0], [1], [0, 0, 1, 1], [], []>} : vector<8x128xbf16>, vector<128x512xbf16>, vector<8x512xf32> -> vector<8x512xf32>
    %c1_61 = arith.constant 1 : index
    %c0_62 = arith.constant 0 : index
    %c0_63 = arith.constant 0 : index
    %122 = vector.load %arg5[%c1_61, %c0_62, %c0_63] : memref<3x1x512xf32, #tpu.memory_space<vmem>>, vector<1x1x512xf32>
    %123 = vector.shape_cast %122 : vector<1x1x512xf32> to vector<1x512xf32>
    %124 = vector.broadcast %123 : vector<1x512xf32> to vector<8x512xf32>
    %125 = arith.addf %121, %124 : vector<8x512xf32>
    %126 = arith.truncf %91 : vector<8x128xf32> to vector<8x128xbf16>
    %c1_64 = arith.constant 1 : index
    %c0_65 = arith.constant 0 : index
    %c0_66 = arith.constant 0 : index
    %127 = vector.load %arg4[%c1_64, %c0_65, %c0_66] : memref<3x128x512xbf16, #tpu.memory_space<vmem>>, vector<1x128x512xbf16>
    %128 = vector.shape_cast %127 : vector<1x128x512xbf16> to vector<128x512xbf16>
    %cst_67 = arith.constant dense<0.000000e+00> : vector<8x512xf32>
    %129 = tpu.matmul %126, %128, %cst_67 {dimension_numbers = #tpu.dot_dimension_numbers<[1], [0], [0], [1], [0, 0, 1, 1], [], []>} : vector<8x128xbf16>, vector<128x512xbf16>, vector<8x512xf32> -> vector<8x512xf32>
    %130 = arith.addf %125, %129 : vector<8x512xf32>
    %131 = vector.extract_strided_slice %130 {offsets = [0, 0], sizes = [8, 384], strides = [1, 1]} : vector<8x512xf32> to vector<8x384xf32>
    %132 = arith.negf %131 : vector<8x384xf32>
    %133 = math.exp %132 : vector<8x384xf32>
    %cst_68 = arith.constant 1.000000e+00 : f32
    %134 = vector.broadcast %cst_68 : f32 to vector<8x384xf32>
    %135 = arith.addf %134, %133 : vector<8x384xf32>
    %136 = arith.divf %134, %135 : vector<8x384xf32>
    %137 = vector.extract_strided_slice %130 {offsets = [0, 384], sizes = [8, 128], strides = [1, 1]} : vector<8x512xf32> to vector<8x128xf32>
    %138 = math.tanh %137 : vector<8x128xf32>
    %139 = vector.extract_strided_slice %136 {offsets = [0, 0], sizes = [8, 128], strides = [1, 1]} : vector<8x384xf32> to vector<8x128xf32>
    %140 = vector.extract_strided_slice %136 {offsets = [0, 128], sizes = [8, 128], strides = [1, 1]} : vector<8x384xf32> to vector<8x128xf32>
    %141 = vector.extract_strided_slice %136 {offsets = [0, 256], sizes = [8, 128], strides = [1, 1]} : vector<8x384xf32> to vector<8x128xf32>
    %142 = arith.mulf %140, %89 : vector<8x128xf32>
    %143 = arith.mulf %139, %138 : vector<8x128xf32>
    %144 = arith.addf %142, %143 : vector<8x128xf32>
    %145 = math.tanh %144 : vector<8x128xf32>
    %146 = arith.mulf %141, %145 : vector<8x128xf32>
    %147 = arith.truncf %146 : vector<8x128xf32> to vector<8x128xbf16>
    %c8_69 = arith.constant 8 : index
    %c0_70 = arith.constant 0 : index
    %148 = vector.load %arg10[%c8_69, %c0_70] : memref<64x128xbf16, #tpu.memory_space<vmem>>, vector<8x128xbf16>
    tpu.vector_store %arg10[%c8_69, %c0_70], %147 {strides = array<i32>} : memref<64x128xbf16, #tpu.memory_space<vmem>>, vector<8x128xbf16>,
    %c0_71 = arith.constant 0 : index
    %c0_72 = arith.constant 0 : index
    %149 = vector.load %arg10[%c0_71, %c0_72] : memref<64x128xbf16, #tpu.memory_space<vmem>>, vector<8x128xbf16>
    %c1_73 = arith.constant 1 : index
    %c0_74 = arith.constant 0 : index
    %c0_75 = arith.constant 0 : index
    %150 = vector.load %arg3[%c1_73, %c0_74, %c0_75] : memref<2x128x512xbf16, #tpu.memory_space<vmem>>, vector<1x128x512xbf16>
    %151 = vector.shape_cast %150 : vector<1x128x512xbf16> to vector<128x512xbf16>
    %cst_76 = arith.constant dense<0.000000e+00> : vector<8x512xf32>
    %152 = tpu.matmul %149, %151, %cst_76 {dimension_numbers = #tpu.dot_dimension_numbers<[1], [0], [0], [1], [0, 0, 1, 1], [], []>} : vector<8x128xbf16>, vector<128x512xbf16>, vector<8x512xf32> -> vector<8x512xf32>
    %c2 = arith.constant 2 : index
    %c0_77 = arith.constant 0 : index
    %c0_78 = arith.constant 0 : index
    %153 = vector.load %arg5[%c2, %c0_77, %c0_78] : memref<3x1x512xf32, #tpu.memory_space<vmem>>, vector<1x1x512xf32>
    %154 = vector.shape_cast %153 : vector<1x1x512xf32> to vector<1x512xf32>
    %155 = vector.broadcast %154 : vector<1x512xf32> to vector<8x512xf32>
    %156 = arith.addf %152, %155 : vector<8x512xf32>
    %157 = arith.truncf %11 : vector<8x128xf32> to vector<8x128xbf16>
    %c2_79 = arith.constant 2 : index
    %c0_80 = arith.constant 0 : index
    %c0_81 = arith.constant 0 : index
    %158 = vector.load %arg4[%c2_79, %c0_80, %c0_81] : memref<3x128x512xbf16, #tpu.memory_space<vmem>>, vector<1x128x512xbf16>
    %159 = vector.shape_cast %158 : vector<1x128x512xbf16> to vector<128x512xbf16>
    %cst_82 = arith.constant dense<0.000000e+00> : vector<8x512xf32>
    %160 = tpu.matmul %157, %159, %cst_82 {dimension_numbers = #tpu.dot_dimension_numbers<[1], [0], [0], [1], [0, 0, 1, 1], [], []>} : vector<8x128xbf16>, vector<128x512xbf16>, vector<8x512xf32> -> vector<8x512xf32>
    %161 = arith.addf %156, %160 : vector<8x512xf32>
    %162 = vector.extract_strided_slice %161 {offsets = [0, 0], sizes = [8, 384], strides = [1, 1]} : vector<8x512xf32> to vector<8x384xf32>
    %163 = arith.negf %162 : vector<8x384xf32>
    %164 = math.exp %163 : vector<8x384xf32>
    %cst_83 = arith.constant 1.000000e+00 : f32
    %165 = vector.broadcast %cst_83 : f32 to vector<8x384xf32>
    %166 = arith.addf %165, %164 : vector<8x384xf32>
    %167 = arith.divf %165, %166 : vector<8x384xf32>
    %168 = vector.extract_strided_slice %161 {offsets = [0, 384], sizes = [8, 128], strides = [1, 1]} : vector<8x512xf32> to vector<8x128xf32>
    %169 = math.tanh %168 : vector<8x128xf32>
    %170 = vector.extract_strided_slice %167 {offsets = [0, 0], sizes = [8, 128], strides = [1, 1]} : vector<8x384xf32> to vector<8x128xf32>
    %171 = vector.extract_strided_slice %167 {offsets = [0, 128], sizes = [8, 128], strides = [1, 1]} : vector<8x384xf32> to vector<8x128xf32>
    %172 = vector.extract_strided_slice %167 {offsets = [0, 256], sizes = [8, 128], strides = [1, 1]} : vector<8x384xf32> to vector<8x128xf32>
    %173 = arith.mulf %171, %14 : vector<8x128xf32>
    %174 = arith.mulf %170, %169 : vector<8x128xf32>
    %175 = arith.addf %173, %174 : vector<8x128xf32>
    %176 = math.tanh %175 : vector<8x128xf32>
    %177 = arith.mulf %172, %176 : vector<8x128xf32>
    %178 = arith.truncf %177 : vector<8x128xf32> to vector<8x128xbf16>
    %c0_84 = arith.constant 0 : index
    %c0_85 = arith.constant 0 : index
    %179 = vector.load %arg10[%c0_84, %c0_85] : memref<64x128xbf16, #tpu.memory_space<vmem>>, vector<8x128xbf16>
    tpu.vector_store %arg10[%c0_84, %c0_85], %178 {strides = array<i32>} : memref<64x128xbf16, #tpu.memory_space<vmem>>, vector<8x128xbf16>,
    %c24 = arith.constant 24 : index
    %c0_86 = arith.constant 0 : index
    %180 = vector.load %arg9[%c24, %c0_86] : memref<64x512xf32, #tpu.memory_space<vmem>>, vector<8x512xf32>
    %181 = arith.truncf %115 : vector<8x128xf32> to vector<8x128xbf16>
    %c0_87 = arith.constant 0 : index
    %c0_88 = arith.constant 0 : index
    %c0_89 = arith.constant 0 : index
    %182 = vector.load %arg4[%c0_87, %c0_88, %c0_89] : memref<3x128x512xbf16, #tpu.memory_space<vmem>>, vector<1x128x512xbf16>
    %183 = vector.shape_cast %182 : vector<1x128x512xbf16> to vector<128x512xbf16>
    %cst_90 = arith.constant dense<0.000000e+00> : vector<8x512xf32>
    %184 = tpu.matmul %181, %183, %cst_90 {dimension_numbers = #tpu.dot_dimension_numbers<[1], [0], [0], [1], [0, 0, 1, 1], [], []>} : vector<8x128xbf16>, vector<128x512xbf16>, vector<8x512xf32> -> vector<8x512xf32>
    %185 = arith.addf %180, %184 : vector<8x512xf32>
    %186 = vector.extract_strided_slice %185 {offsets = [0, 0], sizes = [8, 384], strides = [1, 1]} : vector<8x512xf32> to vector<8x384xf32>
    %187 = arith.negf %186 : vector<8x384xf32>
    %188 = math.exp %187 : vector<8x384xf32>
    %cst_91 = arith.constant 1.000000e+00 : f32
    %189 = vector.broadcast %cst_91 : f32 to vector<8x384xf32>
    %190 = arith.addf %189, %188 : vector<8x384xf32>
    %191 = arith.divf %189, %190 : vector<8x384xf32>
    %192 = vector.extract_strided_slice %185 {offsets = [0, 384], sizes = [8, 128], strides = [1, 1]} : vector<8x512xf32> to vector<8x128xf32>
    %193 = math.tanh %192 : vector<8x128xf32>
    %194 = vector.extract_strided_slice %191 {offsets = [0, 0], sizes = [8, 128], strides = [1, 1]} : vector<8x384xf32> to vector<8x128xf32>
    %195 = vector.extract_strided_slice %191 {offsets = [0, 128], sizes = [8, 128], strides = [1, 1]} : vector<8x384xf32> to vector<8x128xf32>
    %196 = vector.extract_strided_slice %191 {offsets = [0, 256], sizes = [8, 128], strides = [1, 1]} : vector<8x384xf32> to vector<8x128xf32>
    %197 = arith.mulf %195, %113 : vector<8x128xf32>
    %198 = arith.mulf %194, %193 : vector<8x128xf32>
    %199 = arith.addf %197, %198 : vector<8x128xf32>
    %200 = math.tanh %199 : vector<8x128xf32>
    %201 = arith.mulf %196, %200 : vector<8x128xf32>
    %202 = arith.truncf %201 : vector<8x128xf32> to vector<8x128xbf16>
    %c24_92 = arith.constant 24 : index
    %c0_93 = arith.constant 0 : index
    %203 = vector.load %arg10[%c24_92, %c0_93] : memref<64x128xbf16, #tpu.memory_space<vmem>>, vector<8x128xbf16>
    tpu.vector_store %arg10[%c24_92, %c0_93], %202 {strides = array<i32>} : memref<64x128xbf16, #tpu.memory_space<vmem>>, vector<8x128xbf16>,
    %c16_94 = arith.constant 16 : index
    %c0_95 = arith.constant 0 : index
    %204 = vector.load %arg10[%c16_94, %c0_95] : memref<64x128xbf16, #tpu.memory_space<vmem>>, vector<8x128xbf16>
    %c0_96 = arith.constant 0 : index
    %c0_97 = arith.constant 0 : index
    %c0_98 = arith.constant 0 : index
    %205 = vector.load %arg3[%c0_96, %c0_97, %c0_98] : memref<2x128x512xbf16, #tpu.memory_space<vmem>>, vector<1x128x512xbf16>
    %206 = vector.shape_cast %205 : vector<1x128x512xbf16> to vector<128x512xbf16>
    %cst_99 = arith.constant dense<0.000000e+00> : vector<8x512xf32>
    %207 = tpu.matmul %204, %206, %cst_99 {dimension_numbers = #tpu.dot_dimension_numbers<[1], [0], [0], [1], [0, 0, 1, 1], [], []>} : vector<8x128xbf16>, vector<128x512xbf16>, vector<8x512xf32> -> vector<8x512xf32>
    %c1_100 = arith.constant 1 : index
    %c0_101 = arith.constant 0 : index
    %c0_102 = arith.constant 0 : index
    %208 = vector.load %arg5[%c1_100, %c0_101, %c0_102] : memref<3x1x512xf32, #tpu.memory_space<vmem>>, vector<1x1x512xf32>
    %209 = vector.shape_cast %208 : vector<1x1x512xf32> to vector<1x512xf32>
    %210 = vector.broadcast %209 : vector<1x512xf32> to vector<8x512xf32>
    %211 = arith.addf %207, %210 : vector<8x512xf32>
    %212 = arith.truncf %146 : vector<8x128xf32> to vector<8x128xbf16>
    %c1_103 = arith.constant 1 : index
    %c0_104 = arith.constant 0 : index
    %c0_105 = arith.constant 0 : index
    %213 = vector.load %arg4[%c1_103, %c0_104, %c0_105] : memref<3x128x512xbf16, #tpu.memory_space<vmem>>, vector<1x128x512xbf16>
    %214 = vector.shape_cast %213 : vector<1x128x512xbf16> to vector<128x512xbf16>
    %cst_106 = arith.constant dense<0.000000e+00> : vector<8x512xf32>
    %215 = tpu.matmul %212, %214, %cst_106 {dimension_numbers = #tpu.dot_dimension_numbers<[1], [0], [0], [1], [0, 0, 1, 1], [], []>} : vector<8x128xbf16>, vector<128x512xbf16>, vector<8x512xf32> -> vector<8x512xf32>
    %216 = arith.addf %211, %215 : vector<8x512xf32>
    %217 = vector.extract_strided_slice %216 {offsets = [0, 0], sizes = [8, 384], strides = [1, 1]} : vector<8x512xf32> to vector<8x384xf32>
    %218 = arith.negf %217 : vector<8x384xf32>
    %219 = math.exp %218 : vector<8x384xf32>
    %cst_107 = arith.constant 1.000000e+00 : f32
    %220 = vector.broadcast %cst_107 : f32 to vector<8x384xf32>
    %221 = arith.addf %220, %219 : vector<8x384xf32>
    %222 = arith.divf %220, %221 : vector<8x384xf32>
    %223 = vector.extract_strided_slice %216 {offsets = [0, 384], sizes = [8, 128], strides = [1, 1]} : vector<8x512xf32> to vector<8x128xf32>
    %224 = math.tanh %223 : vector<8x128xf32>
    %225 = vector.extract_strided_slice %222 {offsets = [0, 0], sizes = [8, 128], strides = [1, 1]} : vector<8x384xf32> to vector<8x128xf32>
    %226 = vector.extract_strided_slice %222 {offsets = [0, 128], sizes = [8, 128], strides = [1, 1]} : vector<8x384xf32> to vector<8x128xf32>
    %227 = vector.extract_strided_slice %222 {offsets = [0, 256], sizes = [8, 128], strides = [1, 1]} : vector<8x384xf32> to vector<8x128xf32>
    %228 = arith.mulf %226, %144 : vector<8x128xf32>
    %229 = arith.mulf %225, %224 : vector<8x128xf32>
    %230 = arith.addf %228, %229 : vector<8x128xf32>
    %231 = math.tanh %230 : vector<8x128xf32>
    %232 = arith.mulf %227, %231 : vector<8x128xf32>
    %233 = arith.truncf %232 : vector<8x128xf32> to vector<8x128xbf16>
    %c16_108 = arith.constant 16 : index
    %c0_109 = arith.constant 0 : index
    %234 = vector.load %arg10[%c16_108, %c0_109] : memref<64x128xbf16, #tpu.memory_space<vmem>>, vector<8x128xbf16>
    tpu.vector_store %arg10[%c16_108, %c0_109], %233 {strides = array<i32>} : memref<64x128xbf16, #tpu.memory_space<vmem>>, vector<8x128xbf16>,
    %c8_110 = arith.constant 8 : index
    %c0_111 = arith.constant 0 : index
    %235 = vector.load %arg10[%c8_110, %c0_111] : memref<64x128xbf16, #tpu.memory_space<vmem>>, vector<8x128xbf16>
    %c1_112 = arith.constant 1 : index
    %c0_113 = arith.constant 0 : index
    %c0_114 = arith.constant 0 : index
    %236 = vector.load %arg3[%c1_112, %c0_113, %c0_114] : memref<2x128x512xbf16, #tpu.memory_space<vmem>>, vector<1x128x512xbf16>
    %237 = vector.shape_cast %236 : vector<1x128x512xbf16> to vector<128x512xbf16>
    %cst_115 = arith.constant dense<0.000000e+00> : vector<8x512xf32>
    %238 = tpu.matmul %235, %237, %cst_115 {dimension_numbers = #tpu.dot_dimension_numbers<[1], [0], [0], [1], [0, 0, 1, 1], [], []>} : vector<8x128xbf16>, vector<128x512xbf16>, vector<8x512xf32> -> vector<8x512xf32>
    %c2_116 = arith.constant 2 : index
    %c0_117 = arith.constant 0 : index
    %c0_118 = arith.constant 0 : index
    %239 = vector.load %arg5[%c2_116, %c0_117, %c0_118] : memref<3x1x512xf32, #tpu.memory_space<vmem>>, vector<1x1x512xf32>
    %240 = vector.shape_cast %239 : vector<1x1x512xf32> to vector<1x512xf32>
    %241 = vector.broadcast %240 : vector<1x512xf32> to vector<8x512xf32>
    %242 = arith.addf %238, %241 : vector<8x512xf32>
    %243 = arith.truncf %177 : vector<8x128xf32> to vector<8x128xbf16>
    %c2_119 = arith.constant 2 : index
    %c0_120 = arith.constant 0 : index
    %c0_121 = arith.constant 0 : index
    %244 = vector.load %arg4[%c2_119, %c0_120, %c0_121] : memref<3x128x512xbf16, #tpu.memory_space<vmem>>, vector<1x128x512xbf16>
    %245 = vector.shape_cast %244 : vector<1x128x512xbf16> to vector<128x512xbf16>
    %cst_122 = arith.constant dense<0.000000e+00> : vector<8x512xf32>
    %246 = tpu.matmul %243, %245, %cst_122 {dimension_numbers = #tpu.dot_dimension_numbers<[1], [0], [0], [1], [0, 0, 1, 1], [], []>} : vector<8x128xbf16>, vector<128x512xbf16>, vector<8x512xf32> -> vector<8x512xf32>
    %247 = arith.addf %242, %246 : vector<8x512xf32>
    %248 = vector.extract_strided_slice %247 {offsets = [0, 0], sizes = [8, 384], strides = [1, 1]} : vector<8x512xf32> to vector<8x384xf32>
    %249 = arith.negf %248 : vector<8x384xf32>
    %250 = math.exp %249 : vector<8x384xf32>
    %cst_123 = arith.constant 1.000000e+00 : f32
    %251 = vector.broadcast %cst_123 : f32 to vector<8x384xf32>
    %252 = arith.addf %251, %250 : vector<8x384xf32>
    %253 = arith.divf %251, %252 : vector<8x384xf32>
    %254 = vector.extract_strided_slice %247 {offsets = [0, 384], sizes = [8, 128], strides = [1, 1]} : vector<8x512xf32> to vector<8x128xf32>
    %255 = math.tanh %254 : vector<8x128xf32>
    %256 = vector.extract_strided_slice %253 {offsets = [0, 0], sizes = [8, 128], strides = [1, 1]} : vector<8x384xf32> to vector<8x128xf32>
    %257 = vector.extract_strided_slice %253 {offsets = [0, 128], sizes = [8, 128], strides = [1, 1]} : vector<8x384xf32> to vector<8x128xf32>
    %258 = vector.extract_strided_slice %253 {offsets = [0, 256], sizes = [8, 128], strides = [1, 1]} : vector<8x384xf32> to vector<8x128xf32>
    %259 = arith.mulf %257, %175 : vector<8x128xf32>
    %260 = arith.mulf %256, %255 : vector<8x128xf32>
    %261 = arith.addf %259, %260 : vector<8x128xf32>
    %262 = math.tanh %261 : vector<8x128xf32>
    %263 = arith.mulf %258, %262 : vector<8x128xf32>
    %264 = arith.truncf %263 : vector<8x128xf32> to vector<8x128xbf16>
    %c8_124 = arith.constant 8 : index
    %c0_125 = arith.constant 0 : index
    %265 = vector.load %arg10[%c8_124, %c0_125] : memref<64x128xbf16, #tpu.memory_space<vmem>>, vector<8x128xbf16>
    tpu.vector_store %arg10[%c8_124, %c0_125], %264 {strides = array<i32>} : memref<64x128xbf16, #tpu.memory_space<vmem>>, vector<8x128xbf16>,
    %c32 = arith.constant 32 : index
    %c0_126 = arith.constant 0 : index
    %266 = vector.load %arg9[%c32, %c0_126] : memref<64x512xf32, #tpu.memory_space<vmem>>, vector<8x512xf32>
    %267 = arith.truncf %201 : vector<8x128xf32> to vector<8x128xbf16>
    %c0_127 = arith.constant 0 : index
    %c0_128 = arith.constant 0 : index
    %c0_129 = arith.constant 0 : index
    %268 = vector.load %arg4[%c0_127, %c0_128, %c0_129] : memref<3x128x512xbf16, #tpu.memory_space<vmem>>, vector<1x128x512xbf16>
    %269 = vector.shape_cast %268 : vector<1x128x512xbf16> to vector<128x512xbf16>
    %cst_130 = arith.constant dense<0.000000e+00> : vector<8x512xf32>
    %270 = tpu.matmul %267, %269, %cst_130 {dimension_numbers = #tpu.dot_dimension_numbers<[1], [0], [0], [1], [0, 0, 1, 1], [], []>} : vector<8x128xbf16>, vector<128x512xbf16>, vector<8x512xf32> -> vector<8x512xf32>
    %271 = arith.addf %266, %270 : vector<8x512xf32>
    %272 = vector.extract_strided_slice %271 {offsets = [0, 0], sizes = [8, 384], strides = [1, 1]} : vector<8x512xf32> to vector<8x384xf32>
    %273 = arith.negf %272 : vector<8x384xf32>
    %274 = math.exp %273 : vector<8x384xf32>
    %cst_131 = arith.constant 1.000000e+00 : f32
    %275 = vector.broadcast %cst_131 : f32 to vector<8x384xf32>
    %276 = arith.addf %275, %274 : vector<8x384xf32>
    %277 = arith.divf %275, %276 : vector<8x384xf32>
    %278 = vector.extract_strided_slice %271 {offsets = [0, 384], sizes = [8, 128], strides = [1, 1]} : vector<8x512xf32> to vector<8x128xf32>
    %279 = math.tanh %278 : vector<8x128xf32>
    %280 = vector.extract_strided_slice %277 {offsets = [0, 0], sizes = [8, 128], strides = [1, 1]} : vector<8x384xf32> to vector<8x128xf32>
    %281 = vector.extract_strided_slice %277 {offsets = [0, 128], sizes = [8, 128], strides = [1, 1]} : vector<8x384xf32> to vector<8x128xf32>
    %282 = vector.extract_strided_slice %277 {offsets = [0, 256], sizes = [8, 128], strides = [1, 1]} : vector<8x384xf32> to vector<8x128xf32>
    %283 = arith.mulf %281, %199 : vector<8x128xf32>
    %284 = arith.mulf %280, %279 : vector<8x128xf32>
    %285 = arith.addf %283, %284 : vector<8x128xf32>
    %286 = math.tanh %285 : vector<8x128xf32>
    %287 = arith.mulf %282, %286 : vector<8x128xf32>
    %288 = arith.truncf %287 : vector<8x128xf32> to vector<8x128xbf16>
    %c32_132 = arith.constant 32 : index
    %c0_133 = arith.constant 0 : index
    %289 = vector.load %arg10[%c32_132, %c0_133] : memref<64x128xbf16, #tpu.memory_space<vmem>>, vector<8x128xbf16>
    tpu.vector_store %arg10[%c32_132, %c0_133], %288 {strides = array<i32>} : memref<64x128xbf16, #tpu.memory_space<vmem>>, vector<8x128xbf16>,
    %c24_134 = arith.constant 24 : index
    %c0_135 = arith.constant 0 : index
    %290 = vector.load %arg10[%c24_134, %c0_135] : memref<64x128xbf16, #tpu.memory_space<vmem>>, vector<8x128xbf16>
    %c0_136 = arith.constant 0 : index
    %c0_137 = arith.constant 0 : index
    %c0_138 = arith.constant 0 : index
    %291 = vector.load %arg3[%c0_136, %c0_137, %c0_138] : memref<2x128x512xbf16, #tpu.memory_space<vmem>>, vector<1x128x512xbf16>
    %292 = vector.shape_cast %291 : vector<1x128x512xbf16> to vector<128x512xbf16>
    %cst_139 = arith.constant dense<0.000000e+00> : vector<8x512xf32>
    %293 = tpu.matmul %290, %292, %cst_139 {dimension_numbers = #tpu.dot_dimension_numbers<[1], [0], [0], [1], [0, 0, 1, 1], [], []>} : vector<8x128xbf16>, vector<128x512xbf16>, vector<8x512xf32> -> vector<8x512xf32>
    %c1_140 = arith.constant 1 : index
    %c0_141 = arith.constant 0 : index
    %c0_142 = arith.constant 0 : index
    %294 = vector.load %arg5[%c1_140, %c0_141, %c0_142] : memref<3x1x512xf32, #tpu.memory_space<vmem>>, vector<1x1x512xf32>
    %295 = vector.shape_cast %294 : vector<1x1x512xf32> to vector<1x512xf32>
    %296 = vector.broadcast %295 : vector<1x512xf32> to vector<8x512xf32>
    %297 = arith.addf %293, %296 : vector<8x512xf32>
    %298 = arith.truncf %232 : vector<8x128xf32> to vector<8x128xbf16>
    %c1_143 = arith.constant 1 : index
    %c0_144 = arith.constant 0 : index
    %c0_145 = arith.constant 0 : index
    %299 = vector.load %arg4[%c1_143, %c0_144, %c0_145] : memref<3x128x512xbf16, #tpu.memory_space<vmem>>, vector<1x128x512xbf16>
    %300 = vector.shape_cast %299 : vector<1x128x512xbf16> to vector<128x512xbf16>
    %cst_146 = arith.constant dense<0.000000e+00> : vector<8x512xf32>
    %301 = tpu.matmul %298, %300, %cst_146 {dimension_numbers = #tpu.dot_dimension_numbers<[1], [0], [0], [1], [0, 0, 1, 1], [], []>} : vector<8x128xbf16>, vector<128x512xbf16>, vector<8x512xf32> -> vector<8x512xf32>
    %302 = arith.addf %297, %301 : vector<8x512xf32>
    %303 = vector.extract_strided_slice %302 {offsets = [0, 0], sizes = [8, 384], strides = [1, 1]} : vector<8x512xf32> to vector<8x384xf32>
    %304 = arith.negf %303 : vector<8x384xf32>
    %305 = math.exp %304 : vector<8x384xf32>
    %cst_147 = arith.constant 1.000000e+00 : f32
    %306 = vector.broadcast %cst_147 : f32 to vector<8x384xf32>
    %307 = arith.addf %306, %305 : vector<8x384xf32>
    %308 = arith.divf %306, %307 : vector<8x384xf32>
    %309 = vector.extract_strided_slice %302 {offsets = [0, 384], sizes = [8, 128], strides = [1, 1]} : vector<8x512xf32> to vector<8x128xf32>
    %310 = math.tanh %309 : vector<8x128xf32>
    %311 = vector.extract_strided_slice %308 {offsets = [0, 0], sizes = [8, 128], strides = [1, 1]} : vector<8x384xf32> to vector<8x128xf32>
    %312 = vector.extract_strided_slice %308 {offsets = [0, 128], sizes = [8, 128], strides = [1, 1]} : vector<8x384xf32> to vector<8x128xf32>
    %313 = vector.extract_strided_slice %308 {offsets = [0, 256], sizes = [8, 128], strides = [1, 1]} : vector<8x384xf32> to vector<8x128xf32>
    %314 = arith.mulf %312, %230 : vector<8x128xf32>
    %315 = arith.mulf %311, %310 : vector<8x128xf32>
    %316 = arith.addf %314, %315 : vector<8x128xf32>
    %317 = math.tanh %316 : vector<8x128xf32>
    %318 = arith.mulf %313, %317 : vector<8x128xf32>
    %319 = arith.truncf %318 : vector<8x128xf32> to vector<8x128xbf16>
    %c24_148 = arith.constant 24 : index
    %c0_149 = arith.constant 0 : index
    %320 = vector.load %arg10[%c24_148, %c0_149] : memref<64x128xbf16, #tpu.memory_space<vmem>>, vector<8x128xbf16>
    tpu.vector_store %arg10[%c24_148, %c0_149], %319 {strides = array<i32>} : memref<64x128xbf16, #tpu.memory_space<vmem>>, vector<8x128xbf16>,
    %c16_150 = arith.constant 16 : index
    %c0_151 = arith.constant 0 : index
    %321 = vector.load %arg10[%c16_150, %c0_151] : memref<64x128xbf16, #tpu.memory_space<vmem>>, vector<8x128xbf16>
    %c1_152 = arith.constant 1 : index
    %c0_153 = arith.constant 0 : index
    %c0_154 = arith.constant 0 : index
    %322 = vector.load %arg3[%c1_152, %c0_153, %c0_154] : memref<2x128x512xbf16, #tpu.memory_space<vmem>>, vector<1x128x512xbf16>
    %323 = vector.shape_cast %322 : vector<1x128x512xbf16> to vector<128x512xbf16>
    %cst_155 = arith.constant dense<0.000000e+00> : vector<8x512xf32>
    %324 = tpu.matmul %321, %323, %cst_155 {dimension_numbers = #tpu.dot_dimension_numbers<[1], [0], [0], [1], [0, 0, 1, 1], [], []>} : vector<8x128xbf16>, vector<128x512xbf16>, vector<8x512xf32> -> vector<8x512xf32>
    %c2_156 = arith.constant 2 : index
    %c0_157 = arith.constant 0 : index
    %c0_158 = arith.constant 0 : index
    %325 = vector.load %arg5[%c2_156, %c0_157, %c0_158] : memref<3x1x512xf32, #tpu.memory_space<vmem>>, vector<1x1x512xf32>
    %326 = vector.shape_cast %325 : vector<1x1x512xf32> to vector<1x512xf32>
    %327 = vector.broadcast %326 : vector<1x512xf32> to vector<8x512xf32>
    %328 = arith.addf %324, %327 : vector<8x512xf32>
    %329 = arith.truncf %263 : vector<8x128xf32> to vector<8x128xbf16>
    %c2_159 = arith.constant 2 : index
    %c0_160 = arith.constant 0 : index
    %c0_161 = arith.constant 0 : index
    %330 = vector.load %arg4[%c2_159, %c0_160, %c0_161] : memref<3x128x512xbf16, #tpu.memory_space<vmem>>, vector<1x128x512xbf16>
    %331 = vector.shape_cast %330 : vector<1x128x512xbf16> to vector<128x512xbf16>
    %cst_162 = arith.constant dense<0.000000e+00> : vector<8x512xf32>
    %332 = tpu.matmul %329, %331, %cst_162 {dimension_numbers = #tpu.dot_dimension_numbers<[1], [0], [0], [1], [0, 0, 1, 1], [], []>} : vector<8x128xbf16>, vector<128x512xbf16>, vector<8x512xf32> -> vector<8x512xf32>
    %333 = arith.addf %328, %332 : vector<8x512xf32>
    %334 = vector.extract_strided_slice %333 {offsets = [0, 0], sizes = [8, 384], strides = [1, 1]} : vector<8x512xf32> to vector<8x384xf32>
    %335 = arith.negf %334 : vector<8x384xf32>
    %336 = math.exp %335 : vector<8x384xf32>
    %cst_163 = arith.constant 1.000000e+00 : f32
    %337 = vector.broadcast %cst_163 : f32 to vector<8x384xf32>
    %338 = arith.addf %337, %336 : vector<8x384xf32>
    %339 = arith.divf %337, %338 : vector<8x384xf32>
    %340 = vector.extract_strided_slice %333 {offsets = [0, 384], sizes = [8, 128], strides = [1, 1]} : vector<8x512xf32> to vector<8x128xf32>
    %341 = math.tanh %340 : vector<8x128xf32>
    %342 = vector.extract_strided_slice %339 {offsets = [0, 0], sizes = [8, 128], strides = [1, 1]} : vector<8x384xf32> to vector<8x128xf32>
    %343 = vector.extract_strided_slice %339 {offsets = [0, 128], sizes = [8, 128], strides = [1, 1]} : vector<8x384xf32> to vector<8x128xf32>
    %344 = vector.extract_strided_slice %339 {offsets = [0, 256], sizes = [8, 128], strides = [1, 1]} : vector<8x384xf32> to vector<8x128xf32>
    %345 = arith.mulf %343, %261 : vector<8x128xf32>
    %346 = arith.mulf %342, %341 : vector<8x128xf32>
    %347 = arith.addf %345, %346 : vector<8x128xf32>
    %348 = math.tanh %347 : vector<8x128xf32>
    %349 = arith.mulf %344, %348 : vector<8x128xf32>
    %350 = arith.truncf %349 : vector<8x128xf32> to vector<8x128xbf16>
    %c16_164 = arith.constant 16 : index
    %c0_165 = arith.constant 0 : index
    %351 = vector.load %arg10[%c16_164, %c0_165] : memref<64x128xbf16, #tpu.memory_space<vmem>>, vector<8x128xbf16>
    tpu.vector_store %arg10[%c16_164, %c0_165], %350 {strides = array<i32>} : memref<64x128xbf16, #tpu.memory_space<vmem>>, vector<8x128xbf16>,
    %c40 = arith.constant 40 : index
    %c0_166 = arith.constant 0 : index
    %352 = vector.load %arg9[%c40, %c0_166] : memref<64x512xf32, #tpu.memory_space<vmem>>, vector<8x512xf32>
    %353 = arith.truncf %287 : vector<8x128xf32> to vector<8x128xbf16>
    %c0_167 = arith.constant 0 : index
    %c0_168 = arith.constant 0 : index
    %c0_169 = arith.constant 0 : index
    %354 = vector.load %arg4[%c0_167, %c0_168, %c0_169] : memref<3x128x512xbf16, #tpu.memory_space<vmem>>, vector<1x128x512xbf16>
    %355 = vector.shape_cast %354 : vector<1x128x512xbf16> to vector<128x512xbf16>
    %cst_170 = arith.constant dense<0.000000e+00> : vector<8x512xf32>
    %356 = tpu.matmul %353, %355, %cst_170 {dimension_numbers = #tpu.dot_dimension_numbers<[1], [0], [0], [1], [0, 0, 1, 1], [], []>} : vector<8x128xbf16>, vector<128x512xbf16>, vector<8x512xf32> -> vector<8x512xf32>
    %357 = arith.addf %352, %356 : vector<8x512xf32>
    %358 = vector.extract_strided_slice %357 {offsets = [0, 0], sizes = [8, 384], strides = [1, 1]} : vector<8x512xf32> to vector<8x384xf32>
    %359 = arith.negf %358 : vector<8x384xf32>
    %360 = math.exp %359 : vector<8x384xf32>
    %cst_171 = arith.constant 1.000000e+00 : f32
    %361 = vector.broadcast %cst_171 : f32 to vector<8x384xf32>
    %362 = arith.addf %361, %360 : vector<8x384xf32>
    %363 = arith.divf %361, %362 : vector<8x384xf32>
    %364 = vector.extract_strided_slice %357 {offsets = [0, 384], sizes = [8, 128], strides = [1, 1]} : vector<8x512xf32> to vector<8x128xf32>
    %365 = math.tanh %364 : vector<8x128xf32>
    %366 = vector.extract_strided_slice %363 {offsets = [0, 0], sizes = [8, 128], strides = [1, 1]} : vector<8x384xf32> to vector<8x128xf32>
    %367 = vector.extract_strided_slice %363 {offsets = [0, 128], sizes = [8, 128], strides = [1, 1]} : vector<8x384xf32> to vector<8x128xf32>
    %368 = vector.extract_strided_slice %363 {offsets = [0, 256], sizes = [8, 128], strides = [1, 1]} : vector<8x384xf32> to vector<8x128xf32>
    %369 = arith.mulf %367, %285 : vector<8x128xf32>
    %370 = arith.mulf %366, %365 : vector<8x128xf32>
    %371 = arith.addf %369, %370 : vector<8x128xf32>
    %372 = math.tanh %371 : vector<8x128xf32>
    %373 = arith.mulf %368, %372 : vector<8x128xf32>
    %374 = arith.truncf %373 : vector<8x128xf32> to vector<8x128xbf16>
    %c40_172 = arith.constant 40 : index
    %c0_173 = arith.constant 0 : index
    %375 = vector.load %arg10[%c40_172, %c0_173] : memref<64x128xbf16, #tpu.memory_space<vmem>>, vector<8x128xbf16>
    tpu.vector_store %arg10[%c40_172, %c0_173], %374 {strides = array<i32>} : memref<64x128xbf16, #tpu.memory_space<vmem>>, vector<8x128xbf16>,
    %c32_174 = arith.constant 32 : index
    %c0_175 = arith.constant 0 : index
    %376 = vector.load %arg10[%c32_174, %c0_175] : memref<64x128xbf16, #tpu.memory_space<vmem>>, vector<8x128xbf16>
    %c0_176 = arith.constant 0 : index
    %c0_177 = arith.constant 0 : index
    %c0_178 = arith.constant 0 : index
    %377 = vector.load %arg3[%c0_176, %c0_177, %c0_178] : memref<2x128x512xbf16, #tpu.memory_space<vmem>>, vector<1x128x512xbf16>
    %378 = vector.shape_cast %377 : vector<1x128x512xbf16> to vector<128x512xbf16>
    %cst_179 = arith.constant dense<0.000000e+00> : vector<8x512xf32>
    %379 = tpu.matmul %376, %378, %cst_179 {dimension_numbers = #tpu.dot_dimension_numbers<[1], [0], [0], [1], [0, 0, 1, 1], [], []>} : vector<8x128xbf16>, vector<128x512xbf16>, vector<8x512xf32> -> vector<8x512xf32>
    %c1_180 = arith.constant 1 : index
    %c0_181 = arith.constant 0 : index
    %c0_182 = arith.constant 0 : index
    %380 = vector.load %arg5[%c1_180, %c0_181, %c0_182] : memref<3x1x512xf32, #tpu.memory_space<vmem>>, vector<1x1x512xf32>
    %381 = vector.shape_cast %380 : vector<1x1x512xf32> to vector<1x512xf32>
    %382 = vector.broadcast %381 : vector<1x512xf32> to vector<8x512xf32>
    %383 = arith.addf %379, %382 : vector<8x512xf32>
    %384 = arith.truncf %318 : vector<8x128xf32> to vector<8x128xbf16>
    %c1_183 = arith.constant 1 : index
    %c0_184 = arith.constant 0 : index
    %c0_185 = arith.constant 0 : index
    %385 = vector.load %arg4[%c1_183, %c0_184, %c0_185] : memref<3x128x512xbf16, #tpu.memory_space<vmem>>, vector<1x128x512xbf16>
    %386 = vector.shape_cast %385 : vector<1x128x512xbf16> to vector<128x512xbf16>
    %cst_186 = arith.constant dense<0.000000e+00> : vector<8x512xf32>
    %387 = tpu.matmul %384, %386, %cst_186 {dimension_numbers = #tpu.dot_dimension_numbers<[1], [0], [0], [1], [0, 0, 1, 1], [], []>} : vector<8x128xbf16>, vector<128x512xbf16>, vector<8x512xf32> -> vector<8x512xf32>
    %388 = arith.addf %383, %387 : vector<8x512xf32>
    %389 = vector.extract_strided_slice %388 {offsets = [0, 0], sizes = [8, 384], strides = [1, 1]} : vector<8x512xf32> to vector<8x384xf32>
    %390 = arith.negf %389 : vector<8x384xf32>
    %391 = math.exp %390 : vector<8x384xf32>
    %cst_187 = arith.constant 1.000000e+00 : f32
    %392 = vector.broadcast %cst_187 : f32 to vector<8x384xf32>
    %393 = arith.addf %392, %391 : vector<8x384xf32>
    %394 = arith.divf %392, %393 : vector<8x384xf32>
    %395 = vector.extract_strided_slice %388 {offsets = [0, 384], sizes = [8, 128], strides = [1, 1]} : vector<8x512xf32> to vector<8x128xf32>
    %396 = math.tanh %395 : vector<8x128xf32>
    %397 = vector.extract_strided_slice %394 {offsets = [0, 0], sizes = [8, 128], strides = [1, 1]} : vector<8x384xf32> to vector<8x128xf32>
    %398 = vector.extract_strided_slice %394 {offsets = [0, 128], sizes = [8, 128], strides = [1, 1]} : vector<8x384xf32> to vector<8x128xf32>
    %399 = vector.extract_strided_slice %394 {offsets = [0, 256], sizes = [8, 128], strides = [1, 1]} : vector<8x384xf32> to vector<8x128xf32>
    %400 = arith.mulf %398, %316 : vector<8x128xf32>
    %401 = arith.mulf %397, %396 : vector<8x128xf32>
    %402 = arith.addf %400, %401 : vector<8x128xf32>
    %403 = math.tanh %402 : vector<8x128xf32>
    %404 = arith.mulf %399, %403 : vector<8x128xf32>
    %405 = arith.truncf %404 : vector<8x128xf32> to vector<8x128xbf16>
    %c32_188 = arith.constant 32 : index
    %c0_189 = arith.constant 0 : index
    %406 = vector.load %arg10[%c32_188, %c0_189] : memref<64x128xbf16, #tpu.memory_space<vmem>>, vector<8x128xbf16>
    tpu.vector_store %arg10[%c32_188, %c0_189], %405 {strides = array<i32>} : memref<64x128xbf16, #tpu.memory_space<vmem>>, vector<8x128xbf16>,
    %c24_190 = arith.constant 24 : index
    %c0_191 = arith.constant 0 : index
    %407 = vector.load %arg10[%c24_190, %c0_191] : memref<64x128xbf16, #tpu.memory_space<vmem>>, vector<8x128xbf16>
    %c1_192 = arith.constant 1 : index
    %c0_193 = arith.constant 0 : index
    %c0_194 = arith.constant 0 : index
    %408 = vector.load %arg3[%c1_192, %c0_193, %c0_194] : memref<2x128x512xbf16, #tpu.memory_space<vmem>>, vector<1x128x512xbf16>
    %409 = vector.shape_cast %408 : vector<1x128x512xbf16> to vector<128x512xbf16>
    %cst_195 = arith.constant dense<0.000000e+00> : vector<8x512xf32>
    %410 = tpu.matmul %407, %409, %cst_195 {dimension_numbers = #tpu.dot_dimension_numbers<[1], [0], [0], [1], [0, 0, 1, 1], [], []>} : vector<8x128xbf16>, vector<128x512xbf16>, vector<8x512xf32> -> vector<8x512xf32>
    %c2_196 = arith.constant 2 : index
    %c0_197 = arith.constant 0 : index
    %c0_198 = arith.constant 0 : index
    %411 = vector.load %arg5[%c2_196, %c0_197, %c0_198] : memref<3x1x512xf32, #tpu.memory_space<vmem>>, vector<1x1x512xf32>
    %412 = vector.shape_cast %411 : vector<1x1x512xf32> to vector<1x512xf32>
    %413 = vector.broadcast %412 : vector<1x512xf32> to vector<8x512xf32>
    %414 = arith.addf %410, %413 : vector<8x512xf32>
    %415 = arith.truncf %349 : vector<8x128xf32> to vector<8x128xbf16>
    %c2_199 = arith.constant 2 : index
    %c0_200 = arith.constant 0 : index
    %c0_201 = arith.constant 0 : index
    %416 = vector.load %arg4[%c2_199, %c0_200, %c0_201] : memref<3x128x512xbf16, #tpu.memory_space<vmem>>, vector<1x128x512xbf16>
    %417 = vector.shape_cast %416 : vector<1x128x512xbf16> to vector<128x512xbf16>
    %cst_202 = arith.constant dense<0.000000e+00> : vector<8x512xf32>
    %418 = tpu.matmul %415, %417, %cst_202 {dimension_numbers = #tpu.dot_dimension_numbers<[1], [0], [0], [1], [0, 0, 1, 1], [], []>} : vector<8x128xbf16>, vector<128x512xbf16>, vector<8x512xf32> -> vector<8x512xf32>
    %419 = arith.addf %414, %418 : vector<8x512xf32>
    %420 = vector.extract_strided_slice %419 {offsets = [0, 0], sizes = [8, 384], strides = [1, 1]} : vector<8x512xf32> to vector<8x384xf32>
    %421 = arith.negf %420 : vector<8x384xf32>
    %422 = math.exp %421 : vector<8x384xf32>
    %cst_203 = arith.constant 1.000000e+00 : f32
    %423 = vector.broadcast %cst_203 : f32 to vector<8x384xf32>
    %424 = arith.addf %423, %422 : vector<8x384xf32>
    %425 = arith.divf %423, %424 : vector<8x384xf32>
    %426 = vector.extract_strided_slice %419 {offsets = [0, 384], sizes = [8, 128], strides = [1, 1]} : vector<8x512xf32> to vector<8x128xf32>
    %427 = math.tanh %426 : vector<8x128xf32>
    %428 = vector.extract_strided_slice %425 {offsets = [0, 0], sizes = [8, 128], strides = [1, 1]} : vector<8x384xf32> to vector<8x128xf32>
    %429 = vector.extract_strided_slice %425 {offsets = [0, 128], sizes = [8, 128], strides = [1, 1]} : vector<8x384xf32> to vector<8x128xf32>
    %430 = vector.extract_strided_slice %425 {offsets = [0, 256], sizes = [8, 128], strides = [1, 1]} : vector<8x384xf32> to vector<8x128xf32>
    %431 = arith.mulf %429, %347 : vector<8x128xf32>
    %432 = arith.mulf %428, %427 : vector<8x128xf32>
    %433 = arith.addf %431, %432 : vector<8x128xf32>
    %434 = math.tanh %433 : vector<8x128xf32>
    %435 = arith.mulf %430, %434 : vector<8x128xf32>
    %436 = arith.truncf %435 : vector<8x128xf32> to vector<8x128xbf16>
    %c24_204 = arith.constant 24 : index
    %c0_205 = arith.constant 0 : index
    %437 = vector.load %arg10[%c24_204, %c0_205] : memref<64x128xbf16, #tpu.memory_space<vmem>>, vector<8x128xbf16>
    tpu.vector_store %arg10[%c24_204, %c0_205], %436 {strides = array<i32>} : memref<64x128xbf16, #tpu.memory_space<vmem>>, vector<8x128xbf16>,
    %c48 = arith.constant 48 : index
    %c0_206 = arith.constant 0 : index
    %438 = vector.load %arg9[%c48, %c0_206] : memref<64x512xf32, #tpu.memory_space<vmem>>, vector<8x512xf32>
    %439 = arith.truncf %373 : vector<8x128xf32> to vector<8x128xbf16>
    %c0_207 = arith.constant 0 : index
    %c0_208 = arith.constant 0 : index
    %c0_209 = arith.constant 0 : index
    %440 = vector.load %arg4[%c0_207, %c0_208, %c0_209] : memref<3x128x512xbf16, #tpu.memory_space<vmem>>, vector<1x128x512xbf16>
    %441 = vector.shape_cast %440 : vector<1x128x512xbf16> to vector<128x512xbf16>
    %cst_210 = arith.constant dense<0.000000e+00> : vector<8x512xf32>
    %442 = tpu.matmul %439, %441, %cst_210 {dimension_numbers = #tpu.dot_dimension_numbers<[1], [0], [0], [1], [0, 0, 1, 1], [], []>} : vector<8x128xbf16>, vector<128x512xbf16>, vector<8x512xf32> -> vector<8x512xf32>
    %443 = arith.addf %438, %442 : vector<8x512xf32>
    %444 = vector.extract_strided_slice %443 {offsets = [0, 0], sizes = [8, 384], strides = [1, 1]} : vector<8x512xf32> to vector<8x384xf32>
    %445 = arith.negf %444 : vector<8x384xf32>
    %446 = math.exp %445 : vector<8x384xf32>
    %cst_211 = arith.constant 1.000000e+00 : f32
    %447 = vector.broadcast %cst_211 : f32 to vector<8x384xf32>
    %448 = arith.addf %447, %446 : vector<8x384xf32>
    %449 = arith.divf %447, %448 : vector<8x384xf32>
    %450 = vector.extract_strided_slice %443 {offsets = [0, 384], sizes = [8, 128], strides = [1, 1]} : vector<8x512xf32> to vector<8x128xf32>
    %451 = math.tanh %450 : vector<8x128xf32>
    %452 = vector.extract_strided_slice %449 {offsets = [0, 0], sizes = [8, 128], strides = [1, 1]} : vector<8x384xf32> to vector<8x128xf32>
    %453 = vector.extract_strided_slice %449 {offsets = [0, 128], sizes = [8, 128], strides = [1, 1]} : vector<8x384xf32> to vector<8x128xf32>
    %454 = vector.extract_strided_slice %449 {offsets = [0, 256], sizes = [8, 128], strides = [1, 1]} : vector<8x384xf32> to vector<8x128xf32>
    %455 = arith.mulf %453, %371 : vector<8x128xf32>
    %456 = arith.mulf %452, %451 : vector<8x128xf32>
    %457 = arith.addf %455, %456 : vector<8x128xf32>
    %458 = math.tanh %457 : vector<8x128xf32>
    %459 = arith.mulf %454, %458 : vector<8x128xf32>
    %460 = arith.truncf %459 : vector<8x128xf32> to vector<8x128xbf16>
    %c48_212 = arith.constant 48 : index
    %c0_213 = arith.constant 0 : index
    %461 = vector.load %arg10[%c48_212, %c0_213] : memref<64x128xbf16, #tpu.memory_space<vmem>>, vector<8x128xbf16>
    tpu.vector_store %arg10[%c48_212, %c0_213], %460 {strides = array<i32>} : memref<64x128xbf16, #tpu.memory_space<vmem>>, vector<8x128xbf16>,
    %c40_214 = arith.constant 40 : index
    %c0_215 = arith.constant 0 : index
    %462 = vector.load %arg10[%c40_214, %c0_215] : memref<64x128xbf16, #tpu.memory_space<vmem>>, vector<8x128xbf16>
    %c0_216 = arith.constant 0 : index
    %c0_217 = arith.constant 0 : index
    %c0_218 = arith.constant 0 : index
    %463 = vector.load %arg3[%c0_216, %c0_217, %c0_218] : memref<2x128x512xbf16, #tpu.memory_space<vmem>>, vector<1x128x512xbf16>
    %464 = vector.shape_cast %463 : vector<1x128x512xbf16> to vector<128x512xbf16>
    %cst_219 = arith.constant dense<0.000000e+00> : vector<8x512xf32>
    %465 = tpu.matmul %462, %464, %cst_219 {dimension_numbers = #tpu.dot_dimension_numbers<[1], [0], [0], [1], [0, 0, 1, 1], [], []>} : vector<8x128xbf16>, vector<128x512xbf16>, vector<8x512xf32> -> vector<8x512xf32>
    %c1_220 = arith.constant 1 : index
    %c0_221 = arith.constant 0 : index
    %c0_222 = arith.constant 0 : index
    %466 = vector.load %arg5[%c1_220, %c0_221, %c0_222] : memref<3x1x512xf32, #tpu.memory_space<vmem>>, vector<1x1x512xf32>
    %467 = vector.shape_cast %466 : vector<1x1x512xf32> to vector<1x512xf32>
    %468 = vector.broadcast %467 : vector<1x512xf32> to vector<8x512xf32>
    %469 = arith.addf %465, %468 : vector<8x512xf32>
    %470 = arith.truncf %404 : vector<8x128xf32> to vector<8x128xbf16>
    %c1_223 = arith.constant 1 : index
    %c0_224 = arith.constant 0 : index
    %c0_225 = arith.constant 0 : index
    %471 = vector.load %arg4[%c1_223, %c0_224, %c0_225] : memref<3x128x512xbf16, #tpu.memory_space<vmem>>, vector<1x128x512xbf16>
    %472 = vector.shape_cast %471 : vector<1x128x512xbf16> to vector<128x512xbf16>
    %cst_226 = arith.constant dense<0.000000e+00> : vector<8x512xf32>
    %473 = tpu.matmul %470, %472, %cst_226 {dimension_numbers = #tpu.dot_dimension_numbers<[1], [0], [0], [1], [0, 0, 1, 1], [], []>} : vector<8x128xbf16>, vector<128x512xbf16>, vector<8x512xf32> -> vector<8x512xf32>
    %474 = arith.addf %469, %473 : vector<8x512xf32>
    %475 = vector.extract_strided_slice %474 {offsets = [0, 0], sizes = [8, 384], strides = [1, 1]} : vector<8x512xf32> to vector<8x384xf32>
    %476 = arith.negf %475 : vector<8x384xf32>
    %477 = math.exp %476 : vector<8x384xf32>
    %cst_227 = arith.constant 1.000000e+00 : f32
    %478 = vector.broadcast %cst_227 : f32 to vector<8x384xf32>
    %479 = arith.addf %478, %477 : vector<8x384xf32>
    %480 = arith.divf %478, %479 : vector<8x384xf32>
    %481 = vector.extract_strided_slice %474 {offsets = [0, 384], sizes = [8, 128], strides = [1, 1]} : vector<8x512xf32> to vector<8x128xf32>
    %482 = math.tanh %481 : vector<8x128xf32>
    %483 = vector.extract_strided_slice %480 {offsets = [0, 0], sizes = [8, 128], strides = [1, 1]} : vector<8x384xf32> to vector<8x128xf32>
    %484 = vector.extract_strided_slice %480 {offsets = [0, 128], sizes = [8, 128], strides = [1, 1]} : vector<8x384xf32> to vector<8x128xf32>
    %485 = vector.extract_strided_slice %480 {offsets = [0, 256], sizes = [8, 128], strides = [1, 1]} : vector<8x384xf32> to vector<8x128xf32>
    %486 = arith.mulf %484, %402 : vector<8x128xf32>
    %487 = arith.mulf %483, %482 : vector<8x128xf32>
    %488 = arith.addf %486, %487 : vector<8x128xf32>
    %489 = math.tanh %488 : vector<8x128xf32>
    %490 = arith.mulf %485, %489 : vector<8x128xf32>
    %491 = arith.truncf %490 : vector<8x128xf32> to vector<8x128xbf16>
    %c40_228 = arith.constant 40 : index
    %c0_229 = arith.constant 0 : index
    %492 = vector.load %arg10[%c40_228, %c0_229] : memref<64x128xbf16, #tpu.memory_space<vmem>>, vector<8x128xbf16>
    tpu.vector_store %arg10[%c40_228, %c0_229], %491 {strides = array<i32>} : memref<64x128xbf16, #tpu.memory_space<vmem>>, vector<8x128xbf16>,
    %c32_230 = arith.constant 32 : index
    %c0_231 = arith.constant 0 : index
    %493 = vector.load %arg10[%c32_230, %c0_231] : memref<64x128xbf16, #tpu.memory_space<vmem>>, vector<8x128xbf16>
    %c1_232 = arith.constant 1 : index
    %c0_233 = arith.constant 0 : index
    %c0_234 = arith.constant 0 : index
    %494 = vector.load %arg3[%c1_232, %c0_233, %c0_234] : memref<2x128x512xbf16, #tpu.memory_space<vmem>>, vector<1x128x512xbf16>
    %495 = vector.shape_cast %494 : vector<1x128x512xbf16> to vector<128x512xbf16>
    %cst_235 = arith.constant dense<0.000000e+00> : vector<8x512xf32>
    %496 = tpu.matmul %493, %495, %cst_235 {dimension_numbers = #tpu.dot_dimension_numbers<[1], [0], [0], [1], [0, 0, 1, 1], [], []>} : vector<8x128xbf16>, vector<128x512xbf16>, vector<8x512xf32> -> vector<8x512xf32>
    %c2_236 = arith.constant 2 : index
    %c0_237 = arith.constant 0 : index
    %c0_238 = arith.constant 0 : index
    %497 = vector.load %arg5[%c2_236, %c0_237, %c0_238] : memref<3x1x512xf32, #tpu.memory_space<vmem>>, vector<1x1x512xf32>
    %498 = vector.shape_cast %497 : vector<1x1x512xf32> to vector<1x512xf32>
    %499 = vector.broadcast %498 : vector<1x512xf32> to vector<8x512xf32>
    %500 = arith.addf %496, %499 : vector<8x512xf32>
    %501 = arith.truncf %435 : vector<8x128xf32> to vector<8x128xbf16>
    %c2_239 = arith.constant 2 : index
    %c0_240 = arith.constant 0 : index
    %c0_241 = arith.constant 0 : index
    %502 = vector.load %arg4[%c2_239, %c0_240, %c0_241] : memref<3x128x512xbf16, #tpu.memory_space<vmem>>, vector<1x128x512xbf16>
    %503 = vector.shape_cast %502 : vector<1x128x512xbf16> to vector<128x512xbf16>
    %cst_242 = arith.constant dense<0.000000e+00> : vector<8x512xf32>
    %504 = tpu.matmul %501, %503, %cst_242 {dimension_numbers = #tpu.dot_dimension_numbers<[1], [0], [0], [1], [0, 0, 1, 1], [], []>} : vector<8x128xbf16>, vector<128x512xbf16>, vector<8x512xf32> -> vector<8x512xf32>
    %505 = arith.addf %500, %504 : vector<8x512xf32>
    %506 = vector.extract_strided_slice %505 {offsets = [0, 0], sizes = [8, 384], strides = [1, 1]} : vector<8x512xf32> to vector<8x384xf32>
    %507 = arith.negf %506 : vector<8x384xf32>
    %508 = math.exp %507 : vector<8x384xf32>
    %cst_243 = arith.constant 1.000000e+00 : f32
    %509 = vector.broadcast %cst_243 : f32 to vector<8x384xf32>
    %510 = arith.addf %509, %508 : vector<8x384xf32>
    %511 = arith.divf %509, %510 : vector<8x384xf32>
    %512 = vector.extract_strided_slice %505 {offsets = [0, 384], sizes = [8, 128], strides = [1, 1]} : vector<8x512xf32> to vector<8x128xf32>
    %513 = math.tanh %512 : vector<8x128xf32>
    %514 = vector.extract_strided_slice %511 {offsets = [0, 0], sizes = [8, 128], strides = [1, 1]} : vector<8x384xf32> to vector<8x128xf32>
    %515 = vector.extract_strided_slice %511 {offsets = [0, 128], sizes = [8, 128], strides = [1, 1]} : vector<8x384xf32> to vector<8x128xf32>
    %516 = vector.extract_strided_slice %511 {offsets = [0, 256], sizes = [8, 128], strides = [1, 1]} : vector<8x384xf32> to vector<8x128xf32>
    %517 = arith.mulf %515, %433 : vector<8x128xf32>
    %518 = arith.mulf %514, %513 : vector<8x128xf32>
    %519 = arith.addf %517, %518 : vector<8x128xf32>
    %520 = math.tanh %519 : vector<8x128xf32>
    %521 = arith.mulf %516, %520 : vector<8x128xf32>
    %522 = arith.truncf %521 : vector<8x128xf32> to vector<8x128xbf16>
    %c32_244 = arith.constant 32 : index
    %c0_245 = arith.constant 0 : index
    %523 = vector.load %arg10[%c32_244, %c0_245] : memref<64x128xbf16, #tpu.memory_space<vmem>>, vector<8x128xbf16>
    tpu.vector_store %arg10[%c32_244, %c0_245], %522 {strides = array<i32>} : memref<64x128xbf16, #tpu.memory_space<vmem>>, vector<8x128xbf16>,
    %c56 = arith.constant 56 : index
    %c0_246 = arith.constant 0 : index
    %524 = vector.load %arg9[%c56, %c0_246] : memref<64x512xf32, #tpu.memory_space<vmem>>, vector<8x512xf32>
    %525 = arith.truncf %459 : vector<8x128xf32> to vector<8x128xbf16>
    %c0_247 = arith.constant 0 : index
    %c0_248 = arith.constant 0 : index
    %c0_249 = arith.constant 0 : index
    %526 = vector.load %arg4[%c0_247, %c0_248, %c0_249] : memref<3x128x512xbf16, #tpu.memory_space<vmem>>, vector<1x128x512xbf16>
    %527 = vector.shape_cast %526 : vector<1x128x512xbf16> to vector<128x512xbf16>
    %cst_250 = arith.constant dense<0.000000e+00> : vector<8x512xf32>
    %528 = tpu.matmul %525, %527, %cst_250 {dimension_numbers = #tpu.dot_dimension_numbers<[1], [0], [0], [1], [0, 0, 1, 1], [], []>} : vector<8x128xbf16>, vector<128x512xbf16>, vector<8x512xf32> -> vector<8x512xf32>
    %529 = arith.addf %524, %528 : vector<8x512xf32>
    %530 = vector.extract_strided_slice %529 {offsets = [0, 0], sizes = [8, 384], strides = [1, 1]} : vector<8x512xf32> to vector<8x384xf32>
    %531 = arith.negf %530 : vector<8x384xf32>
    %532 = math.exp %531 : vector<8x384xf32>
    %cst_251 = arith.constant 1.000000e+00 : f32
    %533 = vector.broadcast %cst_251 : f32 to vector<8x384xf32>
    %534 = arith.addf %533, %532 : vector<8x384xf32>
    %535 = arith.divf %533, %534 : vector<8x384xf32>
    %536 = vector.extract_strided_slice %529 {offsets = [0, 384], sizes = [8, 128], strides = [1, 1]} : vector<8x512xf32> to vector<8x128xf32>
    %537 = math.tanh %536 : vector<8x128xf32>
    %538 = vector.extract_strided_slice %535 {offsets = [0, 0], sizes = [8, 128], strides = [1, 1]} : vector<8x384xf32> to vector<8x128xf32>
    %539 = vector.extract_strided_slice %535 {offsets = [0, 128], sizes = [8, 128], strides = [1, 1]} : vector<8x384xf32> to vector<8x128xf32>
    %540 = vector.extract_strided_slice %535 {offsets = [0, 256], sizes = [8, 128], strides = [1, 1]} : vector<8x384xf32> to vector<8x128xf32>
    %541 = arith.mulf %539, %457 : vector<8x128xf32>
    %542 = arith.mulf %538, %537 : vector<8x128xf32>
    %543 = arith.addf %541, %542 : vector<8x128xf32>
    %544 = math.tanh %543 : vector<8x128xf32>
    %545 = arith.mulf %540, %544 : vector<8x128xf32>
    %546 = arith.truncf %545 : vector<8x128xf32> to vector<8x128xbf16>
    %c56_252 = arith.constant 56 : index
    %c0_253 = arith.constant 0 : index
    %547 = vector.load %arg10[%c56_252, %c0_253] : memref<64x128xbf16, #tpu.memory_space<vmem>>, vector<8x128xbf16>
    tpu.vector_store %arg10[%c56_252, %c0_253], %546 {strides = array<i32>} : memref<64x128xbf16, #tpu.memory_space<vmem>>, vector<8x128xbf16>,
    %c48_254 = arith.constant 48 : index
    %c0_255 = arith.constant 0 : index
    %548 = vector.load %arg10[%c48_254, %c0_255] : memref<64x128xbf16, #tpu.memory_space<vmem>>, vector<8x128xbf16>
    %c0_256 = arith.constant 0 : index
    %c0_257 = arith.constant 0 : index
    %c0_258 = arith.constant 0 : index
    %549 = vector.load %arg3[%c0_256, %c0_257, %c0_258] : memref<2x128x512xbf16, #tpu.memory_space<vmem>>, vector<1x128x512xbf16>
    %550 = vector.shape_cast %549 : vector<1x128x512xbf16> to vector<128x512xbf16>
    %cst_259 = arith.constant dense<0.000000e+00> : vector<8x512xf32>
    %551 = tpu.matmul %548, %550, %cst_259 {dimension_numbers = #tpu.dot_dimension_numbers<[1], [0], [0], [1], [0, 0, 1, 1], [], []>} : vector<8x128xbf16>, vector<128x512xbf16>, vector<8x512xf32> -> vector<8x512xf32>
    %c1_260 = arith.constant 1 : index
    %c0_261 = arith.constant 0 : index
    %c0_262 = arith.constant 0 : index
    %552 = vector.load %arg5[%c1_260, %c0_261, %c0_262] : memref<3x1x512xf32, #tpu.memory_space<vmem>>, vector<1x1x512xf32>
    %553 = vector.shape_cast %552 : vector<1x1x512xf32> to vector<1x512xf32>
    %554 = vector.broadcast %553 : vector<1x512xf32> to vector<8x512xf32>
    %555 = arith.addf %551, %554 : vector<8x512xf32>
    %556 = arith.truncf %490 : vector<8x128xf32> to vector<8x128xbf16>
    %c1_263 = arith.constant 1 : index
    %c0_264 = arith.constant 0 : index
    %c0_265 = arith.constant 0 : index
    %557 = vector.load %arg4[%c1_263, %c0_264, %c0_265] : memref<3x128x512xbf16, #tpu.memory_space<vmem>>, vector<1x128x512xbf16>
    %558 = vector.shape_cast %557 : vector<1x128x512xbf16> to vector<128x512xbf16>
    %cst_266 = arith.constant dense<0.000000e+00> : vector<8x512xf32>
    %559 = tpu.matmul %556, %558, %cst_266 {dimension_numbers = #tpu.dot_dimension_numbers<[1], [0], [0], [1], [0, 0, 1, 1], [], []>} : vector<8x128xbf16>, vector<128x512xbf16>, vector<8x512xf32> -> vector<8x512xf32>
    %560 = arith.addf %555, %559 : vector<8x512xf32>
    %561 = vector.extract_strided_slice %560 {offsets = [0, 0], sizes = [8, 384], strides = [1, 1]} : vector<8x512xf32> to vector<8x384xf32>
    %562 = arith.negf %561 : vector<8x384xf32>
    %563 = math.exp %562 : vector<8x384xf32>
    %cst_267 = arith.constant 1.000000e+00 : f32
    %564 = vector.broadcast %cst_267 : f32 to vector<8x384xf32>
    %565 = arith.addf %564, %563 : vector<8x384xf32>
    %566 = arith.divf %564, %565 : vector<8x384xf32>
    %567 = vector.extract_strided_slice %560 {offsets = [0, 384], sizes = [8, 128], strides = [1, 1]} : vector<8x512xf32> to vector<8x128xf32>
    %568 = math.tanh %567 : vector<8x128xf32>
    %569 = vector.extract_strided_slice %566 {offsets = [0, 0], sizes = [8, 128], strides = [1, 1]} : vector<8x384xf32> to vector<8x128xf32>
    %570 = vector.extract_strided_slice %566 {offsets = [0, 128], sizes = [8, 128], strides = [1, 1]} : vector<8x384xf32> to vector<8x128xf32>
    %571 = vector.extract_strided_slice %566 {offsets = [0, 256], sizes = [8, 128], strides = [1, 1]} : vector<8x384xf32> to vector<8x128xf32>
    %572 = arith.mulf %570, %488 : vector<8x128xf32>
    %573 = arith.mulf %569, %568 : vector<8x128xf32>
    %574 = arith.addf %572, %573 : vector<8x128xf32>
    %575 = math.tanh %574 : vector<8x128xf32>
    %576 = arith.mulf %571, %575 : vector<8x128xf32>
    %577 = arith.truncf %576 : vector<8x128xf32> to vector<8x128xbf16>
    %c48_268 = arith.constant 48 : index
    %c0_269 = arith.constant 0 : index
    %578 = vector.load %arg10[%c48_268, %c0_269] : memref<64x128xbf16, #tpu.memory_space<vmem>>, vector<8x128xbf16>
    tpu.vector_store %arg10[%c48_268, %c0_269], %577 {strides = array<i32>} : memref<64x128xbf16, #tpu.memory_space<vmem>>, vector<8x128xbf16>,
    %c40_270 = arith.constant 40 : index
    %c0_271 = arith.constant 0 : index
    %579 = vector.load %arg10[%c40_270, %c0_271] : memref<64x128xbf16, #tpu.memory_space<vmem>>, vector<8x128xbf16>
    %c1_272 = arith.constant 1 : index
    %c0_273 = arith.constant 0 : index
    %c0_274 = arith.constant 0 : index
    %580 = vector.load %arg3[%c1_272, %c0_273, %c0_274] : memref<2x128x512xbf16, #tpu.memory_space<vmem>>, vector<1x128x512xbf16>
    %581 = vector.shape_cast %580 : vector<1x128x512xbf16> to vector<128x512xbf16>
    %cst_275 = arith.constant dense<0.000000e+00> : vector<8x512xf32>
    %582 = tpu.matmul %579, %581, %cst_275 {dimension_numbers = #tpu.dot_dimension_numbers<[1], [0], [0], [1], [0, 0, 1, 1], [], []>} : vector<8x128xbf16>, vector<128x512xbf16>, vector<8x512xf32> -> vector<8x512xf32>
    %c2_276 = arith.constant 2 : index
    %c0_277 = arith.constant 0 : index
    %c0_278 = arith.constant 0 : index
    %583 = vector.load %arg5[%c2_276, %c0_277, %c0_278] : memref<3x1x512xf32, #tpu.memory_space<vmem>>, vector<1x1x512xf32>
    %584 = vector.shape_cast %583 : vector<1x1x512xf32> to vector<1x512xf32>
    %585 = vector.broadcast %584 : vector<1x512xf32> to vector<8x512xf32>
    %586 = arith.addf %582, %585 : vector<8x512xf32>
    %587 = arith.truncf %521 : vector<8x128xf32> to vector<8x128xbf16>
    %c2_279 = arith.constant 2 : index
    %c0_280 = arith.constant 0 : index
    %c0_281 = arith.constant 0 : index
    %588 = vector.load %arg4[%c2_279, %c0_280, %c0_281] : memref<3x128x512xbf16, #tpu.memory_space<vmem>>, vector<1x128x512xbf16>
    %589 = vector.shape_cast %588 : vector<1x128x512xbf16> to vector<128x512xbf16>
    %cst_282 = arith.constant dense<0.000000e+00> : vector<8x512xf32>
    %590 = tpu.matmul %587, %589, %cst_282 {dimension_numbers = #tpu.dot_dimension_numbers<[1], [0], [0], [1], [0, 0, 1, 1], [], []>} : vector<8x128xbf16>, vector<128x512xbf16>, vector<8x512xf32> -> vector<8x512xf32>
    %591 = arith.addf %586, %590 : vector<8x512xf32>
    %592 = vector.extract_strided_slice %591 {offsets = [0, 0], sizes = [8, 384], strides = [1, 1]} : vector<8x512xf32> to vector<8x384xf32>
    %593 = arith.negf %592 : vector<8x384xf32>
    %594 = math.exp %593 : vector<8x384xf32>
    %cst_283 = arith.constant 1.000000e+00 : f32
    %595 = vector.broadcast %cst_283 : f32 to vector<8x384xf32>
    %596 = arith.addf %595, %594 : vector<8x384xf32>
    %597 = arith.divf %595, %596 : vector<8x384xf32>
    %598 = vector.extract_strided_slice %591 {offsets = [0, 384], sizes = [8, 128], strides = [1, 1]} : vector<8x512xf32> to vector<8x128xf32>
    %599 = math.tanh %598 : vector<8x128xf32>
    %600 = vector.extract_strided_slice %597 {offsets = [0, 0], sizes = [8, 128], strides = [1, 1]} : vector<8x384xf32> to vector<8x128xf32>
    %601 = vector.extract_strided_slice %597 {offsets = [0, 128], sizes = [8, 128], strides = [1, 1]} : vector<8x384xf32> to vector<8x128xf32>
    %602 = vector.extract_strided_slice %597 {offsets = [0, 256], sizes = [8, 128], strides = [1, 1]} : vector<8x384xf32> to vector<8x128xf32>
    %603 = arith.mulf %601, %519 : vector<8x128xf32>
    %604 = arith.mulf %600, %599 : vector<8x128xf32>
    %605 = arith.addf %603, %604 : vector<8x128xf32>
    %606 = math.tanh %605 : vector<8x128xf32>
    %607 = arith.mulf %602, %606 : vector<8x128xf32>
    %608 = arith.truncf %607 : vector<8x128xf32> to vector<8x128xbf16>
    %c40_284 = arith.constant 40 : index
    %c0_285 = arith.constant 0 : index
    %609 = vector.load %arg10[%c40_284, %c0_285] : memref<64x128xbf16, #tpu.memory_space<vmem>>, vector<8x128xbf16>
    tpu.vector_store %arg10[%c40_284, %c0_285], %608 {strides = array<i32>} : memref<64x128xbf16, #tpu.memory_space<vmem>>, vector<8x128xbf16>,
    %c56_286 = arith.constant 56 : index
    %c0_287 = arith.constant 0 : index
    %610 = vector.load %arg10[%c56_286, %c0_287] : memref<64x128xbf16, #tpu.memory_space<vmem>>, vector<8x128xbf16>
    %c0_288 = arith.constant 0 : index
    %c0_289 = arith.constant 0 : index
    %c0_290 = arith.constant 0 : index
    %611 = vector.load %arg3[%c0_288, %c0_289, %c0_290] : memref<2x128x512xbf16, #tpu.memory_space<vmem>>, vector<1x128x512xbf16>
    %612 = vector.shape_cast %611 : vector<1x128x512xbf16> to vector<128x512xbf16>
    %cst_291 = arith.constant dense<0.000000e+00> : vector<8x512xf32>
    %613 = tpu.matmul %610, %612, %cst_291 {dimension_numbers = #tpu.dot_dimension_numbers<[1], [0], [0], [1], [0, 0, 1, 1], [], []>} : vector<8x128xbf16>, vector<128x512xbf16>, vector<8x512xf32> -> vector<8x512xf32>
    %c1_292 = arith.constant 1 : index
    %c0_293 = arith.constant 0 : index
    %c0_294 = arith.constant 0 : index
    %614 = vector.load %arg5[%c1_292, %c0_293, %c0_294] : memref<3x1x512xf32, #tpu.memory_space<vmem>>, vector<1x1x512xf32>
    %615 = vector.shape_cast %614 : vector<1x1x512xf32> to vector<1x512xf32>
    %616 = vector.broadcast %615 : vector<1x512xf32> to vector<8x512xf32>
    %617 = arith.addf %613, %616 : vector<8x512xf32>
    %618 = arith.truncf %576 : vector<8x128xf32> to vector<8x128xbf16>
    %c1_295 = arith.constant 1 : index
    %c0_296 = arith.constant 0 : index
    %c0_297 = arith.constant 0 : index
    %619 = vector.load %arg4[%c1_295, %c0_296, %c0_297] : memref<3x128x512xbf16, #tpu.memory_space<vmem>>, vector<1x128x512xbf16>
    %620 = vector.shape_cast %619 : vector<1x128x512xbf16> to vector<128x512xbf16>
    %cst_298 = arith.constant dense<0.000000e+00> : vector<8x512xf32>
    %621 = tpu.matmul %618, %620, %cst_298 {dimension_numbers = #tpu.dot_dimension_numbers<[1], [0], [0], [1], [0, 0, 1, 1], [], []>} : vector<8x128xbf16>, vector<128x512xbf16>, vector<8x512xf32> -> vector<8x512xf32>
    %622 = arith.addf %617, %621 : vector<8x512xf32>
    %623 = vector.extract_strided_slice %622 {offsets = [0, 0], sizes = [8, 384], strides = [1, 1]} : vector<8x512xf32> to vector<8x384xf32>
    %624 = arith.negf %623 : vector<8x384xf32>
    %625 = math.exp %624 : vector<8x384xf32>
    %cst_299 = arith.constant 1.000000e+00 : f32
    %626 = vector.broadcast %cst_299 : f32 to vector<8x384xf32>
    %627 = arith.addf %626, %625 : vector<8x384xf32>
    %628 = arith.divf %626, %627 : vector<8x384xf32>
    %629 = vector.extract_strided_slice %622 {offsets = [0, 384], sizes = [8, 128], strides = [1, 1]} : vector<8x512xf32> to vector<8x128xf32>
    %630 = math.tanh %629 : vector<8x128xf32>
    %631 = vector.extract_strided_slice %628 {offsets = [0, 0], sizes = [8, 128], strides = [1, 1]} : vector<8x384xf32> to vector<8x128xf32>
    %632 = vector.extract_strided_slice %628 {offsets = [0, 128], sizes = [8, 128], strides = [1, 1]} : vector<8x384xf32> to vector<8x128xf32>
    %633 = vector.extract_strided_slice %628 {offsets = [0, 256], sizes = [8, 128], strides = [1, 1]} : vector<8x384xf32> to vector<8x128xf32>
    %634 = arith.mulf %632, %574 : vector<8x128xf32>
    %635 = arith.mulf %631, %630 : vector<8x128xf32>
    %636 = arith.addf %634, %635 : vector<8x128xf32>
    %637 = math.tanh %636 : vector<8x128xf32>
    %638 = arith.mulf %633, %637 : vector<8x128xf32>
    %639 = arith.truncf %638 : vector<8x128xf32> to vector<8x128xbf16>
    %c56_300 = arith.constant 56 : index
    %c0_301 = arith.constant 0 : index
    %640 = vector.load %arg10[%c56_300, %c0_301] : memref<64x128xbf16, #tpu.memory_space<vmem>>, vector<8x128xbf16>
    tpu.vector_store %arg10[%c56_300, %c0_301], %639 {strides = array<i32>} : memref<64x128xbf16, #tpu.memory_space<vmem>>, vector<8x128xbf16>,
    %c48_302 = arith.constant 48 : index
    %c0_303 = arith.constant 0 : index
    %641 = vector.load %arg10[%c48_302, %c0_303] : memref<64x128xbf16, #tpu.memory_space<vmem>>, vector<8x128xbf16>
    %c1_304 = arith.constant 1 : index
    %c0_305 = arith.constant 0 : index
    %c0_306 = arith.constant 0 : index
    %642 = vector.load %arg3[%c1_304, %c0_305, %c0_306] : memref<2x128x512xbf16, #tpu.memory_space<vmem>>, vector<1x128x512xbf16>
    %643 = vector.shape_cast %642 : vector<1x128x512xbf16> to vector<128x512xbf16>
    %cst_307 = arith.constant dense<0.000000e+00> : vector<8x512xf32>
    %644 = tpu.matmul %641, %643, %cst_307 {dimension_numbers = #tpu.dot_dimension_numbers<[1], [0], [0], [1], [0, 0, 1, 1], [], []>} : vector<8x128xbf16>, vector<128x512xbf16>, vector<8x512xf32> -> vector<8x512xf32>
    %c2_308 = arith.constant 2 : index
    %c0_309 = arith.constant 0 : index
    %c0_310 = arith.constant 0 : index
    %645 = vector.load %arg5[%c2_308, %c0_309, %c0_310] : memref<3x1x512xf32, #tpu.memory_space<vmem>>, vector<1x1x512xf32>
    %646 = vector.shape_cast %645 : vector<1x1x512xf32> to vector<1x512xf32>
    %647 = vector.broadcast %646 : vector<1x512xf32> to vector<8x512xf32>
    %648 = arith.addf %644, %647 : vector<8x512xf32>
    %649 = arith.truncf %607 : vector<8x128xf32> to vector<8x128xbf16>
    %c2_311 = arith.constant 2 : index
    %c0_312 = arith.constant 0 : index
    %c0_313 = arith.constant 0 : index
    %650 = vector.load %arg4[%c2_311, %c0_312, %c0_313] : memref<3x128x512xbf16, #tpu.memory_space<vmem>>, vector<1x128x512xbf16>
    %651 = vector.shape_cast %650 : vector<1x128x512xbf16> to vector<128x512xbf16>
    %cst_314 = arith.constant dense<0.000000e+00> : vector<8x512xf32>
    %652 = tpu.matmul %649, %651, %cst_314 {dimension_numbers = #tpu.dot_dimension_numbers<[1], [0], [0], [1], [0, 0, 1, 1], [], []>} : vector<8x128xbf16>, vector<128x512xbf16>, vector<8x512xf32> -> vector<8x512xf32>
    %653 = arith.addf %648, %652 : vector<8x512xf32>
    %654 = vector.extract_strided_slice %653 {offsets = [0, 0], sizes = [8, 384], strides = [1, 1]} : vector<8x512xf32> to vector<8x384xf32>
    %655 = arith.negf %654 : vector<8x384xf32>
    %656 = math.exp %655 : vector<8x384xf32>
    %cst_315 = arith.constant 1.000000e+00 : f32
    %657 = vector.broadcast %cst_315 : f32 to vector<8x384xf32>
    %658 = arith.addf %657, %656 : vector<8x384xf32>
    %659 = arith.divf %657, %658 : vector<8x384xf32>
    %660 = vector.extract_strided_slice %653 {offsets = [0, 384], sizes = [8, 128], strides = [1, 1]} : vector<8x512xf32> to vector<8x128xf32>
    %661 = math.tanh %660 : vector<8x128xf32>
    %662 = vector.extract_strided_slice %659 {offsets = [0, 0], sizes = [8, 128], strides = [1, 1]} : vector<8x384xf32> to vector<8x128xf32>
    %663 = vector.extract_strided_slice %659 {offsets = [0, 128], sizes = [8, 128], strides = [1, 1]} : vector<8x384xf32> to vector<8x128xf32>
    %664 = vector.extract_strided_slice %659 {offsets = [0, 256], sizes = [8, 128], strides = [1, 1]} : vector<8x384xf32> to vector<8x128xf32>
    %665 = arith.mulf %663, %605 : vector<8x128xf32>
    %666 = arith.mulf %662, %661 : vector<8x128xf32>
    %667 = arith.addf %665, %666 : vector<8x128xf32>
    %668 = math.tanh %667 : vector<8x128xf32>
    %669 = arith.mulf %664, %668 : vector<8x128xf32>
    %670 = arith.truncf %669 : vector<8x128xf32> to vector<8x128xbf16>
    %c48_316 = arith.constant 48 : index
    %c0_317 = arith.constant 0 : index
    %671 = vector.load %arg10[%c48_316, %c0_317] : memref<64x128xbf16, #tpu.memory_space<vmem>>, vector<8x128xbf16>
    tpu.vector_store %arg10[%c48_316, %c0_317], %670 {strides = array<i32>} : memref<64x128xbf16, #tpu.memory_space<vmem>>, vector<8x128xbf16>,
    %c56_318 = arith.constant 56 : index
    %c0_319 = arith.constant 0 : index
    %672 = vector.load %arg10[%c56_318, %c0_319] : memref<64x128xbf16, #tpu.memory_space<vmem>>, vector<8x128xbf16>
    %c1_320 = arith.constant 1 : index
    %c0_321 = arith.constant 0 : index
    %c0_322 = arith.constant 0 : index
    %673 = vector.load %arg3[%c1_320, %c0_321, %c0_322] : memref<2x128x512xbf16, #tpu.memory_space<vmem>>, vector<1x128x512xbf16>
    %674 = vector.shape_cast %673 : vector<1x128x512xbf16> to vector<128x512xbf16>
    %cst_323 = arith.constant dense<0.000000e+00> : vector<8x512xf32>
    %675 = tpu.matmul %672, %674, %cst_323 {dimension_numbers = #tpu.dot_dimension_numbers<[1], [0], [0], [1], [0, 0, 1, 1], [], []>} : vector<8x128xbf16>, vector<128x512xbf16>, vector<8x512xf32> -> vector<8x512xf32>
    %c2_324 = arith.constant 2 : index
    %c0_325 = arith.constant 0 : index
    %c0_326 = arith.constant 0 : index
    %676 = vector.load %arg5[%c2_324, %c0_325, %c0_326] : memref<3x1x512xf32, #tpu.memory_space<vmem>>, vector<1x1x512xf32>
    %677 = vector.shape_cast %676 : vector<1x1x512xf32> to vector<1x512xf32>
    %678 = vector.broadcast %677 : vector<1x512xf32> to vector<8x512xf32>
    %679 = arith.addf %675, %678 : vector<8x512xf32>
    %680 = arith.truncf %669 : vector<8x128xf32> to vector<8x128xbf16>
    %c2_327 = arith.constant 2 : index
    %c0_328 = arith.constant 0 : index
    %c0_329 = arith.constant 0 : index
    %681 = vector.load %arg4[%c2_327, %c0_328, %c0_329] : memref<3x128x512xbf16, #tpu.memory_space<vmem>>, vector<1x128x512xbf16>
    %682 = vector.shape_cast %681 : vector<1x128x512xbf16> to vector<128x512xbf16>
    %cst_330 = arith.constant dense<0.000000e+00> : vector<8x512xf32>
    %683 = tpu.matmul %680, %682, %cst_330 {dimension_numbers = #tpu.dot_dimension_numbers<[1], [0], [0], [1], [0, 0, 1, 1], [], []>} : vector<8x128xbf16>, vector<128x512xbf16>, vector<8x512xf32> -> vector<8x512xf32>
    %684 = arith.addf %679, %683 : vector<8x512xf32>
    %685 = vector.extract_strided_slice %684 {offsets = [0, 0], sizes = [8, 384], strides = [1, 1]} : vector<8x512xf32> to vector<8x384xf32>
    %686 = arith.negf %685 : vector<8x384xf32>
    %687 = math.exp %686 : vector<8x384xf32>
    %cst_331 = arith.constant 1.000000e+00 : f32
    %688 = vector.broadcast %cst_331 : f32 to vector<8x384xf32>
    %689 = arith.addf %688, %687 : vector<8x384xf32>
    %690 = arith.divf %688, %689 : vector<8x384xf32>
    %691 = vector.extract_strided_slice %684 {offsets = [0, 384], sizes = [8, 128], strides = [1, 1]} : vector<8x512xf32> to vector<8x128xf32>
    %692 = math.tanh %691 : vector<8x128xf32>
    %693 = vector.extract_strided_slice %690 {offsets = [0, 0], sizes = [8, 128], strides = [1, 1]} : vector<8x384xf32> to vector<8x128xf32>
    %694 = vector.extract_strided_slice %690 {offsets = [0, 128], sizes = [8, 128], strides = [1, 1]} : vector<8x384xf32> to vector<8x128xf32>
    %695 = vector.extract_strided_slice %690 {offsets = [0, 256], sizes = [8, 128], strides = [1, 1]} : vector<8x384xf32> to vector<8x128xf32>
    %696 = arith.mulf %694, %667 : vector<8x128xf32>
    %697 = arith.mulf %693, %692 : vector<8x128xf32>
    %698 = arith.addf %696, %697 : vector<8x128xf32>
    %699 = math.tanh %698 : vector<8x128xf32>
    %700 = arith.mulf %695, %699 : vector<8x128xf32>
    %701 = arith.truncf %700 : vector<8x128xf32> to vector<8x128xbf16>
    %c56_332 = arith.constant 56 : index
    %c0_333 = arith.constant 0 : index
    %702 = vector.load %arg10[%c56_332, %c0_333] : memref<64x128xbf16, #tpu.memory_space<vmem>>, vector<8x128xbf16>
    tpu.vector_store %arg10[%c56_332, %c0_333], %701 {strides = array<i32>} : memref<64x128xbf16, #tpu.memory_space<vmem>>, vector<8x128xbf16>,
    %c0_334 = arith.constant 0 : index
    %c0_335 = arith.constant 0 : index
    %703 = vector.load %arg10[%c0_334, %c0_335] : memref<64x128xbf16, #tpu.memory_space<vmem>>, vector<64x128xbf16>
    %c0_336 = arith.constant 0 : index
    %c0_337 = arith.constant 0 : index
    %704 = vector.load %arg6[%c0_336, %c0_337] : memref<128x128xbf16, #tpu.memory_space<vmem>>, vector<128x128xbf16>
    %cst_338 = arith.constant dense<0.000000e+00> : vector<64x128xf32>
    %705 = tpu.matmul %703, %704, %cst_338 {dimension_numbers = #tpu.dot_dimension_numbers<[1], [0], [0], [1], [0, 0, 1, 1], [], []>} : vector<64x128xbf16>, vector<128x128xbf16>, vector<64x128xf32> -> vector<64x128xf32>
    %c0_339 = arith.constant 0 : index
    %c0_340 = arith.constant 0 : index
    %706 = vector.load %arg7[%c0_339, %c0_340] : memref<1x128xf32, #tpu.memory_space<vmem>>, vector<1x128xf32>
    %707 = vector.broadcast %706 : vector<1x128xf32> to vector<64x128xf32>
    %708 = arith.addf %705, %707 : vector<64x128xf32>
    %c0_341 = arith.constant 0 : index
    %c0_342 = arith.constant 0 : index
    %c0_343 = arith.constant 0 : index
    %709 = vector.load %arg8[%c0_341, %c0_342, %c0_343] : memref<1x64x128xf32, #tpu.memory_space<vmem>>, vector<1x64x128xf32>
    %710 = vector.shape_cast %709 : vector<1x64x128xf32> to vector<64x128xf32>
    %711 = vector.shape_cast %708 : vector<64x128xf32> to vector<1x64x128xf32>
    tpu.vector_store %arg8[%c0_341, %c0_342, %c0_343], %711 {strides = array<i32>} : memref<1x64x128xf32, #tpu.memory_space<vmem>>, vector<1x64x128xf32>,
    return
  }
  func.func @transform_0(%arg0: i32) -> (i32, i32, i32) {
    %c0_i32 = arith.constant 0 : i32
    %c0_i32_0 = arith.constant 0 : i32
    %c0_i32_1 = arith.constant 0 : i32
    return %arg0, %c0_i32, %c0_i32_0 : i32, i32, i32
  }
  func.func @transform_1(%arg0: i32) -> (i32, i32) {
    %c0_i32 = arith.constant 0 : i32
    %c0_i32_0 = arith.constant 0 : i32
    %c0_i32_1 = arith.constant 0 : i32
    return %c0_i32, %c0_i32_0 : i32, i32
  }
  func.func @transform_2(%arg0: i32) -> (i32, i32, i32) {
    %c0_i32 = arith.constant 0 : i32
    %c0_i32_0 = arith.constant 0 : i32
    %c0_i32_1 = arith.constant 0 : i32
    %c0_i32_2 = arith.constant 0 : i32
    return %c0_i32, %c0_i32_0, %c0_i32_1 : i32, i32, i32
  }
  func.func @transform_3(%arg0: i32) -> (i32, i32, i32) {
    %c0_i32 = arith.constant 0 : i32
    %c0_i32_0 = arith.constant 0 : i32
    %c0_i32_1 = arith.constant 0 : i32
    %c0_i32_2 = arith.constant 0 : i32
    return %c0_i32, %c0_i32_0, %c0_i32_1 : i32, i32, i32
  }
  func.func @transform_4(%arg0: i32) -> (i32, i32, i32) {
    %c0_i32 = arith.constant 0 : i32
    %c0_i32_0 = arith.constant 0 : i32
    %c0_i32_1 = arith.constant 0 : i32
    %c0_i32_2 = arith.constant 0 : i32
    return %c0_i32, %c0_i32_0, %c0_i32_1 : i32, i32, i32
  }
  func.func @transform_5(%arg0: i32) -> (i32, i32) {
    %c0_i32 = arith.constant 0 : i32
    %c0_i32_0 = arith.constant 0 : i32
    %c0_i32_1 = arith.constant 0 : i32
    return %c0_i32, %c0_i32_0 : i32, i32
  }
  func.func @transform_6(%arg0: i32) -> (i32, i32) {
    %c0_i32 = arith.constant 0 : i32
    %c0_i32_0 = arith.constant 0 : i32
    %c0_i32_1 = arith.constant 0 : i32
    return %c0_i32, %c0_i32_0 : i32, i32
  }
  func.func @transform_7(%arg0: i32) -> (i32, i32, i32) {
    %c0_i32 = arith.constant 0 : i32
    %c0_i32_0 = arith.constant 0 : i32
    %c0_i32_1 = arith.constant 0 : i32
    return %arg0, %c0_i32, %c0_i32_0 : i32, i32, i32
  }
}

</mosaic_0001>

<bundles_post_ra>
// kernel: tpu_custom_call.1
= control target key start
LH: loop header
LB: loop body
LE: loop exit
PB: predicated region body
PF: predicated region fallthrough
CT: control target
= control target key end

     0   :  { %12 = vsyncpa [#allocation5], 0  ;;  %s18003_s0 = inlined_call_operand.hbm [shape: bf16[1,64,128], index: 0, kind: input, shape index: {}]   ;;  %s18004_s1 = inlined_call_operand.hbm [shape: bf16[128,512], index: 1, kind: input, shape index: {}]   ;;  %s18005_s2 = inlined_call_operand.hbm [shape: bf16[2,128,512], index: 2, kind: input, shape index: {}]   ;;  %s18006_s3 = inlined_call_operand.hbm [shape: bf16[3,128,512], index: 3, kind: input, shape index: {}]   ;;  %s18007_s4 = inlined_call_operand.vmem [shape: f32[3,1,512], index: 4, kind: input, shape index: {}]   ;;  %s18008_s5 = inlined_call_operand.hbm [shape: bf16[128,128], index: 5, kind: input, shape index: {}]   ;;  %s18009_s6 = inlined_call_operand.vmem [shape: f32[1,128], index: 6, kind: input, shape index: {}]   ;;  %s18010_s7 = inlined_call_operand.hbm [shape: f32[1,64,128], index: 7, kind: output, shape index: {}]  }
   0x1   :  { %13 = vsyncpa [#allocation8], 0 }
   0x2   :  { %14 = vsyncpa [#allocation11], 0 }
   0x3   :  { %15 = vsyncpa [#allocation6], 0  ;;  %s16659_s24 = smov [#allocation7]   ;;  %s16519_s28 = scalar_lea.hbm %s18004_s1, 4096 }
   0x4   :  { %s33_s25 = sshll.u32 %s16659_s24, 4  ;;  %p16520_p0 = scmp.ne.s32.totalorder %s18004_s1, %s16519_s28  ;;  %s34_s25 = int_to_ptr.vmem [resolvable:$true] %s33_s25 }
   0x5   :  { %p16523_p1 = scmp.lt.u32.totalorder %s16519_s28, %s18004_s1 }
   0x7   :  { %p16525_p2 = pnand %p16523_p1, %p16520_p0 }
   0x9   :  { %16528 = shalt.err (!%p16525_p2)
}
   0xa   :  { %s16529_s10 = scalar_lea.vmem %s34_s25, 4096  ;;  %p16534_p4 = scmp.lt.s32.totalorder %s34_s25, %s34_s25 }
   0xb   :  { %p16530_p3 = scmp.ne.s32.totalorder %s34_s25, %s16529_s10  ;;  %p16535_p5 = scmp.lt.s32.totalorder %s16529_s10, %s16529_s10 }
   0xd   :  { %p16536_p6 = por %p16535_p5, %p16534_p4 }
   0xf   :  { %p16537_p7 = pnand %p16536_p6, %p16530_p3 }
  0x11   :  { %16540 = shalt.err (!%p16537_p7)
}
  0x12   :  { %s16660_s11 = smov 256   ;;  %s16661_s12 = smov 16  }
  0x13   :  { %39 = dma.hbm_to_vmem [thread:$0]  %s18004_s1, 4096, %s34_s25, [#allocation8], %s16660_s11, %s16660_s11, %s16661_s12  }
  0x14   :  { %s16662_s15 = smov [#allocation10]   ;;  %s16663_s17 = smov [#allocation4]  }
  0x15   :  { %s57_s16 = sshll.u32 %s16662_s15, 4  ;;  %s21_s18 = sshll.u32 %s16663_s17, 4  ;;  %s58_s16 = int_to_ptr.vmem [resolvable:$true] %s57_s16  ;;  %s22_s18 = int_to_ptr.vmem [resolvable:$true] %s21_s18 }
  0x16   :  { %s16541_s21 = scalar_lea.hbm %s18006_s3, 12288 }
  0x17   :  { %p16542_p8 = scmp.ne.s32.totalorder %s18006_s3, %s16541_s21  ;;  %p16545_p9 = scmp.lt.u32.totalorder %s16541_s21, %s18006_s3 }
  0x19   :  { %p16547_p10 = pnand %p16545_p9, %p16542_p8 }
  0x1b   :  { %16550 = shalt.err (!%p16547_p10)
}
  0x1c   :  { %s16551_s1 = scalar_lea.vmem %s58_s16, 12288  ;;  %p16556_p12 = scmp.lt.s32.totalorder %s58_s16, %s58_s16 }
  0x1d   :  { %p16552_p11 = scmp.ne.s32.totalorder %s58_s16, %s16551_s1  ;;  %p16557_p13 = scmp.lt.s32.totalorder %s16551_s1, %s16551_s1 }
  0x1f   :  { %p16558_p0 = por %p16557_p13, %p16556_p12 }
  0x21   :  { %p16559_p1 = pnand %p16558_p0, %p16552_p11 }
  0x23   :  { %16562 = shalt.err (!%p16559_p1)
}
  0x24   :  { %63 = dma.hbm_to_vmem [thread:$0]  %s18006_s3, 12288, %s58_s16, [#allocation11], %s16660_s11, %s16660_s11, %s16661_s12  }
  0x25   :  { %s16563_s30 = scalar_lea.hbm %s18003_s0, 512 }
  0x26   :  { %p16564_p2 = scmp.ne.s32.totalorder %s18003_s0, %s16563_s30  ;;  %p16567_p3 = scmp.lt.u32.totalorder %s16563_s30, %s18003_s0 }
  0x28   :  { %p16569_p4 = pnand %p16567_p3, %p16564_p2 }
  0x2a   :  { %16572 = shalt.err (!%p16569_p4)
}
  0x2b   :  { %s16573_s14 = scalar_lea.vmem %s22_s18, 512  ;;  %p16578_p6 = scmp.lt.s32.totalorder %s22_s18, %s22_s18 }
  0x2c   :  { %p16574_p5 = scmp.ne.s32.totalorder %s22_s18, %s16573_s14  ;;  %p16579_p7 = scmp.lt.s32.totalorder %s16573_s14, %s16573_s14 }
  0x2e   :  { %p16580_p8 = por %p16579_p7, %p16578_p6 }
  0x30   :  { %p16581_p9 = pnand %p16580_p8, %p16574_p5 }
  0x32   :  { %16584 = shalt.err (!%p16581_p9)
}
  0x33   :  { %s16664_s3 = smov 64   ;;  %s16665_s15 = smov 4  }
  0x34   :  { %27 = dma.hbm_to_vmem [thread:$0]  %s18003_s0, 512, %s22_s18, [#allocation5], %s16664_s3, %s16664_s3, %s16665_s15  }
  0x35   :  { %s16666_s19 = smov [#allocation9]   ;;  %s16667_s21 = smov [#allocation12]  }
  0x36   :  { %s45_s20 = sshll.u32 %s16666_s19, 4  ;;  %s71_s22 = sshll.u32 %s16667_s21, 4  ;;  %s46_s20 = int_to_ptr.vmem [resolvable:$true] %s45_s20  ;;  %s72_s22 = int_to_ptr.vmem [resolvable:$true] %s71_s22 }
  0x37   :  { %s16585_s26 = scalar_lea.hbm %s18005_s2, 8192 }
  0x38   :  { %p16586_p10 = scmp.ne.s32.totalorder %s18005_s2, %s16585_s26  ;;  %p16589_p11 = scmp.lt.u32.totalorder %s16585_s26, %s18005_s2 }
  0x3a   :  { %p16591_p12 = pnand %p16589_p11, %p16586_p10 }
  0x3c   :  { %16594 = shalt.err (!%p16591_p12)
}
  0x3d   :  { %s16595_s0 = scalar_lea.vmem %s46_s20, 8192  ;;  %p16600_p0 = scmp.lt.s32.totalorder %s46_s20, %s46_s20 }
  0x3e   :  { %p16596_p13 = scmp.ne.s32.totalorder %s46_s20, %s16595_s0  ;;  %p16601_p1 = scmp.lt.s32.totalorder %s16595_s0, %s16595_s0 }
  0x40   :  { %p16602_p2 = por %p16601_p1, %p16600_p0 }
  0x42   :  { %p16603_p3 = pnand %p16602_p2, %p16596_p13 }
  0x44   :  { %16606 = shalt.err (!%p16603_p3)
}
  0x45   :  { %51 = dma.hbm_to_vmem [thread:$0]  %s18005_s2, 8192, %s46_s20, [#allocation8], %s16660_s11, %s16660_s11, %s16661_s12  }
  0x46   :  { %s16607_s9 = scalar_lea.hbm %s18008_s5, 1024 }
  0x47   :  { %p16608_p4 = scmp.ne.s32.totalorder %s18008_s5, %s16607_s9  ;;  %p16611_p5 = scmp.lt.u32.totalorder %s16607_s9, %s18008_s5 }
  0x49   :  { %p16613_p6 = pnand %p16611_p5, %p16608_p4 }
  0x4b   :  { %16616 = shalt.err (!%p16613_p6)
}
  0x4c   :  { %s16617_s17 = scalar_lea.vmem %s72_s22, 1024  ;;  %p16622_p8 = scmp.lt.s32.totalorder %s72_s22, %s72_s22 }
  0x4d   :  { %p16618_p7 = scmp.ne.s32.totalorder %s72_s22, %s16617_s17  ;;  %p16623_p9 = scmp.lt.s32.totalorder %s16617_s17, %s16617_s17 }
  0x4f   :  { %p16624_p10 = por %p16623_p9, %p16622_p8 }
  0x51   :  { %p16625_p11 = pnand %p16624_p10, %p16618_p7 }
  0x53   :  { %16628 = shalt.err (!%p16625_p11)
}
  0x54   :  { %77 = dma.hbm_to_vmem [thread:$0]  %s18008_s5, 1024, %s72_s22, [#allocation11], %s16664_s3, %s16664_s3, %s16665_s15  }
  0x55   :  { %16651 = dma.done.wait [#allocation5], 512  }
  0x56   :  { %16652 = vsyncadd [#allocation5], 4294966784 }
  0x57   :  { %16653 = dma.done.wait [#allocation8], 12288  }
  0x58   :  { %16654 = vsyncadd [#allocation8], 4294955008 }
  0x59   :  { %16655 = dma.done.wait [#allocation11], 13312  }
  0x5a   :  { %16656 = vsyncadd [#allocation11], 4294953984  ;;  %v18011_v0 = vmov 0   ;;  %v14486_v1 = vld [vmem:[#allocation7 + $0x4] ss:$16 sps:$4 sm:$0xff]   ;;  %v14541_v39 = vld [vmem:[#allocation4 + $0x8] sm:$0xff]  }
  0x5b   :  { %374 = vmatprep.mubr.bf16.mxu1 %v18011_v0  ;;  %748 = vmatprep.mubr.bf16.mxu0 %v18011_v0  ;;  %v14488_v2 = vld [vmem:[#allocation7] ss:$16 sps:$4 sm:$0xff]   ;;  %v16789_v3 = vld [vmem:[#allocation10 + $0x4] ss:$16 sps:$4 sm:$0xff]   ;;  %v14537_v32 = vld [vmem:[#allocation7 + $0xc] ss:$16 sps:$4 sm:$0xff]  }
  0x5c   :  { %342 = vmatprep.subr.bf16.mxu1 %v14486_v1  ;;  %v16791_v4 = vld [vmem:[#allocation10] ss:$16 sps:$4 sm:$0xff]   ;;  %v14492_v5 = vld [vmem:[#allocation7 + $0x24] ss:$16 sps:$4 sm:$0xff]   ;;  %716 = vmatprep.subr.bf16.mxu0 %v16789_v3  ;;  %v14535_v35 = vld [vmem:[#allocation7 + $0x8] ss:$16 sps:$4 sm:$0xff]  }
  0x5d   :  { %343 = vmatpush1.bf16.msra.mxu1 %v14488_v2  ;;  %v14494_v6 = vld [vmem:[#allocation7 + $0x20] ss:$16 sps:$4 sm:$0xff]   ;;  %v16794_v7 = vld [vmem:[#allocation10 + $0x24] ss:$16 sps:$4 sm:$0xff]   ;;  %717 = vmatpush1.bf16.msra.mxu0 %v16791_v4  ;;  %v14540_v36 = vld [vmem:[#allocation7 + $0x2c] ss:$16 sps:$4 sm:$0xff]  }
  0x5e   :  { %344 = vmatprep.subr.bf16.mxu1 %v14492_v5  ;;  %v16797_v8 = vld [vmem:[#allocation10 + $0x20] ss:$16 sps:$4 sm:$0xff]   ;;  %718 = vmatprep.subr.bf16.mxu0 %v16794_v7  ;;  %v14498_v9 = vld [vmem:[#allocation7 + $0x44] ss:$16 sps:$4 sm:$0xff]   ;;  %v14538_v37 = vld [vmem:[#allocation7 + $0x28] ss:$16 sps:$4 sm:$0xff]  }
  0x5f   :  { %v14500_v10 = vld [vmem:[#allocation7 + $0x40] ss:$16 sps:$4 sm:$0xff]   ;;  %v16800_v11 = vld [vmem:[#allocation10 + $0x44] ss:$16 sps:$4 sm:$0xff]   ;;  %v14544_v38 = vld [vmem:[#allocation7 + $0x4c] ss:$16 sps:$4 sm:$0xff]  }
  0x60   :  { %v14504_v12 = vld [vmem:[#allocation7 + $0x64] ss:$16 sps:$4 sm:$0xff]   ;;  %v16803_v13 = vld [vmem:[#allocation10 + $0x40] ss:$16 sps:$4 sm:$0xff]   ;;  %v14542_v40 = vld [vmem:[#allocation7 + $0x48] ss:$16 sps:$4 sm:$0xff]  }
  0x61   :  { %345 = vmatpush1.bf16.msra.mxu1 %v14494_v6  ;;  %719 = vmatpush1.bf16.msra.mxu0 %v16797_v8  ;;  %v16806_v14 = vld [vmem:[#allocation10 + $0x64] ss:$16 sps:$4 sm:$0xff]   ;;  %v14506_v15 = vld [vmem:[#allocation7 + $0x60] ss:$16 sps:$4 sm:$0xff]   ;;  %v14547_v41 = vld [vmem:[#allocation7 + $0x6c] ss:$16 sps:$4 sm:$0xff]  }
  0x62   :  { %346 = vmatprep.subr.bf16.mxu1 %v14498_v9  ;;  %720 = vmatprep.subr.bf16.mxu0 %v16800_v11  ;;  %v14510_v16 = vld [vmem:[#allocation7 + $0x84] ss:$16 sps:$4 sm:$0xff]   ;;  %v16809_v17 = vld [vmem:[#allocation10 + $0x60] ss:$16 sps:$4 sm:$0xff]   ;;  %v14545_v42 = vld [vmem:[#allocation7 + $0x68] ss:$16 sps:$4 sm:$0xff]  }
  0x63   :  { %v16812_v18 = vld [vmem:[#allocation10 + $0x84] ss:$16 sps:$4 sm:$0xff]   ;;  %v14512_v19 = vld [vmem:[#allocation7 + $0x80] ss:$16 sps:$4 sm:$0xff]   ;;  %v14551_v43 = vld [vmem:[#allocation7 + $0x8c] ss:$16 sps:$4 sm:$0xff]  }
  0x64   :  { %v14516_v20 = vld [vmem:[#allocation7 + $0xa4] ss:$16 sps:$4 sm:$0xff]   ;;  %v16815_v21 = vld [vmem:[#allocation10 + $0x80] ss:$16 sps:$4 sm:$0xff]   ;;  %v14549_v45 = vld [vmem:[#allocation7 + $0x88] ss:$16 sps:$4 sm:$0xff]  }
  0x65   :  { %347 = vmatpush1.bf16.msra.mxu1 %v14500_v10  ;;  %721 = vmatpush1.bf16.msra.mxu0 %v16803_v13  ;;  %v16818_v22 = vld [vmem:[#allocation10 + $0xa4] ss:$16 sps:$4 sm:$0xff]   ;;  %v14518_v23 = vld [vmem:[#allocation7 + $0xa0] ss:$16 sps:$4 sm:$0xff]   ;;  %v14554_v46 = vld [vmem:[#allocation7 + $0xac] ss:$16 sps:$4 sm:$0xff]  }
  0x66   :  { %348 = vmatprep.subr.bf16.mxu1 %v14504_v12  ;;  %722 = vmatprep.subr.bf16.mxu0 %v16806_v14  ;;  %v14522_v24 = vld [vmem:[#allocation7 + $0xc4] ss:$16 sps:$4 sm:$0xff]   ;;  %v16821_v25 = vld [vmem:[#allocation10 + $0xa0] ss:$16 sps:$4 sm:$0xff]   ;;  %v14552_v47 = vld [vmem:[#allocation7 + $0xa8] ss:$16 sps:$4 sm:$0xff]  }
  0x67   :  { %v16824_v26 = vld [vmem:[#allocation10 + $0xc4] ss:$16 sps:$4 sm:$0xff]   ;;  %v14524_v27 = vld [vmem:[#allocation7 + $0xc0] ss:$16 sps:$4 sm:$0xff]   ;;  %v14558_v48 = vld [vmem:[#allocation7 + $0xcc] ss:$16 sps:$4 sm:$0xff]  }
  0x68   :  { %v14528_v28 = vld [vmem:[#allocation7 + $0xe4] ss:$16 sps:$4 sm:$0xff]   ;;  %v16827_v29 = vld [vmem:[#allocation10 + $0xc0] ss:$16 sps:$4 sm:$0xff]   ;;  %v14555_v49 = vld [vmem:[#allocation4 + $0x18] sm:$0xff]  }
  0x69   :  { %349 = vmatpush1.bf16.msra.mxu1 %v14506_v15  ;;  %723 = vmatpush1.bf16.msra.mxu0 %v16809_v17  ;;  %v16830_v30 = vld [vmem:[#allocation10 + $0xe4] ss:$16 sps:$4 sm:$0xff]   ;;  %v14530_v31 = vld [vmem:[#allocation7 + $0xe0] ss:$16 sps:$4 sm:$0xff]   ;;  %v14556_v50 = vld [vmem:[#allocation7 + $0xc8] ss:$16 sps:$4 sm:$0xff]  }
  0x6a   :  { %350 = vmatprep.subr.bf16.mxu1 %v14510_v16  ;;  %724 = vmatprep.subr.bf16.mxu0 %v16812_v18  ;;  %v16833_v33 = vld [vmem:[#allocation10 + $0xe0] ss:$16 sps:$4 sm:$0xff]   ;;  %v14561_v51 = vld [vmem:[#allocation7 + $0xec] ss:$16 sps:$4 sm:$0xff]   ;;  %v14559_v52 = vld [vmem:[#allocation7 + $0xe8] ss:$16 sps:$4 sm:$0xff]  }
  0x6b   :  { %v16836_v34 = vld [vmem:[#allocation4] sm:$0xff]   ;;  %v14548_v44 = vld [vmem:[#allocation4 + $0x10] sm:$0xff]   ;;  %v14564_v53 = vld [vmem:[#allocation10 + $0xc] ss:$16 sps:$4 sm:$0xff]  }
  0x6c   :  { %v14562_v54 = vld [vmem:[#allocation10 + $0x8] ss:$16 sps:$4 sm:$0xff]   ;;  %v14567_v55 = vld [vmem:[#allocation10 + $0x2c] ss:$16 sps:$4 sm:$0xff]   ;;  %v14588_v6 = vld [vmem:[#allocation9 + $0x4] ss:$16 sps:$4 sm:$0xff]  }
  0x6d   :  { %351 = vmatpush1.bf16.msra.mxu1 %v14512_v19  ;;  %725 = vmatpush1.bf16.msra.mxu0 %v16815_v21  ;;  %v14565_v56 = vld [vmem:[#allocation10 + $0x28] ss:$16 sps:$4 sm:$0xff]   ;;  %v14570_v57 = vld [vmem:[#allocation10 + $0x4c] ss:$16 sps:$4 sm:$0xff]   ;;  %v136_v10 = vld [vmem:[%s18007_s4] sm:$0xf] }
  0x6e   :  { %352 = vmatprep.subr.bf16.mxu1 %v14516_v20  ;;  %726 = vmatprep.subr.bf16.mxu0 %v16818_v22  ;;  %v14568_v58 = vld [vmem:[#allocation10 + $0x48] ss:$16 sps:$4 sm:$0xff]   ;;  %v14573_v59 = vld [vmem:[#allocation10 + $0x6c] ss:$16 sps:$4 sm:$0xff]  }
  0x6f   :  { %v14571_v60 = vld [vmem:[#allocation10 + $0x68] ss:$16 sps:$4 sm:$0xff]   ;;  %v14576_v61 = vld [vmem:[#allocation10 + $0x8c] ss:$16 sps:$4 sm:$0xff]  }
  0x70   :  { %v14574_v62 = vld [vmem:[#allocation10 + $0x88] ss:$16 sps:$4 sm:$0xff]   ;;  %v14579_v63 = vld [vmem:[#allocation10 + $0xac] ss:$16 sps:$4 sm:$0xff]  }
  0x71   :  { %353 = vmatpush1.bf16.msra.mxu1 %v14518_v23  ;;  %727 = vmatpush1.bf16.msra.mxu0 %v16821_v25  ;;  %v14577_v1 = vld [vmem:[#allocation10 + $0xa8] ss:$16 sps:$4 sm:$0xff]   ;;  %v14582_v2 = vld [vmem:[#allocation10 + $0xcc] ss:$16 sps:$4 sm:$0xff]  }
  0x72   :  { %354 = vmatprep.subr.bf16.mxu1 %v14522_v24  ;;  %728 = vmatprep.subr.bf16.mxu0 %v16824_v26  ;;  %v14583_v5 = vld [vmem:[#allocation10 + $0xe8] ss:$16 sps:$4 sm:$0xff]  }
  0x75   :  { %355 = vmatpush1.bf16.msra.mxu1 %v14524_v27  ;;  %729 = vmatpush1.bf16.msra.mxu0 %v16827_v29 }
  0x76   :  { %356 = vmatprep.subr.bf16.mxu1 %v14528_v28  ;;  %730 = vmatprep.subr.bf16.mxu0 %v16830_v30 }
  0x79   :  { %357 = vmatpush1.bf16.msra.mxu1 %v14530_v31  ;;  %731 = vmatpush1.bf16.msra.mxu0 %v16833_v33 }
  0x7a   :  { %415 = vmatprep.subr.bf16.mxu1 %v14537_v32  ;;  %1024 = vmatprep.subr.bf16.mxu0 %v16789_v3  ;;  %v14580_v3 = vld [vmem:[#allocation10 + $0xc8] ss:$16 sps:$4 sm:$0xff]  }
  0x7c   :  { %375 = vmatmul.mubr.bf16.vlgmr.msra.gmra.mrb[0].mxu1 %v16836_v34  ;;  %749 = vmatmul.mubr.bf16.vlgmr.msra.gmra.mrb[0].mxu0 %v18011_v0 }
  0x7d   :  { %416 = vmatpush1.bf16.msra.mxu1 %v14535_v35  ;;  %384 = vmatprep.mubr.bf16.mxu1 %v18011_v0 }
  0x7e   :  { %417 = vmatprep.subr.bf16.mxu1 %v14540_v36  ;;  %1025 = vmatpush1.bf16.msra.mxu0 %v16791_v4  ;;  %v14585_v4 = vld [vmem:[#allocation10 + $0xec] ss:$16 sps:$4 sm:$0xff]  }
  0x7f   :  { %1056 = vmatprep.mubr.bf16.mxu0 %v18011_v0  ;;  %1026 = vmatprep.subr.bf16.mxu0 %v16794_v7  ;;  %v14591_v7 = vld [vmem:[#allocation9 + $0xc] ss:$16 sps:$4 sm:$0xff]  }
  0x81   :  { %418 = vmatpush1.bf16.msra.mxu1 %v14538_v37 }
  0x82   :  { %419 = vmatprep.subr.bf16.mxu1 %v14544_v38  ;;  %1027 = vmatpush1.bf16.msra.mxu0 %v16797_v8  ;;  %v138_v8 = vlaneseq }
  0x83   :  { %1028 = vmatprep.subr.bf16.mxu0 %v16800_v11 }
  0x84   :  { %385 = vmatmul.mubr.bf16.gmra.mrb[4].mxu1 %v14541_v39  ;;  %v139_v9 = vshrl.u32 %v138_v8, 7 }
  0x85   :  { %420 = vmatpush1.bf16.msra.mxu1 %v14542_v40  ;;  %394 = vmatprep.mubr.bf16.mxu1 %v18011_v0 }
  0x86   :  { %421 = vmatprep.subr.bf16.mxu1 %v14547_v41  ;;  %1029 = vmatpush1.bf16.msra.mxu0 %v16803_v13  ;;  %v16872_v11 = vsub.s32 0, %v139_v9  ;;  %v16874_v12 = vsub.s32 1, %v139_v9 }
  0x87   :  { %1030 = vmatprep.subr.bf16.mxu0 %v16806_v14 }
  0x88   :  { %v141_v13 = vrot.slane %v136_v10, %v16872_v11  ;;  %v145_v14 = vrot.slane %v136_v10, %v16874_v12 }
  0x89   :  { %422 = vmatpush1.bf16.msra.mxu1 %v14545_v42 }
  0x8a   :  { %423 = vmatprep.subr.bf16.mxu1 %v14551_v43  ;;  %1031 = vmatpush1.bf16.msra.mxu0 %v16809_v17 }
  0x8b   :  { %1032 = vmatprep.subr.bf16.mxu0 %v16812_v18 }
  0x8c   :  { %395 = vmatmul.mubr.bf16.gmra.mrb[8].mxu1 %v14548_v44 }
  0x8d   :  { %424 = vmatpush1.bf16.msra.mxu1 %v14549_v45  ;;  %404 = vmatprep.mubr.bf16.mxu1 %v18011_v0 }
  0x8e   :  { %425 = vmatprep.subr.bf16.mxu1 %v14554_v46  ;;  %1033 = vmatpush1.bf16.msra.mxu0 %v16815_v21 }
  0x8f   :  { %1034 = vmatprep.subr.bf16.mxu0 %v16818_v22 }
  0x91   :  { %426 = vmatpush1.bf16.msra.mxu1 %v14552_v47 }
  0x92   :  { %427 = vmatprep.subr.bf16.mxu1 %v14558_v48  ;;  %1035 = vmatpush1.bf16.msra.mxu0 %v16821_v25 }
  0x93   :  { %1036 = vmatprep.subr.bf16.mxu0 %v16824_v26 }
  0x94   :  { %405 = vmatmul.mubr.bf16.gmra.mrb[12].mxu1 %v14555_v49 }
  0x95   :  { %428 = vmatpush1.bf16.msra.mxu1 %v14556_v50  ;;  %447 = vmatprep.mubr.bf16.mxu1 %v18011_v0 }
  0x96   :  { %429 = vmatprep.subr.bf16.mxu1 %v14561_v51  ;;  %1037 = vmatpush1.bf16.msra.mxu0 %v16827_v29 }
  0x97   :  { %1038 = vmatprep.subr.bf16.mxu0 %v16830_v30 }
  0x99   :  { %430 = vmatpush1.bf16.msra.mxu1 %v14559_v52 }
  0x9a   :  { %757 = vmatprep.subr.bf16.mxu1 %v14564_v53  ;;  %1039 = vmatpush1.bf16.msra.mxu0 %v16833_v33 }
  0x9b   :  { %1355 = vmatprep.subr.bf16.mxu0 %v14588_v6 }
  0x9c   :  { %448 = vmatmul.mubr.bf16.vlgmr.msra.gmra.mrb[16].mxu1 %v16836_v34 }
  0x9d   :  { %758 = vmatpush1.bf16.msra.mxu1 %v14562_v54  ;;  %457 = vmatprep.mubr.bf16.mxu1 %v18011_v0 }
  0x9e   :  { %759 = vmatprep.subr.bf16.mxu1 %v14567_v55 }
  0xa1   :  { %760 = vmatpush1.bf16.msra.mxu1 %v14565_v56 }
  0xa2   :  { %761 = vmatprep.subr.bf16.mxu1 %v14570_v57 }
  0xa4   :  { %458 = vmatmul.mubr.bf16.gmra.mrb[20].mxu1 %v14541_v39 }
  0xa5   :  { %762 = vmatpush1.bf16.msra.mxu1 %v14568_v58  ;;  %467 = vmatprep.mubr.bf16.mxu1 %v18011_v0 }
  0xa6   :  { %763 = vmatprep.subr.bf16.mxu1 %v14573_v59 }
  0xa9   :  { %764 = vmatpush1.bf16.msra.mxu1 %v14571_v60 }
  0xaa   :  { %765 = vmatprep.subr.bf16.mxu1 %v14576_v61 }
  0xac   :  { %468 = vmatmul.mubr.bf16.gmra.mrb[24].mxu1 %v14548_v44 }
  0xad   :  { %766 = vmatpush1.bf16.msra.mxu1 %v14574_v62  ;;  %477 = vmatprep.mubr.bf16.mxu1 %v18011_v0 }
  0xae   :  { %767 = vmatprep.subr.bf16.mxu1 %v14579_v63 }
  0xb1   :  { %768 = vmatpush1.bf16.msra.mxu1 %v14577_v1 }
  0xb2   :  { %769 = vmatprep.subr.bf16.mxu1 %v14582_v2 }
  0xb4   :  { %478 = vmatmul.mubr.bf16.gmra.mrb[28].mxu1 %v14555_v49 }
  0xb5   :  { %770 = vmatpush1.bf16.msra.mxu1 %v14580_v3  ;;  %789 = vmatprep.mubr.bf16.mxu1 %v18011_v0 }
  0xb6   :  { %771 = vmatprep.subr.bf16.mxu1 %v14585_v4 }
  0xb9   :  { %772 = vmatpush1.bf16.msra.mxu1 %v14583_v5 }
  0xba   :  { %1065 = vmatprep.subr.bf16.mxu1 %v14564_v53  ;;  %v16906_v53 = vsub.s32 2, %v139_v9 }
  0xbc   :  { %790 = vmatmul.mubr.bf16.vlgmr.msra.gmra.mrb[32].mxu1 %v18011_v0 }
  0xbd   :  { %1066 = vmatpush1.bf16.msra.mxu1 %v14562_v54  ;;  %1097 = vmatprep.mubr.bf16.mxu1 %v18011_v0  ;;  %v16908_v54 = vsub.s32 3, %v139_v9 }
  0xbe   :  { %1067 = vmatprep.subr.bf16.mxu1 %v14567_v55 }
  0xc1   :  { %1068 = vmatpush1.bf16.msra.mxu1 %v14565_v56  ;;  %v149_v56 = vrot.slane %v136_v10, %v16906_v53 }
  0xc2   :  { %1069 = vmatprep.subr.bf16.mxu1 %v14570_v57 }
  0xc5   :  { %1070 = vmatpush1.bf16.msra.mxu1 %v14568_v58  ;;  %v153_v58 = vrot.slane %v136_v10, %v16908_v54 }
  0xc6   :  { %1071 = vmatprep.subr.bf16.mxu1 %v14573_v59 }
  0xc9   :  { %1072 = vmatpush1.bf16.msra.mxu1 %v14571_v60 }
  0xca   :  { %1073 = vmatprep.subr.bf16.mxu1 %v14576_v61 }
  0xcd   :  { %1074 = vmatpush1.bf16.msra.mxu1 %v14574_v62 }
  0xce   :  { %1075 = vmatprep.subr.bf16.mxu1 %v14579_v63 }
  0xd1   :  { %1076 = vmatpush1.bf16.msra.mxu1 %v14577_v1 }
  0xd2   :  { %1077 = vmatprep.subr.bf16.mxu1 %v14582_v2 }
  0xd5   :  { %1078 = vmatpush1.bf16.msra.mxu1 %v14580_v3 }
  0xd6   :  { %1079 = vmatprep.subr.bf16.mxu1 %v14585_v4 }
  0xd9   :  { %1080 = vmatpush1.bf16.msra.mxu1 %v14583_v5 }
  0xda   :  { %1396 = vmatprep.subr.bf16.mxu1 %v14591_v7 }
 0x14f   :  { %v376_v15 = vpop.f32.mrb[0].mxu1  ;;  %v750_v20 = vpop.f32.mrb[0].mxu0 }
 0x150   :  { %v377_v16 = vadd.f32 %v376_v15, %v141_v13  ;;  %v378_v17 = vpop.f32.mrb[1].mxu1  ;;  %v752_v24 = vpop.f32.mrb[1].mxu0 }
 0x151   :  { %v379_v18 = vadd.f32 %v378_v17, %v145_v14  ;;  %v380_v19 = vpop.f32.mrb[2].mxu1  ;;  %v754_v27 = vpop.f32.mrb[2].mxu0 }
 0x152   :  { %v16878_v21 = vadd.f32 %v380_v19, %v141_v13  ;;  %v798_v22 = vadd.f32 %v750_v20, %v377_v16  ;;  %v382_v23 = vpop.f32.mrb[3].mxu1  ;;  %v755_v28 = vpop.f32.mrb[3].mxu0 }
 0x153   :  { %v16880_v25 = vadd.f32 %v382_v23, %v145_v14  ;;  %v799_v26 = vadd.f32 %v752_v24, %v379_v18 }
 0x154   :  { %v12900_v9 = vmul.f32 -1.442695, %v798_v22 }
 0x155   :  { %v12901_v8 = vmul.f32 -1.442695, %v799_v26 }
 0x157   :  { %v386_v29 = vpop.f32.mrb[4].mxu1  ;;  %16127 = vpow2.f32 %v12901_v8 }
 0x158   :  { %v16882_v30 = vadd.f32 %v386_v29, %v141_v13  ;;  %v388_v31 = vpop.f32.mrb[5].mxu1  ;;  %16129 = vpow2.f32 %v12900_v9 }
 0x159   :  { %v16884_v32 = vadd.f32 %v388_v31, %v145_v14  ;;  %v390_v33 = vpop.f32.mrb[6].mxu1 }
 0x15a   :  { %18114 = vst [vmem:[#allocation18_spill] sm:$0xff] %v16882_v30  ;;  %v16886_v34 = vadd.f32 %v390_v33, %v141_v13  ;;  %v392_v35 = vpop.f32.mrb[7].mxu1  ;;  %v17101_v30 = vld [vmem:[#allocation10 + $0x1a8] ss:$16 sps:$4 sm:$0xff]  }
 0x15b   :  { %18115 = vst [vmem:[#allocation19_spill] sm:$0xff] %v16884_v32  ;;  %v16888_v36 = vadd.f32 %v392_v35, %v145_v14  ;;  %v17093_v32 = vld [vmem:[#allocation10 + $0x1ac] ss:$16 sps:$4 sm:$0xff]   ;;  %18155 = vst [vmem:[#allocation58_spill] sm:$0xff] %v17101_v30 }
 0x15c   :  { %18116 = vst [vmem:[#allocation20_spill] sm:$0xff] %v16886_v34  ;;  %v17089_v34 = vld [vmem:[#allocation10 + $0x188] ss:$16 sps:$4 sm:$0xff]   ;;  %18153 = vst [vmem:[#allocation56_spill] sm:$0xff] %v17093_v32 }
 0x15d   :  { %18117 = vst [vmem:[#allocation21_spill] sm:$0xff] %v16888_v36  ;;  %v17081_v36 = vld [vmem:[#allocation10 + $0x18c] ss:$16 sps:$4 sm:$0xff]   ;;  %18151 = vst [vmem:[#allocation54_spill] sm:$0xff] %v17089_v34 }
 0x15e   :  { %18149 = vst [vmem:[#allocation52_spill] sm:$0xff] %v17081_v36 }
 0x15f   :  { %v396_v37 = vpop.f32.mrb[8].mxu1 }
 0x160   :  { %v16890_v38 = vadd.f32 %v396_v37, %v141_v13  ;;  %v398_v39 = vpop.f32.mrb[9].mxu1 }
 0x161   :  { %v16892_v40 = vadd.f32 %v398_v39, %v145_v14  ;;  %v400_v41 = vpop.f32.mrb[10].mxu1  ;;  %v16128_v27 = vpop.eup %16127 }
 0x162   :  { %18118 = vst [vmem:[#allocation22_spill] sm:$0xff] %v16890_v38  ;;  %v16894_v42 = vadd.f32 %v400_v41, %v141_v13  ;;  %v402_v43 = vpop.f32.mrb[11].mxu1  ;;  %v16130_v31 = vpop.eup %16129  ;;  %v812_v35 = vadd.f32 1.0, %v16128_v27  ;;  %v16953_v27 = vld [vmem:[#allocation9 + $0x28] ss:$16 sps:$4 sm:$0xff]  }
 0x163   :  { %18119 = vst [vmem:[#allocation23_spill] sm:$0xff] %v16892_v40  ;;  %v16896_v44 = vadd.f32 %v402_v43, %v145_v14  ;;  %v811_v37 = vadd.f32 1.0, %v16130_v31  ;;  %v16957_v31 = vld [vmem:[#allocation9 + $0x4c] ss:$16 sps:$4 sm:$0xff]   ;;  %v17077_v38 = vld [vmem:[#allocation10 + $0x168] ss:$16 sps:$4 sm:$0xff]  }
 0x164   :  { %18120 = vst [vmem:[#allocation24_spill] sm:$0xff] %v16894_v42  ;;  %16131 = vrcp.f32 %v812_v35  ;;  %v16963_v35 = vld [vmem:[#allocation9 + $0x40] ss:$16 sps:$4 sm:$0xff]   ;;  %v17063_v42 = vld [vmem:[#allocation10 + $0x148] ss:$16 sps:$4 sm:$0xff]   ;;  %18147 = vst [vmem:[#allocation50_spill] sm:$0xff] %v17077_v38 }
 0x165   :  { %18121 = vst [vmem:[#allocation25_spill] sm:$0xff] %v16896_v44  ;;  %16133 = vrcp.f32 %v811_v37  ;;  %v16965_v37 = vld [vmem:[#allocation9 + $0x48] ss:$16 sps:$4 sm:$0xff]   ;;  %v17055_v44 = vld [vmem:[#allocation10 + $0x14c] ss:$16 sps:$4 sm:$0xff]   ;;  %18142 = vst [vmem:[#allocation46_spill] sm:$0xff] %v17063_v42 }
 0x166   :  { %18140 = vst [vmem:[#allocation44_spill] sm:$0xff] %v17055_v44  ;;  %v17069_v40 = vld [vmem:[#allocation10 + $0x16c] ss:$16 sps:$4 sm:$0xff]  }
 0x167   :  { %v406_v45 = vpop.f32.mrb[12].mxu1  ;;  %18145 = vst [vmem:[#allocation48_spill] sm:$0xff] %v17069_v40 }
 0x168   :  { %v16898_v46 = vadd.f32 %v406_v45, %v141_v13  ;;  %v408_v47 = vpop.f32.mrb[13].mxu1 }
 0x169   :  { %v16900_v48 = vadd.f32 %v408_v47, %v145_v14  ;;  %v410_v49 = vpop.f32.mrb[14].mxu1 }
 0x16a   :  { %18122 = vst [vmem:[#allocation26_spill] sm:$0xff] %v16898_v46  ;;  %v16902_v50 = vadd.f32 %v410_v49, %v141_v13  ;;  %v412_v51 = vpop.f32.mrb[15].mxu1  ;;  %v17051_v46 = vld [vmem:[#allocation10 + $0x128] ss:$16 sps:$4 sm:$0xff]  }
 0x16b   :  { %18123 = vst [vmem:[#allocation27_spill] sm:$0xff] %v16900_v48  ;;  %v16904_v52 = vadd.f32 %v412_v51, %v145_v14  ;;  %18138 = vst [vmem:[#allocation42_spill] sm:$0xff] %v17051_v46 }
 0x16c   :  { %18124 = vst [vmem:[#allocation28_spill] sm:$0xff] %v16902_v50  ;;  %v17041_v50 = vld [vmem:[#allocation10 + $0x124] ss:$16 sps:$4 sm:$0xff]  }
 0x16d   :  { %18125 = vst [vmem:[#allocation29_spill] sm:$0xff] %v16904_v52  ;;  %v17037_v52 = vld [vmem:[#allocation10 + $0x100] ss:$16 sps:$4 sm:$0xff]  }
 0x16f   :  { %v449_v55 = vpop.f32.mrb[16].mxu1 }
 0x170   :  { %v451_v57 = vpop.f32.mrb[17].mxu1  ;;  %v450_v39 = vadd.f32 %v449_v55, %v149_v56 }
 0x171   :  { %v453_v59 = vpop.f32.mrb[18].mxu1  ;;  %v452_v41 = vadd.f32 %v451_v57, %v153_v58 }
 0x172   :  { %v16912_v60 = vadd.f32 %v453_v59, %v149_v56  ;;  %v455_v61 = vpop.f32.mrb[19].mxu1 }
 0x173   :  { %v16914_v62 = vadd.f32 %v455_v61, %v153_v58 }
 0x177   :  { %v459_v63 = vpop.f32.mrb[20].mxu1 }
 0x178   :  { %v16916_v1 = vadd.f32 %v459_v63, %v149_v56  ;;  %v461_v2 = vpop.f32.mrb[21].mxu1  ;;  %v16132_v63 = vpop.eup %16131 }
 0x179   :  { %v16918_v3 = vadd.f32 %v461_v2, %v153_v58  ;;  %v463_v4 = vpop.f32.mrb[22].mxu1  ;;  %v16134_v2 = vpop.eup %16133  ;;  %v821_v8 = vmul.f32 0.0, %v16132_v63  ;;  %v16995_v63 = vld [vmem:[#allocation9 + $0xac] ss:$16 sps:$4 sm:$0xff]  }
 0x17a   :  { %18126 = vst [vmem:[#allocation30_spill] sm:$0xff] %v16916_v1  ;;  %v16920_v5 = vadd.f32 %v463_v4, %v149_v56  ;;  %v465_v6 = vpop.f32.mrb[23].mxu1  ;;  %v17099_v1 = vld [vmem:[#allocation10 + $0x1a0] ss:$16 sps:$4 sm:$0xff]  }
 0x17b   :  { %18127 = vst [vmem:[#allocation31_spill] sm:$0xff] %v16918_v3  ;;  %v16922_v7 = vadd.f32 %v465_v6, %v153_v58  ;;  %v17091_v3 = vld [vmem:[#allocation10 + $0x1a4] ss:$16 sps:$4 sm:$0xff]   ;;  %18154 = vst [vmem:[#allocation57_spill] sm:$0xff] %v17099_v1 }
 0x17c   :  { %18128 = vst [vmem:[#allocation32_spill] sm:$0xff] %v16920_v5  ;;  %v17087_v5 = vld [vmem:[#allocation10 + $0x180] ss:$16 sps:$4 sm:$0xff]   ;;  %18152 = vst [vmem:[#allocation55_spill] sm:$0xff] %v17091_v3 }
 0x17d   :  { %18129 = vst [vmem:[#allocation33_spill] sm:$0xff] %v16922_v7  ;;  %v17079_v7 = vld [vmem:[#allocation10 + $0x184] ss:$16 sps:$4 sm:$0xff]   ;;  %18150 = vst [vmem:[#allocation53_spill] sm:$0xff] %v17087_v5 }
 0x17e   :  { %18148 = vst [vmem:[#allocation51_spill] sm:$0xff] %v17079_v7 }
 0x17f   :  { %v469_v10 = vpop.f32.mrb[24].mxu1 }
 0x180   :  { %v16924_v13 = vadd.f32 %v469_v10, %v149_v56  ;;  %v471_v14 = vpop.f32.mrb[25].mxu1 }
 0x181   :  { %v16926_v15 = vadd.f32 %v471_v14, %v153_v58  ;;  %v473_v16 = vpop.f32.mrb[26].mxu1  ;;  %v16945_v14 = vld [vmem:[#allocation9 + $0x8] ss:$16 sps:$4 sm:$0xff]  }
 0x182   :  { %18130 = vst [vmem:[#allocation34_spill] sm:$0xff] %v16924_v13  ;;  %v16928_v17 = vadd.f32 %v473_v16, %v149_v56  ;;  %v475_v18 = vpop.f32.mrb[27].mxu1  ;;  %v17075_v13 = vld [vmem:[#allocation10 + $0x160] ss:$16 sps:$4 sm:$0xff]  }
 0x183   :  { %18131 = vst [vmem:[#allocation35_spill] sm:$0xff] %v16926_v15  ;;  %v16930_v19 = vadd.f32 %v475_v18, %v153_v58  ;;  %v16947_v18 = vld [vmem:[#allocation9 + $0x24] ss:$16 sps:$4 sm:$0xff]   ;;  %v18143_v15 = vmov 0   ;;  %18146 = vst [vmem:[#allocation49_spill] sm:$0xff] %v17075_v13 }
 0x184   :  { %18132 = vst [vmem:[#allocation36_spill] sm:$0xff] %v16928_v17  ;;  %v17061_v17 = vld [vmem:[#allocation10 + $0x140] ss:$16 sps:$4 sm:$0xff]  }
 0x185   :  { %18133 = vst [vmem:[#allocation37_spill] sm:$0xff] %v16930_v19  ;;  %v17053_v19 = vld [vmem:[#allocation10 + $0x144] ss:$16 sps:$4 sm:$0xff]   ;;  %18141 = vst [vmem:[#allocation45_spill] sm:$0xff] %v17061_v17 }
 0x186   :  { %18139 = vst [vmem:[#allocation43_spill] sm:$0xff] %v17053_v19 }
 0x187   :  { %v479_v20 = vpop.f32.mrb[28].mxu1 }
 0x188   :  { %v16932_v23 = vadd.f32 %v479_v20, %v149_v56  ;;  %v481_v24 = vpop.f32.mrb[29].mxu1  ;;  %v16949_v20 = vld [vmem:[#allocation9 + $0x2c] ss:$16 sps:$4 sm:$0xff]  }
 0x189   :  { %v16934_v26 = vadd.f32 %v481_v24, %v153_v58  ;;  %v483_v22 = vpop.f32.mrb[30].mxu1 }
 0x18a   :  { %18134 = vst [vmem:[#allocation38_spill] sm:$0xff] %v16932_v23  ;;  %v16936_v28 = vadd.f32 %v483_v22, %v149_v56  ;;  %v485_v29 = vpop.f32.mrb[31].mxu1  ;;  %v16951_v22 = vld [vmem:[#allocation9 + $0x20] ss:$16 sps:$4 sm:$0xff]  }
 0x18b   :  { %18135 = vst [vmem:[#allocation39_spill] sm:$0xff] %v16934_v26  ;;  %v16938_v33 = vadd.f32 %v485_v29, %v153_v58  ;;  %v16943_v58 = vld [vmem:[#allocation9] ss:$16 sps:$4 sm:$0xff]   ;;  %v16955_v29 = vld [vmem:[#allocation9 + $0x44] ss:$16 sps:$4 sm:$0xff]  }
 0x18c   :  { %18136 = vst [vmem:[#allocation40_spill] sm:$0xff] %v16936_v28  ;;  %v17039_v28 = vld [vmem:[#allocation10 + $0x108] ss:$16 sps:$4 sm:$0xff]   ;;  %v17043_v26 = vld [vmem:[#allocation10 + $0x12c] ss:$16 sps:$4 sm:$0xff]  }
 0x18d   :  { %18137 = vst [vmem:[#allocation41_spill] sm:$0xff] %v16938_v33  ;;  %v17031_v33 = vld [vmem:[#allocation10 + $0x10c] ss:$16 sps:$4 sm:$0xff]   ;;  %v17049_v23 = vld [vmem:[#allocation10 + $0x120] ss:$16 sps:$4 sm:$0xff]  }
 0x18f   :  { %v791_v43 = vpop.f32.mrb[32].mxu1 }
 0x190   :  { %v800_v45 = vadd.f32 %v791_v43, %v450_v39  ;;  %v793_v47 = vpop.f32.mrb[33].mxu1  ;;  %v16969_v39 = vld [vmem:[#allocation9 + $0x64] ss:$16 sps:$4 sm:$0xff]   ;;  %v16977_v43 = vld [vmem:[#allocation9 + $0x60] ss:$16 sps:$4 sm:$0xff]  }
 0x191   :  { %v801_v49 = vadd.f32 %v793_v47, %v452_v41  ;;  %v795_v51 = vpop.f32.mrb[34].mxu1  ;;  %v16971_v41 = vld [vmem:[#allocation9 + $0x6c] ss:$16 sps:$4 sm:$0xff]   ;;  %v16981_v47 = vld [vmem:[#allocation9 + $0x84] ss:$16 sps:$4 sm:$0xff]  }
 0x192   :  { %v12902_v59 = vmul.f32 -1.442695, %v800_v45  ;;  %v796_v61 = vpop.f32.mrb[35].mxu1  ;;  %v16979_v45 = vld [vmem:[#allocation9 + $0x68] ss:$16 sps:$4 sm:$0xff]  }
 0x193   :  { %16135 = vtanh.f32 %v801_v49  ;;  %v16983_v49 = vld [vmem:[#allocation9 + $0x8c] ss:$16 sps:$4 sm:$0xff]   ;;  %v16989_v51 = vld [vmem:[#allocation9 + $0x80] ss:$16 sps:$4 sm:$0xff]   ;;  %v16993_v61 = vld [vmem:[#allocation9 + $0xa4] ss:$16 sps:$4 sm:$0xff]  }
 0x194   :  { %16137 = vpow2.f32 %v12902_v59  ;;  %v16991_v59 = vld [vmem:[#allocation9 + $0x88] ss:$16 sps:$4 sm:$0xff]  }
 0x19d   :  { %v16136_v4 = vpop.eup %16135 }
 0x19e   :  { %v16138_v6 = vpop.eup %16137  ;;  %v822_v9 = vmul.f32 %v16136_v4, %v16134_v2  ;;  %v17001_v2 = vld [vmem:[#allocation9 + $0xa0] ss:$16 sps:$4 sm:$0xff]   ;;  %v17003_v4 = vld [vmem:[#allocation9 + $0xa8] ss:$16 sps:$4 sm:$0xff]  }
 0x19f   :  { %v813_v10 = vadd.f32 1.0, %v16138_v6  ;;  %v17005_v6 = vld [vmem:[#allocation9 + $0xc4] ss:$16 sps:$4 sm:$0xff]  }
 0x1a0   :  { %v16940_v55 = vadd.f32 %v822_v9, %v821_v8  ;;  %v17007_v8 = vld [vmem:[#allocation9 + $0xcc] ss:$16 sps:$4 sm:$0xff]   ;;  %v17013_v9 = vld [vmem:[#allocation9 + $0xc0] ss:$16 sps:$4 sm:$0xff]  }
 0x1a1   :  { %16139 = vrcp.f32 %v813_v10  ;;  %v17015_v10 = vld [vmem:[#allocation9 + $0xc8] ss:$16 sps:$4 sm:$0xff]  }
 0x1a2   :  { %16141 = vtanh.f32 %v16940_v55 }
 0x1ab   :  { %v16140_v56 = vpop.eup %16139 }
 0x1ac   :  { %v16142_v57 = vpop.eup %16141 }
 0x1ad   :  { %v825_v16 = vmul.f32 %v16142_v57, %v16140_v56  ;;  %v17017_v56 = vld [vmem:[#allocation9 + $0xe4] ss:$16 sps:$4 sm:$0xff]   ;;  %v17019_v57 = vld [vmem:[#allocation9 + $0xec] ss:$16 sps:$4 sm:$0xff]  }
 0x1af   :  { %v826_v24 = vpack.c.bf16 %v825_v16, %v825_v16  ;;  %v17025_v16 = vld [vmem:[#allocation9 + $0xe0] ss:$16 sps:$4 sm:$0xff]  }
 0x1b1   :  { %827 = vst [vmem:[#allocation3] sm:$0xf] %v826_v24  ;;  %1057 = vmatmul.mubr.bf16.vlgmr.msra.gmra.mrb[4].mxu0 %v826_v24  ;;  %1098 = vmatmul.mubr.bf16.vlgmr.msra.gmra.mrb[36].mxu1 %v826_v24  ;;  %v17027_v24 = vld [vmem:[#allocation9 + $0xe8] ss:$16 sps:$4 sm:$0xff]  }
 0x1b2   :  { %1356 = vmatpush1.bf16.msra.mxu0 %v16943_v58  ;;  %1397 = vmatpush1.bf16.msra.mxu1 %v16945_v14 }
 0x1b3   :  { %1357 = vmatprep.subr.bf16.mxu0 %v16947_v18  ;;  %1398 = vmatprep.subr.bf16.mxu1 %v16949_v20 }
 0x1b4   :  { %1387 = vmatprep.mubr.bf16.mxu0 %v18011_v0  ;;  %1428 = vmatprep.mubr.bf16.mxu1 %v18011_v0  ;;  %v17029_v0 = vld [vmem:[#allocation10 + $0x104] ss:$16 sps:$4 sm:$0xff]  }
 0x1b6   :  { %1358 = vmatpush1.bf16.msra.mxu0 %v16951_v22  ;;  %1399 = vmatpush1.bf16.msra.mxu1 %v16953_v27 }
 0x1b7   :  { %1359 = vmatprep.subr.bf16.mxu0 %v16955_v29  ;;  %1400 = vmatprep.subr.bf16.mxu1 %v16957_v31 }
 0x1b8   :  { %v1139_v48 = vld [vmem:[#allocation3] sm:$0xf] }
 0x1ba   :  { %1360 = vmatpush1.bf16.msra.mxu0 %v16963_v35  ;;  %1401 = vmatpush1.bf16.msra.mxu1 %v16965_v37 }
 0x1bb   :  { %1361 = vmatprep.subr.bf16.mxu0 %v16969_v39  ;;  %1402 = vmatprep.subr.bf16.mxu1 %v16971_v41 }
 0x1be   :  { %1362 = vmatpush1.bf16.msra.mxu0 %v16977_v43  ;;  %1403 = vmatpush1.bf16.msra.mxu1 %v16979_v45 }
 0x1bf   :  { %1363 = vmatprep.subr.bf16.mxu0 %v16981_v47  ;;  %1404 = vmatprep.subr.bf16.mxu1 %v16983_v49 }
 0x1c2   :  { %1364 = vmatpush1.bf16.msra.mxu0 %v16989_v51  ;;  %1405 = vmatpush1.bf16.msra.mxu1 %v16991_v59 }
 0x1c3   :  { %1365 = vmatprep.subr.bf16.mxu0 %v16993_v61  ;;  %1406 = vmatprep.subr.bf16.mxu1 %v16995_v63 }
 0x1c6   :  { %1366 = vmatpush1.bf16.msra.mxu0 %v17001_v2  ;;  %1407 = vmatpush1.bf16.msra.mxu1 %v17003_v4 }
 0x1c7   :  { %1367 = vmatprep.subr.bf16.mxu0 %v17005_v6  ;;  %1408 = vmatprep.subr.bf16.mxu1 %v17007_v8 }
 0x1ca   :  { %1368 = vmatpush1.bf16.msra.mxu0 %v17013_v9  ;;  %1409 = vmatpush1.bf16.msra.mxu1 %v17015_v10 }
 0x1cb   :  { %1369 = vmatprep.subr.bf16.mxu0 %v17017_v56  ;;  %1410 = vmatprep.subr.bf16.mxu1 %v17019_v57 }
 0x1ce   :  { %1370 = vmatpush1.bf16.msra.mxu0 %v17025_v16  ;;  %1411 = vmatpush1.bf16.msra.mxu1 %v17027_v24 }
 0x1cf   :  { %1630 = vmatprep.subr.bf16.mxu0 %v17029_v0  ;;  %1671 = vmatprep.subr.bf16.mxu1 %v17031_v33 }
 0x1d1   :  { %1388 = vmatmul.mubr.bf16.vlgmr.msra.gmra.mrb[8].mxu0 %v1139_v48  ;;  %1429 = vmatmul.mubr.bf16.vlgmr.msra.gmra.mrb[40].mxu1 %v1139_v48  ;;  %v17067_v48 = vld [vmem:[#allocation10 + $0x164] ss:$16 sps:$4 sm:$0xff]  }
 0x1d2   :  { %1631 = vmatpush1.bf16.msra.mxu0 %v17037_v52  ;;  %1672 = vmatpush1.bf16.msra.mxu1 %v17039_v28  ;;  %18144 = vst [vmem:[#allocation47_spill] sm:$0xff] %v17067_v48 }
 0x1d3   :  { %1632 = vmatprep.subr.bf16.mxu0 %v17041_v50  ;;  %1673 = vmatprep.subr.bf16.mxu1 %v17043_v26 }
 0x1d4   :  { %1662 = vmatprep.mubr.bf16.mxu0 %v18143_v15  ;;  %1703 = vmatprep.mubr.bf16.mxu1 %v18143_v15 }
 0x1d6   :  { %1633 = vmatpush1.bf16.msra.mxu0 %v17049_v23  ;;  %1674 = vmatpush1.bf16.msra.mxu1 %v17051_v46 }
 0x1d7   :  { %1634 = vmatprep.subr.bf16.mxu0 %v17053_v19  ;;  %1675 = vmatprep.subr.bf16.mxu1 %v17055_v44 }
 0x1da   :  { %1635 = vmatpush1.bf16.msra.mxu0 %v17061_v17  ;;  %1676 = vmatpush1.bf16.msra.mxu1 %v17063_v42  ;;  %v14711_v42 = vld [vmem:[#allocation10 + $0xc4] ss:$16 sps:$4 sm:$0xff]   ;;  %v14714_v17 = vld [vmem:[#allocation10 + $0xcc] ss:$16 sps:$4 sm:$0xff]  }
 0x1db   :  { %1636 = vmatprep.subr.bf16.mxu0 %v17067_v48  ;;  %1677 = vmatprep.subr.bf16.mxu1 %v17069_v40  ;;  %v17103_v40 = vld [vmem:[#allocation10 + $0x1c4] ss:$16 sps:$4 sm:$0xff]   ;;  %v17105_v48 = vld [vmem:[#allocation10 + $0x1cc] ss:$16 sps:$4 sm:$0xff]  }
 0x1dc   :  { %18156 = vst [vmem:[#allocation59_spill] sm:$0xff] %v17103_v40  ;;  %18157 = vst [vmem:[#allocation60_spill] sm:$0xff] %v17105_v48 }
 0x1de   :  { %1637 = vmatpush1.bf16.msra.mxu0 %v17075_v13  ;;  %1678 = vmatpush1.bf16.msra.mxu1 %v17077_v38  ;;  %v17111_v38 = vld [vmem:[#allocation10 + $0x1c0] ss:$16 sps:$4 sm:$0xff]   ;;  %v17117_v13 = vld [vmem:[#allocation10 + $0x1ec] ss:$16 sps:$4 sm:$0xff]  }
 0x1df   :  { %1638 = vmatprep.subr.bf16.mxu0 %v17079_v7  ;;  %1679 = vmatprep.subr.bf16.mxu1 %v17081_v36  ;;  %18158 = vst [vmem:[#allocation61_spill] sm:$0xff] %v17111_v38  ;;  %v17113_v7 = vld [vmem:[#allocation10 + $0x1c8] ss:$16 sps:$4 sm:$0xff]   ;;  %v17115_v36 = vld [vmem:[#allocation10 + $0x1e4] ss:$16 sps:$4 sm:$0xff]   ;;  %18161 = vst [vmem:[#allocation64_spill] sm:$0xff] %v17117_v13 }
 0x1e0   :  { %18159 = vst [vmem:[#allocation62_spill] sm:$0xff] %v17113_v7  ;;  %18160 = vst [vmem:[#allocation63_spill] sm:$0xff] %v17115_v36 }
 0x1e2   :  { %1639 = vmatpush1.bf16.msra.mxu0 %v17087_v5  ;;  %1680 = vmatpush1.bf16.msra.mxu1 %v17089_v34  ;;  %v17123_v34 = vld [vmem:[#allocation10 + $0x1e0] ss:$16 sps:$4 sm:$0xff]  }
 0x1e3   :  { %1640 = vmatprep.subr.bf16.mxu0 %v17091_v3  ;;  %1681 = vmatprep.subr.bf16.mxu1 %v17093_v32  ;;  %18162 = vst [vmem:[#allocation65_spill] sm:$0xff] %v17123_v34  ;;  %v17125_v3 = vld [vmem:[#allocation10 + $0x1e8] ss:$16 sps:$4 sm:$0xff]   ;;  %v14696_v32 = vld [vmem:[#allocation10 + $0x6c] ss:$16 sps:$4 sm:$0xff]  }
 0x1e4   :  { %18163 = vst [vmem:[#allocation66_spill] sm:$0xff] %v17125_v3  ;;  %v14691_v5 = vld [vmem:[#allocation10 + $0x60] ss:$16 sps:$4 sm:$0xff]  }
 0x1e6   :  { %1641 = vmatpush1.bf16.msra.mxu0 %v17099_v1  ;;  %1682 = vmatpush1.bf16.msra.mxu1 %v17101_v30  ;;  %v16511_v30 = vld [vmem:[#allocation10 + $0xc] ss:$16 sps:$4 sm:$0xff]   ;;  %v14688_v1 = vld [vmem:[#allocation10 + $0x40] ss:$16 sps:$4 sm:$0xff]  }
 0x1e7   :  { %1642 = vmatprep.subr.bf16.mxu0 %v17103_v40  ;;  %1683 = vmatprep.subr.bf16.mxu1 %v17105_v48  ;;  %v16512_v48 = vld [vmem:[#allocation10 + $0x8] ss:$16 sps:$4 sm:$0xff]   ;;  %v14685_v40 = vld [vmem:[#allocation10 + $0x20] ss:$16 sps:$4 sm:$0xff]  }
 0x1ea   :  { %1643 = vmatpush1.bf16.msra.mxu0 %v17111_v38  ;;  %1684 = vmatpush1.bf16.msra.mxu1 %v17113_v7  ;;  %v16513_v38 = vld [vmem:[#allocation10 + $0x2c] ss:$16 sps:$4 sm:$0xff]   ;;  %v14687_v7 = vld [vmem:[#allocation10 + $0x24] ss:$16 sps:$4 sm:$0xff]  }
 0x1eb   :  { %1644 = vmatprep.subr.bf16.mxu0 %v17115_v36  ;;  %1685 = vmatprep.subr.bf16.mxu1 %v17117_v13  ;;  %v16514_v36 = vld [vmem:[#allocation10 + $0x28] ss:$16 sps:$4 sm:$0xff]   ;;  %v16515_v13 = vld [vmem:[#allocation10 + $0x4c] ss:$16 sps:$4 sm:$0xff]  }
 0x1ee   :  { %1645 = vmatpush1.bf16.msra.mxu0 %v17123_v34  ;;  %1686 = vmatpush1.bf16.msra.mxu1 %v17125_v3  ;;  %v16516_v34 = vld [vmem:[#allocation10 + $0x48] ss:$16 sps:$4 sm:$0xff]   ;;  %v14684_v3 = vld [vmem:[#allocation10 + $0x4] ss:$16 sps:$4 sm:$0xff]  }
 0x1ef   :  { %1979 = vmatprep.subr.bf16.mxu1 %v16511_v30  ;;  %v14682_v30 = vld [vmem:[#allocation10] ss:$16 sps:$4 sm:$0xff]   ;;  %1938 = vmatprep.subr.bf16.mxu0 %v14684_v3 }
 0x1f0   :  { %v14697_v3 = vld [vmem:[#allocation10 + $0x80] ss:$16 sps:$4 sm:$0xff]  }
 0x1f1   :  { %1663 = vmatmul.mubr.bf16.vlgmr.msra.gmra.mrb[8].mxu0 %v18143_v15  ;;  %1704 = vmatmul.mubr.bf16.vlgmr.msra.gmra.mrb[40].mxu1 %v18143_v15 }
 0x1f2   :  { %1980 = vmatpush1.bf16.msra.mxu1 %v16512_v48  ;;  %1970 = vmatprep.mubr.bf16.mxu0 %v18143_v15  ;;  %v14690_v48 = vld [vmem:[#allocation10 + $0x44] ss:$16 sps:$4 sm:$0xff]  }
 0x1f3   :  { %1981 = vmatprep.subr.bf16.mxu1 %v16513_v38  ;;  %2011 = vmatprep.mubr.bf16.mxu1 %v18143_v15  ;;  %v14693_v38 = vld [vmem:[#allocation10 + $0x64] ss:$16 sps:$4 sm:$0xff]  }
 0x1f4   :  { %1939 = vmatpush1.bf16.msra.mxu0 %v14682_v30  ;;  %v14700_v30 = vld [vmem:[#allocation10 + $0x88] ss:$16 sps:$4 sm:$0xff]  }
 0x1f5   :  { %1940 = vmatprep.subr.bf16.mxu0 %v14687_v7  ;;  %v14705_v7 = vld [vmem:[#allocation10 + $0xa4] ss:$16 sps:$4 sm:$0xff]  }
 0x1f6   :  { %1982 = vmatpush1.bf16.msra.mxu1 %v16514_v36  ;;  %v14694_v36 = vld [vmem:[#allocation10 + $0x68] ss:$16 sps:$4 sm:$0xff]  }
 0x1f7   :  { %1983 = vmatprep.subr.bf16.mxu1 %v16515_v13  ;;  %v14702_v13 = vld [vmem:[#allocation10 + $0x8c] ss:$16 sps:$4 sm:$0xff]  }
 0x1f8   :  { %1941 = vmatpush1.bf16.msra.mxu0 %v14685_v40  ;;  %v14703_v40 = vld [vmem:[#allocation10 + $0xa0] ss:$16 sps:$4 sm:$0xff]  }
 0x1f9   :  { %1942 = vmatprep.subr.bf16.mxu0 %v14690_v48  ;;  %v14706_v48 = vld [vmem:[#allocation10 + $0xa8] ss:$16 sps:$4 sm:$0xff]  }
 0x1fa   :  { %1984 = vmatpush1.bf16.msra.mxu1 %v16516_v34  ;;  %v14699_v34 = vld [vmem:[#allocation10 + $0x84] ss:$16 sps:$4 sm:$0xff]  }
 0x1fb   :  { %1985 = vmatprep.subr.bf16.mxu1 %v14696_v32  ;;  %v14709_v32 = vld [vmem:[#allocation10 + $0xc0] ss:$16 sps:$4 sm:$0xff]  }
 0x1fc   :  { %1943 = vmatpush1.bf16.msra.mxu0 %v14688_v1  ;;  %v14708_v1 = vld [vmem:[#allocation10 + $0xac] ss:$16 sps:$4 sm:$0xff]  }
 0x1fd   :  { %1944 = vmatprep.subr.bf16.mxu0 %v14693_v38  ;;  %v14717_v38 = vld [vmem:[#allocation10 + $0xe4] ss:$16 sps:$4 sm:$0xff]  }
 0x1fe   :  { %1986 = vmatpush1.bf16.msra.mxu1 %v14694_v36  ;;  %v14720_v36 = vld [vmem:[#allocation10 + $0xec] ss:$16 sps:$4 sm:$0xff]  }
 0x1ff   :  { %1987 = vmatprep.subr.bf16.mxu1 %v14702_v13  ;;  %v14718_v13 = vld [vmem:[#allocation10 + $0xe8] ss:$16 sps:$4 sm:$0xff]  }
 0x200   :  { %1945 = vmatpush1.bf16.msra.mxu0 %v14691_v5  ;;  %v14712_v5 = vld [vmem:[#allocation10 + $0xc8] ss:$16 sps:$4 sm:$0xff]  }
 0x201   :  { %1946 = vmatprep.subr.bf16.mxu0 %v14699_v34  ;;  %v14715_v34 = vld [vmem:[#allocation10 + $0xe0] ss:$16 sps:$4 sm:$0xff]  }
 0x202   :  { %1988 = vmatpush1.bf16.msra.mxu1 %v14700_v30  ;;  %v16518_v30 = vld [vmem:[#allocation9 + $0xc] ss:$16 sps:$4 sm:$0xff]  }
 0x203   :  { %1989 = vmatprep.subr.bf16.mxu1 %v14708_v1 }
 0x204   :  { %1947 = vmatpush1.bf16.msra.mxu0 %v14697_v3  ;;  %v16517_v3 = vld [vmem:[#allocation9 + $0x4] ss:$16 sps:$4 sm:$0xff]  }
 0x205   :  { %1948 = vmatprep.subr.bf16.mxu0 %v14705_v7 }
 0x206   :  { %1990 = vmatpush1.bf16.msra.mxu1 %v14706_v48 }
 0x207   :  { %1991 = vmatprep.subr.bf16.mxu1 %v14714_v17 }
 0x208   :  { %1949 = vmatpush1.bf16.msra.mxu0 %v14703_v40 }
 0x209   :  { %1950 = vmatprep.subr.bf16.mxu0 %v14711_v42 }
 0x20a   :  { %1992 = vmatpush1.bf16.msra.mxu1 %v14712_v5 }
 0x20b   :  { %1993 = vmatprep.subr.bf16.mxu1 %v14720_v36 }
 0x20c   :  { %1951 = vmatpush1.bf16.msra.mxu0 %v14709_v32 }
 0x20d   :  { %1952 = vmatprep.subr.bf16.mxu0 %v14717_v38 }
 0x20e   :  { %1994 = vmatpush1.bf16.msra.mxu1 %v14718_v13 }
 0x20f   :  { %2309 = vmatprep.subr.bf16.mxu1 %v16518_v30 }
 0x210   :  { %1953 = vmatpush1.bf16.msra.mxu0 %v14715_v34 }
 0x211   :  { %2268 = vmatprep.subr.bf16.mxu0 %v16517_v3 }
 0x284   :  { %v1058_v40 = vpop.f32.mrb[4].mxu0  ;;  %v1099_v7 = vpop.f32.mrb[36].mxu1 }
 0x285   :  { %v1106_v42 = vadd.f32 %v1058_v40, %v16878_v21  ;;  %v1108_v48 = vadd.f32 %v1099_v7, %v16912_v60  ;;  %v1060_v17 = vpop.f32.mrb[5].mxu0  ;;  %v1101_v1 = vpop.f32.mrb[37].mxu1 }
 0x286   :  { %v1107_v32 = vadd.f32 %v1060_v17, %v16880_v25  ;;  %v1109_v5 = vadd.f32 %v1101_v1, %v16914_v62  ;;  %v1062_v38 = vpop.f32.mrb[6].mxu0  ;;  %v1103_v36 = vpop.f32.mrb[38].mxu1 }
 0x287   :  { %v12935_v34 = vmul.f32 -1.442695, %v1106_v42  ;;  %v1063_v13 = vpop.f32.mrb[7].mxu0  ;;  %v1104_v44 = vpop.f32.mrb[39].mxu1  ;;  %v12937_v30 = vmul.f32 -1.442695, %v1108_v48 }
 0x288   :  { %v12936_v3 = vmul.f32 -1.442695, %v1107_v32  ;;  %v18172_v13 = vld [vmem:[#allocation50_spill] sm:$0xff] }
 0x289   :  { %16143 = vpow2.f32 %v12935_v34  ;;  %v18171_v34 = vld [vmem:[#allocation49_spill] sm:$0xff] }
 0x28a   :  { %16145 = vpow2.f32 %v12936_v3  ;;  %v18173_v3 = vld [vmem:[#allocation51_spill] sm:$0xff] }
 0x28b   :  { %16147 = vtanh.f32 %v1109_v5 }
 0x28c   :  { %16149 = vpow2.f32 %v12937_v30  ;;  %v18174_v30 = vld [vmem:[#allocation52_spill] sm:$0xff] }
 0x293   :  { %v16144_v19 = vpop.eup %16143 }
 0x294   :  { %v1119_v46 = vadd.f32 1.0, %v16144_v19  ;;  %v16146_v21 = vpop.eup %16145 }
 0x295   :  { %v1120_v60 = vadd.f32 1.0, %v16146_v21  ;;  %v16148_v25 = vpop.eup %16147 }
 0x296   :  { %16151 = vrcp.f32 %v1119_v46  ;;  %v16150_v40 = vpop.eup %16149 }
 0x297   :  { %16153 = vrcp.f32 %v1120_v60  ;;  %v1121_v42 = vadd.f32 1.0, %v16150_v40  ;;  %v18175_v60 = vld [vmem:[#allocation53_spill] sm:$0xff]  ;;  %v18177_v40 = vld [vmem:[#allocation55_spill] sm:$0xff] }
 0x299   :  { %16155 = vrcp.f32 %v1121_v42  ;;  %v18181_v42 = vld [vmem:[#allocation59_spill] sm:$0xff] }
 0x2a0   :  { %v16152_v62 = vpop.eup %16151 }
 0x2a1   :  { %v1130_v7 = vmul.f32 %v16152_v62, %v16148_v25  ;;  %v16154_v17 = vpop.eup %16153  ;;  %v18176_v25 = vld [vmem:[#allocation54_spill] sm:$0xff]  ;;  %v18178_v62 = vld [vmem:[#allocation56_spill] sm:$0xff] }
 0x2a2   :  { %v1129_v44 = vmul.f32 %v16154_v17, %v16940_v55  ;;  %v12938_v55 = vld [vmem:[%s18007_s4 + $0x4] sm:$0xf] }
 0x2a3   :  { %v16156_v19 = vpop.eup %16155  ;;  %v18180_v17 = vld [vmem:[#allocation58_spill] sm:$0xff] }
 0x2a4   :  { %v17142_v1 = vadd.f32 %v1130_v7, %v1129_v44  ;;  %v18179_v7 = vld [vmem:[#allocation57_spill] sm:$0xff]  ;;  %v18182_v44 = vld [vmem:[#allocation60_spill] sm:$0xff] }
 0x2a6   :  { %16157 = vtanh.f32 %v17142_v1 }
 0x2b0   :  { %v16158_v48 = vpop.eup %16157 }
 0x2b1   :  { %v1133_v32 = vmul.f32 %v16158_v48, %v16156_v19  ;;  %v18183_v19 = vld [vmem:[#allocation61_spill] sm:$0xff]  ;;  %v18184_v48 = vld [vmem:[#allocation62_spill] sm:$0xff] }
 0x2b3   :  { %v1134_v5 = vpack.c.bf16 %v1133_v32, %v1133_v32 }
 0x2b5   :  { %v1136_v46 = vrot.slane %v1134_v5, 4  ;;  %1971 = vmatmul.mubr.bf16.vlgmr.msra.gmra.mrb[12].mxu0 %v1134_v5  ;;  %2012 = vmatmul.mubr.bf16.vlgmr.msra.gmra.mrb[44].mxu1 %v1134_v5  ;;  %v18185_v5 = vld [vmem:[#allocation63_spill] sm:$0xff] }
 0x2b6   :  { %2269 = vmatpush1.bf16.msra.mxu0 %v16943_v58  ;;  %2310 = vmatpush1.bf16.msra.mxu1 %v16945_v14  ;;  %v1178_v58 = vrot.slane %v12938_v55, %v16872_v11  ;;  %v1182_v14 = vrot.slane %v12938_v55, %v16874_v12 }
 0x2b7   :  { %1138 = vst [vmem:[#allocation3] sm:$0xf0] %v1136_v46  ;;  %2270 = vmatprep.subr.bf16.mxu0 %v16947_v18  ;;  %2311 = vmatprep.subr.bf16.mxu1 %v16949_v20  ;;  %v18186_v46 = vld [vmem:[#allocation64_spill] sm:$0xff] }
 0x2b8   :  { %2300 = vmatprep.mubr.bf16.mxu0 %v18143_v15  ;;  %2341 = vmatprep.mubr.bf16.mxu1 %v18143_v15 }
 0x2ba   :  { %2271 = vmatpush1.bf16.msra.mxu0 %v16951_v22  ;;  %2312 = vmatpush1.bf16.msra.mxu1 %v16953_v27 }
 0x2bb   :  { %2272 = vmatprep.subr.bf16.mxu0 %v16955_v29  ;;  %2313 = vmatprep.subr.bf16.mxu1 %v16957_v31 }
 0x2be   :  { %2273 = vmatpush1.bf16.msra.mxu0 %v16963_v35  ;;  %2314 = vmatpush1.bf16.msra.mxu1 %v16965_v37 }
 0x2bf   :  { %2274 = vmatprep.subr.bf16.mxu0 %v16969_v39  ;;  %2315 = vmatprep.subr.bf16.mxu1 %v16971_v41 }
 0x2c2   :  { %2275 = vmatpush1.bf16.msra.mxu0 %v16977_v43  ;;  %2316 = vmatpush1.bf16.msra.mxu1 %v16979_v45 }
 0x2c3   :  { %2276 = vmatprep.subr.bf16.mxu0 %v16981_v47  ;;  %2317 = vmatprep.subr.bf16.mxu1 %v16983_v49  ;;  %v1186_v47 = vrot.slane %v12938_v55, %v16906_v53  ;;  %v1190_v49 = vrot.slane %v12938_v55, %v16908_v54  ;;  %v14723_v55 = vld [vmem:[#allocation9 + $0x104] ss:$16 sps:$4 sm:$0xff]  }
 0x2c4   :  { %v1664_v18 = vpop.f32.mrb[8].mxu0  ;;  %v1705_v20 = vpop.f32.mrb[40].mxu1 }
 0x2c5   :  { %v14281_v22 = vadd.f32 %v1664_v18, %v1178_v58  ;;  %v1666_v27 = vpop.f32.mrb[9].mxu0  ;;  %v1707_v29 = vpop.f32.mrb[41].mxu1  ;;  %v14726_v58 = vld [vmem:[#allocation9 + $0x10c] ss:$16 sps:$4 sm:$0xff]  }
 0x2c6   :  { %v14282_v31 = vadd.f32 %v1666_v27, %v1182_v14  ;;  %v1668_v35 = vpop.f32.mrb[10].mxu0  ;;  %v1709_v37 = vpop.f32.mrb[42].mxu1  ;;  %2277 = vmatpush1.bf16.msra.mxu0 %v16989_v51  ;;  %2318 = vmatpush1.bf16.msra.mxu1 %v16991_v59  ;;  %v14283_v51 = vadd.f32 %v1705_v20, %v1186_v47  ;;  %v14284_v59 = vadd.f32 %v1707_v29, %v1190_v49  ;;  %v18187_v20 = vld [vmem:[#allocation65_spill] sm:$0xff]  ;;  %v14721_v27 = vld [vmem:[#allocation9 + $0x100] ss:$16 sps:$4 sm:$0xff]  }
 0x2c7   :  { %v13003_v39 = vmul.f32 -1.442695, %v14281_v22  ;;  %v1669_v41 = vpop.f32.mrb[11].mxu0  ;;  %v1710_v43 = vpop.f32.mrb[43].mxu1  ;;  %2278 = vmatprep.subr.bf16.mxu0 %v16993_v61  ;;  %2319 = vmatprep.subr.bf16.mxu1 %v16995_v63  ;;  %v2050_v63 = vld [vmem:[#allocation3] sm:$0xf0] }
 0x2c8   :  { %v13004_v45 = vmul.f32 -1.442695, %v14282_v31  ;;  %v13005_v61 = vmul.f32 -1.442695, %v14283_v51  ;;  %v18188_v22 = vld [vmem:[#allocation66_spill] sm:$0xff] }
 0x2c9   :  { %16159 = vpow2.f32 %v13003_v39  ;;  %v14724_v29 = vld [vmem:[#allocation9 + $0x108] ss:$16 sps:$4 sm:$0xff]   ;;  %v14729_v35 = vld [vmem:[#allocation9 + $0x124] ss:$16 sps:$4 sm:$0xff]   ;;  %v14732_v37 = vld [vmem:[#allocation9 + $0x12c] ss:$16 sps:$4 sm:$0xff]  }
 0x2ca   :  { %16161 = vpow2.f32 %v13004_v45  ;;  %2279 = vmatpush1.bf16.msra.mxu0 %v17001_v2  ;;  %2320 = vmatpush1.bf16.msra.mxu1 %v17003_v4  ;;  %v14727_v39 = vld [vmem:[#allocation9 + $0x120] ss:$16 sps:$4 sm:$0xff]   ;;  %v14730_v41 = vld [vmem:[#allocation9 + $0x128] ss:$16 sps:$4 sm:$0xff]   ;;  %v14735_v43 = vld [vmem:[#allocation9 + $0x144] ss:$16 sps:$4 sm:$0xff]  }
 0x2cb   :  { %2280 = vmatprep.subr.bf16.mxu0 %v17005_v6  ;;  %2321 = vmatprep.subr.bf16.mxu1 %v17007_v8  ;;  %16163 = vtanh.f32 %v14284_v59  ;;  %v2106_v6 = vrot.slane %v2050_v63, 4  ;;  %v14738_v45 = vld [vmem:[#allocation9 + $0x14c] ss:$16 sps:$4 sm:$0xff]   ;;  %v14733_v47 = vld [vmem:[#allocation9 + $0x140] ss:$16 sps:$4 sm:$0xff]  }
 0x2cc   :  { %16165 = vpow2.f32 %v13005_v61  ;;  %v14736_v49 = vld [vmem:[#allocation9 + $0x148] ss:$16 sps:$4 sm:$0xff]   ;;  %v14741_v51 = vld [vmem:[#allocation9 + $0x164] ss:$16 sps:$4 sm:$0xff]   ;;  %v14744_v59 = vld [vmem:[#allocation9 + $0x16c] ss:$16 sps:$4 sm:$0xff]  }
 0x2cd   :  { %v14739_v61 = vld [vmem:[#allocation9 + $0x160] ss:$16 sps:$4 sm:$0xff]   ;;  %v14742_v63 = vld [vmem:[#allocation9 + $0x168] ss:$16 sps:$4 sm:$0xff]  }
 0x2ce   :  { %2281 = vmatpush1.bf16.msra.mxu0 %v17013_v9  ;;  %2322 = vmatpush1.bf16.msra.mxu1 %v17015_v10  ;;  %v18166_v10 = vld [vmem:[#allocation44_spill] sm:$0xff] }
 0x2cf   :  { %2282 = vmatprep.subr.bf16.mxu0 %v17017_v56  ;;  %2323 = vmatprep.subr.bf16.mxu1 %v17019_v57  ;;  %v18168_v57 = vld [vmem:[#allocation46_spill] sm:$0xff] }
 0x2d2   :  { %2283 = vmatpush1.bf16.msra.mxu0 %v17025_v16  ;;  %2324 = vmatpush1.bf16.msra.mxu1 %v17027_v24  ;;  %v18170_v16 = vld [vmem:[#allocation48_spill] sm:$0xff] }
 0x2d3   :  { %v16160_v2 = vpop.eup %16159  ;;  %2542 = vmatprep.subr.bf16.mxu0 %v17029_v0  ;;  %2583 = vmatprep.subr.bf16.mxu1 %v17031_v33  ;;  %v18164_v0 = vld [vmem:[#allocation42_spill] sm:$0xff]  ;;  %v18165_v33 = vld [vmem:[#allocation43_spill] sm:$0xff] }
 0x2d4   :  { %v1725_v4 = vadd.f32 1.0, %v16160_v2  ;;  %v16162_v8 = vpop.eup %16161  ;;  %v14747_v2 = vld [vmem:[#allocation9 + $0x184] ss:$16 sps:$4 sm:$0xff]  }
 0x2d5   :  { %v1726_v9 = vadd.f32 1.0, %v16162_v8  ;;  %2301 = vmatmul.mubr.bf16.vlgmr.msra.gmra.mrb[16].mxu0 %v2106_v6  ;;  %2342 = vmatmul.mubr.bf16.vlgmr.msra.gmra.mrb[48].mxu1 %v2106_v6  ;;  %v14745_v6 = vld [vmem:[#allocation9 + $0x180] ss:$16 sps:$4 sm:$0xff]   ;;  %v14748_v8 = vld [vmem:[#allocation9 + $0x188] ss:$16 sps:$4 sm:$0xff]  }
 0x2d6   :  { %16167 = vrcp.f32 %v1725_v4  ;;  %2543 = vmatpush1.bf16.msra.mxu0 %v17037_v52  ;;  %2584 = vmatpush1.bf16.msra.mxu1 %v17039_v28  ;;  %v16164_v52 = vpop.eup %16163  ;;  %v18167_v28 = vld [vmem:[#allocation45_spill] sm:$0xff] }
 0x2d7   :  { %16169 = vrcp.f32 %v1726_v9  ;;  %2544 = vmatprep.subr.bf16.mxu0 %v17041_v50  ;;  %2585 = vmatprep.subr.bf16.mxu1 %v17043_v26  ;;  %v16166_v56 = vpop.eup %16165  ;;  %v18169_v26 = vld [vmem:[#allocation47_spill] sm:$0xff]  ;;  %v14753_v9 = vld [vmem:[#allocation9 + $0x1a4] ss:$16 sps:$4 sm:$0xff]  }
 0x2d8   :  { %2574 = vmatprep.mubr.bf16.mxu0 %v18143_v15  ;;  %2615 = vmatprep.mubr.bf16.mxu1 %v18143_v15  ;;  %v14750_v4 = vld [vmem:[#allocation9 + $0x18c] ss:$16 sps:$4 sm:$0xff]  }
 0x2da   :  { %2545 = vmatpush1.bf16.msra.mxu0 %v17049_v23  ;;  %2586 = vmatpush1.bf16.msra.mxu1 %v18164_v0  ;;  %v1727_v23 = vadd.f32 1.0, %v16166_v56  ;;  %v14756_v0 = vld [vmem:[#allocation9 + $0x1ac] ss:$16 sps:$4 sm:$0xff]  }
 0x2db   :  { %2546 = vmatprep.subr.bf16.mxu0 %v18165_v33  ;;  %2587 = vmatprep.subr.bf16.mxu1 %v18166_v10  ;;  %v14751_v33 = vld [vmem:[#allocation9 + $0x1a0] ss:$16 sps:$4 sm:$0xff]   ;;  %v14754_v10 = vld [vmem:[#allocation9 + $0x1a8] ss:$16 sps:$4 sm:$0xff]   ;;  %v14762_v56 = vld [vmem:[#allocation9 + $0x1cc] ss:$16 sps:$4 sm:$0xff]  }
 0x2dc   :  { %16171 = vrcp.f32 %v1727_v23  ;;  %v14774_v23 = vld [vmem:[#allocation10 + $0x20c] ss:$16 sps:$4 sm:$0xff]  }
 0x2de   :  { %2547 = vmatpush1.bf16.msra.mxu0 %v18167_v28  ;;  %2588 = vmatpush1.bf16.msra.mxu1 %v18168_v57  ;;  %v14757_v28 = vld [vmem:[#allocation9 + $0x1c0] ss:$16 sps:$4 sm:$0xff]   ;;  %v14760_v57 = vld [vmem:[#allocation9 + $0x1c8] ss:$16 sps:$4 sm:$0xff]  }
 0x2df   :  { %2548 = vmatprep.subr.bf16.mxu0 %v18169_v26  ;;  %2589 = vmatprep.subr.bf16.mxu1 %v18170_v16  ;;  %v14768_v26 = vld [vmem:[#allocation9 + $0x1ec] ss:$16 sps:$4 sm:$0xff]   ;;  %v14763_v16 = vld [vmem:[#allocation9 + $0x1e0] ss:$16 sps:$4 sm:$0xff]  }
 0x2e0   :  { %v16168_v50 = vpop.eup %16167 }
 0x2e1   :  { %v1736_v24 = vmul.f32 %v16168_v50, %v16164_v52  ;;  %v16170_v38 = vpop.eup %16169  ;;  %v14759_v52 = vld [vmem:[#allocation9 + $0x1c4] ss:$16 sps:$4 sm:$0xff]  }
 0x2e2   :  { %v1735_v36 = vmul.f32 0.0, %v16170_v38  ;;  %2549 = vmatpush1.bf16.msra.mxu0 %v18171_v34  ;;  %2590 = vmatpush1.bf16.msra.mxu1 %v18172_v13  ;;  %v14765_v50 = vld [vmem:[#allocation9 + $0x1e4] ss:$16 sps:$4 sm:$0xff]   ;;  %v14772_v34 = vld [vmem:[#allocation10 + $0x208] ss:$16 sps:$4 sm:$0xff]  }
 0x2e3   :  { %2550 = vmatprep.subr.bf16.mxu0 %v18173_v3  ;;  %2591 = vmatprep.subr.bf16.mxu1 %v18174_v30  ;;  %v14771_v38 = vld [vmem:[#allocation10 + $0x204] ss:$16 sps:$4 sm:$0xff]   ;;  %v14780_v3 = vld [vmem:[#allocation10 + $0x22c] ss:$16 sps:$4 sm:$0xff]  }
 0x2e4   :  { %v17204_v21 = vadd.f32 %v1736_v24, %v1735_v36  ;;  %v14766_v24 = vld [vmem:[#allocation9 + $0x1e8] ss:$16 sps:$4 sm:$0xff]   ;;  %v14769_v36 = vld [vmem:[#allocation10 + $0x200] ss:$16 sps:$4 sm:$0xff]   ;;  %v14777_v13 = vld [vmem:[#allocation10 + $0x224] ss:$16 sps:$4 sm:$0xff]  }
 0x2e6   :  { %16173 = vtanh.f32 %v17204_v21  ;;  %2551 = vmatpush1.bf16.msra.mxu0 %v18175_v60  ;;  %2592 = vmatpush1.bf16.msra.mxu1 %v18176_v25  ;;  %v16172_v32 = vpop.eup %16171  ;;  %v14775_v60 = vld [vmem:[#allocation10 + $0x220] ss:$16 sps:$4 sm:$0xff]   ;;  %v14778_v25 = vld [vmem:[#allocation10 + $0x228] ss:$16 sps:$4 sm:$0xff]  }
 0x2e7   :  { %2552 = vmatprep.subr.bf16.mxu0 %v18177_v40  ;;  %2593 = vmatprep.subr.bf16.mxu1 %v18178_v62  ;;  %v14783_v40 = vld [vmem:[#allocation10 + $0x244] ss:$16 sps:$4 sm:$0xff]   ;;  %v14786_v62 = vld [vmem:[#allocation10 + $0x24c] ss:$16 sps:$4 sm:$0xff]  }
 0x2ea   :  { %2553 = vmatpush1.bf16.msra.mxu0 %v18179_v7  ;;  %2594 = vmatpush1.bf16.msra.mxu1 %v18180_v17  ;;  %v14781_v7 = vld [vmem:[#allocation10 + $0x240] ss:$16 sps:$4 sm:$0xff]   ;;  %v14784_v17 = vld [vmem:[#allocation10 + $0x248] ss:$16 sps:$4 sm:$0xff]  }
 0x2eb   :  { %2554 = vmatprep.subr.bf16.mxu0 %v18181_v42  ;;  %2595 = vmatprep.subr.bf16.mxu1 %v18182_v44  ;;  %v14789_v42 = vld [vmem:[#allocation10 + $0x264] ss:$16 sps:$4 sm:$0xff]   ;;  %v14792_v44 = vld [vmem:[#allocation10 + $0x26c] ss:$16 sps:$4 sm:$0xff]  }
 0x2ee   :  { %2555 = vmatpush1.bf16.msra.mxu0 %v18183_v19  ;;  %2596 = vmatpush1.bf16.msra.mxu1 %v18184_v48  ;;  %v14787_v19 = vld [vmem:[#allocation10 + $0x260] ss:$16 sps:$4 sm:$0xff]   ;;  %v14790_v48 = vld [vmem:[#allocation10 + $0x268] ss:$16 sps:$4 sm:$0xff]  }
 0x2ef   :  { %2556 = vmatprep.subr.bf16.mxu0 %v18185_v5  ;;  %2597 = vmatprep.subr.bf16.mxu1 %v18186_v46  ;;  %v14798_v5 = vld [vmem:[#allocation10 + $0x28c] ss:$16 sps:$4 sm:$0xff]   ;;  %v14793_v46 = vld [vmem:[#allocation10 + $0x280] ss:$16 sps:$4 sm:$0xff]  }
 0x2f0   :  { %v16174_v14 = vpop.eup %16173 }
 0x2f1   :  { %v1739_v18 = vmul.f32 %v16174_v14, %v16172_v32  ;;  %v14795_v32 = vld [vmem:[#allocation10 + $0x284] ss:$16 sps:$4 sm:$0xff]   ;;  %v14804_v14 = vld [vmem:[#allocation10 + $0x2ac] ss:$16 sps:$4 sm:$0xff]  }
 0x2f2   :  { %2557 = vmatpush1.bf16.msra.mxu0 %v18187_v20  ;;  %2598 = vmatpush1.bf16.msra.mxu1 %v18188_v22  ;;  %v14802_v20 = vld [vmem:[#allocation10 + $0x2a8] ss:$16 sps:$4 sm:$0xff]   ;;  %v14807_v22 = vld [vmem:[#allocation10 + $0x2c4] ss:$16 sps:$4 sm:$0xff]  }
 0x2f3   :  { %v1740_v31 = vpack.c.bf16 %v1739_v18, %v1739_v18  ;;  %2874 = vmatprep.subr.bf16.mxu0 %v14723_v55  ;;  %2915 = vmatprep.subr.bf16.mxu1 %v14726_v58  ;;  %v14796_v55 = vld [vmem:[#allocation10 + $0x288] ss:$16 sps:$4 sm:$0xff]   ;;  %v14801_v58 = vld [vmem:[#allocation10 + $0x2a4] ss:$16 sps:$4 sm:$0xff]   ;;  %v14799_v18 = vld [vmem:[#allocation10 + $0x2a0] ss:$16 sps:$4 sm:$0xff]  }
 0x2f5   :  { %1741 = vst [vmem:[#allocation3] sm:$0xf] %v1740_v31  ;;  %2575 = vmatmul.mubr.bf16.vlgmr.msra.gmra.mrb[16].mxu0 %v1740_v31  ;;  %2616 = vmatmul.mubr.bf16.vlgmr.msra.gmra.mrb[48].mxu1 %v1740_v31  ;;  %v14808_v31 = vld [vmem:[#allocation10 + $0x2c8] ss:$16 sps:$4 sm:$0xff]  }
 0x2f6   :  { %2875 = vmatpush1.bf16.msra.mxu0 %v14721_v27  ;;  %2916 = vmatpush1.bf16.msra.mxu1 %v14724_v29  ;;  %v14810_v27 = vld [vmem:[#allocation10 + $0x2cc] ss:$16 sps:$4 sm:$0xff]   ;;  %v14805_v29 = vld [vmem:[#allocation10 + $0x2c0] ss:$16 sps:$4 sm:$0xff]  }
 0x2f7   :  { %2876 = vmatprep.subr.bf16.mxu0 %v14729_v35  ;;  %2917 = vmatprep.subr.bf16.mxu1 %v14732_v37  ;;  %v14813_v35 = vld [vmem:[#allocation10 + $0x2e4] ss:$16 sps:$4 sm:$0xff]   ;;  %v14816_v37 = vld [vmem:[#allocation10 + $0x2ec] ss:$16 sps:$4 sm:$0xff]  }
 0x2f8   :  { %2906 = vmatprep.mubr.bf16.mxu0 %v18143_v15  ;;  %2947 = vmatprep.mubr.bf16.mxu1 %v18143_v15 }
 0x2fa   :  { %2877 = vmatpush1.bf16.msra.mxu0 %v14727_v39  ;;  %2918 = vmatpush1.bf16.msra.mxu1 %v14730_v41  ;;  %v14811_v39 = vld [vmem:[#allocation10 + $0x2e0] ss:$16 sps:$4 sm:$0xff]   ;;  %v14814_v41 = vld [vmem:[#allocation10 + $0x2e8] ss:$16 sps:$4 sm:$0xff]  }
 0x2fb   :  { %2878 = vmatprep.subr.bf16.mxu0 %v14735_v43  ;;  %2919 = vmatprep.subr.bf16.mxu1 %v14738_v45  ;;  %v14819_v43 = vld [vmem:[#allocation10 + $0x4] ss:$16 sps:$4 sm:$0xff]   ;;  %v14822_v45 = vld [vmem:[#allocation10 + $0xc] ss:$16 sps:$4 sm:$0xff]  }
 0x2fc   :  { %v2657_v30 = vld [vmem:[#allocation3] sm:$0xf] }
 0x2fe   :  { %2879 = vmatpush1.bf16.msra.mxu0 %v14733_v47  ;;  %2920 = vmatpush1.bf16.msra.mxu1 %v14736_v49  ;;  %v14817_v47 = vld [vmem:[#allocation10] ss:$16 sps:$4 sm:$0xff]   ;;  %v14820_v49 = vld [vmem:[#allocation10 + $0x8] ss:$16 sps:$4 sm:$0xff]  }
 0x2ff   :  { %2880 = vmatprep.subr.bf16.mxu0 %v14741_v51  ;;  %2921 = vmatprep.subr.bf16.mxu1 %v14744_v59  ;;  %v14825_v51 = vld [vmem:[#allocation10 + $0x24] ss:$16 sps:$4 sm:$0xff]   ;;  %v14828_v59 = vld [vmem:[#allocation10 + $0x2c] ss:$16 sps:$4 sm:$0xff]  }
 0x302   :  { %2881 = vmatpush1.bf16.msra.mxu0 %v14739_v61  ;;  %2922 = vmatpush1.bf16.msra.mxu1 %v14742_v63  ;;  %v14823_v61 = vld [vmem:[#allocation10 + $0x20] ss:$16 sps:$4 sm:$0xff]   ;;  %v14826_v63 = vld [vmem:[#allocation10 + $0x28] ss:$16 sps:$4 sm:$0xff]  }
 0x303   :  { %2882 = vmatprep.subr.bf16.mxu0 %v14747_v2  ;;  %2923 = vmatprep.subr.bf16.mxu1 %v14750_v4  ;;  %v14831_v2 = vld [vmem:[#allocation10 + $0x44] ss:$16 sps:$4 sm:$0xff]   ;;  %v14834_v4 = vld [vmem:[#allocation10 + $0x4c] ss:$16 sps:$4 sm:$0xff]  }
 0x306   :  { %2883 = vmatpush1.bf16.msra.mxu0 %v14745_v6  ;;  %2924 = vmatpush1.bf16.msra.mxu1 %v14748_v8  ;;  %v14829_v6 = vld [vmem:[#allocation10 + $0x40] ss:$16 sps:$4 sm:$0xff]   ;;  %v14832_v8 = vld [vmem:[#allocation10 + $0x48] ss:$16 sps:$4 sm:$0xff]  }
 0x307   :  { %2884 = vmatprep.subr.bf16.mxu0 %v14753_v9  ;;  %2925 = vmatprep.subr.bf16.mxu1 %v14756_v0  ;;  %v14837_v9 = vld [vmem:[#allocation10 + $0x64] ss:$16 sps:$4 sm:$0xff]   ;;  %v14840_v0 = vld [vmem:[#allocation10 + $0x6c] ss:$16 sps:$4 sm:$0xff]  }
 0x30a   :  { %2885 = vmatpush1.bf16.msra.mxu0 %v14751_v33  ;;  %2926 = vmatpush1.bf16.msra.mxu1 %v14754_v10  ;;  %v14835_v33 = vld [vmem:[#allocation10 + $0x60] ss:$16 sps:$4 sm:$0xff]   ;;  %v14838_v10 = vld [vmem:[#allocation10 + $0x68] ss:$16 sps:$4 sm:$0xff]  }
 0x30b   :  { %2886 = vmatprep.subr.bf16.mxu0 %v14759_v52  ;;  %2927 = vmatprep.subr.bf16.mxu1 %v14762_v56  ;;  %v14843_v52 = vld [vmem:[#allocation10 + $0x84] ss:$16 sps:$4 sm:$0xff]   ;;  %v14846_v56 = vld [vmem:[#allocation10 + $0x8c] ss:$16 sps:$4 sm:$0xff]  }
 0x30e   :  { %2887 = vmatpush1.bf16.msra.mxu0 %v14757_v28  ;;  %2928 = vmatpush1.bf16.msra.mxu1 %v14760_v57  ;;  %v14841_v28 = vld [vmem:[#allocation10 + $0x80] ss:$16 sps:$4 sm:$0xff]   ;;  %v14844_v57 = vld [vmem:[#allocation10 + $0x88] ss:$16 sps:$4 sm:$0xff]  }
 0x30f   :  { %2888 = vmatprep.subr.bf16.mxu0 %v14765_v50  ;;  %2929 = vmatprep.subr.bf16.mxu1 %v14768_v26  ;;  %v14849_v50 = vld [vmem:[#allocation10 + $0xa4] ss:$16 sps:$4 sm:$0xff]   ;;  %v14852_v26 = vld [vmem:[#allocation10 + $0xac] ss:$16 sps:$4 sm:$0xff]  }
 0x312   :  { %2889 = vmatpush1.bf16.msra.mxu0 %v14763_v16  ;;  %2930 = vmatpush1.bf16.msra.mxu1 %v14766_v24  ;;  %v14847_v16 = vld [vmem:[#allocation10 + $0xa0] ss:$16 sps:$4 sm:$0xff]   ;;  %v14850_v24 = vld [vmem:[#allocation10 + $0xa8] ss:$16 sps:$4 sm:$0xff]  }
 0x313   :  { %3149 = vmatprep.subr.bf16.mxu0 %v14771_v38  ;;  %3190 = vmatprep.subr.bf16.mxu1 %v14774_v23  ;;  %v14855_v38 = vld [vmem:[#allocation10 + $0xc4] ss:$16 sps:$4 sm:$0xff]   ;;  %v14858_v23 = vld [vmem:[#allocation10 + $0xcc] ss:$16 sps:$4 sm:$0xff]  }
 0x315   :  { %2907 = vmatmul.mubr.bf16.vlgmr.msra.gmra.mrb[20].mxu0 %v2657_v30  ;;  %2948 = vmatmul.mubr.bf16.vlgmr.msra.gmra.mrb[52].mxu1 %v2657_v30  ;;  %v14859_v30 = vld [vmem:[#allocation10 + $0xe0] ss:$16 sps:$4 sm:$0xff]  }
 0x316   :  { %3150 = vmatpush1.bf16.msra.mxu0 %v14769_v36  ;;  %3191 = vmatpush1.bf16.msra.mxu1 %v14772_v34  ;;  %v14853_v36 = vld [vmem:[#allocation10 + $0xc0] ss:$16 sps:$4 sm:$0xff]   ;;  %v14856_v34 = vld [vmem:[#allocation10 + $0xc8] ss:$16 sps:$4 sm:$0xff]  }
 0x317   :  { %3151 = vmatprep.subr.bf16.mxu0 %v14777_v13  ;;  %3192 = vmatprep.subr.bf16.mxu1 %v14780_v3  ;;  %v14861_v13 = vld [vmem:[#allocation10 + $0xe4] ss:$16 sps:$4 sm:$0xff]   ;;  %v14864_v3 = vld [vmem:[#allocation10 + $0xec] ss:$16 sps:$4 sm:$0xff]  }
 0x318   :  { %3181 = vmatprep.mubr.bf16.mxu0 %v18143_v15  ;;  %3222 = vmatprep.mubr.bf16.mxu1 %v18143_v15 }
 0x31a   :  { %3152 = vmatpush1.bf16.msra.mxu0 %v14775_v60  ;;  %3193 = vmatpush1.bf16.msra.mxu1 %v14778_v25  ;;  %v14862_v60 = vld [vmem:[#allocation10 + $0xe8] ss:$16 sps:$4 sm:$0xff]   ;;  %v14867_v25 = vld [vmem:[#allocation9 + $0x4] ss:$16 sps:$4 sm:$0xff]  }
 0x31b   :  { %3153 = vmatprep.subr.bf16.mxu0 %v14783_v40  ;;  %3194 = vmatprep.subr.bf16.mxu1 %v14786_v62  ;;  %v14870_v40 = vld [vmem:[#allocation9 + $0xc] ss:$16 sps:$4 sm:$0xff]  }
 0x31e   :  { %3154 = vmatpush1.bf16.msra.mxu0 %v14781_v7  ;;  %3195 = vmatpush1.bf16.msra.mxu1 %v14784_v17  ;;  %v18189_v17 = vld [vmem:[#allocation18_spill] sm:$0xff] }
 0x31f   :  { %3155 = vmatprep.subr.bf16.mxu0 %v14789_v42  ;;  %3196 = vmatprep.subr.bf16.mxu1 %v14792_v44  ;;  %v18190_v44 = vld [vmem:[#allocation30_spill] sm:$0xff] }
 0x322   :  { %3156 = vmatpush1.bf16.msra.mxu0 %v14787_v19  ;;  %3197 = vmatpush1.bf16.msra.mxu1 %v14790_v48 }
 0x323   :  { %3157 = vmatprep.subr.bf16.mxu0 %v14795_v32  ;;  %3198 = vmatprep.subr.bf16.mxu1 %v14798_v5  ;;  %v18191_v5 = vld [vmem:[#allocation19_spill] sm:$0xff] }
 0x326   :  { %3158 = vmatpush1.bf16.msra.mxu0 %v14793_v46  ;;  %3199 = vmatpush1.bf16.msra.mxu1 %v14796_v55  ;;  %v18192_v55 = vld [vmem:[#allocation31_spill] sm:$0xff] }
 0x327   :  { %3159 = vmatprep.subr.bf16.mxu0 %v14801_v58  ;;  %3200 = vmatprep.subr.bf16.mxu1 %v14804_v14 }
 0x32a   :  { %3160 = vmatpush1.bf16.msra.mxu0 %v14799_v18  ;;  %3201 = vmatpush1.bf16.msra.mxu1 %v14802_v20 }
 0x32b   :  { %3161 = vmatprep.subr.bf16.mxu0 %v14807_v22  ;;  %3202 = vmatprep.subr.bf16.mxu1 %v14810_v27 }
 0x32e   :  { %3162 = vmatpush1.bf16.msra.mxu0 %v14805_v29  ;;  %3203 = vmatpush1.bf16.msra.mxu1 %v14808_v31 }
 0x32f   :  { %3163 = vmatprep.subr.bf16.mxu0 %v14813_v35  ;;  %3204 = vmatprep.subr.bf16.mxu1 %v14816_v37 }
 0x332   :  { %3164 = vmatpush1.bf16.msra.mxu0 %v14811_v39  ;;  %3205 = vmatpush1.bf16.msra.mxu1 %v14814_v41 }
 0x333   :  { %3457 = vmatprep.subr.bf16.mxu0 %v14819_v43  ;;  %3498 = vmatprep.subr.bf16.mxu1 %v14822_v45 }
 0x335   :  { %3182 = vmatmul.mubr.bf16.vlgmr.msra.gmra.mrb[20].mxu0 %v18143_v15  ;;  %3223 = vmatmul.mubr.bf16.vlgmr.msra.gmra.mrb[52].mxu1 %v18143_v15 }
 0x336   :  { %3458 = vmatpush1.bf16.msra.mxu0 %v14817_v47  ;;  %3499 = vmatpush1.bf16.msra.mxu1 %v14820_v49 }
 0x337   :  { %3459 = vmatprep.subr.bf16.mxu0 %v14825_v51  ;;  %3500 = vmatprep.subr.bf16.mxu1 %v14828_v59 }
 0x338   :  { %3489 = vmatprep.mubr.bf16.mxu0 %v18143_v15  ;;  %3530 = vmatprep.mubr.bf16.mxu1 %v18143_v15 }
 0x33a   :  { %3460 = vmatpush1.bf16.msra.mxu0 %v14823_v61  ;;  %3501 = vmatpush1.bf16.msra.mxu1 %v14826_v63 }
 0x33b   :  { %3461 = vmatprep.subr.bf16.mxu0 %v14831_v2  ;;  %3502 = vmatprep.subr.bf16.mxu1 %v14834_v4 }
 0x33e   :  { %3462 = vmatpush1.bf16.msra.mxu0 %v14829_v6  ;;  %3503 = vmatpush1.bf16.msra.mxu1 %v14832_v8  ;;  %v14865_v8 = vld [vmem:[#allocation9] ss:$16 sps:$4 sm:$0xff]  }
 0x33f   :  { %3463 = vmatprep.subr.bf16.mxu0 %v14837_v9  ;;  %3504 = vmatprep.subr.bf16.mxu1 %v14840_v0  ;;  %v14868_v9 = vld [vmem:[#allocation9 + $0x8] ss:$16 sps:$4 sm:$0xff]  }
 0x342   :  { %3464 = vmatpush1.bf16.msra.mxu0 %v14835_v33  ;;  %3505 = vmatpush1.bf16.msra.mxu1 %v14838_v10  ;;  %v14873_v33 = vld [vmem:[#allocation9 + $0x24] ss:$16 sps:$4 sm:$0xff]   ;;  %v14876_v10 = vld [vmem:[#allocation9 + $0x2c] ss:$16 sps:$4 sm:$0xff]  }
 0x343   :  { %3465 = vmatprep.subr.bf16.mxu0 %v14843_v52  ;;  %3506 = vmatprep.subr.bf16.mxu1 %v14846_v56  ;;  %v14871_v52 = vld [vmem:[#allocation9 + $0x20] ss:$16 sps:$4 sm:$0xff]   ;;  %v14879_v56 = vld [vmem:[#allocation9 + $0x44] ss:$16 sps:$4 sm:$0xff]  }
 0x346   :  { %3466 = vmatpush1.bf16.msra.mxu0 %v14841_v28  ;;  %3507 = vmatpush1.bf16.msra.mxu1 %v14844_v57  ;;  %v14882_v28 = vld [vmem:[#allocation9 + $0x4c] ss:$16 sps:$4 sm:$0xff]   ;;  %v14877_v57 = vld [vmem:[#allocation9 + $0x40] ss:$16 sps:$4 sm:$0xff]  }
 0x347   :  { %3467 = vmatprep.subr.bf16.mxu0 %v14849_v50  ;;  %3508 = vmatprep.subr.bf16.mxu1 %v14852_v26  ;;  %v14880_v50 = vld [vmem:[#allocation9 + $0x48] ss:$16 sps:$4 sm:$0xff]   ;;  %v14885_v26 = vld [vmem:[#allocation9 + $0x64] ss:$16 sps:$4 sm:$0xff]  }
 0x34a   :  { %3468 = vmatpush1.bf16.msra.mxu0 %v14847_v16  ;;  %3509 = vmatpush1.bf16.msra.mxu1 %v14850_v24  ;;  %v14888_v16 = vld [vmem:[#allocation9 + $0x6c] ss:$16 sps:$4 sm:$0xff]   ;;  %v13041_v24 = vld [vmem:[%s18007_s4 + $0x4] sm:$0xf] }
 0x34b   :  { %3469 = vmatprep.subr.bf16.mxu0 %v14855_v38  ;;  %3510 = vmatprep.subr.bf16.mxu1 %v14858_v23  ;;  %v14883_v38 = vld [vmem:[#allocation9 + $0x60] ss:$16 sps:$4 sm:$0xff]   ;;  %v14886_v23 = vld [vmem:[#allocation9 + $0x68] ss:$16 sps:$4 sm:$0xff]  }
 0x34e   :  { %3470 = vmatpush1.bf16.msra.mxu0 %v14853_v36  ;;  %3511 = vmatpush1.bf16.msra.mxu1 %v14856_v34  ;;  %v14891_v36 = vld [vmem:[#allocation9 + $0x84] ss:$16 sps:$4 sm:$0xff]   ;;  %v14894_v34 = vld [vmem:[#allocation9 + $0x8c] ss:$16 sps:$4 sm:$0xff]  }
 0x34f   :  { %3471 = vmatprep.subr.bf16.mxu0 %v14861_v13  ;;  %3512 = vmatprep.subr.bf16.mxu1 %v14864_v3  ;;  %v2088_v13 = vrot.slane %v13041_v24, %v16872_v11  ;;  %v2092_v3 = vrot.slane %v13041_v24, %v16874_v12 }
 0x352   :  { %3472 = vmatpush1.bf16.msra.mxu0 %v14859_v30  ;;  %3513 = vmatpush1.bf16.msra.mxu1 %v14862_v60  ;;  %v14889_v30 = vld [vmem:[#allocation9 + $0x80] ss:$16 sps:$4 sm:$0xff]   ;;  %v14892_v60 = vld [vmem:[#allocation9 + $0x88] ss:$16 sps:$4 sm:$0xff]  }
 0x353   :  { %3787 = vmatprep.subr.bf16.mxu0 %v14867_v25  ;;  %3828 = vmatprep.subr.bf16.mxu1 %v14870_v40 }
 0x388   :  { %v1972_v62 = vpop.f32.mrb[12].mxu0  ;;  %v2013_v7 = vpop.f32.mrb[44].mxu1 }
 0x389   :  { %v2020_v42 = vadd.f32 %v1972_v62, %v18189_v17  ;;  %v2022_v19 = vadd.f32 %v2013_v7, %v18190_v44  ;;  %v1974_v48 = vpop.f32.mrb[13].mxu0  ;;  %v2015_v32 = vpop.f32.mrb[45].mxu1  ;;  %v14897_v62 = vld [vmem:[#allocation9 + $0xa4] ss:$16 sps:$4 sm:$0xff]   ;;  %v14900_v7 = vld [vmem:[#allocation9 + $0xac] ss:$16 sps:$4 sm:$0xff]  }
 0x38a   :  { %v2021_v46 = vadd.f32 %v1974_v48, %v18191_v5  ;;  %v2023_v58 = vadd.f32 %v2015_v32, %v18192_v55  ;;  %v1976_v14 = vpop.f32.mrb[14].mxu0  ;;  %v2017_v18 = vpop.f32.mrb[46].mxu1  ;;  %v14895_v5 = vld [vmem:[#allocation9 + $0xa0] ss:$16 sps:$4 sm:$0xff]  }
 0x38b   :  { %v13038_v20 = vmul.f32 -1.442695, %v2020_v42  ;;  %v1977_v22 = vpop.f32.mrb[15].mxu0  ;;  %v2018_v27 = vpop.f32.mrb[47].mxu1  ;;  %v13040_v31 = vmul.f32 -1.442695, %v2022_v19 }
 0x38c   :  { %v13039_v29 = vmul.f32 -1.442695, %v2021_v46  ;;  %v14898_v14 = vld [vmem:[#allocation9 + $0xa8] ss:$16 sps:$4 sm:$0xff]   ;;  %v14906_v22 = vld [vmem:[#allocation9 + $0xcc] ss:$16 sps:$4 sm:$0xff]   ;;  %v2096_v27 = vrot.slane %v13041_v24, %v16906_v53 }
 0x38d   :  { %16175 = vpow2.f32 %v13038_v20  ;;  %v14903_v20 = vld [vmem:[#allocation9 + $0xc4] ss:$16 sps:$4 sm:$0xff]  }
 0x38e   :  { %16177 = vpow2.f32 %v13039_v29  ;;  %v14901_v29 = vld [vmem:[#allocation9 + $0xc0] ss:$16 sps:$4 sm:$0xff]  }
 0x38f   :  { %16179 = vtanh.f32 %v2023_v58 }
 0x390   :  { %16181 = vpow2.f32 %v13040_v31  ;;  %v14904_v31 = vld [vmem:[#allocation9 + $0xc8] ss:$16 sps:$4 sm:$0xff]  }
 0x397   :  { %v16176_v35 = vpop.eup %16175 }
 0x398   :  { %v2033_v37 = vadd.f32 1.0, %v16176_v35  ;;  %v16178_v39 = vpop.eup %16177  ;;  %v2100_v35 = vrot.slane %v13041_v24, %v16908_v54 }
 0x399   :  { %v2034_v41 = vadd.f32 1.0, %v16178_v39  ;;  %v16180_v43 = vpop.eup %16179  ;;  %v14912_v39 = vld [vmem:[#allocation9 + $0xec] ss:$16 sps:$4 sm:$0xff]  }
 0x39a   :  { %16183 = vrcp.f32 %v2033_v37  ;;  %v16182_v45 = vpop.eup %16181  ;;  %v14909_v37 = vld [vmem:[#allocation9 + $0xe4] ss:$16 sps:$4 sm:$0xff]  }
 0x39b   :  { %16185 = vrcp.f32 %v2034_v41  ;;  %v2035_v59 = vadd.f32 1.0, %v16182_v45  ;;  %v14910_v45 = vld [vmem:[#allocation9 + $0xe8] ss:$16 sps:$4 sm:$0xff]  }
 0x39d   :  { %16187 = vrcp.f32 %v2035_v59 }
 0x3a4   :  { %v16184_v47 = vpop.eup %16183 }
 0x3a5   :  { %v2044_v49 = vmul.f32 %v16184_v47, %v16180_v43  ;;  %v16186_v51 = vpop.eup %16185  ;;  %v14907_v43 = vld [vmem:[#allocation9 + $0xe0] ss:$16 sps:$4 sm:$0xff]  }
 0x3a6   :  { %v2043_v61 = vmul.f32 %v16186_v51, %v17142_v1  ;;  %v14874_v1 = vld [vmem:[#allocation9 + $0x28] ss:$16 sps:$4 sm:$0xff]   ;;  %v14918_v51 = vld [vmem:[#allocation10 + $0x10c] ss:$16 sps:$4 sm:$0xff]  }
 0x3a7   :  { %v16188_v2 = vpop.eup %16187 }
 0x3a8   :  { %v17234_v63 = vadd.f32 %v2044_v49, %v2043_v61  ;;  %v14915_v49 = vld [vmem:[#allocation10 + $0x104] ss:$16 sps:$4 sm:$0xff]  }
 0x3aa   :  { %16189 = vtanh.f32 %v17234_v63 }
 0x3b4   :  { %v16190_v4 = vpop.eup %16189 }
 0x3b5   :  { %v2047_v6 = vmul.f32 %v16190_v4, %v16188_v2  ;;  %v14913_v2 = vld [vmem:[#allocation10 + $0x100] ss:$16 sps:$4 sm:$0xff]   ;;  %v14916_v4 = vld [vmem:[#allocation10 + $0x108] ss:$16 sps:$4 sm:$0xff]  }
 0x3b7   :  { %v2048_v0 = vpack.c.bf16 %v2047_v6, %v2047_v6 }
 0x3b9   :  { %2049 = vst [vmem:[#allocation3 + $0x8] sm:$0xf] %v2048_v0  ;;  %3490 = vmatmul.mubr.bf16.vlgmr.msra.gmra.mrb[24].mxu0 %v2048_v0  ;;  %3531 = vmatmul.mubr.bf16.vlgmr.msra.gmra.mrb[56].mxu1 %v2048_v0 }
 0x3ba   :  { %3788 = vmatpush1.bf16.msra.mxu0 %v14865_v8  ;;  %3829 = vmatpush1.bf16.msra.mxu1 %v14868_v9  ;;  %v14921_v8 = vld [vmem:[#allocation10 + $0x124] ss:$16 sps:$4 sm:$0xff]   ;;  %v14924_v9 = vld [vmem:[#allocation10 + $0x12c] ss:$16 sps:$4 sm:$0xff]  }
 0x3bb   :  { %3789 = vmatprep.subr.bf16.mxu0 %v14873_v33  ;;  %3830 = vmatprep.subr.bf16.mxu1 %v14876_v10 }
 0x3bc   :  { %3819 = vmatprep.mubr.bf16.mxu0 %v18143_v15  ;;  %3860 = vmatprep.mubr.bf16.mxu1 %v18143_v15 }
 0x3be   :  { %3790 = vmatpush1.bf16.msra.mxu0 %v14871_v52  ;;  %3831 = vmatpush1.bf16.msra.mxu1 %v14874_v1  ;;  %v14919_v52 = vld [vmem:[#allocation10 + $0x120] ss:$16 sps:$4 sm:$0xff]   ;;  %v14922_v1 = vld [vmem:[#allocation10 + $0x128] ss:$16 sps:$4 sm:$0xff]  }
 0x3bf   :  { %3791 = vmatprep.subr.bf16.mxu0 %v14879_v56  ;;  %3832 = vmatprep.subr.bf16.mxu1 %v14882_v28  ;;  %v14927_v56 = vld [vmem:[#allocation10 + $0x144] ss:$16 sps:$4 sm:$0xff]   ;;  %v14930_v28 = vld [vmem:[#allocation10 + $0x14c] ss:$16 sps:$4 sm:$0xff]  }
 0x3c0   :  { %v3572_v33 = vld [vmem:[#allocation3 + $0x8] sm:$0xf] }
 0x3c2   :  { %3792 = vmatpush1.bf16.msra.mxu0 %v14877_v57  ;;  %3833 = vmatpush1.bf16.msra.mxu1 %v14880_v50  ;;  %v14925_v57 = vld [vmem:[#allocation10 + $0x140] ss:$16 sps:$4 sm:$0xff]   ;;  %v14928_v50 = vld [vmem:[#allocation10 + $0x148] ss:$16 sps:$4 sm:$0xff]  }
 0x3c3   :  { %3793 = vmatprep.subr.bf16.mxu0 %v14885_v26  ;;  %3834 = vmatprep.subr.bf16.mxu1 %v14888_v16  ;;  %v14933_v26 = vld [vmem:[#allocation10 + $0x164] ss:$16 sps:$4 sm:$0xff]   ;;  %v14936_v16 = vld [vmem:[#allocation10 + $0x16c] ss:$16 sps:$4 sm:$0xff]  }
 0x3c6   :  { %3794 = vmatpush1.bf16.msra.mxu0 %v14883_v38  ;;  %3835 = vmatpush1.bf16.msra.mxu1 %v14886_v23  ;;  %v14931_v23 = vld [vmem:[#allocation10 + $0x160] ss:$16 sps:$4 sm:$0xff]  }
 0x3c7   :  { %3795 = vmatprep.subr.bf16.mxu0 %v14891_v36  ;;  %3836 = vmatprep.subr.bf16.mxu1 %v14894_v34  ;;  %v14934_v36 = vld [vmem:[#allocation10 + $0x168] ss:$16 sps:$4 sm:$0xff]  }
 0x3c8   :  { %v2576_v25 = vpop.f32.mrb[16].mxu0  ;;  %v2617_v40 = vpop.f32.mrb[48].mxu1 }
 0x3c9   :  { %v14285_v17 = vadd.f32 %v2576_v25, %v2088_v13  ;;  %v2578_v42 = vpop.f32.mrb[17].mxu0  ;;  %v2619_v44 = vpop.f32.mrb[49].mxu1  ;;  %v14287_v41 = vadd.f32 %v2617_v40, %v2096_v27  ;;  %v14939_v13 = vld [vmem:[#allocation10 + $0x184] ss:$16 sps:$4 sm:$0xff]   ;;  %v14966_v27 = vld [vmem:[#allocation9 + $0x10c] ss:$16 sps:$4 sm:$0xff]  }
 0x3ca   :  { %v14286_v19 = vadd.f32 %v2578_v42, %v2092_v3  ;;  %v2580_v48 = vpop.f32.mrb[18].mxu0  ;;  %v2621_v32 = vpop.f32.mrb[50].mxu1  ;;  %3796 = vmatpush1.bf16.msra.mxu0 %v14889_v30  ;;  %3837 = vmatpush1.bf16.msra.mxu1 %v14892_v60  ;;  %v14288_v47 = vadd.f32 %v2619_v44, %v2100_v35  ;;  %v14942_v3 = vld [vmem:[#allocation10 + $0x18c] ss:$16 sps:$4 sm:$0xff]   ;;  %v14961_v35 = vld [vmem:[#allocation9 + $0x100] ss:$16 sps:$4 sm:$0xff]  }
 0x3cb   :  { %v13106_v46 = vmul.f32 -1.442695, %v14285_v17  ;;  %v2581_v55 = vpop.f32.mrb[19].mxu0  ;;  %v2622_v58 = vpop.f32.mrb[51].mxu1  ;;  %3797 = vmatprep.subr.bf16.mxu0 %v14897_v62  ;;  %3838 = vmatprep.subr.bf16.mxu1 %v14900_v7  ;;  %v13108_v59 = vmul.f32 -1.442695, %v14287_v41 }
 0x3cc   :  { %v13107_v18 = vmul.f32 -1.442695, %v14286_v19  ;;  %v14937_v62 = vld [vmem:[#allocation10 + $0x180] ss:$16 sps:$4 sm:$0xff]   ;;  %v14940_v7 = vld [vmem:[#allocation10 + $0x188] ss:$16 sps:$4 sm:$0xff]  }
 0x3cd   :  { %16191 = vpow2.f32 %v13106_v46  ;;  %v14945_v17 = vld [vmem:[#allocation10 + $0x1a4] ss:$16 sps:$4 sm:$0xff]   ;;  %v14948_v42 = vld [vmem:[#allocation10 + $0x1ac] ss:$16 sps:$4 sm:$0xff]   ;;  %v14943_v19 = vld [vmem:[#allocation10 + $0x1a0] ss:$16 sps:$4 sm:$0xff]  }
 0x3ce   :  { %16193 = vpow2.f32 %v13107_v18  ;;  %3798 = vmatpush1.bf16.msra.mxu0 %v14895_v5  ;;  %3839 = vmatpush1.bf16.msra.mxu1 %v14898_v14  ;;  %v14946_v48 = vld [vmem:[#allocation10 + $0x1a8] ss:$16 sps:$4 sm:$0xff]   ;;  %v14954_v32 = vld [vmem:[#allocation10 + $0x1cc] ss:$16 sps:$4 sm:$0xff]   ;;  %v14949_v5 = vld [vmem:[#allocation10 + $0x1c0] ss:$16 sps:$4 sm:$0xff]  }
 0x3cf   :  { %3799 = vmatprep.subr.bf16.mxu0 %v14903_v20  ;;  %3840 = vmatprep.subr.bf16.mxu1 %v14906_v22  ;;  %16195 = vtanh.f32 %v14288_v47  ;;  %v14952_v46 = vld [vmem:[#allocation10 + $0x1c8] ss:$16 sps:$4 sm:$0xff]   ;;  %v14957_v55 = vld [vmem:[#allocation10 + $0x1e4] ss:$16 sps:$4 sm:$0xff]   ;;  %v14960_v58 = vld [vmem:[#allocation10 + $0x1ec] ss:$16 sps:$4 sm:$0xff]  }
 0x3d0   :  { %16197 = vpow2.f32 %v13108_v59  ;;  %v14955_v14 = vld [vmem:[#allocation10 + $0x1e0] ss:$16 sps:$4 sm:$0xff]   ;;  %v14958_v18 = vld [vmem:[#allocation10 + $0x1e8] ss:$16 sps:$4 sm:$0xff]   ;;  %v14963_v22 = vld [vmem:[#allocation9 + $0x104] ss:$16 sps:$4 sm:$0xff]  }
 0x3d1   :  { %v14969_v41 = vld [vmem:[#allocation9 + $0x124] ss:$16 sps:$4 sm:$0xff]   ;;  %v14967_v47 = vld [vmem:[#allocation9 + $0x120] ss:$16 sps:$4 sm:$0xff]   ;;  %v14978_v59 = vld [vmem:[#allocation9 + $0x14c] ss:$16 sps:$4 sm:$0xff]  }
 0x3d2   :  { %3800 = vmatpush1.bf16.msra.mxu0 %v14901_v29  ;;  %3841 = vmatpush1.bf16.msra.mxu1 %v14904_v31 }
 0x3d3   :  { %3801 = vmatprep.subr.bf16.mxu0 %v14909_v37  ;;  %3842 = vmatprep.subr.bf16.mxu1 %v14912_v39  ;;  %v14964_v37 = vld [vmem:[#allocation9 + $0x108] ss:$16 sps:$4 sm:$0xff]  }
 0x3d6   :  { %3802 = vmatpush1.bf16.msra.mxu0 %v14907_v43  ;;  %3843 = vmatpush1.bf16.msra.mxu1 %v14910_v45  ;;  %v14972_v43 = vld [vmem:[#allocation9 + $0x12c] ss:$16 sps:$4 sm:$0xff]  }
 0x3d7   :  { %v16192_v61 = vpop.eup %16191  ;;  %4061 = vmatprep.subr.bf16.mxu0 %v14915_v49  ;;  %4102 = vmatprep.subr.bf16.mxu1 %v14918_v51  ;;  %v14970_v49 = vld [vmem:[#allocation9 + $0x128] ss:$16 sps:$4 sm:$0xff]   ;;  %v14975_v51 = vld [vmem:[#allocation9 + $0x144] ss:$16 sps:$4 sm:$0xff]  }
 0x3d8   :  { %v2637_v6 = vadd.f32 1.0, %v16192_v61  ;;  %v16194_v0 = vpop.eup %16193  ;;  %v14973_v61 = vld [vmem:[#allocation9 + $0x140] ss:$16 sps:$4 sm:$0xff]  }
 0x3d9   :  { %v2638_v10 = vadd.f32 1.0, %v16194_v0  ;;  %3820 = vmatmul.mubr.bf16.vlgmr.msra.gmra.mrb[28].mxu0 %v3572_v33  ;;  %3861 = vmatmul.mubr.bf16.vlgmr.msra.gmra.mrb[60].mxu1 %v3572_v33  ;;  %v16196_v24 = vpop.eup %16195  ;;  %v14982_v0 = vld [vmem:[#allocation9 + $0x168] ss:$16 sps:$4 sm:$0xff]   ;;  %v14987_v33 = vld [vmem:[#allocation9 + $0x184] ss:$16 sps:$4 sm:$0xff]  }
 0x3da   :  { %16199 = vrcp.f32 %v2637_v6  ;;  %4062 = vmatpush1.bf16.msra.mxu0 %v14913_v2  ;;  %4103 = vmatpush1.bf16.msra.mxu1 %v14916_v4  ;;  %v16198_v38 = vpop.eup %16197  ;;  %v14976_v2 = vld [vmem:[#allocation9 + $0x148] ss:$16 sps:$4 sm:$0xff]   ;;  %v14981_v4 = vld [vmem:[#allocation9 + $0x164] ss:$16 sps:$4 sm:$0xff]   ;;  %v14984_v6 = vld [vmem:[#allocation9 + $0x16c] ss:$16 sps:$4 sm:$0xff]  }
 0x3db   :  { %16201 = vrcp.f32 %v2638_v10  ;;  %4063 = vmatprep.subr.bf16.mxu0 %v14921_v8  ;;  %4104 = vmatprep.subr.bf16.mxu1 %v14924_v9  ;;  %v2639_v25 = vadd.f32 1.0, %v16198_v38  ;;  %v13109_v8 = vld [vmem:[%s18007_s4 + $0x8] sm:$0xf]  ;;  %v14979_v9 = vld [vmem:[#allocation9 + $0x160] ss:$16 sps:$4 sm:$0xff]  }
 0x3dc   :  { %4093 = vmatprep.mubr.bf16.mxu0 %v18143_v15  ;;  %4134 = vmatprep.mubr.bf16.mxu1 %v18143_v15  ;;  %v14990_v10 = vld [vmem:[#allocation9 + $0x18c] ss:$16 sps:$4 sm:$0xff]  }
 0x3dd   :  { %16203 = vrcp.f32 %v2639_v25 }
 0x3de   :  { %4064 = vmatpush1.bf16.msra.mxu0 %v14919_v52  ;;  %4105 = vmatpush1.bf16.msra.mxu1 %v14922_v1  ;;  %v2697_v52 = vrot.slane %v13109_v8, %v16872_v11  ;;  %v2701_v1 = vrot.slane %v13109_v8, %v16874_v12 }
 0x3df   :  { %4065 = vmatprep.subr.bf16.mxu0 %v14927_v56  ;;  %4106 = vmatprep.subr.bf16.mxu1 %v14930_v28  ;;  %v14985_v56 = vld [vmem:[#allocation9 + $0x180] ss:$16 sps:$4 sm:$0xff]   ;;  %v14988_v28 = vld [vmem:[#allocation9 + $0x188] ss:$16 sps:$4 sm:$0xff]  }
 0x3e2   :  { %4066 = vmatpush1.bf16.msra.mxu0 %v14925_v57  ;;  %4107 = vmatpush1.bf16.msra.mxu1 %v14928_v50 }
 0x3e3   :  { %4067 = vmatprep.subr.bf16.mxu0 %v14933_v26  ;;  %4108 = vmatprep.subr.bf16.mxu1 %v14936_v16  ;;  %v14993_v26 = vld [vmem:[#allocation9 + $0x1a4] ss:$16 sps:$4 sm:$0xff]   ;;  %v14996_v16 = vld [vmem:[#allocation9 + $0x1ac] ss:$16 sps:$4 sm:$0xff]  }
 0x3e4   :  { %v16200_v34 = vpop.eup %16199 }
 0x3e5   :  { %v2648_v30 = vmul.f32 %v16200_v34, %v16196_v24  ;;  %v16202_v60 = vpop.eup %16201 }
 0x3e6   :  { %v2647_v40 = vmul.f32 %v16202_v60, %v17204_v21  ;;  %4068 = vmatpush1.bf16.msra.mxu0 %v14931_v23  ;;  %4109 = vmatpush1.bf16.msra.mxu1 %v14934_v36  ;;  %v14951_v21 = vld [vmem:[#allocation10 + $0x1c4] ss:$16 sps:$4 sm:$0xff]  }
 0x3e7   :  { %4069 = vmatprep.subr.bf16.mxu0 %v14939_v13  ;;  %4110 = vmatprep.subr.bf16.mxu1 %v14942_v3  ;;  %v16204_v20 = vpop.eup %16203  ;;  %v14991_v3 = vld [vmem:[#allocation9 + $0x1a0] ss:$16 sps:$4 sm:$0xff]  }
 0x3e8   :  { %v17249_v44 = vadd.f32 %v2648_v30, %v2647_v40  ;;  %v14994_v40 = vld [vmem:[#allocation9 + $0x1a8] ss:$16 sps:$4 sm:$0xff]  }
 0x3ea   :  { %16205 = vtanh.f32 %v17249_v44  ;;  %4070 = vmatpush1.bf16.msra.mxu0 %v14937_v62  ;;  %4111 = vmatpush1.bf16.msra.mxu1 %v14940_v7  ;;  %v14999_v7 = vld [vmem:[#allocation9 + $0x1c4] ss:$16 sps:$4 sm:$0xff]  }
 0x3eb   :  { %4071 = vmatprep.subr.bf16.mxu0 %v14945_v17  ;;  %4112 = vmatprep.subr.bf16.mxu1 %v14948_v42  ;;  %v15002_v17 = vld [vmem:[#allocation9 + $0x1cc] ss:$16 sps:$4 sm:$0xff]   ;;  %v2705_v42 = vrot.slane %v13109_v8, %v16906_v53 }
 0x3ee   :  { %4072 = vmatpush1.bf16.msra.mxu0 %v14943_v19  ;;  %4113 = vmatpush1.bf16.msra.mxu1 %v14946_v48  ;;  %v14997_v19 = vld [vmem:[#allocation9 + $0x1c0] ss:$16 sps:$4 sm:$0xff]   ;;  %v15000_v48 = vld [vmem:[#allocation9 + $0x1c8] ss:$16 sps:$4 sm:$0xff]  }
 0x3ef   :  { %4073 = vmatprep.subr.bf16.mxu0 %v14951_v21  ;;  %4114 = vmatprep.subr.bf16.mxu1 %v14954_v32  ;;  %v2709_v21 = vrot.slane %v13109_v8, %v16908_v54  ;;  %v15005_v32 = vld [vmem:[#allocation9 + $0x1e4] ss:$16 sps:$4 sm:$0xff]   ;;  %v15032_v8 = vld [vmem:[#allocation10 + $0x26c] ss:$16 sps:$4 sm:$0xff]  }
 0x3f2   :  { %4074 = vmatpush1.bf16.msra.mxu0 %v14949_v5  ;;  %4115 = vmatpush1.bf16.msra.mxu1 %v14952_v46  ;;  %v15008_v5 = vld [vmem:[#allocation9 + $0x1ec] ss:$16 sps:$4 sm:$0xff]  }
 0x3f3   :  { %4075 = vmatprep.subr.bf16.mxu0 %v14957_v55  ;;  %4116 = vmatprep.subr.bf16.mxu1 %v14960_v58  ;;  %v15003_v55 = vld [vmem:[#allocation9 + $0x1e0] ss:$16 sps:$4 sm:$0xff]   ;;  %v15006_v58 = vld [vmem:[#allocation9 + $0x1e8] ss:$16 sps:$4 sm:$0xff]  }
 0x3f4   :  { %v16206_v29 = vpop.eup %16205 }
 0x3f5   :  { %v2651_v31 = vmul.f32 %v16206_v29, %v16204_v20  ;;  %v15014_v20 = vld [vmem:[#allocation10 + $0x20c] ss:$16 sps:$4 sm:$0xff]  }
 0x3f6   :  { %4076 = vmatpush1.bf16.msra.mxu0 %v14955_v14  ;;  %4117 = vmatpush1.bf16.msra.mxu1 %v14958_v18  ;;  %v15011_v18 = vld [vmem:[#allocation10 + $0x204] ss:$16 sps:$4 sm:$0xff]  }
 0x3f7   :  { %v2652_v39 = vpack.c.bf16 %v2651_v31, %v2651_v31  ;;  %4391 = vmatprep.subr.bf16.mxu0 %v14963_v22  ;;  %4432 = vmatprep.subr.bf16.mxu1 %v14966_v27  ;;  %v15009_v31 = vld [vmem:[#allocation10 + $0x200] ss:$16 sps:$4 sm:$0xff]  }
 0x3f9   :  { %v2654_v45 = vrot.slane %v2652_v39, 4  ;;  %4094 = vmatmul.mubr.bf16.vlgmr.msra.gmra.mrb[28].mxu0 %v2652_v39  ;;  %4135 = vmatmul.mubr.bf16.vlgmr.msra.gmra.mrb[60].mxu1 %v2652_v39 }
 0x3fa   :  { %4392 = vmatpush1.bf16.msra.mxu0 %v14961_v35  ;;  %4433 = vmatpush1.bf16.msra.mxu1 %v14964_v37  ;;  %v15012_v35 = vld [vmem:[#allocation10 + $0x208] ss:$16 sps:$4 sm:$0xff]  }
 0x3fb   :  { %2656 = vst [vmem:[#allocation3] sm:$0xf0] %v2654_v45  ;;  %4393 = vmatprep.subr.bf16.mxu0 %v14969_v41  ;;  %4434 = vmatprep.subr.bf16.mxu1 %v14972_v43  ;;  %v15017_v41 = vld [vmem:[#allocation10 + $0x224] ss:$16 sps:$4 sm:$0xff]   ;;  %v15020_v43 = vld [vmem:[#allocation10 + $0x22c] ss:$16 sps:$4 sm:$0xff]  }
 0x3fc   :  { %4423 = vmatprep.mubr.bf16.mxu0 %v18143_v15  ;;  %4464 = vmatprep.mubr.bf16.mxu1 %v18143_v15 }
 0x3fe   :  { %4394 = vmatpush1.bf16.msra.mxu0 %v14967_v47  ;;  %4435 = vmatpush1.bf16.msra.mxu1 %v14970_v49  ;;  %v15015_v49 = vld [vmem:[#allocation10 + $0x220] ss:$16 sps:$4 sm:$0xff]  }
 0x3ff   :  { %4395 = vmatprep.subr.bf16.mxu0 %v14975_v51  ;;  %4436 = vmatprep.subr.bf16.mxu1 %v14978_v59  ;;  %v15018_v51 = vld [vmem:[#allocation10 + $0x228] ss:$16 sps:$4 sm:$0xff]   ;;  %v15023_v59 = vld [vmem:[#allocation10 + $0x244] ss:$16 sps:$4 sm:$0xff]  }
 0x402   :  { %4396 = vmatpush1.bf16.msra.mxu0 %v14973_v61  ;;  %4437 = vmatpush1.bf16.msra.mxu1 %v14976_v2  ;;  %v4173_v27 = vld [vmem:[#allocation3] sm:$0xf0]  ;;  %v15026_v61 = vld [vmem:[#allocation10 + $0x24c] ss:$16 sps:$4 sm:$0xff]   ;;  %v15021_v2 = vld [vmem:[#allocation10 + $0x240] ss:$16 sps:$4 sm:$0xff]  }
 0x403   :  { %4397 = vmatprep.subr.bf16.mxu0 %v14981_v4  ;;  %4438 = vmatprep.subr.bf16.mxu1 %v14984_v6  ;;  %v4229_v39 = vrot.slane %v4173_v27, 4  ;;  %v15024_v4 = vld [vmem:[#allocation10 + $0x248] ss:$16 sps:$4 sm:$0xff]   ;;  %v15029_v6 = vld [vmem:[#allocation10 + $0x264] ss:$16 sps:$4 sm:$0xff]  }
 0x404   :  { %v15074_v27 = vld [vmem:[#allocation10 + $0x4c] ss:$16 sps:$4 sm:$0xff]  }
 0x406   :  { %4398 = vmatpush1.bf16.msra.mxu0 %v14979_v9  ;;  %4439 = vmatpush1.bf16.msra.mxu1 %v14982_v0 }
 0x407   :  { %4399 = vmatprep.subr.bf16.mxu0 %v14987_v33  ;;  %4440 = vmatprep.subr.bf16.mxu1 %v14990_v10  ;;  %v15027_v33 = vld [vmem:[#allocation10 + $0x260] ss:$16 sps:$4 sm:$0xff]   ;;  %v15030_v10 = vld [vmem:[#allocation10 + $0x268] ss:$16 sps:$4 sm:$0xff]  }
 0x408   :  { %v3183_v57 = vpop.f32.mrb[20].mxu0  ;;  %v3224_v50 = vpop.f32.mrb[52].mxu1 }
 0x409   :  { %v14289_v24 = vadd.f32 %v3183_v57, %v2697_v52  ;;  %v3185_v38 = vpop.f32.mrb[21].mxu0  ;;  %v3226_v23 = vpop.f32.mrb[53].mxu1  ;;  %v14291_v46 = vadd.f32 %v3224_v50, %v2705_v42 }
 0x40a   :  { %v14290_v36 = vadd.f32 %v3185_v38, %v2701_v1  ;;  %v3187_v34 = vpop.f32.mrb[22].mxu0  ;;  %v3228_v13 = vpop.f32.mrb[54].mxu1  ;;  %4400 = vmatpush1.bf16.msra.mxu0 %v14985_v56  ;;  %4441 = vmatpush1.bf16.msra.mxu1 %v14988_v28  ;;  %v14292_v14 = vadd.f32 %v3226_v23, %v2709_v21  ;;  %v15035_v1 = vld [vmem:[#allocation10 + $0x284] ss:$16 sps:$4 sm:$0xff]   ;;  %v15038_v56 = vld [vmem:[#allocation10 + $0x28c] ss:$16 sps:$4 sm:$0xff]  }
 0x40b   :  { %v13174_v30 = vmul.f32 -1.442695, %v14289_v24  ;;  %v3188_v60 = vpop.f32.mrb[23].mxu0  ;;  %v3229_v25 = vpop.f32.mrb[55].mxu1  ;;  %4401 = vmatprep.subr.bf16.mxu0 %v14993_v26  ;;  %4442 = vmatprep.subr.bf16.mxu1 %v14996_v16  ;;  %v13176_v22 = vmul.f32 -1.442695, %v14291_v46 }
 0x40c   :  { %v13175_v62 = vmul.f32 -1.442695, %v14290_v36  ;;  %v15033_v16 = vld [vmem:[#allocation10 + $0x280] ss:$16 sps:$4 sm:$0xff]   ;;  %v15036_v24 = vld [vmem:[#allocation10 + $0x288] ss:$16 sps:$4 sm:$0xff]  }
 0x40d   :  { %16207 = vpow2.f32 %v13174_v30  ;;  %v15041_v38 = vld [vmem:[#allocation10 + $0x2a4] ss:$16 sps:$4 sm:$0xff]   ;;  %v15044_v23 = vld [vmem:[#allocation10 + $0x2ac] ss:$16 sps:$4 sm:$0xff]   ;;  %v15039_v34 = vld [vmem:[#allocation10 + $0x2a0] ss:$16 sps:$4 sm:$0xff]  }
 0x40e   :  { %16209 = vpow2.f32 %v13175_v62  ;;  %4402 = vmatpush1.bf16.msra.mxu0 %v14991_v3  ;;  %4443 = vmatpush1.bf16.msra.mxu1 %v14994_v40  ;;  %v15042_v13 = vld [vmem:[#allocation10 + $0x2a8] ss:$16 sps:$4 sm:$0xff]   ;;  %v15047_v3 = vld [vmem:[#allocation10 + $0x2c4] ss:$16 sps:$4 sm:$0xff]   ;;  %v15050_v30 = vld [vmem:[#allocation10 + $0x2cc] ss:$16 sps:$4 sm:$0xff]  }
 0x40f   :  { %4403 = vmatprep.subr.bf16.mxu0 %v14999_v7  ;;  %4444 = vmatprep.subr.bf16.mxu1 %v15002_v17  ;;  %16211 = vtanh.f32 %v14292_v14  ;;  %v15045_v60 = vld [vmem:[#allocation10 + $0x2c0] ss:$16 sps:$4 sm:$0xff]   ;;  %v15048_v25 = vld [vmem:[#allocation10 + $0x2c8] ss:$16 sps:$4 sm:$0xff]   ;;  %v15053_v40 = vld [vmem:[#allocation10 + $0x2e4] ss:$16 sps:$4 sm:$0xff]  }
 0x410   :  { %16213 = vpow2.f32 %v13176_v22  ;;  %v15056_v62 = vld [vmem:[#allocation10 + $0x2ec] ss:$16 sps:$4 sm:$0xff]   ;;  %v15051_v7 = vld [vmem:[#allocation10 + $0x2e0] ss:$16 sps:$4 sm:$0xff]   ;;  %v15054_v17 = vld [vmem:[#allocation10 + $0x2e8] ss:$16 sps:$4 sm:$0xff]  }
 0x411   :  { %v15060_v46 = vld [vmem:[#allocation10 + $0x8] ss:$16 sps:$4 sm:$0xff]   ;;  %v15068_v14 = vld [vmem:[#allocation10 + $0x2c] ss:$16 sps:$4 sm:$0xff]   ;;  %v15071_v22 = vld [vmem:[#allocation10 + $0x44] ss:$16 sps:$4 sm:$0xff]  }
 0x412   :  { %4404 = vmatpush1.bf16.msra.mxu0 %v14997_v19  ;;  %4445 = vmatpush1.bf16.msra.mxu1 %v15000_v48  ;;  %v15059_v19 = vld [vmem:[#allocation10 + $0x4] ss:$16 sps:$4 sm:$0xff]   ;;  %v15062_v48 = vld [vmem:[#allocation10 + $0xc] ss:$16 sps:$4 sm:$0xff]  }
 0x413   :  { %4405 = vmatprep.subr.bf16.mxu0 %v15005_v32  ;;  %4446 = vmatprep.subr.bf16.mxu1 %v15008_v5  ;;  %v15057_v5 = vld [vmem:[#allocation10] ss:$16 sps:$4 sm:$0xff]  }
 0x416   :  { %4406 = vmatpush1.bf16.msra.mxu0 %v15003_v55  ;;  %4447 = vmatpush1.bf16.msra.mxu1 %v15006_v58  ;;  %v15065_v58 = vld [vmem:[#allocation10 + $0x24] ss:$16 sps:$4 sm:$0xff]  }
 0x417   :  { %v16208_v29 = vpop.eup %16207  ;;  %4665 = vmatprep.subr.bf16.mxu0 %v15011_v18  ;;  %4706 = vmatprep.subr.bf16.mxu1 %v15014_v20  ;;  %v15063_v18 = vld [vmem:[#allocation10 + $0x20] ss:$16 sps:$4 sm:$0xff]   ;;  %v15066_v20 = vld [vmem:[#allocation10 + $0x28] ss:$16 sps:$4 sm:$0xff]  }
 0x418   :  { %v3244_v37 = vadd.f32 1.0, %v16208_v29  ;;  %v16210_v45 = vpop.eup %16209  ;;  %v15069_v29 = vld [vmem:[#allocation10 + $0x40] ss:$16 sps:$4 sm:$0xff]  }
 0x419   :  { %v3245_v47 = vadd.f32 1.0, %v16210_v45  ;;  %4424 = vmatmul.mubr.bf16.vlgmr.msra.gmra.mrb[32].mxu0 %v4229_v39  ;;  %4465 = vmatmul.mubr.bf16.vlgmr.msra.gmra.mrb[64].mxu1 %v4229_v39  ;;  %v16212_v9 = vpop.eup %16211  ;;  %v15075_v39 = vld [vmem:[#allocation10 + $0x60] ss:$16 sps:$4 sm:$0xff]   ;;  %v15086_v45 = vld [vmem:[#allocation10 + $0x8c] ss:$16 sps:$4 sm:$0xff]  }
 0x41a   :  { %16215 = vrcp.f32 %v3244_v37  ;;  %4666 = vmatpush1.bf16.msra.mxu0 %v15009_v31  ;;  %4707 = vmatpush1.bf16.msra.mxu1 %v15012_v35  ;;  %v16214_v0 = vpop.eup %16213  ;;  %v15072_v31 = vld [vmem:[#allocation10 + $0x48] ss:$16 sps:$4 sm:$0xff]   ;;  %v15077_v35 = vld [vmem:[#allocation10 + $0x64] ss:$16 sps:$4 sm:$0xff]   ;;  %v15080_v37 = vld [vmem:[#allocation10 + $0x6c] ss:$16 sps:$4 sm:$0xff]  }
 0x41b   :  { %16217 = vrcp.f32 %v3245_v47  ;;  %4667 = vmatprep.subr.bf16.mxu0 %v15017_v41  ;;  %4708 = vmatprep.subr.bf16.mxu1 %v15020_v43  ;;  %v3246_v50 = vadd.f32 1.0, %v16214_v0  ;;  %v15078_v41 = vld [vmem:[#allocation10 + $0x68] ss:$16 sps:$4 sm:$0xff]   ;;  %v15083_v43 = vld [vmem:[#allocation10 + $0x84] ss:$16 sps:$4 sm:$0xff]  }
 0x41c   :  { %4697 = vmatprep.mubr.bf16.mxu0 %v18143_v15  ;;  %4738 = vmatprep.mubr.bf16.mxu1 %v18143_v15  ;;  %v15081_v47 = vld [vmem:[#allocation10 + $0x80] ss:$16 sps:$4 sm:$0xff]   ;;  %v15101_v0 = vld [vmem:[#allocation10 + $0xe4] ss:$16 sps:$4 sm:$0xff]  }
 0x41d   :  { %16219 = vrcp.f32 %v3246_v50  ;;  %v18193_v50 = vld [vmem:[#allocation20_spill] sm:$0xff] }
 0x41e   :  { %4668 = vmatpush1.bf16.msra.mxu0 %v15015_v49  ;;  %4709 = vmatpush1.bf16.msra.mxu1 %v15018_v51  ;;  %v15084_v49 = vld [vmem:[#allocation10 + $0x88] ss:$16 sps:$4 sm:$0xff]   ;;  %v15089_v51 = vld [vmem:[#allocation10 + $0xa4] ss:$16 sps:$4 sm:$0xff]  }
 0x41f   :  { %4669 = vmatprep.subr.bf16.mxu0 %v15023_v59  ;;  %4710 = vmatprep.subr.bf16.mxu1 %v15026_v61  ;;  %v15092_v59 = vld [vmem:[#allocation10 + $0xac] ss:$16 sps:$4 sm:$0xff]   ;;  %v15087_v61 = vld [vmem:[#allocation10 + $0xa0] ss:$16 sps:$4 sm:$0xff]  }
 0x422   :  { %4670 = vmatpush1.bf16.msra.mxu0 %v15021_v2  ;;  %4711 = vmatpush1.bf16.msra.mxu1 %v15024_v4  ;;  %v15090_v2 = vld [vmem:[#allocation10 + $0xa8] ss:$16 sps:$4 sm:$0xff]   ;;  %v15095_v4 = vld [vmem:[#allocation10 + $0xc4] ss:$16 sps:$4 sm:$0xff]  }
 0x423   :  { %4671 = vmatprep.subr.bf16.mxu0 %v15029_v6  ;;  %4712 = vmatprep.subr.bf16.mxu1 %v15032_v8  ;;  %v15098_v6 = vld [vmem:[#allocation10 + $0xcc] ss:$16 sps:$4 sm:$0xff]   ;;  %v15093_v8 = vld [vmem:[#allocation10 + $0xc0] ss:$16 sps:$4 sm:$0xff]  }
 0x424   :  { %v16216_v52 = vpop.eup %16215 }
 0x425   :  { %v3255_v28 = vmul.f32 %v16216_v52, %v16212_v9  ;;  %v16218_v57 = vpop.eup %16217  ;;  %v15096_v9 = vld [vmem:[#allocation10 + $0xc8] ss:$16 sps:$4 sm:$0xff]  }
 0x426   :  { %v3254_v26 = vmul.f32 0.0, %v16218_v57  ;;  %4672 = vmatpush1.bf16.msra.mxu0 %v15027_v33  ;;  %4713 = vmatpush1.bf16.msra.mxu1 %v15030_v10  ;;  %v15104_v33 = vld [vmem:[#allocation10 + $0xec] ss:$16 sps:$4 sm:$0xff]   ;;  %v15099_v10 = vld [vmem:[#allocation10 + $0xe0] ss:$16 sps:$4 sm:$0xff]  }
 0x427   :  { %4673 = vmatprep.subr.bf16.mxu0 %v15035_v1  ;;  %4714 = vmatprep.subr.bf16.mxu1 %v15038_v56  ;;  %v16220_v42 = vpop.eup %16219  ;;  %v15102_v52 = vld [vmem:[#allocation10 + $0xe8] ss:$16 sps:$4 sm:$0xff]   ;;  %v15107_v1 = vld [vmem:[#allocation9 + $0x4] ss:$16 sps:$4 sm:$0xff]   ;;  %v15110_v56 = vld [vmem:[#allocation9 + $0xc] ss:$16 sps:$4 sm:$0xff]  }
 0x428   :  { %v17263_v36 = vadd.f32 %v3255_v28, %v3254_v26 }
 0x42a   :  { %16221 = vtanh.f32 %v17263_v36  ;;  %4674 = vmatpush1.bf16.msra.mxu0 %v15033_v16  ;;  %4715 = vmatpush1.bf16.msra.mxu1 %v15036_v24  ;;  %v18194_v16 = vld [vmem:[#allocation32_spill] sm:$0xff] }
 0x42b   :  { %4675 = vmatprep.subr.bf16.mxu0 %v15041_v38  ;;  %4716 = vmatprep.subr.bf16.mxu1 %v15044_v23 }
 0x42e   :  { %4676 = vmatpush1.bf16.msra.mxu0 %v15039_v34  ;;  %4717 = vmatpush1.bf16.msra.mxu1 %v15042_v13  ;;  %v18195_v34 = vld [vmem:[#allocation21_spill] sm:$0xff] }
 0x42f   :  { %4677 = vmatprep.subr.bf16.mxu0 %v15047_v3  ;;  %4718 = vmatprep.subr.bf16.mxu1 %v15050_v30  ;;  %v18196_v3 = vld [vmem:[#allocation33_spill] sm:$0xff] }
 0x432   :  { %4678 = vmatpush1.bf16.msra.mxu0 %v15045_v60  ;;  %4719 = vmatpush1.bf16.msra.mxu1 %v15048_v25 }
 0x433   :  { %4679 = vmatprep.subr.bf16.mxu0 %v15053_v40  ;;  %4720 = vmatprep.subr.bf16.mxu1 %v15056_v62 }
 0x434   :  { %v16222_v21 = vpop.eup %16221 }
 0x435   :  { %v3258_v32 = vmul.f32 %v16222_v21, %v16220_v42 }
 0x436   :  { %4680 = vmatpush1.bf16.msra.mxu0 %v15051_v7  ;;  %4721 = vmatpush1.bf16.msra.mxu1 %v15054_v17 }
 0x437   :  { %v3259_v55 = vpack.c.bf16 %v3258_v32, %v3258_v32  ;;  %4976 = vmatprep.subr.bf16.mxu0 %v15059_v19  ;;  %5017 = vmatprep.subr.bf16.mxu1 %v15062_v48 }
 0x439   :  { %3260 = vst [vmem:[#allocation3] sm:$0xf] %v3259_v55  ;;  %4698 = vmatmul.mubr.bf16.vlgmr.msra.gmra.mrb[32].mxu0 %v3259_v55  ;;  %4739 = vmatmul.mubr.bf16.vlgmr.msra.gmra.mrb[64].mxu1 %v3259_v55 }
 0x43a   :  { %4977 = vmatpush1.bf16.msra.mxu0 %v15057_v5  ;;  %5018 = vmatpush1.bf16.msra.mxu1 %v15060_v46 }
 0x43b   :  { %4978 = vmatprep.subr.bf16.mxu0 %v15065_v58  ;;  %5019 = vmatprep.subr.bf16.mxu1 %v15068_v14 }
 0x43c   :  { %5008 = vmatprep.mubr.bf16.mxu0 %v18143_v15  ;;  %5049 = vmatprep.mubr.bf16.mxu1 %v18143_v15 }
 0x43e   :  { %4979 = vmatpush1.bf16.msra.mxu0 %v15063_v18  ;;  %5020 = vmatpush1.bf16.msra.mxu1 %v15066_v20 }
 0x43f   :  { %4980 = vmatprep.subr.bf16.mxu0 %v15071_v22  ;;  %5021 = vmatprep.subr.bf16.mxu1 %v15074_v27 }
 0x442   :  { %4981 = vmatpush1.bf16.msra.mxu0 %v15069_v29  ;;  %5022 = vmatpush1.bf16.msra.mxu1 %v15072_v31 }
 0x443   :  { %4982 = vmatprep.subr.bf16.mxu0 %v15077_v35  ;;  %5023 = vmatprep.subr.bf16.mxu1 %v15080_v37  ;;  %v15105_v35 = vld [vmem:[#allocation9] ss:$16 sps:$4 sm:$0xff]   ;;  %v15108_v37 = vld [vmem:[#allocation9 + $0x8] ss:$16 sps:$4 sm:$0xff]  }
 0x446   :  { %4983 = vmatpush1.bf16.msra.mxu0 %v15075_v39  ;;  %5024 = vmatpush1.bf16.msra.mxu1 %v15078_v41  ;;  %v15113_v41 = vld [vmem:[#allocation9 + $0x24] ss:$16 sps:$4 sm:$0xff]  }
 0x447   :  { %4984 = vmatprep.subr.bf16.mxu0 %v15083_v43  ;;  %5025 = vmatprep.subr.bf16.mxu1 %v15086_v45  ;;  %v15116_v43 = vld [vmem:[#allocation9 + $0x2c] ss:$16 sps:$4 sm:$0xff]  }
 0x44a   :  { %4985 = vmatpush1.bf16.msra.mxu0 %v15081_v47  ;;  %5026 = vmatpush1.bf16.msra.mxu1 %v15084_v49  ;;  %v15111_v47 = vld [vmem:[#allocation9 + $0x20] ss:$16 sps:$4 sm:$0xff]   ;;  %v15119_v49 = vld [vmem:[#allocation9 + $0x44] ss:$16 sps:$4 sm:$0xff]  }
 0x44b   :  { %4986 = vmatprep.subr.bf16.mxu0 %v15089_v51  ;;  %5027 = vmatprep.subr.bf16.mxu1 %v15092_v59  ;;  %v15122_v51 = vld [vmem:[#allocation9 + $0x4c] ss:$16 sps:$4 sm:$0xff]   ;;  %v15117_v59 = vld [vmem:[#allocation9 + $0x40] ss:$16 sps:$4 sm:$0xff]  }
 0x44e   :  { %4987 = vmatpush1.bf16.msra.mxu0 %v15087_v61  ;;  %5028 = vmatpush1.bf16.msra.mxu1 %v15090_v2  ;;  %v15120_v61 = vld [vmem:[#allocation9 + $0x48] ss:$16 sps:$4 sm:$0xff]   ;;  %v15125_v2 = vld [vmem:[#allocation9 + $0x64] ss:$16 sps:$4 sm:$0xff]  }
 0x44f   :  { %4988 = vmatprep.subr.bf16.mxu0 %v15095_v4  ;;  %5029 = vmatprep.subr.bf16.mxu1 %v15098_v6  ;;  %v15128_v4 = vld [vmem:[#allocation9 + $0x6c] ss:$16 sps:$4 sm:$0xff]   ;;  %v13212_v6 = vld [vmem:[%s18007_s4 + $0x4] sm:$0xf] }
 0x452   :  { %4989 = vmatpush1.bf16.msra.mxu0 %v15093_v8  ;;  %5030 = vmatpush1.bf16.msra.mxu1 %v15096_v9  ;;  %v15123_v8 = vld [vmem:[#allocation9 + $0x60] ss:$16 sps:$4 sm:$0xff]   ;;  %v15126_v9 = vld [vmem:[#allocation9 + $0x68] ss:$16 sps:$4 sm:$0xff]  }
 0x453   :  { %4990 = vmatprep.subr.bf16.mxu0 %v15101_v0  ;;  %5031 = vmatprep.subr.bf16.mxu1 %v15104_v33  ;;  %v15131_v0 = vld [vmem:[#allocation9 + $0x84] ss:$16 sps:$4 sm:$0xff]   ;;  %v15134_v33 = vld [vmem:[#allocation9 + $0x8c] ss:$16 sps:$4 sm:$0xff]  }
 0x456   :  { %4991 = vmatpush1.bf16.msra.mxu0 %v15099_v10  ;;  %5032 = vmatpush1.bf16.msra.mxu1 %v15102_v52  ;;  %v3610_v10 = vrot.slane %v13212_v6, %v16872_v11  ;;  %v3614_v52 = vrot.slane %v13212_v6, %v16874_v12 }
 0x457   :  { %5306 = vmatprep.subr.bf16.mxu0 %v15107_v1  ;;  %5347 = vmatprep.subr.bf16.mxu1 %v15110_v56  ;;  %v15129_v1 = vld [vmem:[#allocation9 + $0x80] ss:$16 sps:$4 sm:$0xff]   ;;  %v15132_v56 = vld [vmem:[#allocation9 + $0x88] ss:$16 sps:$4 sm:$0xff]  }
 0x48c   :  { %v3491_v28 = vpop.f32.mrb[24].mxu0  ;;  %v3532_v57 = vpop.f32.mrb[56].mxu1 }
 0x48d   :  { %v3539_v26 = vadd.f32 %v3491_v28, %v18193_v50  ;;  %v3541_v24 = vadd.f32 %v3532_v57, %v18194_v16  ;;  %v3493_v38 = vpop.f32.mrb[25].mxu0  ;;  %v3534_v23 = vpop.f32.mrb[57].mxu1  ;;  %v15137_v50 = vld [vmem:[#allocation9 + $0xa4] ss:$16 sps:$4 sm:$0xff]  }
 0x48e   :  { %v3540_v13 = vadd.f32 %v3493_v38, %v18195_v34  ;;  %v3542_v30 = vadd.f32 %v3534_v23, %v18196_v3  ;;  %v3495_v60 = vpop.f32.mrb[26].mxu0  ;;  %v3536_v25 = vpop.f32.mrb[58].mxu1  ;;  %v15135_v3 = vld [vmem:[#allocation9 + $0xa0] ss:$16 sps:$4 sm:$0xff]  }
 0x48f   :  { %v13209_v40 = vmul.f32 -1.442695, %v3539_v26  ;;  %v3496_v62 = vpop.f32.mrb[27].mxu0  ;;  %v3537_v7 = vpop.f32.mrb[59].mxu1  ;;  %v13211_v42 = vmul.f32 -1.442695, %v3541_v24 }
 0x490   :  { %v13210_v17 = vmul.f32 -1.442695, %v3540_v13  ;;  %v15140_v26 = vld [vmem:[#allocation9 + $0xac] ss:$16 sps:$4 sm:$0xff]   ;;  %v15143_v7 = vld [vmem:[#allocation9 + $0xc4] ss:$16 sps:$4 sm:$0xff]  }
 0x491   :  { %16223 = vpow2.f32 %v13209_v40  ;;  %v15138_v40 = vld [vmem:[#allocation9 + $0xa8] ss:$16 sps:$4 sm:$0xff]  }
 0x492   :  { %16225 = vpow2.f32 %v13210_v17  ;;  %v15146_v17 = vld [vmem:[#allocation9 + $0xcc] ss:$16 sps:$4 sm:$0xff]  }
 0x493   :  { %16227 = vtanh.f32 %v3542_v30 }
 0x494   :  { %16229 = vpow2.f32 %v13211_v42  ;;  %v3618_v42 = vrot.slane %v13212_v6, %v16906_v53 }
 0x49b   :  { %v16224_v19 = vpop.eup %16223 }
 0x49c   :  { %v3552_v48 = vadd.f32 1.0, %v16224_v19  ;;  %v16226_v21 = vpop.eup %16225  ;;  %v15141_v19 = vld [vmem:[#allocation9 + $0xc0] ss:$16 sps:$4 sm:$0xff]  }
 0x49d   :  { %v3553_v32 = vadd.f32 1.0, %v16226_v21  ;;  %v16228_v5 = vpop.eup %16227  ;;  %v3622_v21 = vrot.slane %v13212_v6, %v16908_v54  ;;  %v15173_v6 = vld [vmem:[#allocation10 + $0x164] ss:$16 sps:$4 sm:$0xff]  }
 0x49e   :  { %16231 = vrcp.f32 %v3552_v48  ;;  %v16230_v46 = vpop.eup %16229  ;;  %v15144_v48 = vld [vmem:[#allocation9 + $0xc8] ss:$16 sps:$4 sm:$0xff]  }
 0x49f   :  { %16233 = vrcp.f32 %v3553_v32  ;;  %v3554_v18 = vadd.f32 1.0, %v16230_v46  ;;  %v15149_v32 = vld [vmem:[#allocation9 + $0xe4] ss:$16 sps:$4 sm:$0xff]  }
 0x4a1   :  { %16235 = vrcp.f32 %v3554_v18  ;;  %v15155_v18 = vld [vmem:[#allocation10 + $0x104] ss:$16 sps:$4 sm:$0xff]  }
 0x4a8   :  { %v16232_v55 = vpop.eup %16231 }
 0x4a9   :  { %v3563_v58 = vmul.f32 %v16232_v55, %v16228_v5  ;;  %v16234_v14 = vpop.eup %16233  ;;  %v15152_v5 = vld [vmem:[#allocation9 + $0xec] ss:$16 sps:$4 sm:$0xff]   ;;  %v15147_v55 = vld [vmem:[#allocation9 + $0xe0] ss:$16 sps:$4 sm:$0xff]  }
 0x4aa   :  { %v3562_v20 = vmul.f32 %v16234_v14, %v17234_v63  ;;  %v15114_v63 = vld [vmem:[#allocation9 + $0x28] ss:$16 sps:$4 sm:$0xff]  }
 0x4ab   :  { %v16236_v27 = vpop.eup %16235 }
 0x4ac   :  { %v17273_v22 = vadd.f32 %v3563_v58, %v3562_v20  ;;  %v15150_v58 = vld [vmem:[#allocation9 + $0xe8] ss:$16 sps:$4 sm:$0xff]   ;;  %v15158_v20 = vld [vmem:[#allocation10 + $0x10c] ss:$16 sps:$4 sm:$0xff]  }
 0x4ae   :  { %16237 = vtanh.f32 %v17273_v22 }
 0x4b8   :  { %v16238_v29 = vpop.eup %16237 }
 0x4b9   :  { %v3566_v31 = vmul.f32 %v16238_v29, %v16236_v27 }
 0x4bb   :  { %v3567_v39 = vpack.c.bf16 %v3566_v31, %v3566_v31 }
 0x4bd   :  { %v3569_v45 = vrot.slane %v3567_v39, 4  ;;  %5009 = vmatmul.mubr.bf16.vlgmr.msra.gmra.mrb[36].mxu0 %v3567_v39  ;;  %5050 = vmatmul.mubr.bf16.vlgmr.msra.gmra.mrb[68].mxu1 %v3567_v39 }
 0x4be   :  { %5307 = vmatpush1.bf16.msra.mxu0 %v15105_v35  ;;  %5348 = vmatpush1.bf16.msra.mxu1 %v15108_v37  ;;  %v15153_v35 = vld [vmem:[#allocation10 + $0x100] ss:$16 sps:$4 sm:$0xff]   ;;  %v15156_v37 = vld [vmem:[#allocation10 + $0x108] ss:$16 sps:$4 sm:$0xff]  }
 0x4bf   :  { %3571 = vst [vmem:[#allocation3 + $0x8] sm:$0xf0] %v3569_v45  ;;  %5308 = vmatprep.subr.bf16.mxu0 %v15113_v41  ;;  %5349 = vmatprep.subr.bf16.mxu1 %v15116_v43  ;;  %v15161_v43 = vld [vmem:[#allocation10 + $0x124] ss:$16 sps:$4 sm:$0xff]   ;;  %v15164_v45 = vld [vmem:[#allocation10 + $0x12c] ss:$16 sps:$4 sm:$0xff]  }
 0x4c0   :  { %5338 = vmatprep.mubr.bf16.mxu0 %v18143_v15  ;;  %5379 = vmatprep.mubr.bf16.mxu1 %v18143_v15 }
 0x4c2   :  { %5309 = vmatpush1.bf16.msra.mxu0 %v15111_v47  ;;  %5350 = vmatpush1.bf16.msra.mxu1 %v15114_v63 }
 0x4c3   :  { %5310 = vmatprep.subr.bf16.mxu0 %v15119_v49  ;;  %5351 = vmatprep.subr.bf16.mxu1 %v15122_v51  ;;  %v15159_v49 = vld [vmem:[#allocation10 + $0x120] ss:$16 sps:$4 sm:$0xff]   ;;  %v15162_v51 = vld [vmem:[#allocation10 + $0x128] ss:$16 sps:$4 sm:$0xff]  }
 0x4c6   :  { %5311 = vmatpush1.bf16.msra.mxu0 %v15117_v59  ;;  %5352 = vmatpush1.bf16.msra.mxu1 %v15120_v61  ;;  %v5088_v29 = vld [vmem:[#allocation3 + $0x8] sm:$0xf0]  ;;  %v15167_v59 = vld [vmem:[#allocation10 + $0x144] ss:$16 sps:$4 sm:$0xff]  }
 0x4c7   :  { %5312 = vmatprep.subr.bf16.mxu0 %v15125_v2  ;;  %5353 = vmatprep.subr.bf16.mxu1 %v15128_v4  ;;  %v5144_v41 = vrot.slane %v5088_v29, 4  ;;  %v15170_v61 = vld [vmem:[#allocation10 + $0x14c] ss:$16 sps:$4 sm:$0xff]   ;;  %v15165_v2 = vld [vmem:[#allocation10 + $0x140] ss:$16 sps:$4 sm:$0xff]  }
 0x4c8   :  { %v15168_v4 = vld [vmem:[#allocation10 + $0x148] ss:$16 sps:$4 sm:$0xff]   ;;  %v15218_v29 = vld [vmem:[#allocation9 + $0x14c] ss:$16 sps:$4 sm:$0xff]  }
 0x4ca   :  { %5313 = vmatpush1.bf16.msra.mxu0 %v15123_v8  ;;  %5354 = vmatpush1.bf16.msra.mxu1 %v15126_v9  ;;  %v15176_v8 = vld [vmem:[#allocation10 + $0x16c] ss:$16 sps:$4 sm:$0xff]  }
 0x4cb   :  { %5314 = vmatprep.subr.bf16.mxu0 %v15131_v0  ;;  %5355 = vmatprep.subr.bf16.mxu1 %v15134_v33  ;;  %v15171_v33 = vld [vmem:[#allocation10 + $0x160] ss:$16 sps:$4 sm:$0xff]  }
 0x4cc   :  { %v4095_v28 = vpop.f32.mrb[28].mxu0  ;;  %v4136_v57 = vpop.f32.mrb[60].mxu1 }
 0x4cd   :  { %v14293_v16 = vadd.f32 %v4095_v28, %v3610_v10  ;;  %v4097_v24 = vpop.f32.mrb[29].mxu0  ;;  %v4138_v38 = vpop.f32.mrb[61].mxu1  ;;  %v14295_v46 = vadd.f32 %v4136_v57, %v3618_v42  ;;  %v15174_v10 = vld [vmem:[#allocation10 + $0x168] ss:$16 sps:$4 sm:$0xff]  }
 0x4ce   :  { %v14294_v23 = vadd.f32 %v4097_v24, %v3614_v52  ;;  %v4099_v34 = vpop.f32.mrb[30].mxu0  ;;  %v4140_v13 = vpop.f32.mrb[62].mxu1  ;;  %5315 = vmatpush1.bf16.msra.mxu0 %v15129_v1  ;;  %5356 = vmatpush1.bf16.msra.mxu1 %v15132_v56  ;;  %v14296_v14 = vadd.f32 %v4138_v38, %v3622_v21  ;;  %v15179_v1 = vld [vmem:[#allocation10 + $0x184] ss:$16 sps:$4 sm:$0xff]   ;;  %v15182_v56 = vld [vmem:[#allocation10 + $0x18c] ss:$16 sps:$4 sm:$0xff]  }
 0x4cf   :  { %v13277_v30 = vmul.f32 -1.442695, %v14293_v16  ;;  %v4100_v60 = vpop.f32.mrb[31].mxu0  ;;  %v4141_v25 = vpop.f32.mrb[63].mxu1  ;;  %5316 = vmatprep.subr.bf16.mxu0 %v15137_v50  ;;  %5357 = vmatprep.subr.bf16.mxu1 %v15140_v26  ;;  %v13279_v27 = vmul.f32 -1.442695, %v14295_v46 }
 0x4d0   :  { %v13278_v62 = vmul.f32 -1.442695, %v14294_v23  ;;  %v15177_v16 = vld [vmem:[#allocation10 + $0x180] ss:$16 sps:$4 sm:$0xff]   ;;  %v15180_v24 = vld [vmem:[#allocation10 + $0x188] ss:$16 sps:$4 sm:$0xff]  }
 0x4d1   :  { %16239 = vpow2.f32 %v13277_v30  ;;  %v15185_v38 = vld [vmem:[#allocation10 + $0x1a4] ss:$16 sps:$4 sm:$0xff]   ;;  %v15188_v23 = vld [vmem:[#allocation10 + $0x1ac] ss:$16 sps:$4 sm:$0xff]   ;;  %v15183_v13 = vld [vmem:[#allocation10 + $0x1a0] ss:$16 sps:$4 sm:$0xff]  }
 0x4d2   :  { %16241 = vpow2.f32 %v13278_v62  ;;  %5317 = vmatpush1.bf16.msra.mxu0 %v15135_v3  ;;  %5358 = vmatpush1.bf16.msra.mxu1 %v15138_v40  ;;  %v15186_v3 = vld [vmem:[#allocation10 + $0x1a8] ss:$16 sps:$4 sm:$0xff]   ;;  %v15194_v30 = vld [vmem:[#allocation10 + $0x1cc] ss:$16 sps:$4 sm:$0xff]   ;;  %v15189_v60 = vld [vmem:[#allocation10 + $0x1c0] ss:$16 sps:$4 sm:$0xff]  }
 0x4d3   :  { %5318 = vmatprep.subr.bf16.mxu0 %v15143_v7  ;;  %5359 = vmatprep.subr.bf16.mxu1 %v15146_v17  ;;  %16243 = vtanh.f32 %v14296_v14  ;;  %v15192_v25 = vld [vmem:[#allocation10 + $0x1c8] ss:$16 sps:$4 sm:$0xff]   ;;  %v15197_v40 = vld [vmem:[#allocation10 + $0x1e4] ss:$16 sps:$4 sm:$0xff]   ;;  %v15200_v62 = vld [vmem:[#allocation10 + $0x1ec] ss:$16 sps:$4 sm:$0xff]  }
 0x4d4   :  { %16245 = vpow2.f32 %v13279_v27  ;;  %v15195_v7 = vld [vmem:[#allocation10 + $0x1e0] ss:$16 sps:$4 sm:$0xff]   ;;  %v15198_v17 = vld [vmem:[#allocation10 + $0x1e8] ss:$16 sps:$4 sm:$0xff]   ;;  %v15212_v14 = vld [vmem:[#allocation9 + $0x12c] ss:$16 sps:$4 sm:$0xff]  }
 0x4d5   :  { %v15204_v46 = vld [vmem:[#allocation9 + $0x108] ss:$16 sps:$4 sm:$0xff]   ;;  %v15215_v27 = vld [vmem:[#allocation9 + $0x144] ss:$16 sps:$4 sm:$0xff]  }
 0x4d6   :  { %5319 = vmatpush1.bf16.msra.mxu0 %v15141_v19  ;;  %5360 = vmatpush1.bf16.msra.mxu1 %v15144_v48  ;;  %v15203_v19 = vld [vmem:[#allocation9 + $0x104] ss:$16 sps:$4 sm:$0xff]   ;;  %v15206_v48 = vld [vmem:[#allocation9 + $0x10c] ss:$16 sps:$4 sm:$0xff]  }
 0x4d7   :  { %5320 = vmatprep.subr.bf16.mxu0 %v15149_v32  ;;  %5361 = vmatprep.subr.bf16.mxu1 %v15152_v5  ;;  %v15201_v5 = vld [vmem:[#allocation9 + $0x100] ss:$16 sps:$4 sm:$0xff]  }
 0x4da   :  { %5321 = vmatpush1.bf16.msra.mxu0 %v15147_v55  ;;  %5362 = vmatpush1.bf16.msra.mxu1 %v15150_v58  ;;  %v15209_v58 = vld [vmem:[#allocation9 + $0x124] ss:$16 sps:$4 sm:$0xff]  }
 0x4db   :  { %v16240_v31 = vpop.eup %16239  ;;  %5580 = vmatprep.subr.bf16.mxu0 %v15155_v18  ;;  %5621 = vmatprep.subr.bf16.mxu1 %v15158_v20  ;;  %v15207_v18 = vld [vmem:[#allocation9 + $0x120] ss:$16 sps:$4 sm:$0xff]   ;;  %v15210_v20 = vld [vmem:[#allocation9 + $0x128] ss:$16 sps:$4 sm:$0xff]  }
 0x4dc   :  { %v4156_v39 = vadd.f32 1.0, %v16240_v31  ;;  %v16242_v47 = vpop.eup %16241  ;;  %v15213_v31 = vld [vmem:[#allocation9 + $0x140] ss:$16 sps:$4 sm:$0xff]  }
 0x4dd   :  { %v4157_v63 = vadd.f32 1.0, %v16242_v47  ;;  %5339 = vmatmul.mubr.bf16.vlgmr.msra.gmra.mrb[40].mxu0 %v5144_v41  ;;  %5380 = vmatmul.mubr.bf16.vlgmr.msra.gmra.mrb[72].mxu1 %v5144_v41  ;;  %v16244_v9 = vpop.eup %16243  ;;  %v13280_v41 = vld [vmem:[%s18007_s4 + $0x8] sm:$0xf]  ;;  %v15227_v47 = vld [vmem:[#allocation9 + $0x184] ss:$16 sps:$4 sm:$0xff]  }
 0x4de   :  { %16247 = vrcp.f32 %v4156_v39  ;;  %5581 = vmatpush1.bf16.msra.mxu0 %v15153_v35  ;;  %5622 = vmatpush1.bf16.msra.mxu1 %v15156_v37  ;;  %v16246_v0 = vpop.eup %16245  ;;  %v15216_v35 = vld [vmem:[#allocation9 + $0x148] ss:$16 sps:$4 sm:$0xff]   ;;  %v15221_v37 = vld [vmem:[#allocation9 + $0x164] ss:$16 sps:$4 sm:$0xff]   ;;  %v15224_v39 = vld [vmem:[#allocation9 + $0x16c] ss:$16 sps:$4 sm:$0xff]  }
 0x4df   :  { %16249 = vrcp.f32 %v4157_v63  ;;  %5582 = vmatprep.subr.bf16.mxu0 %v15161_v43  ;;  %5623 = vmatprep.subr.bf16.mxu1 %v15164_v45  ;;  %v4158_v50 = vadd.f32 1.0, %v16246_v0  ;;  %v15219_v43 = vld [vmem:[#allocation9 + $0x160] ss:$16 sps:$4 sm:$0xff]   ;;  %v15222_v45 = vld [vmem:[#allocation9 + $0x168] ss:$16 sps:$4 sm:$0xff]  }
 0x4e0   :  { %5612 = vmatprep.mubr.bf16.mxu0 %v18143_v15  ;;  %5653 = vmatprep.mubr.bf16.mxu1 %v18143_v15  ;;  %v15230_v63 = vld [vmem:[#allocation9 + $0x18c] ss:$16 sps:$4 sm:$0xff]  }
 0x4e1   :  { %16251 = vrcp.f32 %v4158_v50 }
 0x4e2   :  { %5583 = vmatpush1.bf16.msra.mxu0 %v15159_v49  ;;  %5624 = vmatpush1.bf16.msra.mxu1 %v15162_v51  ;;  %v4211_v49 = vrot.slane %v13280_v41, %v16872_v11  ;;  %v4215_v51 = vrot.slane %v13280_v41, %v16874_v12 }
 0x4e3   :  { %5584 = vmatprep.subr.bf16.mxu0 %v15167_v59  ;;  %5625 = vmatprep.subr.bf16.mxu1 %v15170_v61  ;;  %v15225_v59 = vld [vmem:[#allocation9 + $0x180] ss:$16 sps:$4 sm:$0xff]   ;;  %v15228_v61 = vld [vmem:[#allocation9 + $0x188] ss:$16 sps:$4 sm:$0xff]  }
 0x4e6   :  { %5585 = vmatpush1.bf16.msra.mxu0 %v15165_v2  ;;  %5626 = vmatpush1.bf16.msra.mxu1 %v15168_v4 }
 0x4e7   :  { %5586 = vmatprep.subr.bf16.mxu0 %v15173_v6  ;;  %5627 = vmatprep.subr.bf16.mxu1 %v15176_v8  ;;  %v15233_v6 = vld [vmem:[#allocation9 + $0x1a4] ss:$16 sps:$4 sm:$0xff]   ;;  %v15236_v8 = vld [vmem:[#allocation9 + $0x1ac] ss:$16 sps:$4 sm:$0xff]  }
 0x4e8   :  { %v16248_v52 = vpop.eup %16247 }
 0x4e9   :  { %v4167_v28 = vmul.f32 %v16248_v52, %v16244_v9  ;;  %v16250_v57 = vpop.eup %16249 }
 0x4ea   :  { %v4166_v26 = vmul.f32 %v16250_v57, %v17249_v44  ;;  %5587 = vmatpush1.bf16.msra.mxu0 %v15171_v33  ;;  %5628 = vmatpush1.bf16.msra.mxu1 %v15174_v10  ;;  %v15191_v44 = vld [vmem:[#allocation10 + $0x1c4] ss:$16 sps:$4 sm:$0xff]  }
 0x4eb   :  { %5588 = vmatprep.subr.bf16.mxu0 %v15179_v1  ;;  %5629 = vmatprep.subr.bf16.mxu1 %v15182_v56  ;;  %v16252_v42 = vpop.eup %16251  ;;  %v15231_v56 = vld [vmem:[#allocation9 + $0x1a0] ss:$16 sps:$4 sm:$0xff]  }
 0x4ec   :  { %v17288_v34 = vadd.f32 %v4167_v28, %v4166_v26  ;;  %v15234_v26 = vld [vmem:[#allocation9 + $0x1a8] ss:$16 sps:$4 sm:$0xff]  }
 0x4ee   :  { %16253 = vtanh.f32 %v17288_v34  ;;  %5589 = vmatpush1.bf16.msra.mxu0 %v15177_v16  ;;  %5630 = vmatpush1.bf16.msra.mxu1 %v15180_v24  ;;  %v15239_v24 = vld [vmem:[#allocation9 + $0x1c4] ss:$16 sps:$4 sm:$0xff]  }
 0x4ef   :  { %5590 = vmatprep.subr.bf16.mxu0 %v15185_v38  ;;  %5631 = vmatprep.subr.bf16.mxu1 %v15188_v23  ;;  %v15242_v38 = vld [vmem:[#allocation9 + $0x1cc] ss:$16 sps:$4 sm:$0xff]   ;;  %v4219_v23 = vrot.slane %v13280_v41, %v16906_v53 }
 0x4f2   :  { %5591 = vmatpush1.bf16.msra.mxu0 %v15183_v13  ;;  %5632 = vmatpush1.bf16.msra.mxu1 %v15186_v3  ;;  %v15237_v13 = vld [vmem:[#allocation9 + $0x1c0] ss:$16 sps:$4 sm:$0xff]   ;;  %v15240_v3 = vld [vmem:[#allocation9 + $0x1c8] ss:$16 sps:$4 sm:$0xff]  }
 0x4f3   :  { %5592 = vmatprep.subr.bf16.mxu0 %v15191_v44  ;;  %5633 = vmatprep.subr.bf16.mxu1 %v15194_v30  ;;  %v4223_v44 = vrot.slane %v13280_v41, %v16908_v54  ;;  %v15245_v30 = vld [vmem:[#allocation9 + $0x1e4] ss:$16 sps:$4 sm:$0xff]   ;;  %v15272_v41 = vld [vmem:[#allocation10 + $0x26c] ss:$16 sps:$4 sm:$0xff]  }
 0x4f6   :  { %5593 = vmatpush1.bf16.msra.mxu0 %v15189_v60  ;;  %5634 = vmatpush1.bf16.msra.mxu1 %v15192_v25  ;;  %v15248_v60 = vld [vmem:[#allocation9 + $0x1ec] ss:$16 sps:$4 sm:$0xff]  }
 0x4f7   :  { %5594 = vmatprep.subr.bf16.mxu0 %v15197_v40  ;;  %5635 = vmatprep.subr.bf16.mxu1 %v15200_v62  ;;  %v15243_v40 = vld [vmem:[#allocation9 + $0x1e0] ss:$16 sps:$4 sm:$0xff]   ;;  %v15246_v62 = vld [vmem:[#allocation9 + $0x1e8] ss:$16 sps:$4 sm:$0xff]  }
 0x4f8   :  { %v16254_v21 = vpop.eup %16253 }
 0x4f9   :  { %v4170_v32 = vmul.f32 %v16254_v21, %v16252_v42  ;;  %v15254_v42 = vld [vmem:[#allocation10 + $0x20c] ss:$16 sps:$4 sm:$0xff]   ;;  %v15249_v21 = vld [vmem:[#allocation10 + $0x200] ss:$16 sps:$4 sm:$0xff]  }
 0x4fa   :  { %5595 = vmatpush1.bf16.msra.mxu0 %v15195_v7  ;;  %5636 = vmatpush1.bf16.msra.mxu1 %v15198_v17  ;;  %v15251_v17 = vld [vmem:[#allocation10 + $0x204] ss:$16 sps:$4 sm:$0xff]  }
 0x4fb   :  { %v4171_v55 = vpack.c.bf16 %v4170_v32, %v4170_v32  ;;  %5910 = vmatprep.subr.bf16.mxu0 %v15203_v19  ;;  %5951 = vmatprep.subr.bf16.mxu1 %v15206_v48  ;;  %v15252_v32 = vld [vmem:[#allocation10 + $0x208] ss:$16 sps:$4 sm:$0xff]  }
 0x4fd   :  { %4172 = vst [vmem:[#allocation3 + $0x8] sm:$0xf] %v4171_v55  ;;  %5613 = vmatmul.mubr.bf16.vlgmr.msra.gmra.mrb[40].mxu0 %v4171_v55  ;;  %5654 = vmatmul.mubr.bf16.vlgmr.msra.gmra.mrb[72].mxu1 %v4171_v55  ;;  %v15260_v55 = vld [vmem:[#allocation10 + $0x22c] ss:$16 sps:$4 sm:$0xff]  }
 0x4fe   :  { %5911 = vmatpush1.bf16.msra.mxu0 %v15201_v5  ;;  %5952 = vmatpush1.bf16.msra.mxu1 %v15204_v46  ;;  %v15257_v46 = vld [vmem:[#allocation10 + $0x224] ss:$16 sps:$4 sm:$0xff]  }
 0x4ff   :  { %5912 = vmatprep.subr.bf16.mxu0 %v15209_v58  ;;  %5953 = vmatprep.subr.bf16.mxu1 %v15212_v14 }
 0x500   :  { %5942 = vmatprep.mubr.bf16.mxu0 %v18143_v15  ;;  %5983 = vmatprep.mubr.bf16.mxu1 %v18143_v15 }
 0x502   :  { %5913 = vmatpush1.bf16.msra.mxu0 %v15207_v18  ;;  %5954 = vmatpush1.bf16.msra.mxu1 %v15210_v20  ;;  %v15255_v20 = vld [vmem:[#allocation10 + $0x220] ss:$16 sps:$4 sm:$0xff]  }
 0x503   :  { %5914 = vmatprep.subr.bf16.mxu0 %v15215_v27  ;;  %5955 = vmatprep.subr.bf16.mxu1 %v15218_v29  ;;  %v15258_v27 = vld [vmem:[#allocation10 + $0x228] ss:$16 sps:$4 sm:$0xff]   ;;  %v15263_v29 = vld [vmem:[#allocation10 + $0x244] ss:$16 sps:$4 sm:$0xff]  }
 0x504   :  { %v5695_v14 = vld [vmem:[#allocation3 + $0x8] sm:$0xf] }
 0x506   :  { %5915 = vmatpush1.bf16.msra.mxu0 %v15213_v31  ;;  %5956 = vmatpush1.bf16.msra.mxu1 %v15216_v35  ;;  %v15266_v31 = vld [vmem:[#allocation10 + $0x24c] ss:$16 sps:$4 sm:$0xff]   ;;  %v15261_v35 = vld [vmem:[#allocation10 + $0x240] ss:$16 sps:$4 sm:$0xff]  }
 0x507   :  { %5916 = vmatprep.subr.bf16.mxu0 %v15221_v37  ;;  %5957 = vmatprep.subr.bf16.mxu1 %v15224_v39  ;;  %v15264_v37 = vld [vmem:[#allocation10 + $0x248] ss:$16 sps:$4 sm:$0xff]   ;;  %v15269_v39 = vld [vmem:[#allocation10 + $0x264] ss:$16 sps:$4 sm:$0xff]  }
 0x50a   :  { %5917 = vmatpush1.bf16.msra.mxu0 %v15219_v43  ;;  %5958 = vmatpush1.bf16.msra.mxu1 %v15222_v45 }
 0x50b   :  { %5918 = vmatprep.subr.bf16.mxu0 %v15227_v47  ;;  %5959 = vmatprep.subr.bf16.mxu1 %v15230_v63  ;;  %v15267_v47 = vld [vmem:[#allocation10 + $0x260] ss:$16 sps:$4 sm:$0xff]   ;;  %v15270_v63 = vld [vmem:[#allocation10 + $0x268] ss:$16 sps:$4 sm:$0xff]  }
 0x50c   :  { %v4699_v2 = vpop.f32.mrb[32].mxu0  ;;  %v4740_v4 = vpop.f32.mrb[64].mxu1 }
 0x50d   :  { %v14297_v9 = vadd.f32 %v4699_v2, %v4211_v49  ;;  %v4701_v0 = vpop.f32.mrb[33].mxu0  ;;  %v4742_v33 = vpop.f32.mrb[65].mxu1  ;;  %v14299_v25 = vadd.f32 %v4740_v4, %v4219_v23  ;;  %v15299_v23 = vld [vmem:[#allocation10 + $0x4] ss:$16 sps:$4 sm:$0xff]  }
 0x50e   :  { %v14298_v10 = vadd.f32 %v4701_v0, %v4215_v51  ;;  %v4703_v52 = vpop.f32.mrb[34].mxu0  ;;  %v4744_v1 = vpop.f32.mrb[66].mxu1  ;;  %5919 = vmatpush1.bf16.msra.mxu0 %v15225_v59  ;;  %5960 = vmatpush1.bf16.msra.mxu1 %v15228_v61  ;;  %v14300_v7 = vadd.f32 %v4742_v33, %v4223_v44  ;;  %v15275_v51 = vld [vmem:[#allocation10 + $0x284] ss:$16 sps:$4 sm:$0xff]   ;;  %v15278_v59 = vld [vmem:[#allocation10 + $0x28c] ss:$16 sps:$4 sm:$0xff]  }
 0x50f   :  { %v13345_v28 = vmul.f32 -1.442695, %v14297_v9  ;;  %v4704_v57 = vpop.f32.mrb[35].mxu0  ;;  %v4745_v50 = vpop.f32.mrb[67].mxu1  ;;  %5920 = vmatprep.subr.bf16.mxu0 %v15233_v6  ;;  %5961 = vmatprep.subr.bf16.mxu1 %v15236_v8  ;;  %v13347_v19 = vmul.f32 -1.442695, %v14299_v25 }
 0x510   :  { %v13346_v16 = vmul.f32 -1.442695, %v14298_v10  ;;  %v15273_v8 = vld [vmem:[#allocation10 + $0x280] ss:$16 sps:$4 sm:$0xff]   ;;  %v15276_v9 = vld [vmem:[#allocation10 + $0x288] ss:$16 sps:$4 sm:$0xff]  }
 0x511   :  { %16255 = vpow2.f32 %v13345_v28  ;;  %v15281_v0 = vld [vmem:[#allocation10 + $0x2a4] ss:$16 sps:$4 sm:$0xff]   ;;  %v15284_v33 = vld [vmem:[#allocation10 + $0x2ac] ss:$16 sps:$4 sm:$0xff]   ;;  %v15279_v52 = vld [vmem:[#allocation10 + $0x2a0] ss:$16 sps:$4 sm:$0xff]  }
 0x512   :  { %16257 = vpow2.f32 %v13346_v16  ;;  %5921 = vmatpush1.bf16.msra.mxu0 %v15231_v56  ;;  %5962 = vmatpush1.bf16.msra.mxu1 %v15234_v26  ;;  %v15282_v1 = vld [vmem:[#allocation10 + $0x2a8] ss:$16 sps:$4 sm:$0xff]   ;;  %v15290_v56 = vld [vmem:[#allocation10 + $0x2cc] ss:$16 sps:$4 sm:$0xff]   ;;  %v15285_v28 = vld [vmem:[#allocation10 + $0x2c0] ss:$16 sps:$4 sm:$0xff]  }
 0x513   :  { %5922 = vmatprep.subr.bf16.mxu0 %v15239_v24  ;;  %5963 = vmatprep.subr.bf16.mxu1 %v15242_v38  ;;  %16259 = vtanh.f32 %v14300_v7  ;;  %v15288_v57 = vld [vmem:[#allocation10 + $0x2c8] ss:$16 sps:$4 sm:$0xff]   ;;  %v15293_v50 = vld [vmem:[#allocation10 + $0x2e4] ss:$16 sps:$4 sm:$0xff]   ;;  %v15296_v26 = vld [vmem:[#allocation10 + $0x2ec] ss:$16 sps:$4 sm:$0xff]  }
 0x514   :  { %16261 = vpow2.f32 %v13347_v19  ;;  %v15291_v16 = vld [vmem:[#allocation10 + $0x2e0] ss:$16 sps:$4 sm:$0xff]   ;;  %v15294_v24 = vld [vmem:[#allocation10 + $0x2e8] ss:$16 sps:$4 sm:$0xff]   ;;  %v15311_v19 = vld [vmem:[#allocation10 + $0x44] ss:$16 sps:$4 sm:$0xff]  }
 0x516   :  { %5923 = vmatpush1.bf16.msra.mxu0 %v15237_v13  ;;  %5964 = vmatpush1.bf16.msra.mxu1 %v15240_v3  ;;  %v15302_v13 = vld [vmem:[#allocation10 + $0xc] ss:$16 sps:$4 sm:$0xff]  }
 0x517   :  { %5924 = vmatprep.subr.bf16.mxu0 %v15245_v30  ;;  %5965 = vmatprep.subr.bf16.mxu1 %v15248_v60  ;;  %v15297_v30 = vld [vmem:[#allocation10] ss:$16 sps:$4 sm:$0xff]   ;;  %v15300_v60 = vld [vmem:[#allocation10 + $0x8] ss:$16 sps:$4 sm:$0xff]  }
 0x51a   :  { %5925 = vmatpush1.bf16.msra.mxu0 %v15243_v40  ;;  %5966 = vmatpush1.bf16.msra.mxu1 %v15246_v62  ;;  %v15305_v40 = vld [vmem:[#allocation10 + $0x24] ss:$16 sps:$4 sm:$0xff]   ;;  %v15308_v62 = vld [vmem:[#allocation10 + $0x2c] ss:$16 sps:$4 sm:$0xff]  }
 0x51b   :  { %v16256_v48 = vpop.eup %16255  ;;  %6184 = vmatprep.subr.bf16.mxu0 %v15251_v17  ;;  %6225 = vmatprep.subr.bf16.mxu1 %v15254_v42  ;;  %v15303_v17 = vld [vmem:[#allocation10 + $0x20] ss:$16 sps:$4 sm:$0xff]   ;;  %v15306_v42 = vld [vmem:[#allocation10 + $0x28] ss:$16 sps:$4 sm:$0xff]  }
 0x51c   :  { %v4760_v5 = vadd.f32 1.0, %v16256_v48  ;;  %v16258_v58 = vpop.eup %16257  ;;  %v15314_v48 = vld [vmem:[#allocation10 + $0x4c] ss:$16 sps:$4 sm:$0xff]  }
 0x51d   :  { %v4761_v18 = vadd.f32 1.0, %v16258_v58  ;;  %5943 = vmatmul.mubr.bf16.vlgmr.msra.gmra.mrb[44].mxu0 %v5695_v14  ;;  %5984 = vmatmul.mubr.bf16.vlgmr.msra.gmra.mrb[76].mxu1 %v5695_v14  ;;  %v16260_v43 = vpop.eup %16259  ;;  %v15318_v58 = vld [vmem:[#allocation10 + $0x68] ss:$16 sps:$4 sm:$0xff]   ;;  %v15323_v14 = vld [vmem:[#allocation10 + $0x84] ss:$16 sps:$4 sm:$0xff]  }
 0x51e   :  { %16263 = vrcp.f32 %v4760_v5  ;;  %6185 = vmatpush1.bf16.msra.mxu0 %v15249_v21  ;;  %6226 = vmatpush1.bf16.msra.mxu1 %v15252_v32  ;;  %v16262_v45 = vpop.eup %16261  ;;  %v15309_v21 = vld [vmem:[#allocation10 + $0x40] ss:$16 sps:$4 sm:$0xff]   ;;  %v15312_v32 = vld [vmem:[#allocation10 + $0x48] ss:$16 sps:$4 sm:$0xff]   ;;  %v15317_v5 = vld [vmem:[#allocation10 + $0x64] ss:$16 sps:$4 sm:$0xff]  }
 0x51f   :  { %16265 = vrcp.f32 %v4761_v18  ;;  %6186 = vmatprep.subr.bf16.mxu0 %v15257_v46  ;;  %6227 = vmatprep.subr.bf16.mxu1 %v15260_v55  ;;  %v4762_v4 = vadd.f32 1.0, %v16262_v45  ;;  %v15320_v46 = vld [vmem:[#allocation10 + $0x6c] ss:$16 sps:$4 sm:$0xff]   ;;  %v15315_v55 = vld [vmem:[#allocation10 + $0x60] ss:$16 sps:$4 sm:$0xff]  }
 0x520   :  { %6216 = vmatprep.mubr.bf16.mxu0 %v18143_v15  ;;  %6257 = vmatprep.mubr.bf16.mxu1 %v18143_v15  ;;  %v15326_v18 = vld [vmem:[#allocation10 + $0x8c] ss:$16 sps:$4 sm:$0xff]   ;;  %v15336_v45 = vld [vmem:[#allocation10 + $0xc8] ss:$16 sps:$4 sm:$0xff]  }
 0x521   :  { %16267 = vrcp.f32 %v4762_v4 }
 0x522   :  { %6187 = vmatpush1.bf16.msra.mxu0 %v15255_v20  ;;  %6228 = vmatpush1.bf16.msra.mxu1 %v15258_v27  ;;  %v15321_v20 = vld [vmem:[#allocation10 + $0x80] ss:$16 sps:$4 sm:$0xff]   ;;  %v15324_v27 = vld [vmem:[#allocation10 + $0x88] ss:$16 sps:$4 sm:$0xff]  }
 0x523   :  { %6188 = vmatprep.subr.bf16.mxu0 %v15263_v29  ;;  %6229 = vmatprep.subr.bf16.mxu1 %v15266_v31  ;;  %v15329_v29 = vld [vmem:[#allocation10 + $0xa4] ss:$16 sps:$4 sm:$0xff]   ;;  %v15332_v31 = vld [vmem:[#allocation10 + $0xac] ss:$16 sps:$4 sm:$0xff]  }
 0x526   :  { %6189 = vmatpush1.bf16.msra.mxu0 %v15261_v35  ;;  %6230 = vmatpush1.bf16.msra.mxu1 %v15264_v37  ;;  %v15327_v35 = vld [vmem:[#allocation10 + $0xa0] ss:$16 sps:$4 sm:$0xff]   ;;  %v15330_v37 = vld [vmem:[#allocation10 + $0xa8] ss:$16 sps:$4 sm:$0xff]  }
 0x527   :  { %6190 = vmatprep.subr.bf16.mxu0 %v15269_v39  ;;  %6231 = vmatprep.subr.bf16.mxu1 %v15272_v41  ;;  %v15335_v39 = vld [vmem:[#allocation10 + $0xc4] ss:$16 sps:$4 sm:$0xff]   ;;  %v15338_v41 = vld [vmem:[#allocation10 + $0xcc] ss:$16 sps:$4 sm:$0xff]  }
 0x528   :  { %v16264_v49 = vpop.eup %16263 }
 0x529   :  { %v4771_v61 = vmul.f32 %v16264_v49, %v16260_v43  ;;  %v16266_v2 = vpop.eup %16265  ;;  %v15333_v43 = vld [vmem:[#allocation10 + $0xc0] ss:$16 sps:$4 sm:$0xff]  }
 0x52a   :  { %v4770_v6 = vmul.f32 %v16266_v2, %v17263_v36  ;;  %6191 = vmatpush1.bf16.msra.mxu0 %v15267_v47  ;;  %6232 = vmatpush1.bf16.msra.mxu1 %v15270_v63  ;;  %v15287_v36 = vld [vmem:[#allocation10 + $0x2c4] ss:$16 sps:$4 sm:$0xff]   ;;  %v15344_v63 = vld [vmem:[#allocation10 + $0xec] ss:$16 sps:$4 sm:$0xff]   ;;  %v15339_v49 = vld [vmem:[#allocation10 + $0xe0] ss:$16 sps:$4 sm:$0xff]  }
 0x52b   :  { %6192 = vmatprep.subr.bf16.mxu0 %v15275_v51  ;;  %6233 = vmatprep.subr.bf16.mxu1 %v15278_v59  ;;  %v16268_v38 = vpop.eup %16267  ;;  %v15341_v47 = vld [vmem:[#allocation10 + $0xe4] ss:$16 sps:$4 sm:$0xff]   ;;  %v15342_v51 = vld [vmem:[#allocation10 + $0xe8] ss:$16 sps:$4 sm:$0xff]  }
 0x52c   :  { %v17303_v10 = vadd.f32 %v4771_v61, %v4770_v6  ;;  %v15347_v59 = vld [vmem:[#allocation9 + $0x4] ss:$16 sps:$4 sm:$0xff]   ;;  %v15350_v61 = vld [vmem:[#allocation9 + $0xc] ss:$16 sps:$4 sm:$0xff]  }
 0x52d   :  { %v18197_v6 = vld [vmem:[#allocation22_spill] sm:$0xff] }
 0x52e   :  { %16269 = vtanh.f32 %v17303_v10  ;;  %6193 = vmatpush1.bf16.msra.mxu0 %v15273_v8  ;;  %6234 = vmatpush1.bf16.msra.mxu1 %v15276_v9  ;;  %v18198_v9 = vld [vmem:[#allocation34_spill] sm:$0xff] }
 0x52f   :  { %6194 = vmatprep.subr.bf16.mxu0 %v15281_v0  ;;  %6235 = vmatprep.subr.bf16.mxu1 %v15284_v33 }
 0x532   :  { %6195 = vmatpush1.bf16.msra.mxu0 %v15279_v52  ;;  %6236 = vmatpush1.bf16.msra.mxu1 %v15282_v1  ;;  %v18199_v1 = vld [vmem:[#allocation23_spill] sm:$0xff] }
 0x533   :  { %6196 = vmatprep.subr.bf16.mxu0 %v15287_v36  ;;  %6237 = vmatprep.subr.bf16.mxu1 %v15290_v56  ;;  %v18200_v56 = vld [vmem:[#allocation35_spill] sm:$0xff] }
 0x536   :  { %6197 = vmatpush1.bf16.msra.mxu0 %v15285_v28  ;;  %6238 = vmatpush1.bf16.msra.mxu1 %v15288_v57 }
 0x537   :  { %6198 = vmatprep.subr.bf16.mxu0 %v15293_v50  ;;  %6239 = vmatprep.subr.bf16.mxu1 %v15296_v26 }
 0x538   :  { %v16270_v3 = vpop.eup %16269 }
 0x539   :  { %v4774_v44 = vmul.f32 %v16270_v3, %v16268_v38 }
 0x53a   :  { %6199 = vmatpush1.bf16.msra.mxu0 %v15291_v16  ;;  %6240 = vmatpush1.bf16.msra.mxu1 %v15294_v24 }
 0x53b   :  { %v4775_v25 = vpack.c.bf16 %v4774_v44, %v4774_v44  ;;  %6492 = vmatprep.subr.bf16.mxu0 %v15299_v23  ;;  %6533 = vmatprep.subr.bf16.mxu1 %v15302_v13 }
 0x53d   :  { %v4777_v7 = vrot.slane %v4775_v25, 4  ;;  %6217 = vmatmul.mubr.bf16.vlgmr.msra.gmra.mrb[44].mxu0 %v4775_v25  ;;  %6258 = vmatmul.mubr.bf16.vlgmr.msra.gmra.mrb[76].mxu1 %v4775_v25 }
 0x53e   :  { %6493 = vmatpush1.bf16.msra.mxu0 %v15297_v30  ;;  %6534 = vmatpush1.bf16.msra.mxu1 %v15300_v60 }
 0x53f   :  { %4779 = vst [vmem:[#allocation3] sm:$0xf0] %v4777_v7  ;;  %6494 = vmatprep.subr.bf16.mxu0 %v15305_v40  ;;  %6535 = vmatprep.subr.bf16.mxu1 %v15308_v62 }
 0x540   :  { %6524 = vmatprep.mubr.bf16.mxu0 %v18143_v15  ;;  %6565 = vmatprep.mubr.bf16.mxu1 %v18143_v15 }
 0x542   :  { %6495 = vmatpush1.bf16.msra.mxu0 %v15303_v17  ;;  %6536 = vmatpush1.bf16.msra.mxu1 %v15306_v42 }
 0x543   :  { %6496 = vmatprep.subr.bf16.mxu0 %v15311_v19  ;;  %6537 = vmatprep.subr.bf16.mxu1 %v15314_v48 }
 0x546   :  { %6497 = vmatpush1.bf16.msra.mxu0 %v15309_v21  ;;  %6538 = vmatpush1.bf16.msra.mxu1 %v15312_v32 }
 0x547   :  { %6498 = vmatprep.subr.bf16.mxu0 %v15317_v5  ;;  %6539 = vmatprep.subr.bf16.mxu1 %v15320_v46  ;;  %v15345_v5 = vld [vmem:[#allocation9] ss:$16 sps:$4 sm:$0xff]   ;;  %v15348_v46 = vld [vmem:[#allocation9 + $0x8] ss:$16 sps:$4 sm:$0xff]  }
 0x54a   :  { %6499 = vmatpush1.bf16.msra.mxu0 %v15315_v55  ;;  %6540 = vmatpush1.bf16.msra.mxu1 %v15318_v58  ;;  %v15353_v58 = vld [vmem:[#allocation9 + $0x24] ss:$16 sps:$4 sm:$0xff]  }
 0x54b   :  { %6500 = vmatprep.subr.bf16.mxu0 %v15323_v14  ;;  %6541 = vmatprep.subr.bf16.mxu1 %v15326_v18  ;;  %v15356_v14 = vld [vmem:[#allocation9 + $0x2c] ss:$16 sps:$4 sm:$0xff]   ;;  %v15351_v18 = vld [vmem:[#allocation9 + $0x20] ss:$16 sps:$4 sm:$0xff]  }
 0x54e   :  { %6501 = vmatpush1.bf16.msra.mxu0 %v15321_v20  ;;  %6542 = vmatpush1.bf16.msra.mxu1 %v15324_v27  ;;  %v15359_v20 = vld [vmem:[#allocation9 + $0x44] ss:$16 sps:$4 sm:$0xff]   ;;  %v15362_v27 = vld [vmem:[#allocation9 + $0x4c] ss:$16 sps:$4 sm:$0xff]  }
 0x54f   :  { %6502 = vmatprep.subr.bf16.mxu0 %v15329_v29  ;;  %6543 = vmatprep.subr.bf16.mxu1 %v15332_v31  ;;  %v15357_v29 = vld [vmem:[#allocation9 + $0x40] ss:$16 sps:$4 sm:$0xff]   ;;  %v15360_v31 = vld [vmem:[#allocation9 + $0x48] ss:$16 sps:$4 sm:$0xff]  }
 0x552   :  { %6503 = vmatpush1.bf16.msra.mxu0 %v15327_v35  ;;  %6544 = vmatpush1.bf16.msra.mxu1 %v15330_v37  ;;  %v15365_v35 = vld [vmem:[#allocation9 + $0x64] ss:$16 sps:$4 sm:$0xff]   ;;  %v15368_v37 = vld [vmem:[#allocation9 + $0x6c] ss:$16 sps:$4 sm:$0xff]  }
 0x553   :  { %6504 = vmatprep.subr.bf16.mxu0 %v15335_v39  ;;  %6545 = vmatprep.subr.bf16.mxu1 %v15338_v41  ;;  %v13383_v39 = vld [vmem:[%s18007_s4 + $0x4] sm:$0xf]  ;;  %v15363_v41 = vld [vmem:[#allocation9 + $0x60] ss:$16 sps:$4 sm:$0xff]  }
 0x556   :  { %6505 = vmatpush1.bf16.msra.mxu0 %v15333_v43  ;;  %6546 = vmatpush1.bf16.msra.mxu1 %v15336_v45  ;;  %v15366_v43 = vld [vmem:[#allocation9 + $0x68] ss:$16 sps:$4 sm:$0xff]   ;;  %v15371_v45 = vld [vmem:[#allocation9 + $0x84] ss:$16 sps:$4 sm:$0xff]  }
 0x557   :  { %6506 = vmatprep.subr.bf16.mxu0 %v15341_v47  ;;  %6547 = vmatprep.subr.bf16.mxu1 %v15344_v63  ;;  %v15374_v47 = vld [vmem:[#allocation9 + $0x8c] ss:$16 sps:$4 sm:$0xff]   ;;  %v5126_v63 = vrot.slane %v13383_v39, %v16872_v11 }
 0x55a   :  { %6507 = vmatpush1.bf16.msra.mxu0 %v15339_v49  ;;  %6548 = vmatpush1.bf16.msra.mxu1 %v15342_v51  ;;  %v5130_v49 = vrot.slane %v13383_v39, %v16874_v12  ;;  %v15369_v51 = vld [vmem:[#allocation9 + $0x80] ss:$16 sps:$4 sm:$0xff]  }
 0x55b   :  { %6822 = vmatprep.subr.bf16.mxu0 %v15347_v59  ;;  %6863 = vmatprep.subr.bf16.mxu1 %v15350_v61  ;;  %v15372_v59 = vld [vmem:[#allocation9 + $0x88] ss:$16 sps:$4 sm:$0xff]  }
 0x590   :  { %v5010_v2 = vpop.f32.mrb[36].mxu0  ;;  %v5051_v4 = vpop.f32.mrb[68].mxu1 }
 0x591   :  { %v5058_v8 = vadd.f32 %v5010_v2, %v18197_v6  ;;  %v5060_v0 = vadd.f32 %v5051_v4, %v18198_v9  ;;  %v5012_v33 = vpop.f32.mrb[37].mxu0  ;;  %v5053_v52 = vpop.f32.mrb[69].mxu1  ;;  %v15377_v4 = vld [vmem:[#allocation9 + $0xa4] ss:$16 sps:$4 sm:$0xff]   ;;  %v15380_v6 = vld [vmem:[#allocation9 + $0xac] ss:$16 sps:$4 sm:$0xff]  }
 0x592   :  { %v5059_v36 = vadd.f32 %v5012_v33, %v18199_v1  ;;  %v5061_v28 = vadd.f32 %v5053_v52, %v18200_v56  ;;  %v5014_v57 = vpop.f32.mrb[38].mxu0  ;;  %v5055_v50 = vpop.f32.mrb[70].mxu1 }
 0x593   :  { %v13380_v26 = vmul.f32 -1.442695, %v5058_v8  ;;  %v5015_v16 = vpop.f32.mrb[39].mxu0  ;;  %v5056_v24 = vpop.f32.mrb[71].mxu1  ;;  %v13382_v23 = vmul.f32 -1.442695, %v5060_v0 }
 0x594   :  { %v13381_v38 = vmul.f32 -1.442695, %v5059_v36  ;;  %v15375_v36 = vld [vmem:[#allocation9 + $0xa0] ss:$16 sps:$4 sm:$0xff]   ;;  %v15378_v50 = vld [vmem:[#allocation9 + $0xa8] ss:$16 sps:$4 sm:$0xff]  }
 0x595   :  { %16271 = vpow2.f32 %v13380_v26  ;;  %v15383_v16 = vld [vmem:[#allocation9 + $0xc4] ss:$16 sps:$4 sm:$0xff]   ;;  %v15386_v24 = vld [vmem:[#allocation9 + $0xcc] ss:$16 sps:$4 sm:$0xff]  }
 0x596   :  { %16273 = vpow2.f32 %v13381_v38  ;;  %v5134_v38 = vrot.slane %v13383_v39, %v16906_v53 }
 0x597   :  { %16275 = vtanh.f32 %v5061_v28 }
 0x598   :  { %16277 = vpow2.f32 %v13382_v23  ;;  %v15381_v23 = vld [vmem:[#allocation9 + $0xc0] ss:$16 sps:$4 sm:$0xff]  }
 0x59f   :  { %v16272_v13 = vpop.eup %16271 }
 0x5a0   :  { %v5071_v3 = vadd.f32 1.0, %v16272_v13  ;;  %v16274_v44 = vpop.eup %16273  ;;  %v15384_v13 = vld [vmem:[#allocation9 + $0xc8] ss:$16 sps:$4 sm:$0xff]  }
 0x5a1   :  { %v5072_v30 = vadd.f32 1.0, %v16274_v44  ;;  %v16276_v60 = vpop.eup %16275  ;;  %v15389_v44 = vld [vmem:[#allocation9 + $0xe4] ss:$16 sps:$4 sm:$0xff]  }
 0x5a2   :  { %16279 = vrcp.f32 %v5071_v3  ;;  %v16278_v25 = vpop.eup %16277  ;;  %v5138_v3 = vrot.slane %v13383_v39, %v16908_v54  ;;  %v15416_v39 = vld [vmem:[#allocation10 + $0x16c] ss:$16 sps:$4 sm:$0xff]  }
 0x5a3   :  { %16281 = vrcp.f32 %v5072_v30  ;;  %v5073_v17 = vadd.f32 1.0, %v16278_v25  ;;  %v15392_v30 = vld [vmem:[#allocation9 + $0xec] ss:$16 sps:$4 sm:$0xff]   ;;  %v15387_v25 = vld [vmem:[#allocation9 + $0xe0] ss:$16 sps:$4 sm:$0xff]  }
 0x5a5   :  { %16283 = vrcp.f32 %v5073_v17  ;;  %v15398_v17 = vld [vmem:[#allocation10 + $0x10c] ss:$16 sps:$4 sm:$0xff]  }
 0x5ac   :  { %v16280_v40 = vpop.eup %16279 }
 0x5ad   :  { %v5082_v62 = vmul.f32 %v16280_v40, %v16276_v60  ;;  %v16282_v7 = vpop.eup %16281  ;;  %v15390_v40 = vld [vmem:[#allocation9 + $0xe8] ss:$16 sps:$4 sm:$0xff]  }
 0x5ae   :  { %v5081_v42 = vmul.f32 %v16282_v7, %v17273_v22  ;;  %v15354_v22 = vld [vmem:[#allocation9 + $0x28] ss:$16 sps:$4 sm:$0xff]   ;;  %v15395_v7 = vld [vmem:[#allocation10 + $0x104] ss:$16 sps:$4 sm:$0xff]  }
 0x5af   :  { %v16284_v48 = vpop.eup %16283 }
 0x5b0   :  { %v17313_v19 = vadd.f32 %v5082_v62, %v5081_v42 }
 0x5b2   :  { %16285 = vtanh.f32 %v17313_v19 }
 0x5bc   :  { %v16286_v21 = vpop.eup %16285 }
 0x5bd   :  { %v5085_v32 = vmul.f32 %v16286_v21, %v16284_v48  ;;  %v15393_v21 = vld [vmem:[#allocation10 + $0x100] ss:$16 sps:$4 sm:$0xff]  }
 0x5bf   :  { %v5086_v55 = vpack.c.bf16 %v5085_v32, %v5085_v32  ;;  %v15396_v32 = vld [vmem:[#allocation10 + $0x108] ss:$16 sps:$4 sm:$0xff]  }
 0x5c1   :  { %5087 = vst [vmem:[#allocation3 + $0x10] sm:$0xf] %v5086_v55  ;;  %6525 = vmatmul.mubr.bf16.vlgmr.msra.gmra.mrb[48].mxu0 %v5086_v55  ;;  %6566 = vmatmul.mubr.bf16.vlgmr.msra.gmra.mrb[80].mxu1 %v5086_v55  ;;  %v15404_v55 = vld [vmem:[#allocation10 + $0x12c] ss:$16 sps:$4 sm:$0xff]  }
 0x5c2   :  { %6823 = vmatpush1.bf16.msra.mxu0 %v15345_v5  ;;  %6864 = vmatpush1.bf16.msra.mxu1 %v15348_v46  ;;  %v15401_v46 = vld [vmem:[#allocation10 + $0x124] ss:$16 sps:$4 sm:$0xff]  }
 0x5c3   :  { %6824 = vmatprep.subr.bf16.mxu0 %v15353_v58  ;;  %6865 = vmatprep.subr.bf16.mxu1 %v15356_v14 }
 0x5c4   :  { %6854 = vmatprep.mubr.bf16.mxu0 %v18143_v15  ;;  %6895 = vmatprep.mubr.bf16.mxu1 %v18143_v15 }
 0x5c6   :  { %6825 = vmatpush1.bf16.msra.mxu0 %v15351_v18  ;;  %6866 = vmatpush1.bf16.msra.mxu1 %v15354_v22  ;;  %v15399_v22 = vld [vmem:[#allocation10 + $0x120] ss:$16 sps:$4 sm:$0xff]  }
 0x5c7   :  { %6826 = vmatprep.subr.bf16.mxu0 %v15359_v20  ;;  %6867 = vmatprep.subr.bf16.mxu1 %v15362_v27  ;;  %v15402_v20 = vld [vmem:[#allocation10 + $0x128] ss:$16 sps:$4 sm:$0xff]   ;;  %v15407_v27 = vld [vmem:[#allocation10 + $0x144] ss:$16 sps:$4 sm:$0xff]  }
 0x5c8   :  { %v6607_v14 = vld [vmem:[#allocation3 + $0x10] sm:$0xf] }
 0x5ca   :  { %6827 = vmatpush1.bf16.msra.mxu0 %v15357_v29  ;;  %6868 = vmatpush1.bf16.msra.mxu1 %v15360_v31  ;;  %v15410_v29 = vld [vmem:[#allocation10 + $0x14c] ss:$16 sps:$4 sm:$0xff]   ;;  %v15405_v31 = vld [vmem:[#allocation10 + $0x140] ss:$16 sps:$4 sm:$0xff]  }
 0x5cb   :  { %6828 = vmatprep.subr.bf16.mxu0 %v15365_v35  ;;  %6869 = vmatprep.subr.bf16.mxu1 %v15368_v37  ;;  %v15408_v35 = vld [vmem:[#allocation10 + $0x148] ss:$16 sps:$4 sm:$0xff]   ;;  %v15413_v37 = vld [vmem:[#allocation10 + $0x164] ss:$16 sps:$4 sm:$0xff]  }
 0x5ce   :  { %6829 = vmatpush1.bf16.msra.mxu0 %v15363_v41  ;;  %6870 = vmatpush1.bf16.msra.mxu1 %v15366_v43 }
 0x5cf   :  { %6830 = vmatprep.subr.bf16.mxu0 %v15371_v45  ;;  %6871 = vmatprep.subr.bf16.mxu1 %v15374_v47  ;;  %v15411_v45 = vld [vmem:[#allocation10 + $0x160] ss:$16 sps:$4 sm:$0xff]   ;;  %v15414_v47 = vld [vmem:[#allocation10 + $0x168] ss:$16 sps:$4 sm:$0xff]  }
 0x5d0   :  { %v5614_v61 = vpop.f32.mrb[40].mxu0  ;;  %v5655_v2 = vpop.f32.mrb[72].mxu1 }
 0x5d1   :  { %v14301_v8 = vadd.f32 %v5614_v61, %v5126_v63  ;;  %v5616_v9 = vpop.f32.mrb[41].mxu0  ;;  %v5657_v0 = vpop.f32.mrb[73].mxu1  ;;  %v14303_v60 = vadd.f32 %v5655_v2, %v5134_v38  ;;  %v15443_v38 = vld [vmem:[#allocation9 + $0x104] ss:$16 sps:$4 sm:$0xff]  }
 0x5d2   :  { %v14302_v33 = vadd.f32 %v5616_v9, %v5130_v49  ;;  %v5618_v52 = vpop.f32.mrb[42].mxu0  ;;  %v5659_v1 = vpop.f32.mrb[74].mxu1  ;;  %6831 = vmatpush1.bf16.msra.mxu0 %v15369_v51  ;;  %6872 = vmatpush1.bf16.msra.mxu1 %v15372_v59  ;;  %v14304_v62 = vadd.f32 %v5657_v0, %v5138_v3  ;;  %v15419_v49 = vld [vmem:[#allocation10 + $0x184] ss:$16 sps:$4 sm:$0xff]   ;;  %v15422_v51 = vld [vmem:[#allocation10 + $0x18c] ss:$16 sps:$4 sm:$0xff]  }
 0x5d3   :  { %v13448_v56 = vmul.f32 -1.442695, %v14301_v8  ;;  %v5619_v28 = vpop.f32.mrb[43].mxu0  ;;  %v5660_v57 = vpop.f32.mrb[75].mxu1  ;;  %6832 = vmatprep.subr.bf16.mxu0 %v15377_v4  ;;  %6873 = vmatprep.subr.bf16.mxu1 %v15380_v6  ;;  %v13450_v42 = vmul.f32 -1.442695, %v14303_v60 }
 0x5d4   :  { %v13449_v26 = vmul.f32 -1.442695, %v14302_v33  ;;  %v15417_v6 = vld [vmem:[#allocation10 + $0x180] ss:$16 sps:$4 sm:$0xff]   ;;  %v15420_v8 = vld [vmem:[#allocation10 + $0x188] ss:$16 sps:$4 sm:$0xff]  }
 0x5d5   :  { %16287 = vpow2.f32 %v13448_v56  ;;  %v15425_v9 = vld [vmem:[#allocation10 + $0x1a4] ss:$16 sps:$4 sm:$0xff]   ;;  %v15428_v0 = vld [vmem:[#allocation10 + $0x1ac] ss:$16 sps:$4 sm:$0xff]   ;;  %v15423_v52 = vld [vmem:[#allocation10 + $0x1a0] ss:$16 sps:$4 sm:$0xff]  }
 0x5d6   :  { %16289 = vpow2.f32 %v13449_v26  ;;  %6833 = vmatpush1.bf16.msra.mxu0 %v15375_v36  ;;  %6874 = vmatpush1.bf16.msra.mxu1 %v15378_v50  ;;  %v15426_v1 = vld [vmem:[#allocation10 + $0x1a8] ss:$16 sps:$4 sm:$0xff]   ;;  %v15434_v36 = vld [vmem:[#allocation10 + $0x1cc] ss:$16 sps:$4 sm:$0xff]   ;;  %v15429_v56 = vld [vmem:[#allocation10 + $0x1c0] ss:$16 sps:$4 sm:$0xff]  }
 0x5d7   :  { %6834 = vmatprep.subr.bf16.mxu0 %v15383_v16  ;;  %6875 = vmatprep.subr.bf16.mxu1 %v15386_v24  ;;  %16291 = vtanh.f32 %v14304_v62  ;;  %v15432_v28 = vld [vmem:[#allocation10 + $0x1c8] ss:$16 sps:$4 sm:$0xff]   ;;  %v15437_v57 = vld [vmem:[#allocation10 + $0x1e4] ss:$16 sps:$4 sm:$0xff]   ;;  %v15440_v50 = vld [vmem:[#allocation10 + $0x1ec] ss:$16 sps:$4 sm:$0xff]  }
 0x5d8   :  { %16293 = vpow2.f32 %v13450_v42  ;;  %v15435_v26 = vld [vmem:[#allocation10 + $0x1e0] ss:$16 sps:$4 sm:$0xff]   ;;  %v15438_v16 = vld [vmem:[#allocation10 + $0x1e8] ss:$16 sps:$4 sm:$0xff]   ;;  %v15455_v42 = vld [vmem:[#allocation9 + $0x144] ss:$16 sps:$4 sm:$0xff]  }
 0x5da   :  { %6835 = vmatpush1.bf16.msra.mxu0 %v15381_v23  ;;  %6876 = vmatpush1.bf16.msra.mxu1 %v15384_v13  ;;  %v15446_v23 = vld [vmem:[#allocation9 + $0x10c] ss:$16 sps:$4 sm:$0xff]  }
 0x5db   :  { %6836 = vmatprep.subr.bf16.mxu0 %v15389_v44  ;;  %6877 = vmatprep.subr.bf16.mxu1 %v15392_v30  ;;  %v15441_v44 = vld [vmem:[#allocation9 + $0x100] ss:$16 sps:$4 sm:$0xff]   ;;  %v15444_v30 = vld [vmem:[#allocation9 + $0x108] ss:$16 sps:$4 sm:$0xff]  }
 0x5de   :  { %6837 = vmatpush1.bf16.msra.mxu0 %v15387_v25  ;;  %6878 = vmatpush1.bf16.msra.mxu1 %v15390_v40  ;;  %v15449_v25 = vld [vmem:[#allocation9 + $0x124] ss:$16 sps:$4 sm:$0xff]   ;;  %v15452_v40 = vld [vmem:[#allocation9 + $0x12c] ss:$16 sps:$4 sm:$0xff]  }
 0x5df   :  { %v16288_v48 = vpop.eup %16287  ;;  %7096 = vmatprep.subr.bf16.mxu0 %v15395_v7  ;;  %7137 = vmatprep.subr.bf16.mxu1 %v15398_v17  ;;  %v15447_v7 = vld [vmem:[#allocation9 + $0x120] ss:$16 sps:$4 sm:$0xff]   ;;  %v15450_v17 = vld [vmem:[#allocation9 + $0x128] ss:$16 sps:$4 sm:$0xff]  }
 0x5e0   :  { %v5675_v5 = vadd.f32 1.0, %v16288_v48  ;;  %v16290_v58 = vpop.eup %16289  ;;  %v15458_v48 = vld [vmem:[#allocation9 + $0x14c] ss:$16 sps:$4 sm:$0xff]  }
 0x5e1   :  { %v5676_v18 = vadd.f32 1.0, %v16290_v58  ;;  %6855 = vmatmul.mubr.bf16.vlgmr.msra.gmra.mrb[52].mxu0 %v6607_v14  ;;  %6896 = vmatmul.mubr.bf16.vlgmr.msra.gmra.mrb[84].mxu1 %v6607_v14  ;;  %v16292_v41 = vpop.eup %16291  ;;  %v15459_v58 = vld [vmem:[#allocation9 + $0x160] ss:$16 sps:$4 sm:$0xff]   ;;  %v15462_v14 = vld [vmem:[#allocation9 + $0x168] ss:$16 sps:$4 sm:$0xff]  }
 0x5e2   :  { %16295 = vrcp.f32 %v5675_v5  ;;  %7097 = vmatpush1.bf16.msra.mxu0 %v15393_v21  ;;  %7138 = vmatpush1.bf16.msra.mxu1 %v15396_v32  ;;  %v16294_v43 = vpop.eup %16293  ;;  %v15453_v21 = vld [vmem:[#allocation9 + $0x140] ss:$16 sps:$4 sm:$0xff]   ;;  %v15456_v32 = vld [vmem:[#allocation9 + $0x148] ss:$16 sps:$4 sm:$0xff]   ;;  %v15461_v5 = vld [vmem:[#allocation9 + $0x164] ss:$16 sps:$4 sm:$0xff]  }
 0x5e3   :  { %16297 = vrcp.f32 %v5676_v18  ;;  %7098 = vmatprep.subr.bf16.mxu0 %v15401_v46  ;;  %7139 = vmatprep.subr.bf16.mxu1 %v15404_v55  ;;  %v5677_v2 = vadd.f32 1.0, %v16294_v43  ;;  %v15464_v46 = vld [vmem:[#allocation9 + $0x16c] ss:$16 sps:$4 sm:$0xff]   ;;  %v13451_v55 = vld [vmem:[%s18007_s4 + $0x8] sm:$0xf] }
 0x5e4   :  { %7128 = vmatprep.mubr.bf16.mxu0 %v18143_v15  ;;  %7169 = vmatprep.mubr.bf16.mxu1 %v18143_v15  ;;  %v15467_v18 = vld [vmem:[#allocation9 + $0x184] ss:$16 sps:$4 sm:$0xff]  }
 0x5e5   :  { %16299 = vrcp.f32 %v5677_v2 }
 0x5e6   :  { %7099 = vmatpush1.bf16.msra.mxu0 %v15399_v22  ;;  %7140 = vmatpush1.bf16.msra.mxu1 %v15402_v20  ;;  %v15470_v22 = vld [vmem:[#allocation9 + $0x18c] ss:$16 sps:$4 sm:$0xff]   ;;  %v5733_v20 = vrot.slane %v13451_v55, %v16872_v11 }
 0x5e7   :  { %7100 = vmatprep.subr.bf16.mxu0 %v15407_v27  ;;  %7141 = vmatprep.subr.bf16.mxu1 %v15410_v29  ;;  %v5737_v27 = vrot.slane %v13451_v55, %v16874_v12  ;;  %v15465_v29 = vld [vmem:[#allocation9 + $0x180] ss:$16 sps:$4 sm:$0xff]  }
 0x5ea   :  { %7101 = vmatpush1.bf16.msra.mxu0 %v15405_v31  ;;  %7142 = vmatpush1.bf16.msra.mxu1 %v15408_v35  ;;  %v15468_v31 = vld [vmem:[#allocation9 + $0x188] ss:$16 sps:$4 sm:$0xff]  }
 0x5eb   :  { %7102 = vmatprep.subr.bf16.mxu0 %v15413_v37  ;;  %7143 = vmatprep.subr.bf16.mxu1 %v15416_v39  ;;  %v15473_v39 = vld [vmem:[#allocation9 + $0x1a4] ss:$16 sps:$4 sm:$0xff]  }
 0x5ec   :  { %v16296_v63 = vpop.eup %16295 }
 0x5ed   :  { %v5686_v59 = vmul.f32 %v16296_v63, %v16292_v41  ;;  %v16298_v61 = vpop.eup %16297  ;;  %v15476_v41 = vld [vmem:[#allocation9 + $0x1ac] ss:$16 sps:$4 sm:$0xff]  }
 0x5ee   :  { %v5685_v4 = vmul.f32 %v16298_v61, %v17288_v34  ;;  %7103 = vmatpush1.bf16.msra.mxu0 %v15411_v45  ;;  %7144 = vmatpush1.bf16.msra.mxu1 %v15414_v47  ;;  %v15431_v34 = vld [vmem:[#allocation10 + $0x1c4] ss:$16 sps:$4 sm:$0xff]  }
 0x5ef   :  { %7104 = vmatprep.subr.bf16.mxu0 %v15419_v49  ;;  %7145 = vmatprep.subr.bf16.mxu1 %v15422_v51  ;;  %v16300_v24 = vpop.eup %16299 }
 0x5f0   :  { %v17328_v33 = vadd.f32 %v5686_v59, %v5685_v4  ;;  %v15471_v59 = vld [vmem:[#allocation9 + $0x1a0] ss:$16 sps:$4 sm:$0xff]  }
 0x5f2   :  { %16301 = vtanh.f32 %v17328_v33  ;;  %7105 = vmatpush1.bf16.msra.mxu0 %v15417_v6  ;;  %7146 = vmatpush1.bf16.msra.mxu1 %v15420_v8  ;;  %v15474_v6 = vld [vmem:[#allocation9 + $0x1a8] ss:$16 sps:$4 sm:$0xff]  }
 0x5f3   :  { %7106 = vmatprep.subr.bf16.mxu0 %v15425_v9  ;;  %7147 = vmatprep.subr.bf16.mxu1 %v15428_v0  ;;  %v15479_v9 = vld [vmem:[#allocation9 + $0x1c4] ss:$16 sps:$4 sm:$0xff]   ;;  %v15482_v0 = vld [vmem:[#allocation9 + $0x1cc] ss:$16 sps:$4 sm:$0xff]  }
 0x5f6   :  { %7107 = vmatpush1.bf16.msra.mxu0 %v15423_v52  ;;  %7148 = vmatpush1.bf16.msra.mxu1 %v15426_v1  ;;  %v5741_v52 = vrot.slane %v13451_v55, %v16906_v53  ;;  %v15477_v1 = vld [vmem:[#allocation9 + $0x1c0] ss:$16 sps:$4 sm:$0xff]  }
 0x5f7   :  { %7108 = vmatprep.subr.bf16.mxu0 %v15431_v34  ;;  %7149 = vmatprep.subr.bf16.mxu1 %v15434_v36  ;;  %v15480_v34 = vld [vmem:[#allocation9 + $0x1c8] ss:$16 sps:$4 sm:$0xff]   ;;  %v5745_v36 = vrot.slane %v13451_v55, %v16908_v54  ;;  %v15509_v55 = vld [vmem:[#allocation10 + $0x264] ss:$16 sps:$4 sm:$0xff]  }
 0x5fa   :  { %7109 = vmatpush1.bf16.msra.mxu0 %v15429_v56  ;;  %7150 = vmatpush1.bf16.msra.mxu1 %v15432_v28  ;;  %v15485_v56 = vld [vmem:[#allocation9 + $0x1e4] ss:$16 sps:$4 sm:$0xff]   ;;  %v15488_v28 = vld [vmem:[#allocation9 + $0x1ec] ss:$16 sps:$4 sm:$0xff]  }
 0x5fb   :  { %7110 = vmatprep.subr.bf16.mxu0 %v15437_v57  ;;  %7151 = vmatprep.subr.bf16.mxu1 %v15440_v50  ;;  %v15483_v50 = vld [vmem:[#allocation9 + $0x1e0] ss:$16 sps:$4 sm:$0xff]  }
 0x5fc   :  { %v16302_v13 = vpop.eup %16301 }
 0x5fd   :  { %v5689_v3 = vmul.f32 %v16302_v13, %v16300_v24  ;;  %v15491_v24 = vld [vmem:[#allocation10 + $0x204] ss:$16 sps:$4 sm:$0xff]  }
 0x5fe   :  { %7111 = vmatpush1.bf16.msra.mxu0 %v15435_v26  ;;  %7152 = vmatpush1.bf16.msra.mxu1 %v15438_v16  ;;  %v15486_v26 = vld [vmem:[#allocation9 + $0x1e8] ss:$16 sps:$4 sm:$0xff]  }
 0x5ff   :  { %v5690_v60 = vpack.c.bf16 %v5689_v3, %v5689_v3  ;;  %7426 = vmatprep.subr.bf16.mxu0 %v15443_v38  ;;  %7467 = vmatprep.subr.bf16.mxu1 %v15446_v23  ;;  %v15494_v38 = vld [vmem:[#allocation10 + $0x20c] ss:$16 sps:$4 sm:$0xff]  }
 0x601   :  { %v5692_v62 = vrot.slane %v5690_v60, 4  ;;  %7129 = vmatmul.mubr.bf16.vlgmr.msra.gmra.mrb[52].mxu0 %v5690_v60  ;;  %7170 = vmatmul.mubr.bf16.vlgmr.msra.gmra.mrb[84].mxu1 %v5690_v60 }
 0x602   :  { %7427 = vmatpush1.bf16.msra.mxu0 %v15441_v44  ;;  %7468 = vmatpush1.bf16.msra.mxu1 %v15444_v30  ;;  %v15489_v44 = vld [vmem:[#allocation10 + $0x200] ss:$16 sps:$4 sm:$0xff]   ;;  %v15492_v30 = vld [vmem:[#allocation10 + $0x208] ss:$16 sps:$4 sm:$0xff]  }
 0x603   :  { %5694 = vst [vmem:[#allocation3 + $0x8] sm:$0xf0] %v5692_v62  ;;  %7428 = vmatprep.subr.bf16.mxu0 %v15449_v25  ;;  %7469 = vmatprep.subr.bf16.mxu1 %v15452_v40  ;;  %v15497_v40 = vld [vmem:[#allocation10 + $0x224] ss:$16 sps:$4 sm:$0xff]   ;;  %v15500_v62 = vld [vmem:[#allocation10 + $0x22c] ss:$16 sps:$4 sm:$0xff]  }
 0x604   :  { %7458 = vmatprep.mubr.bf16.mxu0 %v18143_v15  ;;  %7499 = vmatprep.mubr.bf16.mxu1 %v18143_v15 }
 0x606   :  { %7429 = vmatpush1.bf16.msra.mxu0 %v15447_v7  ;;  %7470 = vmatpush1.bf16.msra.mxu1 %v15450_v17 }
 0x607   :  { %7430 = vmatprep.subr.bf16.mxu0 %v15455_v42  ;;  %7471 = vmatprep.subr.bf16.mxu1 %v15458_v48  ;;  %v15495_v42 = vld [vmem:[#allocation10 + $0x220] ss:$16 sps:$4 sm:$0xff]   ;;  %v15498_v48 = vld [vmem:[#allocation10 + $0x228] ss:$16 sps:$4 sm:$0xff]  }
 0x60a   :  { %7431 = vmatpush1.bf16.msra.mxu0 %v15453_v21  ;;  %7472 = vmatpush1.bf16.msra.mxu1 %v15456_v32  ;;  %v7208_v13 = vld [vmem:[#allocation3 + $0x8] sm:$0xf0]  ;;  %v15503_v21 = vld [vmem:[#allocation10 + $0x244] ss:$16 sps:$4 sm:$0xff]  }
 0x60b   :  { %7432 = vmatprep.subr.bf16.mxu0 %v15461_v5  ;;  %7473 = vmatprep.subr.bf16.mxu1 %v15464_v46  ;;  %v7264_v25 = vrot.slane %v7208_v13, 4  ;;  %v15506_v32 = vld [vmem:[#allocation10 + $0x24c] ss:$16 sps:$4 sm:$0xff]   ;;  %v15501_v5 = vld [vmem:[#allocation10 + $0x240] ss:$16 sps:$4 sm:$0xff]  }
 0x60c   :  { %v15504_v46 = vld [vmem:[#allocation10 + $0x248] ss:$16 sps:$4 sm:$0xff]   ;;  %v15554_v13 = vld [vmem:[#allocation10 + $0x4c] ss:$16 sps:$4 sm:$0xff]  }
 0x60e   :  { %7433 = vmatpush1.bf16.msra.mxu0 %v15459_v58  ;;  %7474 = vmatpush1.bf16.msra.mxu1 %v15462_v14  ;;  %v15512_v58 = vld [vmem:[#allocation10 + $0x26c] ss:$16 sps:$4 sm:$0xff]  }
 0x60f   :  { %7434 = vmatprep.subr.bf16.mxu0 %v15467_v18  ;;  %7475 = vmatprep.subr.bf16.mxu1 %v15470_v22  ;;  %v15507_v22 = vld [vmem:[#allocation10 + $0x260] ss:$16 sps:$4 sm:$0xff]  }
 0x610   :  { %v6218_v35 = vpop.f32.mrb[44].mxu0  ;;  %v6259_v37 = vpop.f32.mrb[76].mxu1 }
 0x611   :  { %v14305_v43 = vadd.f32 %v6218_v35, %v5733_v20  ;;  %v6220_v45 = vpop.f32.mrb[45].mxu0  ;;  %v6261_v47 = vpop.f32.mrb[77].mxu1  ;;  %v14307_v57 = vadd.f32 %v6259_v37, %v5741_v52  ;;  %v15510_v20 = vld [vmem:[#allocation10 + $0x268] ss:$16 sps:$4 sm:$0xff]  }
 0x612   :  { %v14306_v63 = vadd.f32 %v6220_v45, %v5737_v27  ;;  %v6222_v49 = vpop.f32.mrb[46].mxu0  ;;  %v6263_v51 = vpop.f32.mrb[78].mxu1  ;;  %7435 = vmatpush1.bf16.msra.mxu0 %v15465_v29  ;;  %7476 = vmatpush1.bf16.msra.mxu1 %v15468_v31  ;;  %v14308_v16 = vadd.f32 %v6261_v47, %v5745_v36  ;;  %v15515_v29 = vld [vmem:[#allocation10 + $0x284] ss:$16 sps:$4 sm:$0xff]   ;;  %v15518_v31 = vld [vmem:[#allocation10 + $0x28c] ss:$16 sps:$4 sm:$0xff]  }
 0x613   :  { %v13516_v61 = vmul.f32 -1.442695, %v14305_v43  ;;  %v6223_v2 = vpop.f32.mrb[47].mxu0  ;;  %v6264_v4 = vpop.f32.mrb[79].mxu1  ;;  %7436 = vmatprep.subr.bf16.mxu0 %v15473_v39  ;;  %7477 = vmatprep.subr.bf16.mxu1 %v15476_v41  ;;  %v13518_v23 = vmul.f32 -1.442695, %v14307_v57 }
 0x614   :  { %v13517_v8 = vmul.f32 -1.442695, %v14306_v63  ;;  %v15513_v43 = vld [vmem:[#allocation10 + $0x280] ss:$16 sps:$4 sm:$0xff]   ;;  %v15516_v45 = vld [vmem:[#allocation10 + $0x288] ss:$16 sps:$4 sm:$0xff]  }
 0x615   :  { %16303 = vpow2.f32 %v13516_v61  ;;  %v15521_v47 = vld [vmem:[#allocation10 + $0x2a4] ss:$16 sps:$4 sm:$0xff]   ;;  %v15524_v63 = vld [vmem:[#allocation10 + $0x2ac] ss:$16 sps:$4 sm:$0xff]   ;;  %v15519_v51 = vld [vmem:[#allocation10 + $0x2a0] ss:$16 sps:$4 sm:$0xff]  }
 0x616   :  { %16305 = vpow2.f32 %v13517_v8  ;;  %7437 = vmatpush1.bf16.msra.mxu0 %v15471_v59  ;;  %7478 = vmatpush1.bf16.msra.mxu1 %v15474_v6  ;;  %v15522_v59 = vld [vmem:[#allocation10 + $0x2a8] ss:$16 sps:$4 sm:$0xff]   ;;  %v15530_v61 = vld [vmem:[#allocation10 + $0x2cc] ss:$16 sps:$4 sm:$0xff]   ;;  %v15525_v2 = vld [vmem:[#allocation10 + $0x2c0] ss:$16 sps:$4 sm:$0xff]  }
 0x617   :  { %7438 = vmatprep.subr.bf16.mxu0 %v15479_v9  ;;  %7479 = vmatprep.subr.bf16.mxu1 %v15482_v0  ;;  %16307 = vtanh.f32 %v14308_v16  ;;  %v15528_v4 = vld [vmem:[#allocation10 + $0x2c8] ss:$16 sps:$4 sm:$0xff]   ;;  %v15533_v6 = vld [vmem:[#allocation10 + $0x2e4] ss:$16 sps:$4 sm:$0xff]   ;;  %v15536_v8 = vld [vmem:[#allocation10 + $0x2ec] ss:$16 sps:$4 sm:$0xff]  }
 0x618   :  { %16309 = vpow2.f32 %v13518_v23  ;;  %v15531_v9 = vld [vmem:[#allocation10 + $0x2e0] ss:$16 sps:$4 sm:$0xff]   ;;  %v15534_v0 = vld [vmem:[#allocation10 + $0x2e8] ss:$16 sps:$4 sm:$0xff]   ;;  %v15548_v16 = vld [vmem:[#allocation10 + $0x2c] ss:$16 sps:$4 sm:$0xff]  }
 0x619   :  { %v15540_v57 = vld [vmem:[#allocation10 + $0x8] ss:$16 sps:$4 sm:$0xff]   ;;  %v15551_v23 = vld [vmem:[#allocation10 + $0x44] ss:$16 sps:$4 sm:$0xff]  }
 0x61a   :  { %7439 = vmatpush1.bf16.msra.mxu0 %v15477_v1  ;;  %7480 = vmatpush1.bf16.msra.mxu1 %v15480_v34  ;;  %v15539_v1 = vld [vmem:[#allocation10 + $0x4] ss:$16 sps:$4 sm:$0xff]   ;;  %v15542_v34 = vld [vmem:[#allocation10 + $0xc] ss:$16 sps:$4 sm:$0xff]  }
 0x61b   :  { %7440 = vmatprep.subr.bf16.mxu0 %v15485_v56  ;;  %7481 = vmatprep.subr.bf16.mxu1 %v15488_v28  ;;  %v15537_v28 = vld [vmem:[#allocation10] ss:$16 sps:$4 sm:$0xff]  }
 0x61e   :  { %7441 = vmatpush1.bf16.msra.mxu0 %v15483_v50  ;;  %7482 = vmatpush1.bf16.msra.mxu1 %v15486_v26  ;;  %v15545_v26 = vld [vmem:[#allocation10 + $0x24] ss:$16 sps:$4 sm:$0xff]  }
 0x61f   :  { %v16304_v3 = vpop.eup %16303  ;;  %7700 = vmatprep.subr.bf16.mxu0 %v15491_v24  ;;  %7741 = vmatprep.subr.bf16.mxu1 %v15494_v38  ;;  %v15543_v24 = vld [vmem:[#allocation10 + $0x20] ss:$16 sps:$4 sm:$0xff]   ;;  %v15546_v38 = vld [vmem:[#allocation10 + $0x28] ss:$16 sps:$4 sm:$0xff]  }
 0x620   :  { %v6279_v60 = vadd.f32 1.0, %v16304_v3  ;;  %v16306_v7 = vpop.eup %16305  ;;  %v15549_v3 = vld [vmem:[#allocation10 + $0x40] ss:$16 sps:$4 sm:$0xff]  }
 0x621   :  { %v6280_v17 = vadd.f32 1.0, %v16306_v7  ;;  %7459 = vmatmul.mubr.bf16.vlgmr.msra.gmra.mrb[56].mxu0 %v7264_v25  ;;  %7500 = vmatmul.mubr.bf16.vlgmr.msra.gmra.mrb[88].mxu1 %v7264_v25  ;;  %v16308_v14 = vpop.eup %16307  ;;  %v15555_v25 = vld [vmem:[#allocation10 + $0x60] ss:$16 sps:$4 sm:$0xff]   ;;  %v15566_v7 = vld [vmem:[#allocation10 + $0x8c] ss:$16 sps:$4 sm:$0xff]  }
 0x622   :  { %16311 = vrcp.f32 %v6279_v60  ;;  %7701 = vmatpush1.bf16.msra.mxu0 %v15489_v44  ;;  %7742 = vmatpush1.bf16.msra.mxu1 %v15492_v30  ;;  %v16310_v18 = vpop.eup %16309  ;;  %v15552_v44 = vld [vmem:[#allocation10 + $0x48] ss:$16 sps:$4 sm:$0xff]   ;;  %v15557_v30 = vld [vmem:[#allocation10 + $0x64] ss:$16 sps:$4 sm:$0xff]   ;;  %v15560_v60 = vld [vmem:[#allocation10 + $0x6c] ss:$16 sps:$4 sm:$0xff]  }
 0x623   :  { %16313 = vrcp.f32 %v6280_v17  ;;  %7702 = vmatprep.subr.bf16.mxu0 %v15497_v40  ;;  %7743 = vmatprep.subr.bf16.mxu1 %v15500_v62  ;;  %v6281_v39 = vadd.f32 1.0, %v16310_v18  ;;  %v15558_v40 = vld [vmem:[#allocation10 + $0x68] ss:$16 sps:$4 sm:$0xff]   ;;  %v15563_v62 = vld [vmem:[#allocation10 + $0x84] ss:$16 sps:$4 sm:$0xff]  }
 0x624   :  { %7732 = vmatprep.mubr.bf16.mxu0 %v18143_v15  ;;  %7773 = vmatprep.mubr.bf16.mxu1 %v18143_v15  ;;  %v15561_v17 = vld [vmem:[#allocation10 + $0x80] ss:$16 sps:$4 sm:$0xff]   ;;  %v15581_v18 = vld [vmem:[#allocation10 + $0xe4] ss:$16 sps:$4 sm:$0xff]  }
 0x625   :  { %16315 = vrcp.f32 %v6281_v39  ;;  %v18201_v39 = vld [vmem:[#allocation24_spill] sm:$0xff] }
 0x626   :  { %7703 = vmatpush1.bf16.msra.mxu0 %v15495_v42  ;;  %7744 = vmatpush1.bf16.msra.mxu1 %v15498_v48  ;;  %v15564_v42 = vld [vmem:[#allocation10 + $0x88] ss:$16 sps:$4 sm:$0xff]   ;;  %v15569_v48 = vld [vmem:[#allocation10 + $0xa4] ss:$16 sps:$4 sm:$0xff]  }
 0x627   :  { %7704 = vmatprep.subr.bf16.mxu0 %v15503_v21  ;;  %7745 = vmatprep.subr.bf16.mxu1 %v15506_v32  ;;  %v15572_v21 = vld [vmem:[#allocation10 + $0xac] ss:$16 sps:$4 sm:$0xff]   ;;  %v15567_v32 = vld [vmem:[#allocation10 + $0xa0] ss:$16 sps:$4 sm:$0xff]  }
 0x62a   :  { %7705 = vmatpush1.bf16.msra.mxu0 %v15501_v5  ;;  %7746 = vmatpush1.bf16.msra.mxu1 %v15504_v46  ;;  %v15570_v5 = vld [vmem:[#allocation10 + $0xa8] ss:$16 sps:$4 sm:$0xff]   ;;  %v15575_v46 = vld [vmem:[#allocation10 + $0xc4] ss:$16 sps:$4 sm:$0xff]  }
 0x62b   :  { %7706 = vmatprep.subr.bf16.mxu0 %v15509_v55  ;;  %7747 = vmatprep.subr.bf16.mxu1 %v15512_v58  ;;  %v15578_v55 = vld [vmem:[#allocation10 + $0xcc] ss:$16 sps:$4 sm:$0xff]   ;;  %v15573_v58 = vld [vmem:[#allocation10 + $0xc0] ss:$16 sps:$4 sm:$0xff]  }
 0x62c   :  { %v16312_v27 = vpop.eup %16311 }
 0x62d   :  { %v6290_v35 = vmul.f32 %v16312_v27, %v16308_v14  ;;  %v16314_v37 = vpop.eup %16313  ;;  %v15576_v14 = vld [vmem:[#allocation10 + $0xc8] ss:$16 sps:$4 sm:$0xff]  }
 0x62e   :  { %v6289_v41 = vmul.f32 %v16314_v37, %v17303_v10  ;;  %7707 = vmatpush1.bf16.msra.mxu0 %v15507_v22  ;;  %7748 = vmatpush1.bf16.msra.mxu1 %v15510_v20  ;;  %v15527_v10 = vld [vmem:[#allocation10 + $0x2c4] ss:$16 sps:$4 sm:$0xff]   ;;  %v15584_v22 = vld [vmem:[#allocation10 + $0xec] ss:$16 sps:$4 sm:$0xff]   ;;  %v15579_v20 = vld [vmem:[#allocation10 + $0xe0] ss:$16 sps:$4 sm:$0xff]  }
 0x62f   :  { %7708 = vmatprep.subr.bf16.mxu0 %v15515_v29  ;;  %7749 = vmatprep.subr.bf16.mxu1 %v15518_v31  ;;  %v16316_v52 = vpop.eup %16315  ;;  %v15582_v27 = vld [vmem:[#allocation10 + $0xe8] ss:$16 sps:$4 sm:$0xff]   ;;  %v15587_v29 = vld [vmem:[#allocation9 + $0x4] ss:$16 sps:$4 sm:$0xff]   ;;  %v15590_v31 = vld [vmem:[#allocation9 + $0xc] ss:$16 sps:$4 sm:$0xff]  }
 0x630   :  { %v17343_v49 = vadd.f32 %v6290_v35, %v6289_v41 }
 0x632   :  { %16317 = vtanh.f32 %v17343_v49  ;;  %7709 = vmatpush1.bf16.msra.mxu0 %v15513_v43  ;;  %7750 = vmatpush1.bf16.msra.mxu1 %v15516_v45  ;;  %v18202_v43 = vld [vmem:[#allocation36_spill] sm:$0xff] }
 0x633   :  { %7710 = vmatprep.subr.bf16.mxu0 %v15521_v47  ;;  %7751 = vmatprep.subr.bf16.mxu1 %v15524_v63 }
 0x636   :  { %7711 = vmatpush1.bf16.msra.mxu0 %v15519_v51  ;;  %7752 = vmatpush1.bf16.msra.mxu1 %v15522_v59  ;;  %v18203_v51 = vld [vmem:[#allocation25_spill] sm:$0xff] }
 0x637   :  { %7712 = vmatprep.subr.bf16.mxu0 %v15527_v10  ;;  %7753 = vmatprep.subr.bf16.mxu1 %v15530_v61  ;;  %v18204_v10 = vld [vmem:[#allocation37_spill] sm:$0xff] }
 0x63a   :  { %7713 = vmatpush1.bf16.msra.mxu0 %v15525_v2  ;;  %7754 = vmatpush1.bf16.msra.mxu1 %v15528_v4 }
 0x63b   :  { %7714 = vmatprep.subr.bf16.mxu0 %v15533_v6  ;;  %7755 = vmatprep.subr.bf16.mxu1 %v15536_v8 }
 0x63c   :  { %v16318_v36 = vpop.eup %16317 }
 0x63d   :  { %v6293_v56 = vmul.f32 %v16318_v36, %v16316_v52 }
 0x63e   :  { %7715 = vmatpush1.bf16.msra.mxu0 %v15531_v9  ;;  %7756 = vmatpush1.bf16.msra.mxu1 %v15534_v0 }
 0x63f   :  { %v6294_v50 = vpack.c.bf16 %v6293_v56, %v6293_v56  ;;  %8011 = vmatprep.subr.bf16.mxu0 %v15539_v1  ;;  %8052 = vmatprep.subr.bf16.mxu1 %v15542_v34 }
 0x641   :  { %6295 = vst [vmem:[#allocation3 + $0x8] sm:$0xf] %v6294_v50  ;;  %7733 = vmatmul.mubr.bf16.vlgmr.msra.gmra.mrb[56].mxu0 %v6294_v50  ;;  %7774 = vmatmul.mubr.bf16.vlgmr.msra.gmra.mrb[88].mxu1 %v6294_v50 }
 0x642   :  { %8012 = vmatpush1.bf16.msra.mxu0 %v15537_v28  ;;  %8053 = vmatpush1.bf16.msra.mxu1 %v15540_v57 }
 0x643   :  { %8013 = vmatprep.subr.bf16.mxu0 %v15545_v26  ;;  %8054 = vmatprep.subr.bf16.mxu1 %v15548_v16 }
 0x644   :  { %8043 = vmatprep.mubr.bf16.mxu0 %v18143_v15  ;;  %8084 = vmatprep.mubr.bf16.mxu1 %v18143_v15 }
 0x646   :  { %8014 = vmatpush1.bf16.msra.mxu0 %v15543_v24  ;;  %8055 = vmatpush1.bf16.msra.mxu1 %v15546_v38 }
 0x647   :  { %8015 = vmatprep.subr.bf16.mxu0 %v15551_v23  ;;  %8056 = vmatprep.subr.bf16.mxu1 %v15554_v13 }
 0x64a   :  { %8016 = vmatpush1.bf16.msra.mxu0 %v15549_v3  ;;  %8057 = vmatpush1.bf16.msra.mxu1 %v15552_v44 }
 0x64b   :  { %8017 = vmatprep.subr.bf16.mxu0 %v15557_v30  ;;  %8058 = vmatprep.subr.bf16.mxu1 %v15560_v60  ;;  %v15585_v30 = vld [vmem:[#allocation9] ss:$16 sps:$4 sm:$0xff]   ;;  %v15588_v60 = vld [vmem:[#allocation9 + $0x8] ss:$16 sps:$4 sm:$0xff]  }
 0x64e   :  { %8018 = vmatpush1.bf16.msra.mxu0 %v15555_v25  ;;  %8059 = vmatpush1.bf16.msra.mxu1 %v15558_v40  ;;  %v15593_v40 = vld [vmem:[#allocation9 + $0x24] ss:$16 sps:$4 sm:$0xff]  }
 0x64f   :  { %8019 = vmatprep.subr.bf16.mxu0 %v15563_v62  ;;  %8060 = vmatprep.subr.bf16.mxu1 %v15566_v7  ;;  %v15596_v62 = vld [vmem:[#allocation9 + $0x2c] ss:$16 sps:$4 sm:$0xff]  }
 0x652   :  { %8020 = vmatpush1.bf16.msra.mxu0 %v15561_v17  ;;  %8061 = vmatpush1.bf16.msra.mxu1 %v15564_v42  ;;  %v15591_v17 = vld [vmem:[#allocation9 + $0x20] ss:$16 sps:$4 sm:$0xff]   ;;  %v15599_v42 = vld [vmem:[#allocation9 + $0x44] ss:$16 sps:$4 sm:$0xff]  }
 0x653   :  { %8021 = vmatprep.subr.bf16.mxu0 %v15569_v48  ;;  %8062 = vmatprep.subr.bf16.mxu1 %v15572_v21  ;;  %v15602_v48 = vld [vmem:[#allocation9 + $0x4c] ss:$16 sps:$4 sm:$0xff]   ;;  %v15597_v21 = vld [vmem:[#allocation9 + $0x40] ss:$16 sps:$4 sm:$0xff]  }
 0x656   :  { %8022 = vmatpush1.bf16.msra.mxu0 %v15567_v32  ;;  %8063 = vmatpush1.bf16.msra.mxu1 %v15570_v5  ;;  %v15600_v32 = vld [vmem:[#allocation9 + $0x48] ss:$16 sps:$4 sm:$0xff]   ;;  %v15605_v5 = vld [vmem:[#allocation9 + $0x64] ss:$16 sps:$4 sm:$0xff]  }
 0x657   :  { %8023 = vmatprep.subr.bf16.mxu0 %v15575_v46  ;;  %8064 = vmatprep.subr.bf16.mxu1 %v15578_v55  ;;  %v15608_v46 = vld [vmem:[#allocation9 + $0x6c] ss:$16 sps:$4 sm:$0xff]   ;;  %v13554_v55 = vld [vmem:[%s18007_s4 + $0x4] sm:$0xf] }
 0x65a   :  { %8024 = vmatpush1.bf16.msra.mxu0 %v15573_v58  ;;  %8065 = vmatpush1.bf16.msra.mxu1 %v15576_v14  ;;  %v15603_v58 = vld [vmem:[#allocation9 + $0x60] ss:$16 sps:$4 sm:$0xff]   ;;  %v15606_v14 = vld [vmem:[#allocation9 + $0x68] ss:$16 sps:$4 sm:$0xff]  }
 0x65b   :  { %8025 = vmatprep.subr.bf16.mxu0 %v15581_v18  ;;  %8066 = vmatprep.subr.bf16.mxu1 %v15584_v22  ;;  %v15611_v18 = vld [vmem:[#allocation9 + $0x84] ss:$16 sps:$4 sm:$0xff]   ;;  %v15614_v22 = vld [vmem:[#allocation9 + $0x8c] ss:$16 sps:$4 sm:$0xff]  }
 0x65e   :  { %8026 = vmatpush1.bf16.msra.mxu0 %v15579_v20  ;;  %8067 = vmatpush1.bf16.msra.mxu1 %v15582_v27  ;;  %v6645_v20 = vrot.slane %v13554_v55, %v16872_v11  ;;  %v6649_v27 = vrot.slane %v13554_v55, %v16874_v12 }
 0x65f   :  { %8341 = vmatprep.subr.bf16.mxu0 %v15587_v29  ;;  %8382 = vmatprep.subr.bf16.mxu1 %v15590_v31  ;;  %v15609_v29 = vld [vmem:[#allocation9 + $0x80] ss:$16 sps:$4 sm:$0xff]   ;;  %v15612_v31 = vld [vmem:[#allocation9 + $0x88] ss:$16 sps:$4 sm:$0xff]  }
 0x694   :  { %v6526_v35 = vpop.f32.mrb[48].mxu0  ;;  %v6567_v37 = vpop.f32.mrb[80].mxu1 }
 0x695   :  { %v6574_v41 = vadd.f32 %v6526_v35, %v18201_v39  ;;  %v6576_v45 = vadd.f32 %v6567_v37, %v18202_v43  ;;  %v6528_v47 = vpop.f32.mrb[49].mxu0  ;;  %v6569_v63 = vpop.f32.mrb[81].mxu1  ;;  %v15617_v39 = vld [vmem:[#allocation9 + $0xa4] ss:$16 sps:$4 sm:$0xff]  }
 0x696   :  { %v6575_v59 = vadd.f32 %v6528_v47, %v18203_v51  ;;  %v6577_v61 = vadd.f32 %v6569_v63, %v18204_v10  ;;  %v6530_v2 = vpop.f32.mrb[50].mxu0  ;;  %v6571_v4 = vpop.f32.mrb[82].mxu1  ;;  %v15615_v10 = vld [vmem:[#allocation9 + $0xa0] ss:$16 sps:$4 sm:$0xff]  }
 0x697   :  { %v13551_v6 = vmul.f32 -1.442695, %v6574_v41  ;;  %v6531_v8 = vpop.f32.mrb[51].mxu0  ;;  %v6572_v9 = vpop.f32.mrb[83].mxu1  ;;  %v13553_v52 = vmul.f32 -1.442695, %v6576_v45 }
 0x698   :  { %v13552_v0 = vmul.f32 -1.442695, %v6575_v59  ;;  %v15620_v41 = vld [vmem:[#allocation9 + $0xac] ss:$16 sps:$4 sm:$0xff]   ;;  %v15623_v9 = vld [vmem:[#allocation9 + $0xc4] ss:$16 sps:$4 sm:$0xff]  }
 0x699   :  { %16319 = vpow2.f32 %v13551_v6  ;;  %v15618_v6 = vld [vmem:[#allocation9 + $0xa8] ss:$16 sps:$4 sm:$0xff]  }
 0x69a   :  { %16321 = vpow2.f32 %v13552_v0  ;;  %v15626_v0 = vld [vmem:[#allocation9 + $0xcc] ss:$16 sps:$4 sm:$0xff]  }
 0x69b   :  { %16323 = vtanh.f32 %v6577_v61 }
 0x69c   :  { %16325 = vpow2.f32 %v13553_v52  ;;  %v6653_v52 = vrot.slane %v13554_v55, %v16906_v53 }
 0x6a3   :  { %v16320_v1 = vpop.eup %16319 }
 0x6a4   :  { %v6587_v34 = vadd.f32 1.0, %v16320_v1  ;;  %v16322_v36 = vpop.eup %16321  ;;  %v15621_v1 = vld [vmem:[#allocation9 + $0xc0] ss:$16 sps:$4 sm:$0xff]  }
 0x6a5   :  { %v6588_v56 = vadd.f32 1.0, %v16322_v36  ;;  %v16324_v28 = vpop.eup %16323  ;;  %v6657_v36 = vrot.slane %v13554_v55, %v16908_v54  ;;  %v15653_v55 = vld [vmem:[#allocation10 + $0x164] ss:$16 sps:$4 sm:$0xff]  }
 0x6a6   :  { %16327 = vrcp.f32 %v6587_v34  ;;  %v16326_v57 = vpop.eup %16325  ;;  %v15624_v34 = vld [vmem:[#allocation9 + $0xc8] ss:$16 sps:$4 sm:$0xff]  }
 0x6a7   :  { %16329 = vrcp.f32 %v6588_v56  ;;  %v6589_v24 = vadd.f32 1.0, %v16326_v57  ;;  %v15629_v56 = vld [vmem:[#allocation9 + $0xe4] ss:$16 sps:$4 sm:$0xff]  }
 0x6a9   :  { %16331 = vrcp.f32 %v6589_v24  ;;  %v15635_v24 = vld [vmem:[#allocation10 + $0x104] ss:$16 sps:$4 sm:$0xff]  }
 0x6b0   :  { %v16328_v50 = vpop.eup %16327 }
 0x6b1   :  { %v6598_v26 = vmul.f32 %v16328_v50, %v16324_v28  ;;  %v16330_v16 = vpop.eup %16329  ;;  %v15632_v28 = vld [vmem:[#allocation9 + $0xec] ss:$16 sps:$4 sm:$0xff]   ;;  %v15627_v50 = vld [vmem:[#allocation9 + $0xe0] ss:$16 sps:$4 sm:$0xff]  }
 0x6b2   :  { %v6597_v38 = vmul.f32 %v16330_v16, %v17313_v19  ;;  %v15594_v19 = vld [vmem:[#allocation9 + $0x28] ss:$16 sps:$4 sm:$0xff]  }
 0x6b3   :  { %v16332_v13 = vpop.eup %16331 }
 0x6b4   :  { %v17353_v23 = vadd.f32 %v6598_v26, %v6597_v38  ;;  %v15630_v26 = vld [vmem:[#allocation9 + $0xe8] ss:$16 sps:$4 sm:$0xff]   ;;  %v15638_v38 = vld [vmem:[#allocation10 + $0x10c] ss:$16 sps:$4 sm:$0xff]  }
 0x6b6   :  { %16333 = vtanh.f32 %v17353_v23 }
 0x6c0   :  { %v16334_v3 = vpop.eup %16333 }
 0x6c1   :  { %v6601_v44 = vmul.f32 %v16334_v3, %v16332_v13 }
 0x6c3   :  { %v6602_v25 = vpack.c.bf16 %v6601_v44, %v6601_v44 }
 0x6c5   :  { %v6604_v7 = vrot.slane %v6602_v25, 4  ;;  %8044 = vmatmul.mubr.bf16.vlgmr.msra.gmra.mrb[60].mxu0 %v6602_v25  ;;  %8085 = vmatmul.mubr.bf16.vlgmr.msra.gmra.mrb[92].mxu1 %v6602_v25 }
 0x6c6   :  { %8342 = vmatpush1.bf16.msra.mxu0 %v15585_v30  ;;  %8383 = vmatpush1.bf16.msra.mxu1 %v15588_v60  ;;  %v15633_v30 = vld [vmem:[#allocation10 + $0x100] ss:$16 sps:$4 sm:$0xff]   ;;  %v15636_v60 = vld [vmem:[#allocation10 + $0x108] ss:$16 sps:$4 sm:$0xff]  }
 0x6c7   :  { %6606 = vst [vmem:[#allocation3 + $0x10] sm:$0xf0] %v6604_v7  ;;  %8343 = vmatprep.subr.bf16.mxu0 %v15593_v40  ;;  %8384 = vmatprep.subr.bf16.mxu1 %v15596_v62  ;;  %v15641_v62 = vld [vmem:[#allocation10 + $0x124] ss:$16 sps:$4 sm:$0xff]   ;;  %v15644_v7 = vld [vmem:[#allocation10 + $0x12c] ss:$16 sps:$4 sm:$0xff]  }
 0x6c8   :  { %8373 = vmatprep.mubr.bf16.mxu0 %v18143_v15  ;;  %8414 = vmatprep.mubr.bf16.mxu1 %v18143_v15 }
 0x6ca   :  { %8344 = vmatpush1.bf16.msra.mxu0 %v15591_v17  ;;  %8385 = vmatpush1.bf16.msra.mxu1 %v15594_v19 }
 0x6cb   :  { %8345 = vmatprep.subr.bf16.mxu0 %v15599_v42  ;;  %8386 = vmatprep.subr.bf16.mxu1 %v15602_v48  ;;  %v15639_v42 = vld [vmem:[#allocation10 + $0x120] ss:$16 sps:$4 sm:$0xff]   ;;  %v15642_v48 = vld [vmem:[#allocation10 + $0x128] ss:$16 sps:$4 sm:$0xff]  }
 0x6ce   :  { %8346 = vmatpush1.bf16.msra.mxu0 %v15597_v21  ;;  %8387 = vmatpush1.bf16.msra.mxu1 %v15600_v32  ;;  %v8123_v3 = vld [vmem:[#allocation3 + $0x10] sm:$0xf0]  ;;  %v15650_v32 = vld [vmem:[#allocation10 + $0x14c] ss:$16 sps:$4 sm:$0xff]  }
 0x6cf   :  { %8347 = vmatprep.subr.bf16.mxu0 %v15605_v5  ;;  %8388 = vmatprep.subr.bf16.mxu1 %v15608_v46  ;;  %v8179_v40 = vrot.slane %v8123_v3, 4  ;;  %v15647_v21 = vld [vmem:[#allocation10 + $0x144] ss:$16 sps:$4 sm:$0xff]   ;;  %v15645_v5 = vld [vmem:[#allocation10 + $0x140] ss:$16 sps:$4 sm:$0xff]  }
 0x6d0   :  { %v15648_v46 = vld [vmem:[#allocation10 + $0x148] ss:$16 sps:$4 sm:$0xff]   ;;  %v15698_v3 = vld [vmem:[#allocation9 + $0x14c] ss:$16 sps:$4 sm:$0xff]  }
 0x6d2   :  { %8348 = vmatpush1.bf16.msra.mxu0 %v15603_v58  ;;  %8389 = vmatpush1.bf16.msra.mxu1 %v15606_v14  ;;  %v15656_v58 = vld [vmem:[#allocation10 + $0x16c] ss:$16 sps:$4 sm:$0xff]  }
 0x6d3   :  { %8349 = vmatprep.subr.bf16.mxu0 %v15611_v18  ;;  %8390 = vmatprep.subr.bf16.mxu1 %v15614_v22  ;;  %v15651_v22 = vld [vmem:[#allocation10 + $0x160] ss:$16 sps:$4 sm:$0xff]  }
 0x6d4   :  { %v7130_v35 = vpop.f32.mrb[52].mxu0  ;;  %v7171_v37 = vpop.f32.mrb[84].mxu1 }
 0x6d5   :  { %v14309_v43 = vadd.f32 %v7130_v35, %v6645_v20  ;;  %v7132_v45 = vpop.f32.mrb[53].mxu0  ;;  %v7173_v47 = vpop.f32.mrb[85].mxu1  ;;  %v14311_v57 = vadd.f32 %v7171_v37, %v6653_v52  ;;  %v15654_v20 = vld [vmem:[#allocation10 + $0x168] ss:$16 sps:$4 sm:$0xff]  }
 0x6d6   :  { %v14310_v63 = vadd.f32 %v7132_v45, %v6649_v27  ;;  %v7134_v51 = vpop.f32.mrb[54].mxu0  ;;  %v7175_v59 = vpop.f32.mrb[86].mxu1  ;;  %8350 = vmatpush1.bf16.msra.mxu0 %v15609_v29  ;;  %8391 = vmatpush1.bf16.msra.mxu1 %v15612_v31  ;;  %v14312_v16 = vadd.f32 %v7173_v47, %v6657_v36  ;;  %v15659_v29 = vld [vmem:[#allocation10 + $0x184] ss:$16 sps:$4 sm:$0xff]   ;;  %v15662_v31 = vld [vmem:[#allocation10 + $0x18c] ss:$16 sps:$4 sm:$0xff]  }
 0x6d7   :  { %v13619_v61 = vmul.f32 -1.442695, %v14309_v43  ;;  %v7135_v2 = vpop.f32.mrb[55].mxu0  ;;  %v7176_v4 = vpop.f32.mrb[87].mxu1  ;;  %8351 = vmatprep.subr.bf16.mxu0 %v15617_v39  ;;  %8392 = vmatprep.subr.bf16.mxu1 %v15620_v41  ;;  %v13621_v13 = vmul.f32 -1.442695, %v14311_v57 }
 0x6d8   :  { %v13620_v8 = vmul.f32 -1.442695, %v14310_v63  ;;  %v15657_v43 = vld [vmem:[#allocation10 + $0x180] ss:$16 sps:$4 sm:$0xff]   ;;  %v15660_v45 = vld [vmem:[#allocation10 + $0x188] ss:$16 sps:$4 sm:$0xff]  }
 0x6d9   :  { %16335 = vpow2.f32 %v13619_v61  ;;  %v15665_v47 = vld [vmem:[#allocation10 + $0x1a4] ss:$16 sps:$4 sm:$0xff]   ;;  %v15668_v63 = vld [vmem:[#allocation10 + $0x1ac] ss:$16 sps:$4 sm:$0xff]   ;;  %v15663_v59 = vld [vmem:[#allocation10 + $0x1a0] ss:$16 sps:$4 sm:$0xff]  }
 0x6da   :  { %16337 = vpow2.f32 %v13620_v8  ;;  %8352 = vmatpush1.bf16.msra.mxu0 %v15615_v10  ;;  %8393 = vmatpush1.bf16.msra.mxu1 %v15618_v6  ;;  %v15666_v10 = vld [vmem:[#allocation10 + $0x1a8] ss:$16 sps:$4 sm:$0xff]   ;;  %v15674_v61 = vld [vmem:[#allocation10 + $0x1cc] ss:$16 sps:$4 sm:$0xff]   ;;  %v15669_v2 = vld [vmem:[#allocation10 + $0x1c0] ss:$16 sps:$4 sm:$0xff]  }
 0x6db   :  { %8353 = vmatprep.subr.bf16.mxu0 %v15623_v9  ;;  %8394 = vmatprep.subr.bf16.mxu1 %v15626_v0  ;;  %16339 = vtanh.f32 %v14312_v16  ;;  %v15672_v4 = vld [vmem:[#allocation10 + $0x1c8] ss:$16 sps:$4 sm:$0xff]   ;;  %v15677_v6 = vld [vmem:[#allocation10 + $0x1e4] ss:$16 sps:$4 sm:$0xff]   ;;  %v15680_v8 = vld [vmem:[#allocation10 + $0x1ec] ss:$16 sps:$4 sm:$0xff]  }
 0x6dc   :  { %16341 = vpow2.f32 %v13621_v13  ;;  %v15675_v9 = vld [vmem:[#allocation10 + $0x1e0] ss:$16 sps:$4 sm:$0xff]   ;;  %v15678_v0 = vld [vmem:[#allocation10 + $0x1e8] ss:$16 sps:$4 sm:$0xff]   ;;  %v15692_v16 = vld [vmem:[#allocation9 + $0x12c] ss:$16 sps:$4 sm:$0xff]  }
 0x6dd   :  { %v15684_v57 = vld [vmem:[#allocation9 + $0x108] ss:$16 sps:$4 sm:$0xff]   ;;  %v15695_v13 = vld [vmem:[#allocation9 + $0x144] ss:$16 sps:$4 sm:$0xff]  }
 0x6de   :  { %8354 = vmatpush1.bf16.msra.mxu0 %v15621_v1  ;;  %8395 = vmatpush1.bf16.msra.mxu1 %v15624_v34  ;;  %v15683_v1 = vld [vmem:[#allocation9 + $0x104] ss:$16 sps:$4 sm:$0xff]   ;;  %v15686_v34 = vld [vmem:[#allocation9 + $0x10c] ss:$16 sps:$4 sm:$0xff]  }
 0x6df   :  { %8355 = vmatprep.subr.bf16.mxu0 %v15629_v56  ;;  %8396 = vmatprep.subr.bf16.mxu1 %v15632_v28  ;;  %v15681_v28 = vld [vmem:[#allocation9 + $0x100] ss:$16 sps:$4 sm:$0xff]  }
 0x6e2   :  { %8356 = vmatpush1.bf16.msra.mxu0 %v15627_v50  ;;  %8397 = vmatpush1.bf16.msra.mxu1 %v15630_v26  ;;  %v15689_v26 = vld [vmem:[#allocation9 + $0x124] ss:$16 sps:$4 sm:$0xff]  }
 0x6e3   :  { %v16336_v44 = vpop.eup %16335  ;;  %8615 = vmatprep.subr.bf16.mxu0 %v15635_v24  ;;  %8656 = vmatprep.subr.bf16.mxu1 %v15638_v38  ;;  %v15687_v24 = vld [vmem:[#allocation9 + $0x120] ss:$16 sps:$4 sm:$0xff]   ;;  %v15690_v38 = vld [vmem:[#allocation9 + $0x128] ss:$16 sps:$4 sm:$0xff]  }
 0x6e4   :  { %v7191_v25 = vadd.f32 1.0, %v16336_v44  ;;  %v16338_v17 = vpop.eup %16337  ;;  %v15693_v44 = vld [vmem:[#allocation9 + $0x140] ss:$16 sps:$4 sm:$0xff]  }
 0x6e5   :  { %v7192_v19 = vadd.f32 1.0, %v16338_v17  ;;  %8374 = vmatmul.mubr.bf16.vlgmr.msra.gmra.mrb[64].mxu0 %v8179_v40  ;;  %8415 = vmatmul.mubr.bf16.vlgmr.msra.gmra.mrb[96].mxu1 %v8179_v40  ;;  %v16340_v14 = vpop.eup %16339  ;;  %v13622_v40 = vld [vmem:[%s18007_s4 + $0x8] sm:$0xf]  ;;  %v15707_v17 = vld [vmem:[#allocation9 + $0x184] ss:$16 sps:$4 sm:$0xff]  }
 0x6e6   :  { %16343 = vrcp.f32 %v7191_v25  ;;  %8616 = vmatpush1.bf16.msra.mxu0 %v15633_v30  ;;  %8657 = vmatpush1.bf16.msra.mxu1 %v15636_v60  ;;  %v16342_v18 = vpop.eup %16341  ;;  %v15696_v30 = vld [vmem:[#allocation9 + $0x148] ss:$16 sps:$4 sm:$0xff]   ;;  %v15701_v60 = vld [vmem:[#allocation9 + $0x164] ss:$16 sps:$4 sm:$0xff]   ;;  %v15704_v25 = vld [vmem:[#allocation9 + $0x16c] ss:$16 sps:$4 sm:$0xff]  }
 0x6e7   :  { %16345 = vrcp.f32 %v7192_v19  ;;  %8617 = vmatprep.subr.bf16.mxu0 %v15641_v62  ;;  %8658 = vmatprep.subr.bf16.mxu1 %v15644_v7  ;;  %v7193_v39 = vadd.f32 1.0, %v16342_v18  ;;  %v15699_v62 = vld [vmem:[#allocation9 + $0x160] ss:$16 sps:$4 sm:$0xff]   ;;  %v15702_v7 = vld [vmem:[#allocation9 + $0x168] ss:$16 sps:$4 sm:$0xff]  }
 0x6e8   :  { %8647 = vmatprep.mubr.bf16.mxu0 %v18143_v15  ;;  %8688 = vmatprep.mubr.bf16.mxu1 %v18143_v15  ;;  %v15710_v19 = vld [vmem:[#allocation9 + $0x18c] ss:$16 sps:$4 sm:$0xff]  }
 0x6e9   :  { %16347 = vrcp.f32 %v7193_v39 }
 0x6ea   :  { %8618 = vmatpush1.bf16.msra.mxu0 %v15639_v42  ;;  %8659 = vmatpush1.bf16.msra.mxu1 %v15642_v48  ;;  %v7246_v42 = vrot.slane %v13622_v40, %v16872_v11  ;;  %v7250_v48 = vrot.slane %v13622_v40, %v16874_v12 }
 0x6eb   :  { %8619 = vmatprep.subr.bf16.mxu0 %v15647_v21  ;;  %8660 = vmatprep.subr.bf16.mxu1 %v15650_v32  ;;  %v15705_v21 = vld [vmem:[#allocation9 + $0x180] ss:$16 sps:$4 sm:$0xff]   ;;  %v15708_v32 = vld [vmem:[#allocation9 + $0x188] ss:$16 sps:$4 sm:$0xff]  }
 0x6ee   :  { %8620 = vmatpush1.bf16.msra.mxu0 %v15645_v5  ;;  %8661 = vmatpush1.bf16.msra.mxu1 %v15648_v46 }
 0x6ef   :  { %8621 = vmatprep.subr.bf16.mxu0 %v15653_v55  ;;  %8662 = vmatprep.subr.bf16.mxu1 %v15656_v58  ;;  %v15713_v55 = vld [vmem:[#allocation9 + $0x1a4] ss:$16 sps:$4 sm:$0xff]   ;;  %v15716_v58 = vld [vmem:[#allocation9 + $0x1ac] ss:$16 sps:$4 sm:$0xff]  }
 0x6f0   :  { %v16344_v27 = vpop.eup %16343 }
 0x6f1   :  { %v7202_v35 = vmul.f32 %v16344_v27, %v16340_v14  ;;  %v16346_v37 = vpop.eup %16345 }
 0x6f2   :  { %v7201_v41 = vmul.f32 %v16346_v37, %v17328_v33  ;;  %8622 = vmatpush1.bf16.msra.mxu0 %v15651_v22  ;;  %8663 = vmatpush1.bf16.msra.mxu1 %v15654_v20  ;;  %v15671_v33 = vld [vmem:[#allocation10 + $0x1c4] ss:$16 sps:$4 sm:$0xff]  }
 0x6f3   :  { %8623 = vmatprep.subr.bf16.mxu0 %v15659_v29  ;;  %8664 = vmatprep.subr.bf16.mxu1 %v15662_v31  ;;  %v16348_v52 = vpop.eup %16347  ;;  %v15711_v31 = vld [vmem:[#allocation9 + $0x1a0] ss:$16 sps:$4 sm:$0xff]  }
 0x6f4   :  { %v17368_v51 = vadd.f32 %v7202_v35, %v7201_v41  ;;  %v15714_v41 = vld [vmem:[#allocation9 + $0x1a8] ss:$16 sps:$4 sm:$0xff]  }
 0x6f6   :  { %16349 = vtanh.f32 %v17368_v51  ;;  %8624 = vmatpush1.bf16.msra.mxu0 %v15657_v43  ;;  %8665 = vmatpush1.bf16.msra.mxu1 %v15660_v45  ;;  %v15719_v45 = vld [vmem:[#allocation9 + $0x1c4] ss:$16 sps:$4 sm:$0xff]  }
 0x6f7   :  { %8625 = vmatprep.subr.bf16.mxu0 %v15665_v47  ;;  %8666 = vmatprep.subr.bf16.mxu1 %v15668_v63  ;;  %v15722_v47 = vld [vmem:[#allocation9 + $0x1cc] ss:$16 sps:$4 sm:$0xff]   ;;  %v7254_v63 = vrot.slane %v13622_v40, %v16906_v53 }
 0x6fa   :  { %8626 = vmatpush1.bf16.msra.mxu0 %v15663_v59  ;;  %8667 = vmatpush1.bf16.msra.mxu1 %v15666_v10  ;;  %v15717_v59 = vld [vmem:[#allocation9 + $0x1c0] ss:$16 sps:$4 sm:$0xff]   ;;  %v15720_v10 = vld [vmem:[#allocation9 + $0x1c8] ss:$16 sps:$4 sm:$0xff]  }
 0x6fb   :  { %8627 = vmatprep.subr.bf16.mxu0 %v15671_v33  ;;  %8668 = vmatprep.subr.bf16.mxu1 %v15674_v61  ;;  %v7258_v33 = vrot.slane %v13622_v40, %v16908_v54  ;;  %v15725_v61 = vld [vmem:[#allocation9 + $0x1e4] ss:$16 sps:$4 sm:$0xff]   ;;  %v15752_v40 = vld [vmem:[#allocation10 + $0x26c] ss:$16 sps:$4 sm:$0xff]  }
 0x6fe   :  { %8628 = vmatpush1.bf16.msra.mxu0 %v15669_v2  ;;  %8669 = vmatpush1.bf16.msra.mxu1 %v15672_v4  ;;  %v15728_v2 = vld [vmem:[#allocation9 + $0x1ec] ss:$16 sps:$4 sm:$0xff]  }
 0x6ff   :  { %8629 = vmatprep.subr.bf16.mxu0 %v15677_v6  ;;  %8670 = vmatprep.subr.bf16.mxu1 %v15680_v8  ;;  %v15723_v6 = vld [vmem:[#allocation9 + $0x1e0] ss:$16 sps:$4 sm:$0xff]   ;;  %v15726_v8 = vld [vmem:[#allocation9 + $0x1e8] ss:$16 sps:$4 sm:$0xff]  }
 0x700   :  { %v16350_v36 = vpop.eup %16349 }
 0x701   :  { %v7205_v56 = vmul.f32 %v16350_v36, %v16348_v52  ;;  %v15734_v52 = vld [vmem:[#allocation10 + $0x20c] ss:$16 sps:$4 sm:$0xff]   ;;  %v15729_v36 = vld [vmem:[#allocation10 + $0x200] ss:$16 sps:$4 sm:$0xff]  }
 0x702   :  { %8630 = vmatpush1.bf16.msra.mxu0 %v15675_v9  ;;  %8671 = vmatpush1.bf16.msra.mxu1 %v15678_v0  ;;  %v15731_v0 = vld [vmem:[#allocation10 + $0x204] ss:$16 sps:$4 sm:$0xff]  }
 0x703   :  { %v7206_v50 = vpack.c.bf16 %v7205_v56, %v7205_v56  ;;  %8945 = vmatprep.subr.bf16.mxu0 %v15683_v1  ;;  %8986 = vmatprep.subr.bf16.mxu1 %v15686_v34  ;;  %v15732_v56 = vld [vmem:[#allocation10 + $0x208] ss:$16 sps:$4 sm:$0xff]  }
 0x705   :  { %7207 = vst [vmem:[#allocation3 + $0x10] sm:$0xf] %v7206_v50  ;;  %8648 = vmatmul.mubr.bf16.vlgmr.msra.gmra.mrb[64].mxu0 %v7206_v50  ;;  %8689 = vmatmul.mubr.bf16.vlgmr.msra.gmra.mrb[96].mxu1 %v7206_v50  ;;  %v15740_v50 = vld [vmem:[#allocation10 + $0x22c] ss:$16 sps:$4 sm:$0xff]  }
 0x706   :  { %8946 = vmatpush1.bf16.msra.mxu0 %v15681_v28  ;;  %8987 = vmatpush1.bf16.msra.mxu1 %v15684_v57  ;;  %v15737_v57 = vld [vmem:[#allocation10 + $0x224] ss:$16 sps:$4 sm:$0xff]  }
 0x707   :  { %8947 = vmatprep.subr.bf16.mxu0 %v15689_v26  ;;  %8988 = vmatprep.subr.bf16.mxu1 %v15692_v16 }
 0x708   :  { %8977 = vmatprep.mubr.bf16.mxu0 %v18143_v15  ;;  %9018 = vmatprep.mubr.bf16.mxu1 %v18143_v15 }
 0x70a   :  { %8948 = vmatpush1.bf16.msra.mxu0 %v15687_v24  ;;  %8989 = vmatpush1.bf16.msra.mxu1 %v15690_v38  ;;  %v15735_v38 = vld [vmem:[#allocation10 + $0x220] ss:$16 sps:$4 sm:$0xff]  }
 0x70b   :  { %8949 = vmatprep.subr.bf16.mxu0 %v15695_v13  ;;  %8990 = vmatprep.subr.bf16.mxu1 %v15698_v3  ;;  %v15738_v13 = vld [vmem:[#allocation10 + $0x228] ss:$16 sps:$4 sm:$0xff]   ;;  %v15743_v3 = vld [vmem:[#allocation10 + $0x244] ss:$16 sps:$4 sm:$0xff]  }
 0x70c   :  { %v8730_v16 = vld [vmem:[#allocation3 + $0x10] sm:$0xf] }
 0x70e   :  { %8950 = vmatpush1.bf16.msra.mxu0 %v15693_v44  ;;  %8991 = vmatpush1.bf16.msra.mxu1 %v15696_v30  ;;  %v15746_v44 = vld [vmem:[#allocation10 + $0x24c] ss:$16 sps:$4 sm:$0xff]   ;;  %v15741_v30 = vld [vmem:[#allocation10 + $0x240] ss:$16 sps:$4 sm:$0xff]  }
 0x70f   :  { %8951 = vmatprep.subr.bf16.mxu0 %v15701_v60  ;;  %8992 = vmatprep.subr.bf16.mxu1 %v15704_v25  ;;  %v15744_v60 = vld [vmem:[#allocation10 + $0x248] ss:$16 sps:$4 sm:$0xff]   ;;  %v15749_v25 = vld [vmem:[#allocation10 + $0x264] ss:$16 sps:$4 sm:$0xff]  }
 0x712   :  { %8952 = vmatpush1.bf16.msra.mxu0 %v15699_v62  ;;  %8993 = vmatpush1.bf16.msra.mxu1 %v15702_v7 }
 0x713   :  { %8953 = vmatprep.subr.bf16.mxu0 %v15707_v17  ;;  %8994 = vmatprep.subr.bf16.mxu1 %v15710_v19  ;;  %v15747_v17 = vld [vmem:[#allocation10 + $0x260] ss:$16 sps:$4 sm:$0xff]   ;;  %v15750_v19 = vld [vmem:[#allocation10 + $0x268] ss:$16 sps:$4 sm:$0xff]  }
 0x714   :  { %v7734_v5 = vpop.f32.mrb[56].mxu0  ;;  %v7775_v46 = vpop.f32.mrb[88].mxu1 }
 0x715   :  { %v14313_v14 = vadd.f32 %v7734_v5, %v7246_v42  ;;  %v7736_v18 = vpop.f32.mrb[57].mxu0  ;;  %v7777_v22 = vpop.f32.mrb[89].mxu1  ;;  %v14315_v4 = vadd.f32 %v7775_v46, %v7254_v63  ;;  %v15779_v63 = vld [vmem:[#allocation10 + $0x4] ss:$16 sps:$4 sm:$0xff]  }
 0x716   :  { %v14314_v20 = vadd.f32 %v7736_v18, %v7250_v48  ;;  %v7738_v27 = vpop.f32.mrb[58].mxu0  ;;  %v7779_v29 = vpop.f32.mrb[90].mxu1  ;;  %8954 = vmatpush1.bf16.msra.mxu0 %v15705_v21  ;;  %8995 = vmatpush1.bf16.msra.mxu1 %v15708_v32  ;;  %v14316_v9 = vadd.f32 %v7777_v22, %v7258_v33  ;;  %v15755_v48 = vld [vmem:[#allocation10 + $0x284] ss:$16 sps:$4 sm:$0xff]   ;;  %v15758_v21 = vld [vmem:[#allocation10 + $0x28c] ss:$16 sps:$4 sm:$0xff]  }
 0x717   :  { %v13687_v35 = vmul.f32 -1.442695, %v14313_v14  ;;  %v7739_v37 = vpop.f32.mrb[59].mxu0  ;;  %v7780_v39 = vpop.f32.mrb[91].mxu1  ;;  %8955 = vmatprep.subr.bf16.mxu0 %v15713_v55  ;;  %8996 = vmatprep.subr.bf16.mxu1 %v15716_v58  ;;  %v13689_v1 = vmul.f32 -1.442695, %v14315_v4 }
 0x718   :  { %v13688_v43 = vmul.f32 -1.442695, %v14314_v20  ;;  %v15753_v58 = vld [vmem:[#allocation10 + $0x280] ss:$16 sps:$4 sm:$0xff]   ;;  %v15756_v14 = vld [vmem:[#allocation10 + $0x288] ss:$16 sps:$4 sm:$0xff]  }
 0x719   :  { %16351 = vpow2.f32 %v13687_v35  ;;  %v15761_v18 = vld [vmem:[#allocation10 + $0x2a4] ss:$16 sps:$4 sm:$0xff]   ;;  %v15764_v22 = vld [vmem:[#allocation10 + $0x2ac] ss:$16 sps:$4 sm:$0xff]   ;;  %v15759_v27 = vld [vmem:[#allocation10 + $0x2a0] ss:$16 sps:$4 sm:$0xff]  }
 0x71a   :  { %16353 = vpow2.f32 %v13688_v43  ;;  %8956 = vmatpush1.bf16.msra.mxu0 %v15711_v31  ;;  %8997 = vmatpush1.bf16.msra.mxu1 %v15714_v41  ;;  %v15762_v29 = vld [vmem:[#allocation10 + $0x2a8] ss:$16 sps:$4 sm:$0xff]   ;;  %v15770_v31 = vld [vmem:[#allocation10 + $0x2cc] ss:$16 sps:$4 sm:$0xff]   ;;  %v15765_v35 = vld [vmem:[#allocation10 + $0x2c0] ss:$16 sps:$4 sm:$0xff]  }
 0x71b   :  { %8957 = vmatprep.subr.bf16.mxu0 %v15719_v45  ;;  %8998 = vmatprep.subr.bf16.mxu1 %v15722_v47  ;;  %16355 = vtanh.f32 %v14316_v9  ;;  %v15768_v37 = vld [vmem:[#allocation10 + $0x2c8] ss:$16 sps:$4 sm:$0xff]   ;;  %v15773_v39 = vld [vmem:[#allocation10 + $0x2e4] ss:$16 sps:$4 sm:$0xff]   ;;  %v15776_v41 = vld [vmem:[#allocation10 + $0x2ec] ss:$16 sps:$4 sm:$0xff]  }
 0x71c   :  { %16357 = vpow2.f32 %v13689_v1  ;;  %v15771_v43 = vld [vmem:[#allocation10 + $0x2e0] ss:$16 sps:$4 sm:$0xff]   ;;  %v15774_v45 = vld [vmem:[#allocation10 + $0x2e8] ss:$16 sps:$4 sm:$0xff]   ;;  %v15791_v1 = vld [vmem:[#allocation10 + $0x44] ss:$16 sps:$4 sm:$0xff]  }
 0x71e   :  { %8958 = vmatpush1.bf16.msra.mxu0 %v15717_v59  ;;  %8999 = vmatpush1.bf16.msra.mxu1 %v15720_v10  ;;  %v15782_v59 = vld [vmem:[#allocation10 + $0xc] ss:$16 sps:$4 sm:$0xff]  }
 0x71f   :  { %8959 = vmatprep.subr.bf16.mxu0 %v15725_v61  ;;  %9000 = vmatprep.subr.bf16.mxu1 %v15728_v2  ;;  %v15777_v61 = vld [vmem:[#allocation10] ss:$16 sps:$4 sm:$0xff]   ;;  %v15780_v2 = vld [vmem:[#allocation10 + $0x8] ss:$16 sps:$4 sm:$0xff]  }
 0x722   :  { %8960 = vmatpush1.bf16.msra.mxu0 %v15723_v6  ;;  %9001 = vmatpush1.bf16.msra.mxu1 %v15726_v8  ;;  %v15785_v6 = vld [vmem:[#allocation10 + $0x24] ss:$16 sps:$4 sm:$0xff]   ;;  %v15788_v8 = vld [vmem:[#allocation10 + $0x2c] ss:$16 sps:$4 sm:$0xff]  }
 0x723   :  { %v16352_v34 = vpop.eup %16351  ;;  %9219 = vmatprep.subr.bf16.mxu0 %v15731_v0  ;;  %9260 = vmatprep.subr.bf16.mxu1 %v15734_v52  ;;  %v15783_v0 = vld [vmem:[#allocation10 + $0x20] ss:$16 sps:$4 sm:$0xff]   ;;  %v15786_v52 = vld [vmem:[#allocation10 + $0x28] ss:$16 sps:$4 sm:$0xff]  }
 0x724   :  { %v7795_v28 = vadd.f32 1.0, %v16352_v34  ;;  %v16354_v26 = vpop.eup %16353  ;;  %v15794_v34 = vld [vmem:[#allocation10 + $0x4c] ss:$16 sps:$4 sm:$0xff]  }
 0x725   :  { %v7796_v24 = vadd.f32 1.0, %v16354_v26  ;;  %8978 = vmatmul.mubr.bf16.vlgmr.msra.gmra.mrb[68].mxu0 %v8730_v16  ;;  %9019 = vmatmul.mubr.bf16.vlgmr.msra.gmra.mrb[100].mxu1 %v8730_v16  ;;  %v16356_v62 = vpop.eup %16355  ;;  %v15798_v26 = vld [vmem:[#allocation10 + $0x68] ss:$16 sps:$4 sm:$0xff]   ;;  %v15803_v16 = vld [vmem:[#allocation10 + $0x84] ss:$16 sps:$4 sm:$0xff]  }
 0x726   :  { %16359 = vrcp.f32 %v7795_v28  ;;  %9220 = vmatpush1.bf16.msra.mxu0 %v15729_v36  ;;  %9261 = vmatpush1.bf16.msra.mxu1 %v15732_v56  ;;  %v16358_v7 = vpop.eup %16357  ;;  %v15789_v36 = vld [vmem:[#allocation10 + $0x40] ss:$16 sps:$4 sm:$0xff]   ;;  %v15792_v56 = vld [vmem:[#allocation10 + $0x48] ss:$16 sps:$4 sm:$0xff]   ;;  %v15797_v28 = vld [vmem:[#allocation10 + $0x64] ss:$16 sps:$4 sm:$0xff]  }
 0x727   :  { %16361 = vrcp.f32 %v7796_v24  ;;  %9221 = vmatprep.subr.bf16.mxu0 %v15737_v57  ;;  %9262 = vmatprep.subr.bf16.mxu1 %v15740_v50  ;;  %v7797_v46 = vadd.f32 1.0, %v16358_v7  ;;  %v15800_v57 = vld [vmem:[#allocation10 + $0x6c] ss:$16 sps:$4 sm:$0xff]   ;;  %v15795_v50 = vld [vmem:[#allocation10 + $0x60] ss:$16 sps:$4 sm:$0xff]  }
 0x728   :  { %9251 = vmatprep.mubr.bf16.mxu0 %v18143_v15  ;;  %9292 = vmatprep.mubr.bf16.mxu1 %v18143_v15  ;;  %v15806_v24 = vld [vmem:[#allocation10 + $0x8c] ss:$16 sps:$4 sm:$0xff]   ;;  %v15816_v7 = vld [vmem:[#allocation10 + $0xc8] ss:$16 sps:$4 sm:$0xff]  }
 0x729   :  { %16363 = vrcp.f32 %v7797_v46 }
 0x72a   :  { %9222 = vmatpush1.bf16.msra.mxu0 %v15735_v38  ;;  %9263 = vmatpush1.bf16.msra.mxu1 %v15738_v13  ;;  %v15801_v38 = vld [vmem:[#allocation10 + $0x80] ss:$16 sps:$4 sm:$0xff]   ;;  %v15804_v13 = vld [vmem:[#allocation10 + $0x88] ss:$16 sps:$4 sm:$0xff]  }
 0x72b   :  { %9223 = vmatprep.subr.bf16.mxu0 %v15743_v3  ;;  %9264 = vmatprep.subr.bf16.mxu1 %v15746_v44  ;;  %v15809_v3 = vld [vmem:[#allocation10 + $0xa4] ss:$16 sps:$4 sm:$0xff]   ;;  %v15812_v44 = vld [vmem:[#allocation10 + $0xac] ss:$16 sps:$4 sm:$0xff]  }
 0x72e   :  { %9224 = vmatpush1.bf16.msra.mxu0 %v15741_v30  ;;  %9265 = vmatpush1.bf16.msra.mxu1 %v15744_v60  ;;  %v15807_v30 = vld [vmem:[#allocation10 + $0xa0] ss:$16 sps:$4 sm:$0xff]   ;;  %v15810_v60 = vld [vmem:[#allocation10 + $0xa8] ss:$16 sps:$4 sm:$0xff]  }
 0x72f   :  { %9225 = vmatprep.subr.bf16.mxu0 %v15749_v25  ;;  %9266 = vmatprep.subr.bf16.mxu1 %v15752_v40  ;;  %v15815_v25 = vld [vmem:[#allocation10 + $0xc4] ss:$16 sps:$4 sm:$0xff]   ;;  %v15818_v40 = vld [vmem:[#allocation10 + $0xcc] ss:$16 sps:$4 sm:$0xff]  }
 0x730   :  { %v16360_v42 = vpop.eup %16359 }
 0x731   :  { %v7806_v32 = vmul.f32 %v16360_v42, %v16356_v62  ;;  %v16362_v5 = vpop.eup %16361  ;;  %v15813_v62 = vld [vmem:[#allocation10 + $0xc0] ss:$16 sps:$4 sm:$0xff]  }
 0x732   :  { %v7805_v55 = vmul.f32 %v16362_v5, %v17343_v49  ;;  %9226 = vmatpush1.bf16.msra.mxu0 %v15747_v17  ;;  %9267 = vmatpush1.bf16.msra.mxu1 %v15750_v19  ;;  %v15767_v49 = vld [vmem:[#allocation10 + $0x2c4] ss:$16 sps:$4 sm:$0xff]   ;;  %v15824_v19 = vld [vmem:[#allocation10 + $0xec] ss:$16 sps:$4 sm:$0xff]   ;;  %v15819_v42 = vld [vmem:[#allocation10 + $0xe0] ss:$16 sps:$4 sm:$0xff]  }
 0x733   :  { %9227 = vmatprep.subr.bf16.mxu0 %v15755_v48  ;;  %9268 = vmatprep.subr.bf16.mxu1 %v15758_v21  ;;  %v16364_v47 = vpop.eup %16363  ;;  %v15821_v17 = vld [vmem:[#allocation10 + $0xe4] ss:$16 sps:$4 sm:$0xff]   ;;  %v15822_v48 = vld [vmem:[#allocation10 + $0xe8] ss:$16 sps:$4 sm:$0xff]  }
 0x734   :  { %v17383_v20 = vadd.f32 %v7806_v32, %v7805_v55  ;;  %v15827_v21 = vld [vmem:[#allocation9 + $0x4] ss:$16 sps:$4 sm:$0xff]   ;;  %v15830_v32 = vld [vmem:[#allocation9 + $0xc] ss:$16 sps:$4 sm:$0xff]  }
 0x735   :  { %v18205_v55 = vld [vmem:[#allocation26_spill] sm:$0xff] }
 0x736   :  { %16365 = vtanh.f32 %v17383_v20  ;;  %9228 = vmatpush1.bf16.msra.mxu0 %v15753_v58  ;;  %9269 = vmatpush1.bf16.msra.mxu1 %v15756_v14  ;;  %v18206_v14 = vld [vmem:[#allocation38_spill] sm:$0xff] }
 0x737   :  { %9229 = vmatprep.subr.bf16.mxu0 %v15761_v18  ;;  %9270 = vmatprep.subr.bf16.mxu1 %v15764_v22 }
 0x73a   :  { %9230 = vmatpush1.bf16.msra.mxu0 %v15759_v27  ;;  %9271 = vmatpush1.bf16.msra.mxu1 %v15762_v29  ;;  %v18207_v29 = vld [vmem:[#allocation27_spill] sm:$0xff] }
 0x73b   :  { %9231 = vmatprep.subr.bf16.mxu0 %v15767_v49  ;;  %9272 = vmatprep.subr.bf16.mxu1 %v15770_v31  ;;  %v18208_v31 = vld [vmem:[#allocation39_spill] sm:$0xff] }
 0x73e   :  { %9232 = vmatpush1.bf16.msra.mxu0 %v15765_v35  ;;  %9273 = vmatpush1.bf16.msra.mxu1 %v15768_v37 }
 0x73f   :  { %9233 = vmatprep.subr.bf16.mxu0 %v15773_v39  ;;  %9274 = vmatprep.subr.bf16.mxu1 %v15776_v41 }
 0x740   :  { %v16366_v10 = vpop.eup %16365 }
 0x741   :  { %v7809_v33 = vmul.f32 %v16366_v10, %v16364_v47 }
 0x742   :  { %9234 = vmatpush1.bf16.msra.mxu0 %v15771_v43  ;;  %9275 = vmatpush1.bf16.msra.mxu1 %v15774_v45 }
 0x743   :  { %v7810_v4 = vpack.c.bf16 %v7809_v33, %v7809_v33  ;;  %9527 = vmatprep.subr.bf16.mxu0 %v15779_v63  ;;  %9568 = vmatprep.subr.bf16.mxu1 %v15782_v59 }
 0x745   :  { %v7812_v9 = vrot.slane %v7810_v4, 4  ;;  %9252 = vmatmul.mubr.bf16.vlgmr.msra.gmra.mrb[68].mxu0 %v7810_v4  ;;  %9293 = vmatmul.mubr.bf16.vlgmr.msra.gmra.mrb[100].mxu1 %v7810_v4 }
 0x746   :  { %9528 = vmatpush1.bf16.msra.mxu0 %v15777_v61  ;;  %9569 = vmatpush1.bf16.msra.mxu1 %v15780_v2 }
 0x747   :  { %7814 = vst [vmem:[#allocation3 + $0x8] sm:$0xf0] %v7812_v9  ;;  %9529 = vmatprep.subr.bf16.mxu0 %v15785_v6  ;;  %9570 = vmatprep.subr.bf16.mxu1 %v15788_v8 }
 0x748   :  { %9559 = vmatprep.mubr.bf16.mxu0 %v18143_v15  ;;  %9600 = vmatprep.mubr.bf16.mxu1 %v18143_v15 }
 0x74a   :  { %9530 = vmatpush1.bf16.msra.mxu0 %v15783_v0  ;;  %9571 = vmatpush1.bf16.msra.mxu1 %v15786_v52 }
 0x74b   :  { %9531 = vmatprep.subr.bf16.mxu0 %v15791_v1  ;;  %9572 = vmatprep.subr.bf16.mxu1 %v15794_v34 }
 0x74e   :  { %9532 = vmatpush1.bf16.msra.mxu0 %v15789_v36  ;;  %9573 = vmatpush1.bf16.msra.mxu1 %v15792_v56 }
 0x74f   :  { %9533 = vmatprep.subr.bf16.mxu0 %v15797_v28  ;;  %9574 = vmatprep.subr.bf16.mxu1 %v15800_v57  ;;  %v15825_v28 = vld [vmem:[#allocation9] ss:$16 sps:$4 sm:$0xff]   ;;  %v15828_v57 = vld [vmem:[#allocation9 + $0x8] ss:$16 sps:$4 sm:$0xff]  }
 0x752   :  { %9534 = vmatpush1.bf16.msra.mxu0 %v15795_v50  ;;  %9575 = vmatpush1.bf16.msra.mxu1 %v15798_v26  ;;  %v17396_v26 = vld [vmem:[#allocation9 + $0x24] ss:$16 sps:$4 sm:$0xff]  }
 0x753   :  { %9535 = vmatprep.subr.bf16.mxu0 %v15803_v16  ;;  %9576 = vmatprep.subr.bf16.mxu1 %v15806_v24  ;;  %v17398_v16 = vld [vmem:[#allocation9 + $0x2c] ss:$16 sps:$4 sm:$0xff]   ;;  %v17402_v24 = vld [vmem:[#allocation9 + $0x28] ss:$16 sps:$4 sm:$0xff]  }
 0x756   :  { %9536 = vmatpush1.bf16.msra.mxu0 %v15801_v38  ;;  %9577 = vmatpush1.bf16.msra.mxu1 %v15804_v13  ;;  %v17406_v38 = vld [vmem:[#allocation9 + $0x44] ss:$16 sps:$4 sm:$0xff]   ;;  %v17408_v13 = vld [vmem:[#allocation9 + $0x4c] ss:$16 sps:$4 sm:$0xff]  }
 0x757   :  { %9537 = vmatprep.subr.bf16.mxu0 %v15809_v3  ;;  %9578 = vmatprep.subr.bf16.mxu1 %v15812_v44  ;;  %v17414_v3 = vld [vmem:[#allocation9 + $0x40] ss:$16 sps:$4 sm:$0xff]   ;;  %v17416_v44 = vld [vmem:[#allocation9 + $0x48] ss:$16 sps:$4 sm:$0xff]  }
 0x75a   :  { %9538 = vmatpush1.bf16.msra.mxu0 %v15807_v30  ;;  %9579 = vmatpush1.bf16.msra.mxu1 %v15810_v60  ;;  %v17420_v30 = vld [vmem:[#allocation9 + $0x64] ss:$16 sps:$4 sm:$0xff]   ;;  %v17422_v60 = vld [vmem:[#allocation9 + $0x6c] ss:$16 sps:$4 sm:$0xff]  }
 0x75b   :  { %9539 = vmatprep.subr.bf16.mxu0 %v15815_v25  ;;  %9580 = vmatprep.subr.bf16.mxu1 %v15818_v40  ;;  %v13725_v25 = vld [vmem:[%s18007_s4 + $0x4] sm:$0xf]  ;;  %v17429_v40 = vld [vmem:[#allocation9 + $0x60] ss:$16 sps:$4 sm:$0xff]  }
 0x75e   :  { %9540 = vmatpush1.bf16.msra.mxu0 %v15813_v62  ;;  %9581 = vmatpush1.bf16.msra.mxu1 %v15816_v7  ;;  %v17431_v62 = vld [vmem:[#allocation9 + $0x68] ss:$16 sps:$4 sm:$0xff]   ;;  %v17435_v7 = vld [vmem:[#allocation9 + $0x84] ss:$16 sps:$4 sm:$0xff]  }
 0x75f   :  { %9541 = vmatprep.subr.bf16.mxu0 %v15821_v17  ;;  %9582 = vmatprep.subr.bf16.mxu1 %v15824_v19  ;;  %v17437_v17 = vld [vmem:[#allocation9 + $0x8c] ss:$16 sps:$4 sm:$0xff]   ;;  %v8161_v19 = vrot.slane %v13725_v25, %v16872_v11 }
 0x762   :  { %9542 = vmatpush1.bf16.msra.mxu0 %v15819_v42  ;;  %9583 = vmatpush1.bf16.msra.mxu1 %v15822_v48  ;;  %v8165_v42 = vrot.slane %v13725_v25, %v16874_v12  ;;  %v17443_v48 = vld [vmem:[#allocation9 + $0x80] ss:$16 sps:$4 sm:$0xff]  }
 0x763   :  { %9857 = vmatprep.subr.bf16.mxu0 %v15827_v21  ;;  %9898 = vmatprep.subr.bf16.mxu1 %v15830_v32  ;;  %v17445_v21 = vld [vmem:[#allocation9 + $0x88] ss:$16 sps:$4 sm:$0xff]  }
 0x798   :  { %v8045_v5 = vpop.f32.mrb[60].mxu0  ;;  %v8086_v46 = vpop.f32.mrb[92].mxu1 }
 0x799   :  { %v8093_v58 = vadd.f32 %v8045_v5, %v18205_v55  ;;  %v8095_v18 = vadd.f32 %v8086_v46, %v18206_v14  ;;  %v8047_v22 = vpop.f32.mrb[61].mxu0  ;;  %v8088_v27 = vpop.f32.mrb[93].mxu1  ;;  %v17449_v46 = vld [vmem:[#allocation9 + $0xa4] ss:$16 sps:$4 sm:$0xff]   ;;  %v17451_v55 = vld [vmem:[#allocation9 + $0xac] ss:$16 sps:$4 sm:$0xff]  }
 0x79a   :  { %v8094_v49 = vadd.f32 %v8047_v22, %v18207_v29  ;;  %v8096_v35 = vadd.f32 %v8088_v27, %v18208_v31  ;;  %v8049_v37 = vpop.f32.mrb[62].mxu0  ;;  %v8090_v39 = vpop.f32.mrb[94].mxu1 }
 0x79b   :  { %v13722_v41 = vmul.f32 -1.442695, %v8093_v58  ;;  %v8050_v43 = vpop.f32.mrb[63].mxu0  ;;  %v8091_v45 = vpop.f32.mrb[95].mxu1  ;;  %v13724_v63 = vmul.f32 -1.442695, %v8095_v18 }
 0x79c   :  { %v13723_v47 = vmul.f32 -1.442695, %v8094_v49  ;;  %v17453_v49 = vld [vmem:[#allocation9 + $0xa0] ss:$16 sps:$4 sm:$0xff]   ;;  %v17457_v39 = vld [vmem:[#allocation9 + $0xa8] ss:$16 sps:$4 sm:$0xff]  }
 0x79d   :  { %16367 = vpow2.f32 %v13722_v41  ;;  %v17461_v43 = vld [vmem:[#allocation9 + $0xc4] ss:$16 sps:$4 sm:$0xff]   ;;  %v17463_v45 = vld [vmem:[#allocation9 + $0xcc] ss:$16 sps:$4 sm:$0xff]  }
 0x79e   :  { %16369 = vpow2.f32 %v13723_v47  ;;  %v8169_v47 = vrot.slane %v13725_v25, %v16906_v53 }
 0x79f   :  { %16371 = vtanh.f32 %v8096_v35 }
 0x7a0   :  { %16373 = vpow2.f32 %v13724_v63  ;;  %v17468_v63 = vld [vmem:[#allocation9 + $0xc0] ss:$16 sps:$4 sm:$0xff]  }
 0x7a7   :  { %v16368_v59 = vpop.eup %16367 }
 0x7a8   :  { %v8106_v10 = vadd.f32 1.0, %v16368_v59  ;;  %v16370_v33 = vpop.eup %16369  ;;  %v17470_v59 = vld [vmem:[#allocation9 + $0xc8] ss:$16 sps:$4 sm:$0xff]  }
 0x7a9   :  { %v8107_v61 = vadd.f32 1.0, %v16370_v33  ;;  %v16372_v2 = vpop.eup %16371  ;;  %v17475_v33 = vld [vmem:[#allocation9 + $0xe4] ss:$16 sps:$4 sm:$0xff]  }
 0x7aa   :  { %16375 = vrcp.f32 %v8106_v10  ;;  %v16374_v4 = vpop.eup %16373  ;;  %v8173_v10 = vrot.slane %v13725_v25, %v16908_v54 }
 0x7ab   :  { %16377 = vrcp.f32 %v8107_v61  ;;  %v8108_v0 = vadd.f32 1.0, %v16374_v4  ;;  %v17477_v61 = vld [vmem:[#allocation9 + $0xec] ss:$16 sps:$4 sm:$0xff]   ;;  %v17481_v4 = vld [vmem:[#allocation9 + $0xe0] ss:$16 sps:$4 sm:$0xff]  }
 0x7ad   :  { %16379 = vrcp.f32 %v8108_v0  ;;  %v17489_v0 = vld [vmem:[#allocation10 + $0x10c] ss:$16 sps:$4 sm:$0xff]  }
 0x7b4   :  { %v16376_v6 = vpop.eup %16375 }
 0x7b5   :  { %v8117_v8 = vmul.f32 %v16376_v6, %v16372_v2  ;;  %v16378_v9 = vpop.eup %16377  ;;  %v17483_v6 = vld [vmem:[#allocation9 + $0xe8] ss:$16 sps:$4 sm:$0xff]  }
 0x7b6   :  { %v8116_v52 = vmul.f32 %v16378_v9, %v17353_v23  ;;  %v17400_v23 = vld [vmem:[#allocation9 + $0x20] ss:$16 sps:$4 sm:$0xff]   ;;  %v17487_v9 = vld [vmem:[#allocation10 + $0x104] ss:$16 sps:$4 sm:$0xff]  }
 0x7b7   :  { %v16380_v34 = vpop.eup %16379 }
 0x7b8   :  { %v17393_v1 = vadd.f32 %v8117_v8, %v8116_v52 }
 0x7ba   :  { %16381 = vtanh.f32 %v17393_v1 }
 0x7c4   :  { %v16382_v36 = vpop.eup %16381 }
 0x7c5   :  { %v8120_v56 = vmul.f32 %v16382_v36, %v16380_v34  ;;  %v17493_v36 = vld [vmem:[#allocation10 + $0x100] ss:$16 sps:$4 sm:$0xff]  }
 0x7c7   :  { %v8121_v50 = vpack.c.bf16 %v8120_v56, %v8120_v56  ;;  %v17495_v56 = vld [vmem:[#allocation10 + $0x108] ss:$16 sps:$4 sm:$0xff]  }
 0x7c9   :  { %8122 = vst [vmem:[#allocation3 + $0x18] sm:$0xf] %v8121_v50  ;;  %9560 = vmatmul.mubr.bf16.vlgmr.msra.gmra.mrb[72].mxu0 %v8121_v50  ;;  %9601 = vmatmul.mubr.bf16.vlgmr.msra.gmra.mrb[104].mxu1 %v8121_v50  ;;  %v17501_v50 = vld [vmem:[#allocation10 + $0x12c] ss:$16 sps:$4 sm:$0xff]  }
 0x7ca   :  { %9858 = vmatpush1.bf16.msra.mxu0 %v15825_v28  ;;  %9899 = vmatpush1.bf16.msra.mxu1 %v15828_v57  ;;  %v17499_v57 = vld [vmem:[#allocation10 + $0x124] ss:$16 sps:$4 sm:$0xff]  }
 0x7cb   :  { %9859 = vmatprep.subr.bf16.mxu0 %v17396_v26  ;;  %9900 = vmatprep.subr.bf16.mxu1 %v17398_v16 }
 0x7cc   :  { %9889 = vmatprep.mubr.bf16.mxu0 %v18143_v15  ;;  %9930 = vmatprep.mubr.bf16.mxu1 %v18143_v15 }
 0x7ce   :  { %9860 = vmatpush1.bf16.msra.mxu0 %v17400_v23  ;;  %9901 = vmatpush1.bf16.msra.mxu1 %v17402_v24 }
 0x7cf   :  { %9861 = vmatprep.subr.bf16.mxu0 %v17406_v38  ;;  %9902 = vmatprep.subr.bf16.mxu1 %v17408_v13 }
 0x7d2   :  { %9862 = vmatpush1.bf16.msra.mxu0 %v17414_v3  ;;  %9903 = vmatpush1.bf16.msra.mxu1 %v17416_v44 }
 0x7d3   :  { %9863 = vmatprep.subr.bf16.mxu0 %v17420_v30  ;;  %9904 = vmatprep.subr.bf16.mxu1 %v17422_v60 }
 0x7d6   :  { %9864 = vmatpush1.bf16.msra.mxu0 %v17429_v40  ;;  %9905 = vmatpush1.bf16.msra.mxu1 %v17431_v62 }
 0x7d7   :  { %9865 = vmatprep.subr.bf16.mxu0 %v17435_v7  ;;  %9906 = vmatprep.subr.bf16.mxu1 %v17437_v17 }
 0x7d8   :  { %v8649_v32 = vpop.f32.mrb[64].mxu0  ;;  %v8690_v5 = vpop.f32.mrb[96].mxu1 }
 0x7d9   :  { %v14317_v58 = vadd.f32 %v8649_v32, %v8161_v19  ;;  %v8651_v14 = vpop.f32.mrb[65].mxu0  ;;  %v8692_v18 = vpop.f32.mrb[97].mxu1  ;;  %v14319_v2 = vadd.f32 %v8690_v5, %v8169_v47  ;;  %v9642_v19 = vld [vmem:[#allocation3 + $0x18] sm:$0xf]  ;;  %v17505_v32 = vld [vmem:[#allocation10 + $0x120] ss:$16 sps:$4 sm:$0xff]  }
 0x7da   :  { %v14318_v22 = vadd.f32 %v8651_v14, %v8165_v42  ;;  %v8653_v27 = vpop.f32.mrb[66].mxu0  ;;  %v8694_v29 = vpop.f32.mrb[98].mxu1  ;;  %9866 = vmatpush1.bf16.msra.mxu0 %v17443_v48  ;;  %9907 = vmatpush1.bf16.msra.mxu1 %v17445_v21  ;;  %v14320_v8 = vadd.f32 %v8692_v18, %v8173_v10  ;;  %v17507_v5 = vld [vmem:[#allocation10 + $0x128] ss:$16 sps:$4 sm:$0xff]   ;;  %v17513_v14 = vld [vmem:[#allocation10 + $0x14c] ss:$16 sps:$4 sm:$0xff]  }
 0x7db   :  { %v13790_v31 = vmul.f32 -1.442695, %v14317_v58  ;;  %v8654_v35 = vpop.f32.mrb[67].mxu0  ;;  %v8695_v37 = vpop.f32.mrb[99].mxu1  ;;  %9867 = vmatprep.subr.bf16.mxu0 %v17449_v46  ;;  %9908 = vmatprep.subr.bf16.mxu1 %v17451_v55  ;;  %v13792_v52 = vmul.f32 -1.442695, %v14319_v2 }
 0x7dc   :  { %v13791_v41 = vmul.f32 -1.442695, %v14318_v22  ;;  %v17511_v58 = vld [vmem:[#allocation10 + $0x144] ss:$16 sps:$4 sm:$0xff]   ;;  %18210 = vst [vmem:[#allocation43_spill] sm:$0xff] %v17513_v14 }
 0x7dd   :  { %16383 = vpow2.f32 %v13790_v31  ;;  %18209 = vst [vmem:[#allocation42_spill] sm:$0xff] %v17511_v58  ;;  %v17519_v18 = vld [vmem:[#allocation10 + $0x140] ss:$16 sps:$4 sm:$0xff]   ;;  %v17521_v22 = vld [vmem:[#allocation10 + $0x148] ss:$16 sps:$4 sm:$0xff]  }
 0x7de   :  { %16385 = vpow2.f32 %v13791_v41  ;;  %9868 = vmatpush1.bf16.msra.mxu0 %v17453_v49  ;;  %9909 = vmatpush1.bf16.msra.mxu1 %v17457_v39  ;;  %18211 = vst [vmem:[#allocation44_spill] sm:$0xff] %v17519_v18  ;;  %18212 = vst [vmem:[#allocation45_spill] sm:$0xff] %v17521_v22  ;;  %v17525_v27 = vld [vmem:[#allocation10 + $0x164] ss:$16 sps:$4 sm:$0xff]   ;;  %v17527_v29 = vld [vmem:[#allocation10 + $0x16c] ss:$16 sps:$4 sm:$0xff]  }
 0x7df   :  { %9869 = vmatprep.subr.bf16.mxu0 %v17461_v43  ;;  %9910 = vmatprep.subr.bf16.mxu1 %v17463_v45  ;;  %16387 = vtanh.f32 %v14320_v8  ;;  %18213 = vst [vmem:[#allocation46_spill] sm:$0xff] %v17525_v27  ;;  %18214 = vst [vmem:[#allocation47_spill] sm:$0xff] %v17527_v29  ;;  %v17531_v37 = vld [vmem:[#allocation10 + $0x160] ss:$16 sps:$4 sm:$0xff]   ;;  %v17533_v41 = vld [vmem:[#allocation10 + $0x168] ss:$16 sps:$4 sm:$0xff]  }
 0x7e0   :  { %16389 = vpow2.f32 %v13792_v52  ;;  %18215 = vst [vmem:[#allocation48_spill] sm:$0xff] %v17531_v37  ;;  %18216 = vst [vmem:[#allocation49_spill] sm:$0xff] %v17533_v41  ;;  %v17537_v10 = vld [vmem:[#allocation10 + $0x184] ss:$16 sps:$4 sm:$0xff]   ;;  %v17539_v2 = vld [vmem:[#allocation10 + $0x18c] ss:$16 sps:$4 sm:$0xff]  }
 0x7e1   :  { %18217 = vst [vmem:[#allocation50_spill] sm:$0xff] %v17537_v10  ;;  %18218 = vst [vmem:[#allocation51_spill] sm:$0xff] %v17539_v2 }
 0x7e2   :  { %9870 = vmatpush1.bf16.msra.mxu0 %v17468_v63  ;;  %9911 = vmatpush1.bf16.msra.mxu1 %v17470_v59 }
 0x7e3   :  { %9871 = vmatprep.subr.bf16.mxu0 %v17475_v33  ;;  %9912 = vmatprep.subr.bf16.mxu1 %v17477_v61 }
 0x7e6   :  { %9872 = vmatpush1.bf16.msra.mxu0 %v17481_v4  ;;  %9913 = vmatpush1.bf16.msra.mxu1 %v17483_v6 }
 0x7e7   :  { %v16384_v34 = vpop.eup %16383  ;;  %10131 = vmatprep.subr.bf16.mxu0 %v17487_v9  ;;  %10172 = vmatprep.subr.bf16.mxu1 %v17489_v0 }
 0x7e8   :  { %v8710_v28 = vadd.f32 1.0, %v16384_v34  ;;  %v16386_v25 = vpop.eup %16385 }
 0x7e9   :  { %v8711_v42 = vadd.f32 1.0, %v16386_v25  ;;  %9890 = vmatmul.mubr.bf16.vlgmr.msra.gmra.mrb[76].mxu0 %v9642_v19  ;;  %9931 = vmatmul.mubr.bf16.vlgmr.msra.gmra.mrb[108].mxu1 %v9642_v19  ;;  %v16388_v31 = vpop.eup %16387  ;;  %v17544_v25 = vld [vmem:[#allocation10 + $0x180] ss:$16 sps:$4 sm:$0xff]   ;;  %v17546_v19 = vld [vmem:[#allocation10 + $0x188] ss:$16 sps:$4 sm:$0xff]  }
 0x7ea   :  { %16391 = vrcp.f32 %v8710_v28  ;;  %10132 = vmatpush1.bf16.msra.mxu0 %v17493_v36  ;;  %10173 = vmatpush1.bf16.msra.mxu1 %v17495_v56  ;;  %v16390_v35 = vpop.eup %16389  ;;  %18219 = vst [vmem:[#allocation52_spill] sm:$0xff] %v17544_v25  ;;  %18220 = vst [vmem:[#allocation53_spill] sm:$0xff] %v17546_v19 }
 0x7eb   :  { %16393 = vrcp.f32 %v8711_v42  ;;  %10133 = vmatprep.subr.bf16.mxu0 %v17499_v57  ;;  %10174 = vmatprep.subr.bf16.mxu1 %v17501_v50  ;;  %v8712_v34 = vadd.f32 1.0, %v16390_v35  ;;  %v17550_v42 = vld [vmem:[#allocation10 + $0x1a4] ss:$16 sps:$4 sm:$0xff]   ;;  %v17561_v35 = vld [vmem:[#allocation10 + $0x1a8] ss:$16 sps:$4 sm:$0xff]  }
 0x7ec   :  { %10163 = vmatprep.mubr.bf16.mxu0 %v18143_v15  ;;  %10204 = vmatprep.mubr.bf16.mxu1 %v18143_v15  ;;  %18221 = vst [vmem:[#allocation54_spill] sm:$0xff] %v17550_v42  ;;  %18225 = vst [vmem:[#allocation58_spill] sm:$0xff] %v17561_v35 }
 0x7ed   :  { %16395 = vrcp.f32 %v8712_v34  ;;  %v17573_v34 = vld [vmem:[#allocation10 + $0x1c8] ss:$16 sps:$4 sm:$0xff]  }
 0x7ee   :  { %10134 = vmatpush1.bf16.msra.mxu0 %v17505_v32  ;;  %10175 = vmatpush1.bf16.msra.mxu1 %v17507_v5  ;;  %18229 = vst [vmem:[#allocation62_spill] sm:$0xff] %v17573_v34 }
 0x7ef   :  { %10135 = vmatprep.subr.bf16.mxu0 %v17511_v58  ;;  %10176 = vmatprep.subr.bf16.mxu1 %v17513_v14 }
 0x7f2   :  { %10136 = vmatpush1.bf16.msra.mxu0 %v17519_v18  ;;  %10177 = vmatpush1.bf16.msra.mxu1 %v17521_v22  ;;  %v17660_v22 = vld [vmem:[#allocation9 + $0x1a0] ss:$16 sps:$4 sm:$0xff]  }
 0x7f3   :  { %10137 = vmatprep.subr.bf16.mxu0 %v17525_v27  ;;  %10178 = vmatprep.subr.bf16.mxu1 %v17527_v29  ;;  %v17552_v29 = vld [vmem:[#allocation10 + $0x1ac] ss:$16 sps:$4 sm:$0xff]  }
 0x7f4   :  { %v16392_v47 = vpop.eup %16391  ;;  %18222 = vst [vmem:[#allocation55_spill] sm:$0xff] %v17552_v29 }
 0x7f5   :  { %v8721_v8 = vmul.f32 %v16392_v47, %v16388_v31  ;;  %v16394_v52 = vpop.eup %16393  ;;  %v17565_v47 = vld [vmem:[#allocation10 + $0x1c4] ss:$16 sps:$4 sm:$0xff]  }
 0x7f6   :  { %v8720_v28 = vmul.f32 %v16394_v52, %v17368_v51  ;;  %10138 = vmatpush1.bf16.msra.mxu0 %v17531_v37  ;;  %10179 = vmatpush1.bf16.msra.mxu1 %v17533_v41  ;;  %v17559_v51 = vld [vmem:[#allocation10 + $0x1a0] ss:$16 sps:$4 sm:$0xff]   ;;  %18226 = vst [vmem:[#allocation59_spill] sm:$0xff] %v17565_v47  ;;  %v17567_v52 = vld [vmem:[#allocation10 + $0x1cc] ss:$16 sps:$4 sm:$0xff]  }
 0x7f7   :  { %10139 = vmatprep.subr.bf16.mxu0 %v17537_v10  ;;  %10180 = vmatprep.subr.bf16.mxu1 %v17539_v2  ;;  %18224 = vst [vmem:[#allocation57_spill] sm:$0xff] %v17559_v51  ;;  %18227 = vst [vmem:[#allocation60_spill] sm:$0xff] %v17567_v52 }
 0x7f8   :  { %v17554_v31 = vadd.f32 %v8721_v8, %v8720_v28  ;;  %v17571_v8 = vld [vmem:[#allocation10 + $0x1c0] ss:$16 sps:$4 sm:$0xff]   ;;  %v17577_v28 = vld [vmem:[#allocation10 + $0x1e4] ss:$16 sps:$4 sm:$0xff]  }
 0x7f9   :  { %18228 = vst [vmem:[#allocation61_spill] sm:$0xff] %v17571_v8  ;;  %18230 = vst [vmem:[#allocation63_spill] sm:$0xff] %v17577_v28 }
 0x7fa   :  { %18223 = vst [vmem:[#allocation56_spill] sm:$0xff] %v17554_v31  ;;  %16397 = vtanh.f32 %v17554_v31  ;;  %10140 = vmatpush1.bf16.msra.mxu0 %v17544_v25  ;;  %10181 = vmatpush1.bf16.msra.mxu1 %v17546_v19  ;;  %v17579_v31 = vld [vmem:[#allocation10 + $0x1ec] ss:$16 sps:$4 sm:$0xff]  }
 0x7fb   :  { %10141 = vmatprep.subr.bf16.mxu0 %v17550_v42  ;;  %10182 = vmatprep.subr.bf16.mxu1 %v17552_v29  ;;  %18231 = vst [vmem:[#allocation64_spill] sm:$0xff] %v17579_v31  ;;  %v17583_v29 = vld [vmem:[#allocation10 + $0x1e0] ss:$16 sps:$4 sm:$0xff]  }
 0x7fc   :  { %18232 = vst [vmem:[#allocation65_spill] sm:$0xff] %v17583_v29 }
 0x7fe   :  { %10142 = vmatpush1.bf16.msra.mxu0 %v17559_v51  ;;  %10183 = vmatpush1.bf16.msra.mxu1 %v17561_v35  ;;  %v17585_v51 = vld [vmem:[#allocation10 + $0x1e8] ss:$16 sps:$4 sm:$0xff]   ;;  %v16396_v35 = vpop.eup %16395 }
 0x7ff   :  { %10143 = vmatprep.subr.bf16.mxu0 %v17565_v47  ;;  %10184 = vmatprep.subr.bf16.mxu1 %v17567_v52  ;;  %18233 = vst [vmem:[#allocation66_spill] sm:$0xff] %v17585_v51  ;;  %v17589_v47 = vld [vmem:[#allocation9 + $0x104] ss:$16 sps:$4 sm:$0xff]   ;;  %v17591_v52 = vld [vmem:[#allocation9 + $0x10c] ss:$16 sps:$4 sm:$0xff]  }
 0x800   :  { %18234 = vst [vmem:[#allocation18_spill] sm:$0xff] %v17589_v47  ;;  %18235 = vst [vmem:[#allocation30_spill] sm:$0xff] %v17591_v52 }
 0x802   :  { %10144 = vmatpush1.bf16.msra.mxu0 %v17571_v8  ;;  %10185 = vmatpush1.bf16.msra.mxu1 %v17573_v34  ;;  %v17595_v34 = vld [vmem:[#allocation9 + $0x100] ss:$16 sps:$4 sm:$0xff]   ;;  %v17597_v8 = vld [vmem:[#allocation9 + $0x108] ss:$16 sps:$4 sm:$0xff]  }
 0x803   :  { %10145 = vmatprep.subr.bf16.mxu0 %v17577_v28  ;;  %10186 = vmatprep.subr.bf16.mxu1 %v17579_v31  ;;  %18236 = vst [vmem:[#allocation19_spill] sm:$0xff] %v17595_v34  ;;  %18237 = vst [vmem:[#allocation31_spill] sm:$0xff] %v17597_v8  ;;  %v17601_v31 = vld [vmem:[#allocation9 + $0x124] ss:$16 sps:$4 sm:$0xff]   ;;  %v17603_v28 = vld [vmem:[#allocation9 + $0x12c] ss:$16 sps:$4 sm:$0xff]  }
 0x804   :  { %v16398_v42 = vpop.eup %16397  ;;  %18238 = vst [vmem:[#allocation20_spill] sm:$0xff] %v17601_v31  ;;  %18239 = vst [vmem:[#allocation32_spill] sm:$0xff] %v17603_v28 }
 0x805   :  { %v8724_v19 = vmul.f32 %v16398_v42, %v16396_v35  ;;  %v17607_v42 = vld [vmem:[#allocation9 + $0x120] ss:$16 sps:$4 sm:$0xff]   ;;  %v17609_v35 = vld [vmem:[#allocation9 + $0x128] ss:$16 sps:$4 sm:$0xff]  }
 0x806   :  { %10146 = vmatpush1.bf16.msra.mxu0 %v17583_v29  ;;  %10187 = vmatpush1.bf16.msra.mxu1 %v17585_v51  ;;  %18240 = vst [vmem:[#allocation21_spill] sm:$0xff] %v17607_v42  ;;  %18241 = vst [vmem:[#allocation33_spill] sm:$0xff] %v17609_v35  ;;  %v17658_v29 = vld [vmem:[#allocation9 + $0x1ac] ss:$16 sps:$4 sm:$0xff]  }
 0x807   :  { %v8725_v25 = vpack.c.bf16 %v8724_v19, %v8724_v19  ;;  %10461 = vmatprep.subr.bf16.mxu0 %v17589_v47  ;;  %10502 = vmatprep.subr.bf16.mxu1 %v17591_v52  ;;  %v17613_v19 = vld [vmem:[#allocation9 + $0x144] ss:$16 sps:$4 sm:$0xff]   ;;  %v17615_v52 = vld [vmem:[#allocation9 + $0x14c] ss:$16 sps:$4 sm:$0xff]  }
 0x808   :  { %18242 = vst [vmem:[#allocation22_spill] sm:$0xff] %v17613_v19  ;;  %18243 = vst [vmem:[#allocation34_spill] sm:$0xff] %v17615_v52 }
 0x809   :  { %v8727_v2 = vrot.slane %v8725_v25, 4  ;;  %10164 = vmatmul.mubr.bf16.vlgmr.msra.gmra.mrb[76].mxu0 %v8725_v25  ;;  %10205 = vmatmul.mubr.bf16.vlgmr.msra.gmra.mrb[108].mxu1 %v8725_v25  ;;  %v17621_v25 = vld [vmem:[#allocation9 + $0x140] ss:$16 sps:$4 sm:$0xff]  }
 0x80a   :  { %10462 = vmatpush1.bf16.msra.mxu0 %v17595_v34  ;;  %10503 = vmatpush1.bf16.msra.mxu1 %v17597_v8  ;;  %18244 = vst [vmem:[#allocation23_spill] sm:$0xff] %v17621_v25  ;;  %v17623_v8 = vld [vmem:[#allocation9 + $0x148] ss:$16 sps:$4 sm:$0xff]  }
 0x80b   :  { %8729 = vst [vmem:[#allocation3 + $0x10] sm:$0xf0] %v8727_v2  ;;  %10463 = vmatprep.subr.bf16.mxu0 %v17601_v31  ;;  %10504 = vmatprep.subr.bf16.mxu1 %v17603_v28  ;;  %18245 = vst [vmem:[#allocation35_spill] sm:$0xff] %v17623_v8  ;;  %v17627_v2 = vld [vmem:[#allocation9 + $0x164] ss:$16 sps:$4 sm:$0xff]  }
 0x80c   :  { %10493 = vmatprep.mubr.bf16.mxu0 %v18143_v15  ;;  %10534 = vmatprep.mubr.bf16.mxu1 %v18143_v15  ;;  %18246 = vst [vmem:[#allocation24_spill] sm:$0xff] %v17627_v2  ;;  %v17629_v28 = vld [vmem:[#allocation9 + $0x16c] ss:$16 sps:$4 sm:$0xff]   ;;  %v13793_v31 = vld [vmem:[%s18007_s4 + $0x8] sm:$0xf] }
 0x80d   :  { %18247 = vst [vmem:[#allocation36_spill] sm:$0xff] %v17629_v28  ;;  %v8768_v34 = vrot.slane %v13793_v31, %v16872_v11  ;;  %v8772_v47 = vrot.slane %v13793_v31, %v16874_v12 }
 0x80e   :  { %10464 = vmatpush1.bf16.msra.mxu0 %v17607_v42  ;;  %10505 = vmatpush1.bf16.msra.mxu1 %v17609_v35  ;;  %v17636_v35 = vld [vmem:[#allocation9 + $0x160] ss:$16 sps:$4 sm:$0xff]   ;;  %v17638_v42 = vld [vmem:[#allocation9 + $0x168] ss:$16 sps:$4 sm:$0xff]  }
 0x80f   :  { %10465 = vmatprep.subr.bf16.mxu0 %v17613_v19  ;;  %10506 = vmatprep.subr.bf16.mxu1 %v17615_v52  ;;  %18248 = vst [vmem:[#allocation25_spill] sm:$0xff] %v17636_v35  ;;  %18249 = vst [vmem:[#allocation37_spill] sm:$0xff] %v17638_v42  ;;  %v17642_v52 = vld [vmem:[#allocation9 + $0x184] ss:$16 sps:$4 sm:$0xff]   ;;  %v17644_v19 = vld [vmem:[#allocation9 + $0x18c] ss:$16 sps:$4 sm:$0xff]  }
 0x810   :  { %18250 = vst [vmem:[#allocation26_spill] sm:$0xff] %v17642_v52  ;;  %18251 = vst [vmem:[#allocation38_spill] sm:$0xff] %v17644_v19 }
 0x812   :  { %10466 = vmatpush1.bf16.msra.mxu0 %v17621_v25  ;;  %10507 = vmatpush1.bf16.msra.mxu1 %v17623_v8  ;;  %v17650_v8 = vld [vmem:[#allocation9 + $0x180] ss:$16 sps:$4 sm:$0xff]   ;;  %v17652_v25 = vld [vmem:[#allocation9 + $0x188] ss:$16 sps:$4 sm:$0xff]  }
 0x813   :  { %10467 = vmatprep.subr.bf16.mxu0 %v17627_v2  ;;  %10508 = vmatprep.subr.bf16.mxu1 %v17629_v28  ;;  %v17656_v28 = vld [vmem:[#allocation9 + $0x1a4] ss:$16 sps:$4 sm:$0xff]  }
 0x816   :  { %10468 = vmatpush1.bf16.msra.mxu0 %v17636_v35  ;;  %10509 = vmatpush1.bf16.msra.mxu1 %v17638_v42 }
 0x817   :  { %10469 = vmatprep.subr.bf16.mxu0 %v17642_v52  ;;  %10510 = vmatprep.subr.bf16.mxu1 %v17644_v19  ;;  %v17664_v19 = vld [vmem:[#allocation9 + $0x1a8] ss:$16 sps:$4 sm:$0xff]  }
 0x818   :  { %v9253_v51 = vpop.f32.mrb[68].mxu0  ;;  %v9294_v2 = vpop.f32.mrb[100].mxu1  ;;  %18252 = vst [vmem:[#allocation27_spill] sm:$0xff] %v17664_v19 }
 0x819   :  { %v14321_v10 = vadd.f32 %v9253_v51, %v8768_v34  ;;  %v9255_v41 = vpop.f32.mrb[69].mxu0  ;;  %v9296_v37 = vpop.f32.mrb[101].mxu1  ;;  %v17668_v51 = vld [vmem:[#allocation9 + $0x1c4] ss:$16 sps:$4 sm:$0xff]  }
 0x81a   :  { %v14322_v35 = vadd.f32 %v9255_v41, %v8772_v47  ;;  %v9257_v27 = vpop.f32.mrb[70].mxu0  ;;  %v9298_v42 = vpop.f32.mrb[102].mxu1  ;;  %10470 = vmatpush1.bf16.msra.mxu0 %v17650_v8  ;;  %10511 = vmatpush1.bf16.msra.mxu1 %v17652_v25  ;;  %18253 = vst [vmem:[#allocation39_spill] sm:$0xff] %v17668_v51  ;;  %v8776_v41 = vrot.slane %v13793_v31, %v16906_v53 }
 0x81b   :  { %v13858_v18 = vmul.f32 -1.442695, %v14321_v10  ;;  %v9258_v52 = vpop.f32.mrb[71].mxu0  ;;  %v9299_v14 = vpop.f32.mrb[103].mxu1  ;;  %10471 = vmatprep.subr.bf16.mxu0 %v17656_v28  ;;  %10512 = vmatprep.subr.bf16.mxu1 %v17658_v29  ;;  %v17670_v27 = vld [vmem:[#allocation9 + $0x1cc] ss:$16 sps:$4 sm:$0xff]   ;;  %v8780_v47 = vrot.slane %v13793_v31, %v16908_v54 }
 0x81c   :  { %v13859_v58 = vmul.f32 -1.442695, %v14322_v35  ;;  %18254 = vst [vmem:[#allocation67_spill] sm:$0xff] %v17670_v27  ;;  %v17675_v14 = vld [vmem:[#allocation9 + $0x1c0] ss:$16 sps:$4 sm:$0xff]   ;;  %v14323_v34 = vadd.f32 %v9294_v2, %v8776_v41 }
 0x81d   :  { %16399 = vpow2.f32 %v13858_v18  ;;  %v17677_v10 = vld [vmem:[#allocation9 + $0x1c8] ss:$16 sps:$4 sm:$0xff]   ;;  %v17682_v52 = vld [vmem:[#allocation9 + $0x1e4] ss:$16 sps:$4 sm:$0xff]   ;;  %v17684_v18 = vld [vmem:[#allocation9 + $0x1ec] ss:$16 sps:$4 sm:$0xff]   ;;  %v14324_v35 = vadd.f32 %v9296_v37, %v8780_v47 }
 0x81e   :  { %16401 = vpow2.f32 %v13859_v58  ;;  %10472 = vmatpush1.bf16.msra.mxu0 %v17660_v22  ;;  %10513 = vmatpush1.bf16.msra.mxu1 %v17664_v19  ;;  %18255 = vst [vmem:[#allocation68_spill] sm:$0xff] %v17677_v10  ;;  %18256 = vst [vmem:[#allocation69_spill] sm:$0xff] %v17682_v52  ;;  %v17688_v58 = vld [vmem:[#allocation9 + $0x1e0] ss:$16 sps:$4 sm:$0xff]   ;;  %v17690_v42 = vld [vmem:[#allocation9 + $0x1e8] ss:$16 sps:$4 sm:$0xff]  }
 0x81f   :  { %10473 = vmatprep.subr.bf16.mxu0 %v17668_v51  ;;  %10514 = vmatprep.subr.bf16.mxu1 %v17670_v27  ;;  %18257 = vst [vmem:[#allocation70_spill] sm:$0xff] %v17684_v18  ;;  %18258 = vst [vmem:[#allocation71_spill] sm:$0xff] %v17688_v58  ;;  %v17694_v31 = vld [vmem:[#allocation10 + $0x204] ss:$16 sps:$4 sm:$0xff]   ;;  %v17696_v27 = vld [vmem:[#allocation10 + $0x20c] ss:$16 sps:$4 sm:$0xff]   ;;  %16403 = vtanh.f32 %v14324_v35 }
 0x820   :  { %18259 = vst [vmem:[#allocation72_spill] sm:$0xff] %v17690_v42  ;;  %18260 = vst [vmem:[#allocation73_spill] sm:$0xff] %v17694_v31  ;;  %v13860_v51 = vmul.f32 -1.442695, %v14323_v34  ;;  %v10243_v19 = vld [vmem:[#allocation3 + $0x10] sm:$0xf0] }
 0x821   :  { %18261 = vst [vmem:[#allocation74_spill] sm:$0xff] %v17696_v27  ;;  %v17700_v41 = vld [vmem:[#allocation10 + $0x200] ss:$16 sps:$4 sm:$0xff]   ;;  %v10299_v47 = vrot.slane %v10243_v19, 4  ;;  %v17708_v34 = vld [vmem:[#allocation10 + $0x22c] ss:$16 sps:$4 sm:$0xff]  }
 0x822   :  { %10474 = vmatpush1.bf16.msra.mxu0 %v17675_v14  ;;  %10515 = vmatpush1.bf16.msra.mxu1 %v17677_v10  ;;  %18262 = vst [vmem:[#allocation75_spill] sm:$0xff] %v17700_v41  ;;  %v17702_v10 = vld [vmem:[#allocation10 + $0x208] ss:$16 sps:$4 sm:$0xff]   ;;  %18265 = vst [vmem:[#allocation78_spill] sm:$0xff] %v17708_v34  ;;  %16405 = vpow2.f32 %v13860_v51  ;;  %v17712_v35 = vld [vmem:[#allocation10 + $0x220] ss:$16 sps:$4 sm:$0xff]  }
 0x823   :  { %10475 = vmatprep.subr.bf16.mxu0 %v17682_v52  ;;  %10516 = vmatprep.subr.bf16.mxu1 %v17684_v18  ;;  %18263 = vst [vmem:[#allocation76_spill] sm:$0xff] %v17702_v10  ;;  %v17706_v18 = vld [vmem:[#allocation10 + $0x224] ss:$16 sps:$4 sm:$0xff]   ;;  %18266 = vst [vmem:[#allocation79_spill] sm:$0xff] %v17712_v35  ;;  %v17714_v19 = vld [vmem:[#allocation10 + $0x228] ss:$16 sps:$4 sm:$0xff]  }
 0x824   :  { %18264 = vst [vmem:[#allocation77_spill] sm:$0xff] %v17706_v18  ;;  %18267 = vst [vmem:[#allocation80_spill] sm:$0xff] %v17714_v19  ;;  %v17720_v51 = vld [vmem:[#allocation10 + $0x24c] ss:$16 sps:$4 sm:$0xff]  }
 0x825   :  { %18269 = vst [vmem:[#allocation82_spill] sm:$0xff] %v17720_v51 }
 0x826   :  { %10476 = vmatpush1.bf16.msra.mxu0 %v17688_v58  ;;  %10517 = vmatpush1.bf16.msra.mxu1 %v17690_v42  ;;  %v17753_v42 = vld [vmem:[#allocation10 + $0x288] ss:$16 sps:$4 sm:$0xff]  }
 0x827   :  { %v16400_v2 = vpop.eup %16399  ;;  %10735 = vmatprep.subr.bf16.mxu0 %v17694_v31  ;;  %10776 = vmatprep.subr.bf16.mxu1 %v17696_v27  ;;  %18276 = vst [vmem:[#allocation89_spill] sm:$0xff] %v17753_v42 }
 0x828   :  { %v9314_v37 = vadd.f32 1.0, %v16400_v2  ;;  %v16402_v52 = vpop.eup %16401  ;;  %v17718_v2 = vld [vmem:[#allocation10 + $0x244] ss:$16 sps:$4 sm:$0xff]  }
 0x829   :  { %v9315_v58 = vadd.f32 1.0, %v16402_v52  ;;  %10494 = vmatmul.mubr.bf16.vlgmr.msra.gmra.mrb[80].mxu0 %v10299_v47  ;;  %10535 = vmatmul.mubr.bf16.vlgmr.msra.gmra.mrb[112].mxu1 %v10299_v47  ;;  %18268 = vst [vmem:[#allocation81_spill] sm:$0xff] %v17718_v2  ;;  %v17726_v52 = vld [vmem:[#allocation10 + $0x240] ss:$16 sps:$4 sm:$0xff]   ;;  %v17734_v47 = vld [vmem:[#allocation10 + $0x26c] ss:$16 sps:$4 sm:$0xff]  }
 0x82a   :  { %16407 = vrcp.f32 %v9314_v37  ;;  %10736 = vmatpush1.bf16.msra.mxu0 %v17700_v41  ;;  %10777 = vmatpush1.bf16.msra.mxu1 %v17702_v10  ;;  %18270 = vst [vmem:[#allocation83_spill] sm:$0xff] %v17726_v52  ;;  %v17728_v37 = vld [vmem:[#allocation10 + $0x248] ss:$16 sps:$4 sm:$0xff]   ;;  %18273 = vst [vmem:[#allocation86_spill] sm:$0xff] %v17734_v47 }
 0x82b   :  { %16409 = vrcp.f32 %v9315_v58  ;;  %10737 = vmatprep.subr.bf16.mxu0 %v17706_v18  ;;  %10778 = vmatprep.subr.bf16.mxu1 %v17708_v34  ;;  %18271 = vst [vmem:[#allocation84_spill] sm:$0xff] %v17728_v37  ;;  %v17732_v58 = vld [vmem:[#allocation10 + $0x264] ss:$16 sps:$4 sm:$0xff]   ;;  %v16404_v34 = vpop.eup %16403 }
 0x82c   :  { %10767 = vmatprep.mubr.bf16.mxu0 %v18143_v15  ;;  %10808 = vmatprep.mubr.bf16.mxu1 %v18143_v15  ;;  %18272 = vst [vmem:[#allocation85_spill] sm:$0xff] %v17732_v58  ;;  %v16406_v18 = vpop.eup %16405 }
 0x82d   :  { %v9316_v31 = vadd.f32 1.0, %v16406_v18  ;;  %v17772_v18 = vld [vmem:[#allocation10 + $0x2c4] ss:$16 sps:$4 sm:$0xff]  }
 0x82e   :  { %10738 = vmatpush1.bf16.msra.mxu0 %v17712_v35  ;;  %10779 = vmatpush1.bf16.msra.mxu1 %v17714_v19  ;;  %v17738_v35 = vld [vmem:[#allocation10 + $0x260] ss:$16 sps:$4 sm:$0xff]   ;;  %v17740_v19 = vld [vmem:[#allocation10 + $0x268] ss:$16 sps:$4 sm:$0xff]   ;;  %18281 = vst [vmem:[#allocation94_spill] sm:$0xff] %v17772_v18 }
 0x82f   :  { %10739 = vmatprep.subr.bf16.mxu0 %v17718_v2  ;;  %10780 = vmatprep.subr.bf16.mxu1 %v17720_v51  ;;  %v17744_v51 = vld [vmem:[#allocation10 + $0x284] ss:$16 sps:$4 sm:$0xff]   ;;  %v17746_v2 = vld [vmem:[#allocation10 + $0x28c] ss:$16 sps:$4 sm:$0xff]   ;;  %16411 = vrcp.f32 %v9316_v31  ;;  %v17778_v31 = vld [vmem:[#allocation10 + $0x2c0] ss:$16 sps:$4 sm:$0xff]  }
 0x830   :  { %18274 = vst [vmem:[#allocation87_spill] sm:$0xff] %v17746_v2  ;;  %18283 = vst [vmem:[#allocation96_spill] sm:$0xff] %v17778_v31 }
 0x832   :  { %10740 = vmatpush1.bf16.msra.mxu0 %v17726_v52  ;;  %10781 = vmatpush1.bf16.msra.mxu1 %v17728_v37  ;;  %v17751_v37 = vld [vmem:[#allocation10 + $0x280] ss:$16 sps:$4 sm:$0xff]  }
 0x833   :  { %10741 = vmatprep.subr.bf16.mxu0 %v17732_v58  ;;  %10782 = vmatprep.subr.bf16.mxu1 %v17734_v47  ;;  %18275 = vst [vmem:[#allocation88_spill] sm:$0xff] %v17751_v37  ;;  %v17757_v47 = vld [vmem:[#allocation10 + $0x2a4] ss:$16 sps:$4 sm:$0xff]   ;;  %v17759_v58 = vld [vmem:[#allocation10 + $0x2ac] ss:$16 sps:$4 sm:$0xff]  }
 0x834   :  { %v16408_v10 = vpop.eup %16407  ;;  %18277 = vst [vmem:[#allocation90_spill] sm:$0xff] %v17757_v47  ;;  %18278 = vst [vmem:[#allocation91_spill] sm:$0xff] %v17759_v58 }
 0x835   :  { %v9325_v41 = vmul.f32 %v16408_v10, %v16404_v34  ;;  %v16410_v27 = vpop.eup %16409  ;;  %v17774_v34 = vld [vmem:[#allocation10 + $0x2cc] ss:$16 sps:$4 sm:$0xff]  }
 0x836   :  { %v9324_v52 = vmul.f32 %v16410_v27, %v17383_v20  ;;  %10742 = vmatpush1.bf16.msra.mxu0 %v17738_v35  ;;  %10783 = vmatpush1.bf16.msra.mxu1 %v17740_v19  ;;  %v17766_v20 = vld [vmem:[#allocation10 + $0x2a0] ss:$16 sps:$4 sm:$0xff]   ;;  %v17768_v27 = vld [vmem:[#allocation10 + $0x2a8] ss:$16 sps:$4 sm:$0xff]   ;;  %18282 = vst [vmem:[#allocation95_spill] sm:$0xff] %v17774_v34 }
 0x837   :  { %10743 = vmatprep.subr.bf16.mxu0 %v17744_v51  ;;  %10784 = vmatprep.subr.bf16.mxu1 %v17746_v2  ;;  %18279 = vst [vmem:[#allocation92_spill] sm:$0xff] %v17766_v20  ;;  %18280 = vst [vmem:[#allocation93_spill] sm:$0xff] %v17768_v27  ;;  %v16020_v2 = vld [vmem:[#allocation9 + $0x8] ss:$16 sps:$4 sm:$0xff]  }
 0x838   :  { %v17761_v10 = vadd.f32 %v9325_v41, %v9324_v52  ;;  %v17780_v41 = vld [vmem:[#allocation10 + $0x2c8] ss:$16 sps:$4 sm:$0xff]   ;;  %v17784_v52 = vld [vmem:[#allocation10 + $0x2e4] ss:$16 sps:$4 sm:$0xff]  }
 0x839   :  { %18284 = vst [vmem:[#allocation97_spill] sm:$0xff] %v17780_v41 }
 0x83a   :  { %16413 = vtanh.f32 %v17761_v10  ;;  %10744 = vmatpush1.bf16.msra.mxu0 %v17751_v37  ;;  %10785 = vmatpush1.bf16.msra.mxu1 %v17753_v42  ;;  %v16022_v42 = vld [vmem:[#allocation9 + $0xc] ss:$16 sps:$4 sm:$0xff]  }
 0x83b   :  { %10745 = vmatprep.subr.bf16.mxu0 %v17757_v47  ;;  %10786 = vmatprep.subr.bf16.mxu1 %v17759_v58  ;;  %v17786_v47 = vld [vmem:[#allocation10 + $0x2ec] ss:$16 sps:$4 sm:$0xff]   ;;  %v17790_v58 = vld [vmem:[#allocation10 + $0x2e0] ss:$16 sps:$4 sm:$0xff]  }
 0x83e   :  { %10746 = vmatpush1.bf16.msra.mxu0 %v17766_v20  ;;  %10787 = vmatpush1.bf16.msra.mxu1 %v17768_v27  ;;  %v17792_v20 = vld [vmem:[#allocation10 + $0x2e8] ss:$16 sps:$4 sm:$0xff]   ;;  %v16412_v27 = vpop.eup %16411 }
 0x83f   :  { %10747 = vmatprep.subr.bf16.mxu0 %v17772_v18  ;;  %10788 = vmatprep.subr.bf16.mxu1 %v17774_v34  ;;  %v16019_v18 = vld [vmem:[#allocation9 + $0x4] ss:$16 sps:$4 sm:$0xff]  }
 0x842   :  { %10748 = vmatpush1.bf16.msra.mxu0 %v17778_v31  ;;  %10789 = vmatpush1.bf16.msra.mxu1 %v17780_v41  ;;  %v16017_v31 = vld [vmem:[#allocation9] ss:$16 sps:$4 sm:$0xff]  }
 0x843   :  { %10749 = vmatprep.subr.bf16.mxu0 %v17784_v52  ;;  %10790 = vmatprep.subr.bf16.mxu1 %v17786_v47 }
 0x844   :  { %v16414_v34 = vpop.eup %16413 }
 0x845   :  { %v9328_v37 = vmul.f32 %v16414_v34, %v16412_v27 }
 0x846   :  { %10750 = vmatpush1.bf16.msra.mxu0 %v17790_v58  ;;  %10791 = vmatpush1.bf16.msra.mxu1 %v17792_v20 }
 0x847   :  { %v9329_v41 = vpack.c.bf16 %v9328_v37, %v9328_v37  ;;  %11068 = vmatprep.subr.bf16.mxu0 %v16019_v18  ;;  %11109 = vmatprep.subr.bf16.mxu1 %v16022_v42 }
 0x849   :  { %9330 = vst [vmem:[#allocation3 + $0x10] sm:$0xf] %v9329_v41  ;;  %10768 = vmatmul.mubr.bf16.vlgmr.msra.gmra.mrb[80].mxu0 %v9329_v41  ;;  %10809 = vmatmul.mubr.bf16.vlgmr.msra.gmra.mrb[112].mxu1 %v9329_v41 }
 0x84a   :  { %11069 = vmatpush1.bf16.msra.mxu0 %v16017_v31  ;;  %11110 = vmatpush1.bf16.msra.mxu1 %v16020_v2  ;;  %v13896_v31 = vld [vmem:[%s18007_s4 + $0x4] sm:$0xf] }
 0x84b   :  { %11070 = vmatprep.subr.bf16.mxu0 %v17396_v26  ;;  %11111 = vmatprep.subr.bf16.mxu1 %v17398_v16 }
 0x84c   :  { %11100 = vmatprep.mubr.bf16.mxu0 %v18143_v15  ;;  %11141 = vmatprep.mubr.bf16.mxu1 %v18143_v15 }
 0x84e   :  { %11071 = vmatpush1.bf16.msra.mxu0 %v17400_v23  ;;  %11112 = vmatpush1.bf16.msra.mxu1 %v17402_v24  ;;  %v18285_v23 = vld [vmem:[#allocation28_spill] sm:$0xff] }
 0x84f   :  { %11072 = vmatprep.subr.bf16.mxu0 %v17406_v38  ;;  %11113 = vmatprep.subr.bf16.mxu1 %v17408_v13  ;;  %v18286_v38 = vld [vmem:[#allocation40_spill] sm:$0xff] }
 0x852   :  { %11073 = vmatpush1.bf16.msra.mxu0 %v17414_v3  ;;  %11114 = vmatpush1.bf16.msra.mxu1 %v17416_v44 }
 0x853   :  { %11074 = vmatprep.subr.bf16.mxu0 %v17420_v30  ;;  %11115 = vmatprep.subr.bf16.mxu1 %v17422_v60  ;;  %v18287_v30 = vld [vmem:[#allocation29_spill] sm:$0xff] }
 0x856   :  { %11075 = vmatpush1.bf16.msra.mxu0 %v17429_v40  ;;  %11116 = vmatpush1.bf16.msra.mxu1 %v17431_v62  ;;  %v18288_v40 = vld [vmem:[#allocation41_spill] sm:$0xff] }
 0x857   :  { %11076 = vmatprep.subr.bf16.mxu0 %v17435_v7  ;;  %11117 = vmatprep.subr.bf16.mxu1 %v17437_v17 }
 0x85a   :  { %11077 = vmatpush1.bf16.msra.mxu0 %v17443_v48  ;;  %11118 = vmatpush1.bf16.msra.mxu1 %v17445_v21 }
 0x85b   :  { %11078 = vmatprep.subr.bf16.mxu0 %v17449_v46  ;;  %11119 = vmatprep.subr.bf16.mxu1 %v17451_v55 }
 0x85e   :  { %11079 = vmatpush1.bf16.msra.mxu0 %v17453_v49  ;;  %11120 = vmatpush1.bf16.msra.mxu1 %v17457_v39 }
 0x85f   :  { %11080 = vmatprep.subr.bf16.mxu0 %v17461_v43  ;;  %11121 = vmatprep.subr.bf16.mxu1 %v17463_v45 }
 0x862   :  { %11081 = vmatpush1.bf16.msra.mxu0 %v17468_v63  ;;  %11122 = vmatpush1.bf16.msra.mxu1 %v17470_v59 }
 0x863   :  { %11082 = vmatprep.subr.bf16.mxu0 %v17475_v33  ;;  %11123 = vmatprep.subr.bf16.mxu1 %v17477_v61 }
 0x866   :  { %11083 = vmatpush1.bf16.msra.mxu0 %v17481_v4  ;;  %11124 = vmatpush1.bf16.msra.mxu1 %v17483_v6 }
 0x867   :  { %11342 = vmatprep.subr.bf16.mxu0 %v17487_v9  ;;  %11383 = vmatprep.subr.bf16.mxu1 %v17489_v0 }
 0x89c   :  { %v9561_v26 = vpop.f32.mrb[72].mxu0  ;;  %v9602_v16 = vpop.f32.mrb[104].mxu1 }
 0x89d   :  { %v9609_v24 = vadd.f32 %v9561_v26, %v18285_v23  ;;  %v9611_v13 = vadd.f32 %v9602_v16, %v18286_v38  ;;  %v9563_v3 = vpop.f32.mrb[73].mxu0  ;;  %v9604_v44 = vpop.f32.mrb[105].mxu1  ;;  %v9680_v16 = vrot.slane %v13896_v31, %v16872_v11 }
 0x89e   :  { %v9610_v60 = vadd.f32 %v9563_v3, %v18287_v30  ;;  %v9612_v62 = vadd.f32 %v9604_v44, %v18288_v40  ;;  %v9565_v7 = vpop.f32.mrb[74].mxu0  ;;  %v9606_v17 = vpop.f32.mrb[106].mxu1 }
 0x89f   :  { %v13893_v48 = vmul.f32 -1.442695, %v9609_v24  ;;  %v9566_v21 = vpop.f32.mrb[75].mxu0  ;;  %v9607_v46 = vpop.f32.mrb[107].mxu1  ;;  %v13895_v49 = vmul.f32 -1.442695, %v9611_v13  ;;  %v9688_v7 = vrot.slane %v13896_v31, %v16906_v53 }
 0x8a0   :  { %v13894_v55 = vmul.f32 -1.442695, %v9610_v60  ;;  %v18291_v17 = vld [vmem:[#allocation44_spill] sm:$0xff]  ;;  %v9692_v21 = vrot.slane %v13896_v31, %v16908_v54  ;;  %v18293_v46 = vld [vmem:[#allocation46_spill] sm:$0xff] }
 0x8a1   :  { %16415 = vpow2.f32 %v13893_v48  ;;  %v18292_v48 = vld [vmem:[#allocation45_spill] sm:$0xff] }
 0x8a2   :  { %16417 = vpow2.f32 %v13894_v55  ;;  %v18295_v55 = vld [vmem:[#allocation48_spill] sm:$0xff] }
 0x8a3   :  { %16419 = vtanh.f32 %v9612_v62 }
 0x8a4   :  { %16421 = vpow2.f32 %v13895_v49  ;;  %v18296_v49 = vld [vmem:[#allocation49_spill] sm:$0xff] }
 0x8ab   :  { %v16416_v39 = vpop.eup %16415 }
 0x8ac   :  { %v9622_v43 = vadd.f32 1.0, %v16416_v39  ;;  %v16418_v45 = vpop.eup %16417 }
 0x8ad   :  { %v9623_v63 = vadd.f32 1.0, %v16418_v45  ;;  %v16420_v59 = vpop.eup %16419  ;;  %v18298_v45 = vld [vmem:[#allocation51_spill] sm:$0xff] }
 0x8ae   :  { %16423 = vrcp.f32 %v9622_v43  ;;  %v16422_v33 = vpop.eup %16421  ;;  %v18297_v43 = vld [vmem:[#allocation50_spill] sm:$0xff] }
 0x8af   :  { %16425 = vrcp.f32 %v9623_v63  ;;  %v9624_v9 = vadd.f32 1.0, %v16422_v33  ;;  %v18299_v33 = vld [vmem:[#allocation52_spill] sm:$0xff] }
 0x8b1   :  { %16427 = vrcp.f32 %v9624_v9  ;;  %v18302_v9 = vld [vmem:[#allocation55_spill] sm:$0xff] }
 0x8b8   :  { %v16424_v61 = vpop.eup %16423 }
 0x8b9   :  { %v9633_v4 = vmul.f32 %v16424_v61, %v16420_v59  ;;  %v16426_v6 = vpop.eup %16425  ;;  %v18300_v61 = vld [vmem:[#allocation53_spill] sm:$0xff] }
 0x8ba   :  { %v9632_v0 = vmul.f32 %v16426_v6, %v17393_v1  ;;  %v9684_v1 = vrot.slane %v13896_v31, %v16874_v12  ;;  %v18301_v6 = vld [vmem:[#allocation54_spill] sm:$0xff] }
 0x8bb   :  { %v16428_v2 = vpop.eup %16427  ;;  %v18308_v31 = vld [vmem:[#allocation62_spill] sm:$0xff] }
 0x8bc   :  { %v9634_v42 = vadd.f32 %v9633_v4, %v9632_v0 }
 0x8be   :  { %16429 = vtanh.f32 %v9634_v42 }
 0x8c8   :  { %v16430_v37 = vpop.eup %16429 }
 0x8c9   :  { %v9636_v27 = vmul.f32 %v16430_v37, %v16428_v2  ;;  %v18303_v2 = vld [vmem:[#allocation57_spill] sm:$0xff]  ;;  %v18304_v37 = vld [vmem:[#allocation58_spill] sm:$0xff] }
 0x8cb   :  { %v9637_v18 = vpack.c.bf16 %v9636_v27, %v9636_v27  ;;  %v18305_v27 = vld [vmem:[#allocation59_spill] sm:$0xff] }
 0x8cd   :  { %v9639_v34 = vrot.slane %v9637_v18, 4  ;;  %v18306_v18 = vld [vmem:[#allocation60_spill] sm:$0xff] }
 0x8cf   :  { %9641 = vst [vmem:[#allocation3 + $0x18] sm:$0xf0] %v9639_v34  ;;  %v18307_v34 = vld [vmem:[#allocation61_spill] sm:$0xff] }
 0x8d6   :  { %v10850_v41 = vld [vmem:[#allocation3 + $0x18] sm:$0xf0] }
 0x8d7   :  { %v10906_v26 = vrot.slane %v10850_v41, 4  ;;  %v18309_v41 = vld [vmem:[#allocation63_spill] sm:$0xff] }
 0x8d9   :  { %11101 = vmatmul.mubr.bf16.vlgmr.msra.gmra.mrb[84].mxu0 %v10906_v26  ;;  %11142 = vmatmul.mubr.bf16.vlgmr.msra.gmra.mrb[116].mxu1 %v10906_v26  ;;  %v18310_v26 = vld [vmem:[#allocation64_spill] sm:$0xff] }
 0x8da   :  { %11343 = vmatpush1.bf16.msra.mxu0 %v17493_v36  ;;  %11384 = vmatpush1.bf16.msra.mxu1 %v17495_v56 }
 0x8db   :  { %11344 = vmatprep.subr.bf16.mxu0 %v17499_v57  ;;  %11385 = vmatprep.subr.bf16.mxu1 %v17501_v50  ;;  %v18289_v57 = vld [vmem:[#allocation42_spill] sm:$0xff]  ;;  %v18290_v50 = vld [vmem:[#allocation43_spill] sm:$0xff] }
 0x8dc   :  { %v10165_v23 = vpop.f32.mrb[76].mxu0  ;;  %v10206_v24 = vpop.f32.mrb[108].mxu1  ;;  %11374 = vmatprep.mubr.bf16.mxu0 %v18143_v15  ;;  %11415 = vmatprep.mubr.bf16.mxu1 %v18143_v15 }
 0x8dd   :  { %v14325_v38 = vadd.f32 %v10165_v23, %v9680_v16  ;;  %v10167_v13 = vpop.f32.mrb[77].mxu0  ;;  %v10208_v3 = vpop.f32.mrb[109].mxu1  ;;  %v18311_v23 = vld [vmem:[#allocation65_spill] sm:$0xff] }
 0x8de   :  { %v14326_v44 = vadd.f32 %v10167_v13, %v9684_v1  ;;  %v10169_v30 = vpop.f32.mrb[78].mxu0  ;;  %v10210_v60 = vpop.f32.mrb[110].mxu1  ;;  %11345 = vmatpush1.bf16.msra.mxu0 %v17505_v32  ;;  %11386 = vmatpush1.bf16.msra.mxu1 %v17507_v5  ;;  %v18294_v32 = vld [vmem:[#allocation47_spill] sm:$0xff]  ;;  %v14327_v5 = vadd.f32 %v10206_v24, %v9688_v7  ;;  %v14328_v39 = vadd.f32 %v10208_v3, %v9692_v21  ;;  %v18312_v24 = vld [vmem:[#allocation66_spill] sm:$0xff]  ;;  %v18318_v21 = vld [vmem:[#allocation20_spill] sm:$0xff] }
 0x8df   :  { %v13961_v40 = vmul.f32 -1.442695, %v14325_v38  ;;  %v10170_v36 = vpop.f32.mrb[79].mxu0  ;;  %v10211_v62 = vpop.f32.mrb[111].mxu1  ;;  %11346 = vmatprep.subr.bf16.mxu0 %v18289_v57  ;;  %11387 = vmatprep.subr.bf16.mxu1 %v18290_v50  ;;  %v18313_v13 = vld [vmem:[#allocation18_spill] sm:$0xff] }
 0x8e0   :  { %v13962_v56 = vmul.f32 -1.442695, %v14326_v44  ;;  %v13963_v63 = vmul.f32 -1.442695, %v14327_v5  ;;  %v18314_v3 = vld [vmem:[#allocation30_spill] sm:$0xff]  ;;  %v18321_v5 = vld [vmem:[#allocation33_spill] sm:$0xff] }
 0x8e1   :  { %16431 = vpow2.f32 %v13961_v40  ;;  %v18315_v40 = vld [vmem:[#allocation56_spill] sm:$0xff] }
 0x8e2   :  { %16433 = vpow2.f32 %v13962_v56  ;;  %11347 = vmatpush1.bf16.msra.mxu0 %v18291_v17  ;;  %11388 = vmatpush1.bf16.msra.mxu1 %v18292_v48  ;;  %v18316_v17 = vld [vmem:[#allocation19_spill] sm:$0xff] }
 0x8e3   :  { %11348 = vmatprep.subr.bf16.mxu0 %v18293_v46  ;;  %11389 = vmatprep.subr.bf16.mxu1 %v18294_v32  ;;  %16435 = vtanh.f32 %v14328_v39  ;;  %v18317_v48 = vld [vmem:[#allocation31_spill] sm:$0xff]  ;;  %v18319_v46 = vld [vmem:[#allocation32_spill] sm:$0xff]  ;;  %v18320_v32 = vld [vmem:[#allocation21_spill] sm:$0xff] }
 0x8e4   :  { %16437 = vpow2.f32 %v13963_v63  ;;  %v13964_v39 = vld [vmem:[%s18007_s4 + $0x8] sm:$0xf]  ;;  %v18326_v63 = vld [vmem:[#allocation24_spill] sm:$0xff] }
 0x8e6   :  { %11349 = vmatpush1.bf16.msra.mxu0 %v18295_v55  ;;  %11390 = vmatpush1.bf16.msra.mxu1 %v18296_v49  ;;  %v18322_v55 = vld [vmem:[#allocation22_spill] sm:$0xff] }
 0x8e7   :  { %11350 = vmatprep.subr.bf16.mxu0 %v18297_v43  ;;  %11391 = vmatprep.subr.bf16.mxu1 %v18298_v45  ;;  %v18323_v49 = vld [vmem:[#allocation34_spill] sm:$0xff]  ;;  %v18324_v43 = vld [vmem:[#allocation23_spill] sm:$0xff] }
 0x8e8   :  { %v18325_v45 = vld [vmem:[#allocation35_spill] sm:$0xff] }
 0x8ea   :  { %11351 = vmatpush1.bf16.msra.mxu0 %v18299_v33  ;;  %11392 = vmatpush1.bf16.msra.mxu1 %v18300_v61  ;;  %v10281_v33 = vrot.slane %v13964_v39, %v16872_v11  ;;  %v10285_v61 = vrot.slane %v13964_v39, %v16874_v12 }
 0x8eb   :  { %v16432_v59 = vpop.eup %16431  ;;  %11352 = vmatprep.subr.bf16.mxu0 %v18301_v6  ;;  %11393 = vmatprep.subr.bf16.mxu1 %v18302_v9  ;;  %v18329_v6 = vld [vmem:[#allocation37_spill] sm:$0xff] }
 0x8ec   :  { %v10226_v4 = vadd.f32 1.0, %v16432_v59  ;;  %v16434_v0 = vpop.eup %16433  ;;  %v18327_v59 = vld [vmem:[#allocation36_spill] sm:$0xff] }
 0x8ed   :  { %v10227_v42 = vadd.f32 1.0, %v16434_v0  ;;  %v16436_v16 = vpop.eup %16435 }
 0x8ee   :  { %16439 = vrcp.f32 %v10226_v4  ;;  %11353 = vmatpush1.bf16.msra.mxu0 %v18303_v2  ;;  %11394 = vmatpush1.bf16.msra.mxu1 %v18304_v37  ;;  %v16438_v1 = vpop.eup %16437  ;;  %v18328_v4 = vld [vmem:[#allocation25_spill] sm:$0xff]  ;;  %v18331_v2 = vld [vmem:[#allocation38_spill] sm:$0xff] }
 0x8ef   :  { %16441 = vrcp.f32 %v10227_v42  ;;  %11354 = vmatprep.subr.bf16.mxu0 %v18305_v27  ;;  %11395 = vmatprep.subr.bf16.mxu1 %v18306_v18  ;;  %v10228_v60 = vadd.f32 1.0, %v16438_v1  ;;  %v18330_v42 = vld [vmem:[#allocation26_spill] sm:$0xff] }
 0x8f1   :  { %16443 = vrcp.f32 %v10228_v60 }
 0x8f2   :  { %11355 = vmatpush1.bf16.msra.mxu0 %v18307_v34  ;;  %11396 = vmatpush1.bf16.msra.mxu1 %v18308_v31 }
 0x8f3   :  { %11356 = vmatprep.subr.bf16.mxu0 %v18309_v41  ;;  %11397 = vmatprep.subr.bf16.mxu1 %v18310_v26 }
 0x8f6   :  { %11357 = vmatpush1.bf16.msra.mxu0 %v18311_v23  ;;  %11398 = vmatpush1.bf16.msra.mxu1 %v18312_v24  ;;  %v10289_v24 = vrot.slane %v13964_v39, %v16906_v53 }
 0x8f7   :  { %11672 = vmatprep.subr.bf16.mxu0 %v18313_v13  ;;  %11713 = vmatprep.subr.bf16.mxu1 %v18314_v3  ;;  %v10293_v13 = vrot.slane %v13964_v39, %v16908_v54  ;;  %v18349_v39 = vld [vmem:[#allocation82_spill] sm:$0xff] }
 0x8f8   :  { %v16440_v38 = vpop.eup %16439 }
 0x8f9   :  { %v10237_v44 = vmul.f32 %v16440_v38, %v16436_v16  ;;  %v16442_v30 = vpop.eup %16441  ;;  %v18332_v38 = vld [vmem:[#allocation27_spill] sm:$0xff] }
 0x8fa   :  { %v10236_v36 = vmul.f32 %v16442_v30, %v18315_v40  ;;  %v18337_v30 = vld [vmem:[#allocation70_spill] sm:$0xff]  ;;  %v18338_v40 = vld [vmem:[#allocation71_spill] sm:$0xff] }
 0x8fb   :  { %v16444_v56 = vpop.eup %16443 }
 0x8fc   :  { %v17877_v62 = vadd.f32 %v10237_v44, %v10236_v36  ;;  %v18336_v44 = vld [vmem:[#allocation69_spill] sm:$0xff]  ;;  %v18339_v36 = vld [vmem:[#allocation72_spill] sm:$0xff] }
 0x8fe   :  { %16445 = vtanh.f32 %v17877_v62 }
 0x908   :  { %v16446_v57 = vpop.eup %16445 }
 0x909   :  { %v10240_v50 = vmul.f32 %v16446_v57, %v16444_v56  ;;  %v18340_v57 = vld [vmem:[#allocation73_spill] sm:$0xff] }
 0x90b   :  { %v10241_v7 = vpack.c.bf16 %v10240_v50, %v10240_v50  ;;  %v18341_v50 = vld [vmem:[#allocation74_spill] sm:$0xff] }
 0x90d   :  { %10242 = vst [vmem:[#allocation3 + $0x18] sm:$0xf] %v10241_v7  ;;  %11375 = vmatmul.mubr.bf16.vlgmr.msra.gmra.mrb[84].mxu0 %v10241_v7  ;;  %11416 = vmatmul.mubr.bf16.vlgmr.msra.gmra.mrb[116].mxu1 %v10241_v7 }
 0x90e   :  { %11673 = vmatpush1.bf16.msra.mxu0 %v18316_v17  ;;  %11714 = vmatpush1.bf16.msra.mxu1 %v18317_v48  ;;  %v18342_v48 = vld [vmem:[#allocation75_spill] sm:$0xff] }
 0x90f   :  { %11674 = vmatprep.subr.bf16.mxu0 %v18318_v21  ;;  %11715 = vmatprep.subr.bf16.mxu1 %v18319_v46  ;;  %v18343_v21 = vld [vmem:[#allocation76_spill] sm:$0xff]  ;;  %v18344_v46 = vld [vmem:[#allocation77_spill] sm:$0xff] }
 0x910   :  { %11704 = vmatprep.mubr.bf16.mxu0 %v18143_v15  ;;  %11745 = vmatprep.mubr.bf16.mxu1 %v18143_v15 }
 0x912   :  { %11675 = vmatpush1.bf16.msra.mxu0 %v18320_v32  ;;  %11716 = vmatpush1.bf16.msra.mxu1 %v18321_v5  ;;  %v18345_v32 = vld [vmem:[#allocation78_spill] sm:$0xff]  ;;  %v18346_v5 = vld [vmem:[#allocation79_spill] sm:$0xff] }
 0x913   :  { %11676 = vmatprep.subr.bf16.mxu0 %v18322_v55  ;;  %11717 = vmatprep.subr.bf16.mxu1 %v18323_v49  ;;  %v18347_v55 = vld [vmem:[#allocation80_spill] sm:$0xff]  ;;  %v18348_v49 = vld [vmem:[#allocation81_spill] sm:$0xff] }
 0x914   :  { %v11457_v7 = vld [vmem:[#allocation3 + $0x18] sm:$0xf] }
 0x916   :  { %11677 = vmatpush1.bf16.msra.mxu0 %v18324_v43  ;;  %11718 = vmatpush1.bf16.msra.mxu1 %v18325_v45 }
 0x917   :  { %11678 = vmatprep.subr.bf16.mxu0 %v18326_v63  ;;  %11719 = vmatprep.subr.bf16.mxu1 %v18327_v59  ;;  %v18350_v63 = vld [vmem:[#allocation83_spill] sm:$0xff]  ;;  %v18351_v59 = vld [vmem:[#allocation84_spill] sm:$0xff] }
 0x91a   :  { %11679 = vmatpush1.bf16.msra.mxu0 %v18328_v4  ;;  %11720 = vmatpush1.bf16.msra.mxu1 %v18329_v6  ;;  %v18353_v4 = vld [vmem:[#allocation86_spill] sm:$0xff] }
 0x91b   :  { %11680 = vmatprep.subr.bf16.mxu0 %v18330_v42  ;;  %11721 = vmatprep.subr.bf16.mxu1 %v18331_v2  ;;  %v18354_v2 = vld [vmem:[#allocation87_spill] sm:$0xff] }
 0x91c   :  { %v10769_v9 = vpop.f32.mrb[80].mxu0  ;;  %v10810_v0 = vpop.f32.mrb[112].mxu1 }
 0x91d   :  { %v14329_v37 = vadd.f32 %v10769_v9, %v10281_v33  ;;  %v10771_v27 = vpop.f32.mrb[81].mxu0  ;;  %v10812_v18 = vpop.f32.mrb[113].mxu1  ;;  %v14331_v3 = vadd.f32 %v10810_v0, %v10289_v24 }
 0x91e   :  { %v14330_v34 = vadd.f32 %v10771_v27, %v10285_v61  ;;  %v10773_v31 = vpop.f32.mrb[82].mxu0  ;;  %v10814_v41 = vpop.f32.mrb[114].mxu1  ;;  %11681 = vmatpush1.bf16.msra.mxu0 %v17650_v8  ;;  %11722 = vmatpush1.bf16.msra.mxu1 %v17652_v25  ;;  %v18333_v8 = vld [vmem:[#allocation39_spill] sm:$0xff]  ;;  %v18352_v61 = vld [vmem:[#allocation85_spill] sm:$0xff]  ;;  %v18355_v27 = vld [vmem:[#allocation88_spill] sm:$0xff] }
 0x91f   :  { %v14029_v26 = vmul.f32 -1.442695, %v14329_v37  ;;  %v10774_v16 = vpop.f32.mrb[83].mxu0  ;;  %v10815_v1 = vpop.f32.mrb[115].mxu1  ;;  %11682 = vmatprep.subr.bf16.mxu0 %v17656_v28  ;;  %11723 = vmatprep.subr.bf16.mxu1 %v17658_v29  ;;  %v18334_v25 = vld [vmem:[#allocation67_spill] sm:$0xff]  ;;  %v18335_v28 = vld [vmem:[#allocation68_spill] sm:$0xff]  ;;  %v14332_v29 = vadd.f32 %v10812_v18, %v10293_v13 }
 0x920   :  { %v14030_v23 = vmul.f32 -1.442695, %v14330_v34  ;;  %v14031_v60 = vmul.f32 -1.442695, %v14331_v3  ;;  %v18356_v18 = vld [vmem:[#allocation89_spill] sm:$0xff]  ;;  %v18357_v34 = vld [vmem:[#allocation90_spill] sm:$0xff] }
 0x921   :  { %16447 = vpow2.f32 %v14029_v26  ;;  %v18362_v31 = vld [vmem:[#allocation95_spill] sm:$0xff]  ;;  %v18363_v41 = vld [vmem:[#allocation96_spill] sm:$0xff]  ;;  %v18364_v26 = vld [vmem:[#allocation97_spill] sm:$0xff] }
 0x922   :  { %16449 = vpow2.f32 %v14030_v23  ;;  %11683 = vmatpush1.bf16.msra.mxu0 %v17660_v22  ;;  %11724 = vmatpush1.bf16.msra.mxu1 %v18332_v38  ;;  %v16025_v13 = vld [vmem:[#allocation9 + $0x104] ss:$16 sps:$4 sm:$0xff]   ;;  %v16032_v3 = vld [vmem:[#allocation9 + $0x128] ss:$16 sps:$4 sm:$0xff]  }
 0x923   :  { %11684 = vmatprep.subr.bf16.mxu0 %v18333_v8  ;;  %11725 = vmatprep.subr.bf16.mxu1 %v18334_v25  ;;  %16451 = vtanh.f32 %v14332_v29  ;;  %v16028_v8 = vld [vmem:[#allocation9 + $0x10c] ss:$16 sps:$4 sm:$0xff]   ;;  %v16026_v25 = vld [vmem:[#allocation9 + $0x108] ss:$16 sps:$4 sm:$0xff]  }
 0x924   :  { %16453 = vpow2.f32 %v14031_v60  ;;  %v16040_v29 = vld [vmem:[#allocation9 + $0x14c] ss:$16 sps:$4 sm:$0xff]   ;;  %v16043_v60 = vld [vmem:[#allocation9 + $0x164] ss:$16 sps:$4 sm:$0xff]  }
 0x926   :  { %11685 = vmatpush1.bf16.msra.mxu0 %v17675_v14  ;;  %11726 = vmatpush1.bf16.msra.mxu1 %v18335_v28  ;;  %v16037_v28 = vld [vmem:[#allocation9 + $0x144] ss:$16 sps:$4 sm:$0xff]  }
 0x927   :  { %11686 = vmatprep.subr.bf16.mxu0 %v18336_v44  ;;  %11727 = vmatprep.subr.bf16.mxu1 %v18337_v30  ;;  %v16035_v44 = vld [vmem:[#allocation9 + $0x140] ss:$16 sps:$4 sm:$0xff]   ;;  %v16038_v30 = vld [vmem:[#allocation9 + $0x148] ss:$16 sps:$4 sm:$0xff]  }
 0x92a   :  { %11687 = vmatpush1.bf16.msra.mxu0 %v18338_v40  ;;  %11728 = vmatpush1.bf16.msra.mxu1 %v18339_v36  ;;  %v16041_v40 = vld [vmem:[#allocation9 + $0x160] ss:$16 sps:$4 sm:$0xff]   ;;  %v16044_v36 = vld [vmem:[#allocation9 + $0x168] ss:$16 sps:$4 sm:$0xff]  }
 0x92b   :  { %v16448_v22 = vpop.eup %16447  ;;  %11946 = vmatprep.subr.bf16.mxu0 %v18340_v57  ;;  %11987 = vmatprep.subr.bf16.mxu1 %v18341_v50  ;;  %v16052_v57 = vld [vmem:[#allocation9 + $0x18c] ss:$16 sps:$4 sm:$0xff]   ;;  %v16047_v50 = vld [vmem:[#allocation9 + $0x180] ss:$16 sps:$4 sm:$0xff]  }
 0x92c   :  { %v10830_v56 = vadd.f32 1.0, %v16448_v22  ;;  %v16450_v14 = vpop.eup %16449  ;;  %v16046_v22 = vld [vmem:[#allocation9 + $0x16c] ss:$16 sps:$4 sm:$0xff]  }
 0x92d   :  { %v10831_v17 = vadd.f32 1.0, %v16450_v14  ;;  %11705 = vmatmul.mubr.bf16.vlgmr.msra.gmra.mrb[88].mxu0 %v11457_v7  ;;  %11746 = vmatmul.mubr.bf16.vlgmr.msra.gmra.mrb[120].mxu1 %v11457_v7  ;;  %v16452_v43 = vpop.eup %16451  ;;  %v16050_v14 = vld [vmem:[#allocation9 + $0x188] ss:$16 sps:$4 sm:$0xff]   ;;  %v16055_v7 = vld [vmem:[#allocation9 + $0x1a4] ss:$16 sps:$4 sm:$0xff]  }
 0x92e   :  { %16455 = vrcp.f32 %v10830_v56  ;;  %11947 = vmatpush1.bf16.msra.mxu0 %v18342_v48  ;;  %11988 = vmatpush1.bf16.msra.mxu1 %v18343_v21  ;;  %v16454_v45 = vpop.eup %16453  ;;  %v16049_v56 = vld [vmem:[#allocation9 + $0x184] ss:$16 sps:$4 sm:$0xff]   ;;  %v16053_v48 = vld [vmem:[#allocation9 + $0x1a0] ss:$16 sps:$4 sm:$0xff]   ;;  %v16056_v21 = vld [vmem:[#allocation9 + $0x1a8] ss:$16 sps:$4 sm:$0xff]  }
 0x92f   :  { %16457 = vrcp.f32 %v10831_v17  ;;  %11948 = vmatprep.subr.bf16.mxu0 %v18344_v46  ;;  %11989 = vmatprep.subr.bf16.mxu1 %v18345_v32  ;;  %v10832_v0 = vadd.f32 1.0, %v16454_v45  ;;  %v16058_v17 = vld [vmem:[#allocation9 + $0x1ac] ss:$16 sps:$4 sm:$0xff]   ;;  %v16059_v46 = vld [vmem:[#allocation9 + $0x1c0] ss:$16 sps:$4 sm:$0xff]  }
 0x930   :  { %11978 = vmatprep.mubr.bf16.mxu0 %v18143_v15  ;;  %12019 = vmatprep.mubr.bf16.mxu1 %v18143_v15  ;;  %v16061_v32 = vld [vmem:[#allocation9 + $0x1c4] ss:$16 sps:$4 sm:$0xff]   ;;  %v16068_v45 = vld [vmem:[#allocation9 + $0x1e8] ss:$16 sps:$4 sm:$0xff]  }
 0x931   :  { %16459 = vrcp.f32 %v10832_v0 }
 0x932   :  { %11949 = vmatpush1.bf16.msra.mxu0 %v18346_v5  ;;  %11990 = vmatpush1.bf16.msra.mxu1 %v18347_v55  ;;  %v16062_v5 = vld [vmem:[#allocation9 + $0x1c8] ss:$16 sps:$4 sm:$0xff]   ;;  %v16064_v55 = vld [vmem:[#allocation9 + $0x1cc] ss:$16 sps:$4 sm:$0xff]  }
 0x933   :  { %11950 = vmatprep.subr.bf16.mxu0 %v18348_v49  ;;  %11991 = vmatprep.subr.bf16.mxu1 %v18349_v39  ;;  %v16067_v49 = vld [vmem:[#allocation9 + $0x1e4] ss:$16 sps:$4 sm:$0xff]   ;;  %v16070_v39 = vld [vmem:[#allocation9 + $0x1ec] ss:$16 sps:$4 sm:$0xff]  }
 0x936   :  { %11951 = vmatpush1.bf16.msra.mxu0 %v18350_v63  ;;  %11992 = vmatpush1.bf16.msra.mxu1 %v18351_v59  ;;  %v16073_v63 = vld [vmem:[#allocation10 + $0x204] ss:$16 sps:$4 sm:$0xff]   ;;  %v16076_v59 = vld [vmem:[#allocation10 + $0x20c] ss:$16 sps:$4 sm:$0xff]  }
 0x937   :  { %11952 = vmatprep.subr.bf16.mxu0 %v18352_v61  ;;  %11993 = vmatprep.subr.bf16.mxu1 %v18353_v4 }
 0x938   :  { %v16456_v33 = vpop.eup %16455 }
 0x939   :  { %v10841_v6 = vmul.f32 %v16456_v33, %v16452_v43  ;;  %v16458_v9 = vpop.eup %16457  ;;  %v16065_v43 = vld [vmem:[#allocation9 + $0x1e0] ss:$16 sps:$4 sm:$0xff]   ;;  %v14032_v33 = vld [vmem:[%s18007_s4 + $0x4] sm:$0xf] }
 0x93a   :  { %v10840_v42 = vmul.f32 %v16458_v9, %v17761_v10  ;;  %11953 = vmatpush1.bf16.msra.mxu0 %v17738_v35  ;;  %11994 = vmatpush1.bf16.msra.mxu1 %v17740_v19  ;;  %v18358_v10 = vld [vmem:[#allocation91_spill] sm:$0xff]  ;;  %v18359_v35 = vld [vmem:[#allocation92_spill] sm:$0xff]  ;;  %v18360_v19 = vld [vmem:[#allocation93_spill] sm:$0xff]  ;;  %v10888_v61 = vrot.slane %v14032_v33, %v16872_v11  ;;  %v10892_v4 = vrot.slane %v14032_v33, %v16874_v12 }
 0x93b   :  { %11954 = vmatprep.subr.bf16.mxu0 %v17744_v51  ;;  %11995 = vmatprep.subr.bf16.mxu1 %v18354_v2  ;;  %v18361_v51 = vld [vmem:[#allocation94_spill] sm:$0xff]  ;;  %v16460_v16 = vpop.eup %16459 }
 0x93c   :  { %v17940_v37 = vadd.f32 %v10841_v6, %v10840_v42 }
 0x93e   :  { %16461 = vtanh.f32 %v17940_v37  ;;  %11955 = vmatpush1.bf16.msra.mxu0 %v18355_v27  ;;  %11996 = vmatpush1.bf16.msra.mxu1 %v18356_v18 }
 0x93f   :  { %11956 = vmatprep.subr.bf16.mxu0 %v18357_v34  ;;  %11997 = vmatprep.subr.bf16.mxu1 %v18358_v10 }
 0x942   :  { %11957 = vmatpush1.bf16.msra.mxu0 %v18359_v35  ;;  %11998 = vmatpush1.bf16.msra.mxu1 %v18360_v19 }
 0x943   :  { %11958 = vmatprep.subr.bf16.mxu0 %v18361_v51  ;;  %11999 = vmatprep.subr.bf16.mxu1 %v18362_v31  ;;  %v10896_v31 = vrot.slane %v14032_v33, %v16906_v53 }
 0x946   :  { %11959 = vmatpush1.bf16.msra.mxu0 %v18363_v41  ;;  %12000 = vmatpush1.bf16.msra.mxu1 %v18364_v26  ;;  %v10900_v41 = vrot.slane %v14032_v33, %v16908_v54  ;;  %v16083_v33 = vld [vmem:[#allocation10 + $0x240] ss:$16 sps:$4 sm:$0xff]  }
 0x947   :  { %11960 = vmatprep.subr.bf16.mxu0 %v17784_v52  ;;  %12001 = vmatprep.subr.bf16.mxu1 %v17786_v47  ;;  %v16023_v52 = vld [vmem:[#allocation9 + $0x100] ss:$16 sps:$4 sm:$0xff]   ;;  %v16034_v47 = vld [vmem:[#allocation9 + $0x12c] ss:$16 sps:$4 sm:$0xff]  }
 0x948   :  { %v16462_v1 = vpop.eup %16461 }
 0x949   :  { %v10844_v23 = vmul.f32 %v16462_v1, %v16460_v16 }
 0x94a   :  { %11961 = vmatpush1.bf16.msra.mxu0 %v17790_v58  ;;  %12002 = vmatpush1.bf16.msra.mxu1 %v17792_v20  ;;  %v16031_v58 = vld [vmem:[#allocation9 + $0x124] ss:$16 sps:$4 sm:$0xff]   ;;  %v16029_v20 = vld [vmem:[#allocation9 + $0x120] ss:$16 sps:$4 sm:$0xff]  }
 0x94b   :  { %v10845_v24 = vpack.c.bf16 %v10844_v23, %v10844_v23  ;;  %12276 = vmatprep.subr.bf16.mxu0 %v16025_v13  ;;  %12317 = vmatprep.subr.bf16.mxu1 %v16028_v8 }
 0x94d   :  { %v10847_v38 = vrot.slane %v10845_v24, 4  ;;  %11979 = vmatmul.mubr.bf16.vlgmr.msra.gmra.mrb[88].mxu0 %v10845_v24  ;;  %12020 = vmatmul.mubr.bf16.vlgmr.msra.gmra.mrb[120].mxu1 %v10845_v24 }
 0x94e   :  { %12308 = vmatprep.mubr.bf16.mxu0 %v18143_v15  ;;  %12349 = vmatprep.mubr.bf16.mxu1 %v18143_v15 }
 0x94f   :  { %10849 = vst [vmem:[#allocation3 + $0x10] sm:$0xf0] %v10847_v38  ;;  %12277 = vmatpush1.bf16.msra.mxu0 %v16023_v52  ;;  %12318 = vmatpush1.bf16.msra.mxu1 %v16026_v25 }
 0x950   :  { %12278 = vmatprep.subr.bf16.mxu0 %v16031_v58  ;;  %12319 = vmatprep.subr.bf16.mxu1 %v16034_v47 }
 0x953   :  { %12279 = vmatpush1.bf16.msra.mxu0 %v16029_v20  ;;  %12320 = vmatpush1.bf16.msra.mxu1 %v16032_v3 }
 0x954   :  { %12280 = vmatprep.subr.bf16.mxu0 %v16037_v28  ;;  %12321 = vmatprep.subr.bf16.mxu1 %v16040_v29 }
 0x957   :  { %12281 = vmatpush1.bf16.msra.mxu0 %v16035_v44  ;;  %12322 = vmatpush1.bf16.msra.mxu1 %v16038_v30 }
 0x958   :  { %12282 = vmatprep.subr.bf16.mxu0 %v16043_v60  ;;  %12323 = vmatprep.subr.bf16.mxu1 %v16046_v22 }
 0x95b   :  { %12283 = vmatpush1.bf16.msra.mxu0 %v16041_v40  ;;  %12324 = vmatpush1.bf16.msra.mxu1 %v16044_v36  ;;  %v14100_v40 = vld [vmem:[%s18007_s4 + $0x8] sm:$0xf] }
 0x95c   :  { %12284 = vmatprep.subr.bf16.mxu0 %v16049_v56  ;;  %12325 = vmatprep.subr.bf16.mxu1 %v16052_v57  ;;  %v16071_v56 = vld [vmem:[#allocation10 + $0x200] ss:$16 sps:$4 sm:$0xff]   ;;  %v16074_v57 = vld [vmem:[#allocation10 + $0x208] ss:$16 sps:$4 sm:$0xff]  }
 0x95f   :  { %12285 = vmatpush1.bf16.msra.mxu0 %v16047_v50  ;;  %12326 = vmatpush1.bf16.msra.mxu1 %v16050_v14  ;;  %v16079_v14 = vld [vmem:[#allocation10 + $0x224] ss:$16 sps:$4 sm:$0xff]  }
 0x960   :  { %12286 = vmatprep.subr.bf16.mxu0 %v16055_v7  ;;  %12327 = vmatprep.subr.bf16.mxu1 %v16058_v17  ;;  %v16082_v7 = vld [vmem:[#allocation10 + $0x22c] ss:$16 sps:$4 sm:$0xff]   ;;  %v11499_v17 = vrot.slane %v14100_v40, %v16874_v12 }
 0x963   :  { %12287 = vmatpush1.bf16.msra.mxu0 %v16053_v48  ;;  %12328 = vmatpush1.bf16.msra.mxu1 %v16056_v21  ;;  %v16077_v48 = vld [vmem:[#allocation10 + $0x220] ss:$16 sps:$4 sm:$0xff]   ;;  %v16080_v21 = vld [vmem:[#allocation10 + $0x228] ss:$16 sps:$4 sm:$0xff]  }
 0x964   :  { %12288 = vmatprep.subr.bf16.mxu0 %v16061_v32  ;;  %12329 = vmatprep.subr.bf16.mxu1 %v16064_v55  ;;  %v16088_v55 = vld [vmem:[#allocation10 + $0x24c] ss:$16 sps:$4 sm:$0xff]  }
 0x967   :  { %12289 = vmatpush1.bf16.msra.mxu0 %v16059_v46  ;;  %12330 = vmatpush1.bf16.msra.mxu1 %v16062_v5  ;;  %v16085_v5 = vld [vmem:[#allocation10 + $0x244] ss:$16 sps:$4 sm:$0xff]  }
 0x968   :  { %12290 = vmatprep.subr.bf16.mxu0 %v16067_v49  ;;  %12331 = vmatprep.subr.bf16.mxu1 %v16070_v39 }
 0x96b   :  { %12291 = vmatpush1.bf16.msra.mxu0 %v16065_v43  ;;  %12332 = vmatpush1.bf16.msra.mxu1 %v16068_v45 }
 0x96c   :  { %12550 = vmatprep.subr.bf16.mxu0 %v16073_v63  ;;  %12591 = vmatprep.subr.bf16.mxu1 %v16076_v59 }
 0x9e0   :  { %v11376_v6 = vpop.f32.mrb[84].mxu0  ;;  %v11417_v9 = vpop.f32.mrb[116].mxu1 }
 0x9e1   :  { %v14333_v0 = vadd.f32 %v11376_v6, %v10888_v61  ;;  %v11378_v42 = vpop.f32.mrb[85].mxu0  ;;  %v11419_v2 = vpop.f32.mrb[117].mxu1  ;;  %v14335_v26 = vadd.f32 %v11417_v9, %v10896_v31  ;;  %v16086_v9 = vld [vmem:[#allocation10 + $0x248] ss:$16 sps:$4 sm:$0xff]  }
 0x9e2   :  { %v14334_v27 = vadd.f32 %v11378_v42, %v10892_v4  ;;  %v11380_v18 = vpop.f32.mrb[86].mxu0  ;;  %v11421_v34 = vpop.f32.mrb[118].mxu1  ;;  %v14336_v16 = vadd.f32 %v11419_v2, %v10900_v41  ;;  %v16091_v42 = vld [vmem:[#allocation10 + $0x264] ss:$16 sps:$4 sm:$0xff]   ;;  %v16094_v2 = vld [vmem:[#allocation10 + $0x26c] ss:$16 sps:$4 sm:$0xff]  }
 0x9e3   :  { %v14097_v10 = vmul.f32 -1.442695, %v14333_v0  ;;  %v11381_v35 = vpop.f32.mrb[87].mxu0  ;;  %v11422_v19 = vpop.f32.mrb[119].mxu1  ;;  %v14099_v1 = vmul.f32 -1.442695, %v14335_v26  ;;  %v11507_v34 = vrot.slane %v14100_v40, %v16908_v54 }
 0x9e4   :  { %v14098_v51 = vmul.f32 -1.442695, %v14334_v27  ;;  %v11503_v27 = vrot.slane %v14100_v40, %v16906_v53  ;;  %v16092_v18 = vld [vmem:[#allocation10 + $0x268] ss:$16 sps:$4 sm:$0xff]   ;;  %v16100_v35 = vld [vmem:[#allocation10 + $0x28c] ss:$16 sps:$4 sm:$0xff]  }
 0x9e5   :  { %16463 = vpow2.f32 %v14097_v10  ;;  %v16097_v10 = vld [vmem:[#allocation10 + $0x284] ss:$16 sps:$4 sm:$0xff]   ;;  %v16098_v31 = vld [vmem:[#allocation10 + $0x288] ss:$16 sps:$4 sm:$0xff]  }
 0x9e6   :  { %16465 = vpow2.f32 %v14098_v51  ;;  %v16095_v51 = vld [vmem:[#allocation10 + $0x280] ss:$16 sps:$4 sm:$0xff]   ;;  %v16103_v26 = vld [vmem:[#allocation10 + $0x2a4] ss:$16 sps:$4 sm:$0xff]  }
 0x9e7   :  { %16467 = vtanh.f32 %v14336_v16  ;;  %v16106_v16 = vld [vmem:[#allocation10 + $0x2ac] ss:$16 sps:$4 sm:$0xff]  }
 0x9e8   :  { %16469 = vpow2.f32 %v14099_v1 }
 0x9ef   :  { %v16464_v23 = vpop.eup %16463 }
 0x9f0   :  { %v11437_v24 = vadd.f32 1.0, %v16464_v23  ;;  %v16466_v38 = vpop.eup %16465 }
 0x9f1   :  { %v11438_v13 = vadd.f32 1.0, %v16466_v38  ;;  %v16468_v8 = vpop.eup %16467  ;;  %v16104_v38 = vld [vmem:[#allocation10 + $0x2a8] ss:$16 sps:$4 sm:$0xff]  }
 0x9f2   :  { %16471 = vrcp.f32 %v11437_v24  ;;  %v16470_v52 = vpop.eup %16469  ;;  %v16101_v24 = vld [vmem:[#allocation10 + $0x2a0] ss:$16 sps:$4 sm:$0xff]  }
 0x9f3   :  { %16473 = vrcp.f32 %v11438_v13  ;;  %v11439_v20 = vadd.f32 1.0, %v16470_v52  ;;  %v16112_v52 = vld [vmem:[#allocation10 + $0x2cc] ss:$16 sps:$4 sm:$0xff]  }
 0x9f5   :  { %16475 = vrcp.f32 %v11439_v20  ;;  %v16110_v20 = vld [vmem:[#allocation10 + $0x2c8] ss:$16 sps:$4 sm:$0xff]  }
 0x9fc   :  { %v16472_v25 = vpop.eup %16471 }
 0x9fd   :  { %v11448_v58 = vmul.f32 %v16472_v25, %v16468_v8  ;;  %v16474_v47 = vpop.eup %16473  ;;  %v16109_v8 = vld [vmem:[#allocation10 + $0x2c4] ss:$16 sps:$4 sm:$0xff]  }
 0x9fe   :  { %v11447_v3 = vmul.f32 %v16474_v47, %v17877_v62  ;;  %v11495_v62 = vrot.slane %v14100_v40, %v16872_v11  ;;  %v16107_v47 = vld [vmem:[#allocation10 + $0x2c0] ss:$16 sps:$4 sm:$0xff]  }
 0x9ff   :  { %v16476_v29 = vpop.eup %16475 }
 0xa00   :  { %v11449_v28 = vadd.f32 %v11448_v58, %v11447_v3  ;;  %v16115_v3 = vld [vmem:[#allocation10 + $0x2e4] ss:$16 sps:$4 sm:$0xff]  }
 0xa02   :  { %16477 = vtanh.f32 %v11449_v28  ;;  %v16118_v28 = vld [vmem:[#allocation10 + $0x2ec] ss:$16 sps:$4 sm:$0xff]  }
 0xa0c   :  { %v16478_v44 = vpop.eup %16477 }
 0xa0d   :  { %v11451_v30 = vmul.f32 %v16478_v44, %v16476_v29  ;;  %v16113_v29 = vld [vmem:[#allocation10 + $0x2e0] ss:$16 sps:$4 sm:$0xff]   ;;  %v16116_v44 = vld [vmem:[#allocation10 + $0x2e8] ss:$16 sps:$4 sm:$0xff]  }
 0xa0f   :  { %v11452_v60 = vpack.c.bf16 %v11451_v30, %v11451_v30  ;;  %v16119_v30 = vld [vmem:[#allocation12] sm:$0xff]  }
 0xa11   :  { %v11454_v22 = vrot.slane %v11452_v60, 4 }
 0xa13   :  { %11456 = vst [vmem:[#allocation3 + $0x18] sm:$0xf0] %v11454_v22 }
 0xa1a   :  { %v12058_v36 = vld [vmem:[#allocation3 + $0x18] sm:$0xf0] }
 0xa1b   :  { %v12114_v50 = vrot.slane %v12058_v36, 4 }
 0xa1d   :  { %12309 = vmatmul.mubr.bf16.vlgmr.msra.gmra.mrb[92].mxu0 %v12114_v50  ;;  %12350 = vmatmul.mubr.bf16.vlgmr.msra.gmra.mrb[124].mxu1 %v12114_v50 }
 0xa1e   :  { %12551 = vmatpush1.bf16.msra.mxu0 %v16071_v56  ;;  %12592 = vmatpush1.bf16.msra.mxu1 %v16074_v57 }
 0xa1f   :  { %12552 = vmatprep.subr.bf16.mxu0 %v16079_v14  ;;  %12593 = vmatprep.subr.bf16.mxu1 %v16082_v7 }
 0xa20   :  { %v11980_v46 = vpop.f32.mrb[88].mxu0  ;;  %v12021_v32 = vpop.f32.mrb[120].mxu1  ;;  %12582 = vmatprep.mubr.bf16.mxu0 %v18143_v15  ;;  %12623 = vmatprep.mubr.bf16.mxu1 %v18143_v15  ;;  %v16089_v15 = vld [vmem:[#allocation10 + $0x260] ss:$16 sps:$4 sm:$0xff]  }
 0xa21   :  { %v14337_v49 = vadd.f32 %v11980_v46, %v11495_v62  ;;  %v11982_v39 = vpop.f32.mrb[89].mxu0  ;;  %v12023_v43 = vpop.f32.mrb[121].mxu1  ;;  %v14339_v19 = vadd.f32 %v12021_v32, %v11503_v27  ;;  %v12665_v46 = vld [vmem:[#allocation3] sm:$0xff]  ;;  %v16121_v32 = vld [vmem:[#allocation12 + $0x10] sm:$0xff]  }
 0xa22   :  { %v14338_v45 = vadd.f32 %v11982_v39, %v11499_v17  ;;  %v11984_v63 = vpop.f32.mrb[90].mxu0  ;;  %v12025_v59 = vpop.f32.mrb[122].mxu1  ;;  %12553 = vmatpush1.bf16.msra.mxu0 %v16077_v48  ;;  %12594 = vmatpush1.bf16.msra.mxu1 %v16080_v21  ;;  %v14340_v41 = vadd.f32 %v12023_v43, %v11507_v34  ;;  %v16120_v21 = vld [vmem:[#allocation12 + $0x8] sm:$0xff]   ;;  %v16126_v39 = vld [vmem:[#allocation12 + $0x38] sm:$0xff]  }
 0xa23   :  { %v14165_v61 = vmul.f32 -1.442695, %v14337_v49  ;;  %v11985_v4 = vpop.f32.mrb[91].mxu0  ;;  %v12026_v6 = vpop.f32.mrb[123].mxu1  ;;  %12554 = vmatprep.subr.bf16.mxu0 %v16085_v5  ;;  %12595 = vmatprep.subr.bf16.mxu1 %v16088_v55  ;;  %v14167_v1 = vmul.f32 -1.442695, %v14339_v19 }
 0xa24   :  { %v14166_v0 = vmul.f32 -1.442695, %v14338_v45  ;;  %v16123_v5 = vld [vmem:[#allocation12 + $0x20] sm:$0xff]   ;;  %v16124_v55 = vld [vmem:[#allocation12 + $0x28] sm:$0xff]   ;;  %v16125_v49 = vld [vmem:[#allocation12 + $0x30] sm:$0xff]  }
 0xa25   :  { %16479 = vpow2.f32 %v14165_v61  ;;  %v12666_v43 = vld [vmem:[#allocation3 + $0x8] sm:$0xff]  ;;  %v12667_v45 = vld [vmem:[#allocation3 + $0x10] sm:$0xff] }
 0xa26   :  { %16481 = vpow2.f32 %v14166_v0  ;;  %12555 = vmatpush1.bf16.msra.mxu0 %v16083_v33  ;;  %12596 = vmatpush1.bf16.msra.mxu1 %v16086_v9  ;;  %v14168_v63 = vld [vmem:[%s18007_s4 + $0x8] sm:$0xf] }
 0xa27   :  { %12556 = vmatprep.subr.bf16.mxu0 %v16091_v42  ;;  %12597 = vmatprep.subr.bf16.mxu1 %v16094_v2  ;;  %16483 = vtanh.f32 %v14340_v41  ;;  %v12096_v59 = vrot.slane %v14168_v63, %v16872_v11  ;;  %v12100_v33 = vrot.slane %v14168_v63, %v16874_v12  ;;  %v12108_v11 = vrot.slane %v14168_v63, %v16908_v54  ;;  %v14236_v54 = vld [vmem:[%s18009_s6] ss:$0 sm:$0xff]  ;;  %s16669_s6 = smov [#allocation13]  }
 0xa28   :  { %16485 = vpow2.f32 %v14167_v1  ;;  %s12818_s22 = sshll.u32 %s16669_s6, 4  ;;  %s12819_s22 = int_to_ptr.vmem [resolvable:$true] %s12818_s22 }
 0xa29   :  { %s16629_s23 = scalar_lea.vmem %s12819_s22, 1024  ;;  %p16634_p13 = scmp.lt.s32.totalorder %s12819_s22, %s12819_s22 }
 0xa2a   :  { %12557 = vmatpush1.bf16.msra.mxu0 %v16089_v15  ;;  %12598 = vmatpush1.bf16.msra.mxu1 %v16092_v18  ;;  %p16630_p12 = scmp.ne.s32.totalorder %s12819_s22, %s16629_s23  ;;  %p16635_p0 = scmp.lt.s32.totalorder %s16629_s23, %s16629_s23 }
 0xa2b   :  { %12558 = vmatprep.subr.bf16.mxu0 %v16097_v10  ;;  %12599 = vmatprep.subr.bf16.mxu1 %v16100_v35  ;;  %v12104_v35 = vrot.slane %v14168_v63, %v16906_v53 }
 0xa2c   :  { %p16636_p1 = por %p16635_p0, %p16634_p13 }
 0xa2e   :  { %12559 = vmatpush1.bf16.msra.mxu0 %v16095_v51  ;;  %12600 = vmatpush1.bf16.msra.mxu1 %v16098_v31  ;;  %p16637_p2 = pnand %p16636_p1, %p16630_p12 }
 0xa2f   :  { %v16480_v23 = vpop.eup %16479  ;;  %12560 = vmatprep.subr.bf16.mxu0 %v16103_v26  ;;  %12601 = vmatprep.subr.bf16.mxu1 %v16106_v16 }
 0xa30   :  { %v12041_v13 = vadd.f32 1.0, %v16480_v23  ;;  %v16482_v25 = vpop.eup %16481 }
 0xa31   :  { %v12042_v58 = vadd.f32 1.0, %v16482_v25  ;;  %v16484_v60 = vpop.eup %16483 }
 0xa32   :  { %16487 = vrcp.f32 %v12041_v13  ;;  %12561 = vmatpush1.bf16.msra.mxu0 %v16101_v24  ;;  %12602 = vmatpush1.bf16.msra.mxu1 %v16104_v38  ;;  %v16486_v22 = vpop.eup %16485 }
 0xa33   :  { %16489 = vrcp.f32 %v12042_v58  ;;  %12562 = vmatprep.subr.bf16.mxu0 %v16109_v8  ;;  %12603 = vmatprep.subr.bf16.mxu1 %v16112_v52  ;;  %v12043_v57 = vadd.f32 1.0, %v16486_v22 }
 0xa35   :  { %16491 = vrcp.f32 %v12043_v57 }
 0xa36   :  { %12563 = vmatpush1.bf16.msra.mxu0 %v16107_v47  ;;  %12604 = vmatpush1.bf16.msra.mxu1 %v16110_v20 }
 0xa37   :  { %12564 = vmatprep.subr.bf16.mxu0 %v16115_v3  ;;  %12605 = vmatprep.subr.bf16.mxu1 %v16118_v28 }
 0xa3a   :  { %12565 = vmatpush1.bf16.msra.mxu0 %v16113_v29  ;;  %12606 = vmatpush1.bf16.msra.mxu1 %v16116_v44 }
 0xa3b   :  { %14257 = vmatprep.subr.bf16.mxu0 %v16119_v30 }
 0xa3c   :  { %v16488_v40 = vpop.eup %16487 }
 0xa3d   :  { %v12052_v36 = vmul.f32 %v16488_v40, %v16484_v60  ;;  %v16490_v56 = vpop.eup %16489 }
 0xa3e   :  { %v12051_v50 = vmul.f32 %v16490_v56, %v17940_v37  ;;  %v16122_v37 = vld [vmem:[#allocation12 + $0x18] sm:$0xff]  }
 0xa3f   :  { %v16492_v7 = vpop.eup %16491 }
 0xa40   :  { %v17977_v14 = vadd.f32 %v12052_v36, %v12051_v50 }
 0xa42   :  { %16493 = vtanh.f32 %v17977_v14 }
 0xa4c   :  { %v16494_v62 = vpop.eup %16493 }
 0xa4d   :  { %v12055_v17 = vmul.f32 %v16494_v62, %v16492_v7 }
 0xa4f   :  { %v12056_v48 = vpack.c.bf16 %v12055_v17, %v12055_v17 }
 0xa51   :  { %12057 = vst [vmem:[#allocation3 + $0x18] sm:$0xf] %v12056_v48  ;;  %12583 = vmatmul.mubr.bf16.vlgmr.msra.gmra.mrb[92].mxu0 %v12056_v48  ;;  %12624 = vmatmul.mubr.bf16.vlgmr.msra.gmra.mrb[124].mxu1 %v12056_v48 }
 0xa52   :  { %14258 = vmatpush3.bf16.msra.mxu0 %v16119_v30  ;;  %14273 = vmatprep.mubr.bf16.mxu0 %v12665_v46 }
 0xa53   :  { %14259 = vmatprep.subr.bf16.mxu0 %v16120_v21 }
 0xa56   :  { %14260 = vmatpush3.bf16.msra.mxu0 %v16120_v21 }
 0xa57   :  { %14261 = vmatprep.subr.bf16.mxu0 %v16121_v32 }
 0xa5a   :  { %14262 = vmatpush3.bf16.msra.mxu0 %v16121_v32 }
 0xa5b   :  { %14263 = vmatprep.subr.bf16.mxu0 %v16122_v37 }
 0xa5e   :  { %14264 = vmatpush3.bf16.msra.mxu0 %v16122_v37 }
 0xa5f   :  { %14265 = vmatprep.subr.bf16.mxu0 %v16123_v5 }
 0xa62   :  { %14266 = vmatpush3.bf16.msra.mxu0 %v16123_v5 }
 0xa63   :  { %14267 = vmatprep.subr.bf16.mxu0 %v16124_v55 }
 0xa66   :  { %14268 = vmatpush3.bf16.msra.mxu0 %v16124_v55 }
 0xa67   :  { %14269 = vmatprep.subr.bf16.mxu0 %v16125_v49 }
 0xa6a   :  { %14270 = vmatpush3.bf16.msra.mxu0 %v16125_v49 }
 0xa6b   :  { %14271 = vmatprep.subr.bf16.mxu0 %v16126_v39 }
 0xa6e   :  { %14272 = vmatpush3.bf16.msra.mxu0 %v16126_v39 }
 0xa71   :  { %14274 = vmatmul.mubr.bf16.vlgmr.msra.gmra.mrb[96].mxu0 %v12666_v43 }
 0xa72   :  { %14277 = vmatprep.mubr.bf16.mxu0 %v12667_v45 }
 0xb24   :  { %v12584_v61 = vpop.f32.mrb[92].mxu0  ;;  %v12625_v4 = vpop.f32.mrb[124].mxu1 }
 0xb25   :  { %v14341_v6 = vadd.f32 %v12584_v61, %v12096_v59  ;;  %v12586_v9 = vpop.f32.mrb[93].mxu0  ;;  %v12627_v0 = vpop.f32.mrb[125].mxu1  ;;  %v14343_v19 = vadd.f32 %v12625_v4, %v12104_v35 }
 0xb26   :  { %v14342_v42 = vadd.f32 %v12586_v9, %v12100_v33  ;;  %v12588_v2 = vpop.f32.mrb[94].mxu0  ;;  %v12629_v27 = vpop.f32.mrb[126].mxu1  ;;  %v14344_v12 = vadd.f32 %v12627_v0, %v12108_v11 }
 0xb27   :  { %v14233_v15 = vmul.f32 -1.442695, %v14341_v6  ;;  %v12589_v18 = vpop.f32.mrb[95].mxu0  ;;  %v12630_v34 = vpop.f32.mrb[127].mxu1  ;;  %v14235_v51 = vmul.f32 -1.442695, %v14343_v19 }
 0xb28   :  { %v14234_v10 = vmul.f32 -1.442695, %v14342_v42 }
 0xb29   :  { %16495 = vpow2.f32 %v14233_v15 }
 0xb2a   :  { %16497 = vpow2.f32 %v14234_v10 }
 0xb2b   :  { %16499 = vtanh.f32 %v14344_v12 }
 0xb2c   :  { %16501 = vpow2.f32 %v14235_v51 }
 0xb33   :  { %v16496_v31 = vpop.eup %16495 }
 0xb34   :  { %v12645_v41 = vadd.f32 1.0, %v16496_v31  ;;  %v16498_v26 = vpop.eup %16497 }
 0xb35   :  { %v12646_v16 = vadd.f32 1.0, %v16498_v26  ;;  %v16500_v1 = vpop.eup %16499 }
 0xb36   :  { %16503 = vrcp.f32 %v12645_v41  ;;  %v16502_v23 = vpop.eup %16501 }
 0xb37   :  { %16505 = vrcp.f32 %v12646_v16  ;;  %v12647_v53 = vadd.f32 1.0, %v16502_v23 }
 0xb39   :  { %16507 = vrcp.f32 %v12647_v53 }
 0xb40   :  { %v16504_v24 = vpop.eup %16503 }
 0xb41   :  { %v12656_v38 = vmul.f32 %v16504_v24, %v16500_v1  ;;  %v16506_v13 = vpop.eup %16505 }
 0xb42   :  { %v12655_v8 = vmul.f32 %v16506_v13, %v17977_v14 }
 0xb43   :  { %v16508_v30 = vpop.eup %16507 }
 0xb44   :  { %v14275_v52 = vpop.f32.mrb[96].mxu0  ;;  %v12657_v25 = vadd.f32 %v12656_v38, %v12655_v8 }
 0xb45   :  { %v12783_v58 = vadd.f32 %v14275_v52, %v14236_v54  ;;  %v12774_v47 = vpop.f32.mrb[97].mxu0 }
 0xb46   :  { %v12775_v20 = vadd.f32 %v14236_v54, %v12774_v47  ;;  %v14276_v3 = vpop.f32.mrb[98].mxu0  ;;  %16509 = vtanh.f32 %v12657_v25 }
 0xb47   :  { %12807 = vst [vmem:[#allocation13 + $0x10] sm:$0xff] %v12783_v58  ;;  %v12786_v28 = vadd.f32 %v14276_v3, %v14236_v54  ;;  %v12777_v29 = vpop.f32.mrb[99].mxu0 }
 0xb48   :  { %12805 = vst [vmem:[#allocation13] sm:$0xff] %v12775_v20  ;;  %v12778_v44 = vadd.f32 %v14236_v54, %v12777_v29 }
 0xb49   :  { %12808 = vst [vmem:[#allocation13 + $0x18] sm:$0xff] %v12786_v28 }
 0xb4a   :  { %12806 = vst [vmem:[#allocation13 + $0x8] sm:$0xff] %v12778_v44 }
 0xb50   :  { %v16510_v60 = vpop.eup %16509 }
 0xb51   :  { %v12659_v22 = vmul.f32 %v16510_v60, %v16508_v30 }
 0xb53   :  { %v12660_v40 = vpack.c.bf16 %v12659_v22, %v12659_v22 }
 0xb55   :  { %v12662_v36 = vrot.slane %v12660_v40, 4 }
 0xb57   :  { %12664 = vst [vmem:[#allocation3 + $0x18] sm:$0xf0] %v12662_v36 }
 0xb5e   :  { %v12668_v56 = vld [vmem:[#allocation3 + $0x18] sm:$0xff] }
 0xb5f   :  { %14278 = vmatmul.mubr.bf16.gmra.mrb[100].mxu0 %v12668_v56 }
 0xc32   :  { %v14279_v57 = vpop.f32.mrb[100].mxu0 }
 0xc33   :  { %v12799_v50 = vadd.f32 %v14279_v57, %v14236_v54  ;;  %v12790_v14 = vpop.f32.mrb[101].mxu0 }
 0xc34   :  { %v12791_v7 = vadd.f32 %v14236_v54, %v12790_v14  ;;  %v14280_v62 = vpop.f32.mrb[102].mxu0 }
 0xc35   :  { %12811 = vst [vmem:[#allocation13 + $0x30] sm:$0xff] %v12799_v50  ;;  %v12802_v17 = vadd.f32 %v14280_v62, %v14236_v54  ;;  %v12793_v48 = vpop.f32.mrb[103].mxu0 }
 0xc36   :  { %12809 = vst [vmem:[#allocation13 + $0x20] sm:$0xff] %v12791_v7  ;;  %v12794_v21 = vadd.f32 %v14236_v54, %v12793_v48 }
 0xc37   :  { %12812 = vst [vmem:[#allocation13 + $0x38] sm:$0xff] %v12802_v17 }
 0xc38   :  { %12810 = vst [vmem:[#allocation13 + $0x28] sm:$0xff] %v12794_v21 }
 0xc39   :  { %16640 = shalt.err (!%p16637_p2)
}
 0xc3a   :  { %s16641_s1 = scalar_lea.hbm %s18010_s7, 1024 }
 0xc3b   :  { %p16642_p3 = scmp.ne.s32.totalorder %s18010_s7, %s16641_s1  ;;  %p16645_p4 = scmp.lt.u32.totalorder %s16641_s1, %s18010_s7 }
 0xc3d   :  { %p16647_p5 = pnand %p16645_p4, %p16642_p3 }
 0xc3f   :  { %16650 = shalt.err (!%p16647_p5)
}
 0xc40   :  { %s16670_s18 = smov 128   ;;  %s16671_s29 = smov 8  }
 0xc41   :  { %12824 = dma.vmem_to_hbm [thread:$0]  %s12819_s22, 1024, %s18010_s7, [#allocation6], %s16670_s18, %s16670_s18, %s16671_s29  }
 0xc42   :  { %16657 = dma.done.wait [#allocation6], 1024  }
 0xc43   :  { %16658 = vsyncadd [#allocation6], 4294966272 }
 0xc44   :  { %12828 = vsyncpa [#allocation5], 1 }
 0xc45   :  { %12829 = vsyncpa [#allocation8], 1 }
 0xc46   :  { %12830 = vsyncpa [#allocation11], 1 }
 0xc47   :  { %12831 = vsyncpa [#allocation6], 1 }

</bundles_post_ra>
